<compile_context>
chip_gen: v7x
topology: tpu7x:2x2x1
jax: 0.10.0
libtpu: 0.0.40
codegen_flags: <defaults>
</compile_context>

<pallas_src>
import functools
import math

import jax
import jax.numpy as jnp
from jax.experimental import pallas as pl
from jax.experimental.pallas import tpu as pltpu

EPS = 1e-5


def _round_up(x, m):
    return ((x + m - 1) // m) * m


def _choose_tile(dim, preferred, unit):
    """Largest tile <= preferred (multiple of unit) that divides dim."""
    if dim <= preferred:
        return dim
    for t in range(preferred, unit - 1, -unit):
        if dim % t == 0:
            return t
    return dim


# ------------------------------------------------------------------
# Pallas kernels
# ------------------------------------------------------------------

def _fused_mm_kernel(apply_relu, has_residual, x_ref, w_ref, b_ref, *rest):
    """Tiled matmul; accumulates into the resident f32 output block and applies
    the (+ bias [+ residual] [ReLU]) epilogue on the last K step."""
    if has_residual:
        res_ref, o_ref = rest
    else:
        (o_ref,) = rest

    k = pl.program_id(2)

    @pl.when(k == 0)
    def _():
        o_ref[...] = jnp.zeros_like(o_ref)

    o_ref[...] += jnp.dot(x_ref[...], w_ref[...],
                          preferred_element_type=jnp.float32)

    @pl.when(k == pl.num_programs(2) - 1)
    def _():
        y = o_ref[...] + b_ref[...]
        if has_residual:
            y = y + res_ref[...]
        if apply_relu:
            y = jnp.maximum(y, 0.0)
        o_ref[...] = y


def fused_matmul(x, w, bias, residual=None, relu=True):
    """(M,K) @ (K,N) + bias [+ residual] [ReLU].  bf16 MXU inputs, f32 accumulation."""
    M, K = x.shape
    K2, N = w.shape
    assert K == K2

    Mp = _round_up(M, 8)
    tm = _choose_tile(Mp, 256, 8)

    Np = N if (N % 128 == 0 or N <= 256) else _round_up(N, 128)
    tn = _choose_tile(Np, 256, 128) if Np % 128 == 0 else Np

    Kp = K if (K % 128 == 0 or K <= 1024) else _round_up(K, 128)
    tk = _choose_tile(Kp, 256, 128) if Kp % 128 == 0 else Kp

    if (Mp, Kp) != (M, K):
        x = jnp.pad(x, ((0, Mp - M), (0, Kp - K)))
    if (Kp, Np) != (K, N):
        w = jnp.pad(w, ((0, Kp - K), (0, Np - N)))
    b2 = bias.reshape(1, N).astype(jnp.float32)
    if Np != N:
        b2 = jnp.pad(b2, ((0, 0), (0, Np - N)))

    args = [x.astype(jnp.bfloat16), w.astype(jnp.bfloat16), b2]
    in_specs = [
        pl.BlockSpec((tm, tk), lambda i, j, k: (i, k)),
        pl.BlockSpec((tk, tn), lambda i, j, k: (k, j)),
        pl.BlockSpec((1, tn), lambda i, j, k: (0, j)),
    ]
    if residual is not None:
        r = residual.astype(jnp.float32)
        if (Mp, Np) != r.shape:
            r = jnp.pad(r, ((0, Mp - r.shape[0]), (0, Np - r.shape[1])))
        args.append(r)
        in_specs.append(pl.BlockSpec((tm, tn), lambda i, j, k: (i, j)))

    out = pl.pallas_call(
        functools.partial(_fused_mm_kernel, relu, residual is not None),
        out_shape=jax.ShapeDtypeStruct((Mp, Np), jnp.float32),
        grid_spec=pltpu.PrefetchScalarGridSpec(
            num_scalar_prefetch=0,
            grid=(Mp // tm, Np // tn, Kp // tk),
            in_specs=in_specs,
            out_specs=pl.BlockSpec((tm, tn), lambda i, j, k: (i, j)),
        ),
        compiler_params=pltpu.CompilerParams(
            dimension_semantics=("parallel", "parallel", "arbitrary")),
    )(*args)

    if (Mp, Np) != (M, N):
        out = out[:M, :N]
    return out


def _head_kernel(x_ref, w_ref, b_ref, o_ref):
    pooled = jnp.mean(x_ref[...], axis=1)          # AdaptiveAvgPool2d((1,1)) + flatten
    o_ref[...] = jnp.dot(pooled, w_ref[...],
                         preferred_element_type=jnp.float32) + b_ref[...]


def head(x, fc):
    """Global avgpool + flatten + Linear (bias fused), one whole-VMEM kernel."""
    B, H, W, C = x.shape
    ncls = fc["w"].shape[1]
    Np = _round_up(ncls, 128)                      # lane-dense output, sliced after
    w_p = jnp.pad(fc["w"], ((0, 0), (0, Np - ncls)))
    b_p = jnp.pad(fc["b"], (0, Np - ncls)).reshape(1, Np)
    out = pl.pallas_call(
        _head_kernel,
        out_shape=jax.ShapeDtypeStruct((B, Np), jnp.float32),
        in_specs=[pl.BlockSpec(memory_space=pltpu.MemorySpace.VMEM)] * 3,
        out_specs=pl.BlockSpec(memory_space=pltpu.MemorySpace.VMEM),
    )(x.reshape(B, H * W, C), w_p, b_p)
    return out[:, :ncls]


# ------------------------------------------------------------------
# Conv / pool glue (patch gather + pooling windows in plain JAX, compute in Pallas)
# ------------------------------------------------------------------

def _im2col_3x3_s1(x):
    """3x3 / stride-1 / pad-1 patch gather -> (B*H*W, 9*C), (kh, kw, cin)-major."""
    B, H, W, C = x.shape
    xp = jnp.pad(x, ((0, 0), (1, 1), (1, 1), (0, 0)))
    cols = [xp[:, dh:dh + H, dw:dw + W, :] for dh in range(3) for dw in range(3)]
    return jnp.concatenate(cols, axis=-1).reshape(B * H * W, 9 * C)


def conv_bn_act(x, w, bn, *, relu=True, residual=None):
    """Conv (3x3/s1/p1 or 1x1/s1, no bias) with BN folded into (w, bias); optional
    fused residual add and ReLU in the matmul epilogue."""
    B, H, W, Cin = x.shape
    kh, kw, _, Cout = w.shape
    scale = bn["gamma"] * jax.lax.rsqrt(bn["var"] + EPS)
    bias = bn["beta"] - bn["mean"] * scale
    w_f = (w * scale).reshape(kh * kw * Cin, Cout)
    lhs = x.reshape(B * H * W, Cin) if kh == 1 else _im2col_3x3_s1(x)
    res = None if residual is None else residual.reshape(B * H * W, Cout)
    y = fused_matmul(lhs, w_f, bias, residual=res, relu=relu)
    return y.reshape(B, H, W, Cout)


def maxpool_3x3_s2_pad1(x):
    """F.pad(1,1,1,1, value=0) + MaxPool2d(3, stride=2) as a fused XLA maximum tree
    (post-ReLU activations are >= 0, so zero padding matches PyTorch exactly)."""
    B, H, W, C = x.shape
    xp = jnp.pad(x, ((0, 0), (1, 1), (1, 1), (0, 0)))
    Ho = (H + 2 - 3) // 2 + 1
    Wo = (W + 2 - 3) // 2 + 1
    out = None
    for dh in range(3):
        for dw in range(3):
            win = xp[:, dh:dh + 2 * Ho:2, dw:dw + 2 * Wo:2, :]
            out = win if out is None else jnp.maximum(out, win)
    return out


def basic_block(x, p):
    """BasicBlock: conv3x3+BN+ReLU, conv3x3+BN, (+ 1x1 downsample), add, ReLU."""
    if "ds_w" in p:
        identity = conv_bn_act(x, p["ds_w"], p["ds_bn"], relu=False)
    else:
        identity = x
    out = conv_bn_act(x, p["w1"], p["bn1"], relu=True)
    out = conv_bn_act(out, p["w2"], p["bn2"], relu=True, residual=identity)
    return out


# ------------------------------------------------------------------
# Parameter initialization (deterministic, synthetic)
# ------------------------------------------------------------------

def init_conv(key, kh, kw, cin, cout):
    std = math.sqrt(2.0 / (kh * kw * cout))  # kaiming_normal_, fan_out, relu
    return std * jax.random.normal(key, (kh, kw, cin, cout), jnp.float32)


def init_bn(c):
    return {"gamma": jnp.ones((c,), jnp.float32),
            "beta": jnp.zeros((c,), jnp.float32),
            "mean": jnp.zeros((c,), jnp.float32),
            "var": jnp.ones((c,), jnp.float32)}


def init_block(key, cin, cout):
    k1, k2, k3 = jax.random.split(key, 3)
    p = {"w1": init_conv(k1, 3, 3, cin, cout), "bn1": init_bn(cout),
         "w2": init_conv(k2, 3, 3, cout, cout), "bn2": init_bn(cout)}
    if cin != cout:                      # stride=1 everywhere; downsample on channel change
        p["ds_w"] = init_conv(k3, 1, 1, cin, cout)
        p["ds_bn"] = init_bn(cout)
    return p


def init_linear(key, cin, cout):
    k1, k2 = jax.random.split(key)
    bound = 1.0 / math.sqrt(cin)
    return {"w": jax.random.uniform(k1, (cin, cout), jnp.float32, -bound, bound),
            "b": jax.random.uniform(k2, (cout,), jnp.float32, -bound, bound)}


def init_resnet(key, nchannel, num_classes=1):
    ks = jax.random.split(key, 6)
    return {
        "stem": {"w": init_conv(ks[0], 3, 3, nchannel, 64), "bn": init_bn(64)},  # layer0
        "l1": init_block(ks[1], 64, 64),       # layer1 (no downsample)
        "l2": init_block(ks[2], 64, 128),      # layer2 (stride=1, 1x1 downsample)
        "l3": init_block(ks[3], 128, 256),     # layer3
        "l4": init_block(ks[4], 256, 512),     # layer4
        "fc": init_linear(ks[5], 512, num_classes),
    }


# ------------------------------------------------------------------
# Model forward
# ------------------------------------------------------------------

def model_forward(params, x_nchw):
    # PyTorch input is NCHW; the kernels use NHWC (channels -> lane dim).
    x = jnp.transpose(x_nchw, (0, 2, 3, 1)).astype(jnp.float32)
    x = conv_bn_act(x, params["stem"]["w"], params["stem"]["bn"], relu=True)  # layer0
    x = maxpool_3x3_s2_pad1(x)                                                # pad + pooling
    x = basic_block(x, params["l1"])
    x = basic_block(x, params["l2"])
    x = basic_block(x, params["l3"])
    x = basic_block(x, params["l4"])
    return head(x, params["fc"])                                              # avgpool+fc


if __name__ == "__main__":
    key = jax.random.PRNGKey(0)
    kp, kx = jax.random.split(key)

    params = init_resnet(kp, nchannel=4, num_classes=1)
    x = jax.random.normal(kx, (2, 4, 16, 16), jnp.float32)   # NCHW input

    fwd = jax.jit(model_forward)
    out = fwd(params, x)
    jax.block_until_ready(out)

    assert out.shape == (2, 1)
    assert bool(jnp.all(jnp.isfinite(out)))
    print("KERNEL_OK")
</pallas_src>

<mosaic_0001>
module attributes {stable_mosaic.version = 11 : i64} {
  func.func @_fused_mm_kernel(%arg0: i32, %arg1: i32, %arg2: i32, %arg3: memref<256x36xbf16, #tpu.memory_space<vmem>>, %arg4: memref<36x64xbf16, #tpu.memory_space<vmem>>, %arg5: memref<1x64xf32, #tpu.memory_space<vmem>>, %arg6: memref<256x64xf32, #tpu.memory_space<vmem>>) attributes {dimension_semantics = [#tpu.dimension_semantics<parallel>, #tpu.dimension_semantics<parallel>, #tpu.dimension_semantics<arbitrary>], iteration_bounds = array<i64: 2, 1, 1>, scalar_prefetch = 0 : i64, scratch_operands = 0 : i64, tpu.core_type = #tpu.core_type<tc>, window_params = [{transform_indices = @transform_0, window_bounds = array<i64: 256, 36>}, {transform_indices = @transform_1, window_bounds = array<i64: 36, 64>}, {transform_indices = @transform_2, window_bounds = array<i64: 1, 64>}, {transform_indices = @transform_3, window_bounds = array<i64: 256, 64>}]} {
    %c0_i32 = arith.constant 0 : i32
    %0 = arith.cmpi eq, %arg2, %c0_i32 : i32
    %1 = arith.extui %0 : i1 to i32
    %c0_i32_0 = arith.constant 0 : i32
    %2 = arith.cmpi ne, %1, %c0_i32_0 : i32
    scf.if %2 {
      %cst_10 = arith.constant 0.000000e+00 : f32
      %12 = vector.broadcast %cst_10 : f32 to vector<256x64xf32>
      %c0_11 = arith.constant 0 : index
      %c0_12 = arith.constant 0 : index
      %13 = vector.load %arg6[%c0_11, %c0_12] : memref<256x64xf32, #tpu.memory_space<vmem>>, vector<256x64xf32>
      tpu.vector_store %arg6[%c0_11, %c0_12], %12 {strides = array<i32>} : memref<256x64xf32, #tpu.memory_space<vmem>>, vector<256x64xf32>,
    } else {
    }
    %c0 = arith.constant 0 : index
    %c0_1 = arith.constant 0 : index
    %3 = vector.load %arg6[%c0, %c0_1] : memref<256x64xf32, #tpu.memory_space<vmem>>, vector<256x64xf32>
    %c0_2 = arith.constant 0 : index
    %c0_3 = arith.constant 0 : index
    %4 = vector.load %arg3[%c0_2, %c0_3] : memref<256x36xbf16, #tpu.memory_space<vmem>>, vector<256x36xbf16>
    %c0_4 = arith.constant 0 : index
    %c0_5 = arith.constant 0 : index
    %5 = vector.load %arg4[%c0_4, %c0_5] : memref<36x64xbf16, #tpu.memory_space<vmem>>, vector<36x64xbf16>
    %cst = arith.constant dense<0.000000e+00> : vector<256x64xf32>
    %6 = tpu.matmul %4, %5, %cst {dimension_numbers = #tpu.dot_dimension_numbers<[1], [0], [0], [1], [0, 0, 1, 1], [], []>} : vector<256x36xbf16>, vector<36x64xbf16>, vector<256x64xf32> -> vector<256x64xf32>
    %7 = arith.addf %3, %6 : vector<256x64xf32>
    %c0_6 = arith.constant 0 : index
    %c0_7 = arith.constant 0 : index
    %8 = vector.load %arg6[%c0_6, %c0_7] : memref<256x64xf32, #tpu.memory_space<vmem>>, vector<256x64xf32>
    tpu.vector_store %arg6[%c0_6, %c0_7], %7 {strides = array<i32>} : memref<256x64xf32, #tpu.memory_space<vmem>>, vector<256x64xf32>,
    %c0_i32_8 = arith.constant 0 : i32
    %9 = arith.cmpi eq, %arg2, %c0_i32_8 : i32
    %10 = arith.extui %9 : i1 to i32
    %c0_i32_9 = arith.constant 0 : i32
    %11 = arith.cmpi ne, %10, %c0_i32_9 : i32
    scf.if %11 {
      %c0_10 = arith.constant 0 : index
      %c0_11 = arith.constant 0 : index
      %12 = vector.load %arg6[%c0_10, %c0_11] : memref<256x64xf32, #tpu.memory_space<vmem>>, vector<256x64xf32>
      %c0_12 = arith.constant 0 : index
      %c0_13 = arith.constant 0 : index
      %13 = vector.load %arg5[%c0_12, %c0_13] : memref<1x64xf32, #tpu.memory_space<vmem>>, vector<1x64xf32>
      %14 = vector.broadcast %13 : vector<1x64xf32> to vector<256x64xf32>
      %15 = arith.addf %12, %14 : vector<256x64xf32>
      %cst_14 = arith.constant 0.000000e+00 : f32
      %16 = vector.broadcast %cst_14 : f32 to vector<256x64xf32>
      %17 = arith.maximumf %15, %16 : vector<256x64xf32>
      %c0_15 = arith.constant 0 : index
      %c0_16 = arith.constant 0 : index
      %18 = vector.load %arg6[%c0_15, %c0_16] : memref<256x64xf32, #tpu.memory_space<vmem>>, vector<256x64xf32>
      tpu.vector_store %arg6[%c0_15, %c0_16], %17 {strides = array<i32>} : memref<256x64xf32, #tpu.memory_space<vmem>>, vector<256x64xf32>,
    } else {
    }
    return
  }
  func.func @transform_0(%arg0: i32, %arg1: i32, %arg2: i32) -> (i32, i32) {
    %c0_i32 = arith.constant 0 : i32
    return %arg0, %arg2 : i32, i32
  }
  func.func @transform_1(%arg0: i32, %arg1: i32, %arg2: i32) -> (i32, i32) {
    %c0_i32 = arith.constant 0 : i32
    return %arg2, %arg1 : i32, i32
  }
  func.func @transform_2(%arg0: i32, %arg1: i32, %arg2: i32) -> (i32, i32) {
    %c0_i32 = arith.constant 0 : i32
    %c0_i32_0 = arith.constant 0 : i32
    return %c0_i32, %arg1 : i32, i32
  }
  func.func @transform_3(%arg0: i32, %arg1: i32, %arg2: i32) -> (i32, i32) {
    %c0_i32 = arith.constant 0 : i32
    return %arg0, %arg1 : i32, i32
  }
}

module attributes {stable_mosaic.version = 11 : i64} {
  func.func @_fused_mm_kernel(%arg0: i32, %arg1: i32, %arg2: i32, %arg3: memref<128x576xbf16, #tpu.memory_space<vmem>>, %arg4: memref<576x64xbf16, #tpu.memory_space<vmem>>, %arg5: memref<1x64xf32, #tpu.memory_space<vmem>>, %arg6: memref<128x64xf32, #tpu.memory_space<vmem>>) attributes {dimension_semantics = [#tpu.dimension_semantics<parallel>, #tpu.dimension_semantics<parallel>, #tpu.dimension_semantics<arbitrary>], iteration_bounds = array<i64: 1, 1, 1>, scalar_prefetch = 0 : i64, scratch_operands = 0 : i64, tpu.core_type = #tpu.core_type<tc>, window_params = [{transform_indices = @transform_0, window_bounds = array<i64: 128, 576>}, {transform_indices = @transform_1, window_bounds = array<i64: 576, 64>}, {transform_indices = @transform_2, window_bounds = array<i64: 1, 64>}, {transform_indices = @transform_3, window_bounds = array<i64: 128, 64>}]} {
    %c0_i32 = arith.constant 0 : i32
    %0 = arith.cmpi eq, %arg2, %c0_i32 : i32
    %1 = arith.extui %0 : i1 to i32
    %c0_i32_0 = arith.constant 0 : i32
    %2 = arith.cmpi ne, %1, %c0_i32_0 : i32
    scf.if %2 {
      %cst_10 = arith.constant 0.000000e+00 : f32
      %12 = vector.broadcast %cst_10 : f32 to vector<128x64xf32>
      %c0_11 = arith.constant 0 : index
      %c0_12 = arith.constant 0 : index
      %13 = vector.load %arg6[%c0_11, %c0_12] : memref<128x64xf32, #tpu.memory_space<vmem>>, vector<128x64xf32>
      tpu.vector_store %arg6[%c0_11, %c0_12], %12 {strides = array<i32>} : memref<128x64xf32, #tpu.memory_space<vmem>>, vector<128x64xf32>,
    } else {
    }
    %c0 = arith.constant 0 : index
    %c0_1 = arith.constant 0 : index
    %3 = vector.load %arg6[%c0, %c0_1] : memref<128x64xf32, #tpu.memory_space<vmem>>, vector<128x64xf32>
    %c0_2 = arith.constant 0 : index
    %c0_3 = arith.constant 0 : index
    %4 = vector.load %arg3[%c0_2, %c0_3] : memref<128x576xbf16, #tpu.memory_space<vmem>>, vector<128x576xbf16>
    %c0_4 = arith.constant 0 : index
    %c0_5 = arith.constant 0 : index
    %5 = vector.load %arg4[%c0_4, %c0_5] : memref<576x64xbf16, #tpu.memory_space<vmem>>, vector<576x64xbf16>
    %cst = arith.constant dense<0.000000e+00> : vector<128x64xf32>
    %6 = tpu.matmul %4, %5, %cst {dimension_numbers = #tpu.dot_dimension_numbers<[1], [0], [0], [1], [0, 0, 1, 1], [], []>} : vector<128x576xbf16>, vector<576x64xbf16>, vector<128x64xf32> -> vector<128x64xf32>
    %7 = arith.addf %3, %6 : vector<128x64xf32>
    %c0_6 = arith.constant 0 : index
    %c0_7 = arith.constant 0 : index
    %8 = vector.load %arg6[%c0_6, %c0_7] : memref<128x64xf32, #tpu.memory_space<vmem>>, vector<128x64xf32>
    tpu.vector_store %arg6[%c0_6, %c0_7], %7 {strides = array<i32>} : memref<128x64xf32, #tpu.memory_space<vmem>>, vector<128x64xf32>,
    %c0_i32_8 = arith.constant 0 : i32
    %9 = arith.cmpi eq, %arg2, %c0_i32_8 : i32
    %10 = arith.extui %9 : i1 to i32
    %c0_i32_9 = arith.constant 0 : i32
    %11 = arith.cmpi ne, %10, %c0_i32_9 : i32
    scf.if %11 {
      %c0_10 = arith.constant 0 : index
      %c0_11 = arith.constant 0 : index
      %12 = vector.load %arg6[%c0_10, %c0_11] : memref<128x64xf32, #tpu.memory_space<vmem>>, vector<128x64xf32>
      %c0_12 = arith.constant 0 : index
      %c0_13 = arith.constant 0 : index
      %13 = vector.load %arg5[%c0_12, %c0_13] : memref<1x64xf32, #tpu.memory_space<vmem>>, vector<1x64xf32>
      %14 = vector.broadcast %13 : vector<1x64xf32> to vector<128x64xf32>
      %15 = arith.addf %12, %14 : vector<128x64xf32>
      %cst_14 = arith.constant 0.000000e+00 : f32
      %16 = vector.broadcast %cst_14 : f32 to vector<128x64xf32>
      %17 = arith.maximumf %15, %16 : vector<128x64xf32>
      %c0_15 = arith.constant 0 : index
      %c0_16 = arith.constant 0 : index
      %18 = vector.load %arg6[%c0_15, %c0_16] : memref<128x64xf32, #tpu.memory_space<vmem>>, vector<128x64xf32>
      tpu.vector_store %arg6[%c0_15, %c0_16], %17 {strides = array<i32>} : memref<128x64xf32, #tpu.memory_space<vmem>>, vector<128x64xf32>,
    } else {
    }
    return
  }
  func.func @transform_0(%arg0: i32, %arg1: i32, %arg2: i32) -> (i32, i32) {
    %c0_i32 = arith.constant 0 : i32
    return %arg0, %arg2 : i32, i32
  }
  func.func @transform_1(%arg0: i32, %arg1: i32, %arg2: i32) -> (i32, i32) {
    %c0_i32 = arith.constant 0 : i32
    return %arg2, %arg1 : i32, i32
  }
  func.func @transform_2(%arg0: i32, %arg1: i32, %arg2: i32) -> (i32, i32) {
    %c0_i32 = arith.constant 0 : i32
    %c0_i32_0 = arith.constant 0 : i32
    return %c0_i32, %arg1 : i32, i32
  }
  func.func @transform_3(%arg0: i32, %arg1: i32, %arg2: i32) -> (i32, i32) {
    %c0_i32 = arith.constant 0 : i32
    return %arg0, %arg1 : i32, i32
  }
}

module attributes {stable_mosaic.version = 11 : i64} {
  func.func @_fused_mm_kernel(%arg0: i32, %arg1: i32, %arg2: i32, %arg3: memref<128x576xbf16, #tpu.memory_space<vmem>>, %arg4: memref<576x64xbf16, #tpu.memory_space<vmem>>, %arg5: memref<1x64xf32, #tpu.memory_space<vmem>>, %arg6: memref<128x64xf32, #tpu.memory_space<vmem>>, %arg7: memref<128x64xf32, #tpu.memory_space<vmem>>) attributes {dimension_semantics = [#tpu.dimension_semantics<parallel>, #tpu.dimension_semantics<parallel>, #tpu.dimension_semantics<arbitrary>], iteration_bounds = array<i64: 1, 1, 1>, scalar_prefetch = 0 : i64, scratch_operands = 0 : i64, tpu.core_type = #tpu.core_type<tc>, window_params = [{transform_indices = @transform_0, window_bounds = array<i64: 128, 576>}, {transform_indices = @transform_1, window_bounds = array<i64: 576, 64>}, {transform_indices = @transform_2, window_bounds = array<i64: 1, 64>}, {transform_indices = @transform_3, window_bounds = array<i64: 128, 64>}, {transform_indices = @transform_4, window_bounds = array<i64: 128, 64>}]} {
    %c0_i32 = arith.constant 0 : i32
    %0 = arith.cmpi eq, %arg2, %c0_i32 : i32
    %1 = arith.extui %0 : i1 to i32
    %c0_i32_0 = arith.constant 0 : i32
    %2 = arith.cmpi ne, %1, %c0_i32_0 : i32
    scf.if %2 {
      %cst_10 = arith.constant 0.000000e+00 : f32
      %12 = vector.broadcast %cst_10 : f32 to vector<128x64xf32>
      %c0_11 = arith.constant 0 : index
      %c0_12 = arith.constant 0 : index
      %13 = vector.load %arg7[%c0_11, %c0_12] : memref<128x64xf32, #tpu.memory_space<vmem>>, vector<128x64xf32>
      tpu.vector_store %arg7[%c0_11, %c0_12], %12 {strides = array<i32>} : memref<128x64xf32, #tpu.memory_space<vmem>>, vector<128x64xf32>,
    } else {
    }
    %c0 = arith.constant 0 : index
    %c0_1 = arith.constant 0 : index
    %3 = vector.load %arg7[%c0, %c0_1] : memref<128x64xf32, #tpu.memory_space<vmem>>, vector<128x64xf32>
    %c0_2 = arith.constant 0 : index
    %c0_3 = arith.constant 0 : index
    %4 = vector.load %arg3[%c0_2, %c0_3] : memref<128x576xbf16, #tpu.memory_space<vmem>>, vector<128x576xbf16>
    %c0_4 = arith.constant 0 : index
    %c0_5 = arith.constant 0 : index
    %5 = vector.load %arg4[%c0_4, %c0_5] : memref<576x64xbf16, #tpu.memory_space<vmem>>, vector<576x64xbf16>
    %cst = arith.constant dense<0.000000e+00> : vector<128x64xf32>
    %6 = tpu.matmul %4, %5, %cst {dimension_numbers = #tpu.dot_dimension_numbers<[1], [0], [0], [1], [0, 0, 1, 1], [], []>} : vector<128x576xbf16>, vector<576x64xbf16>, vector<128x64xf32> -> vector<128x64xf32>
    %7 = arith.addf %3, %6 : vector<128x64xf32>
    %c0_6 = arith.constant 0 : index
    %c0_7 = arith.constant 0 : index
    %8 = vector.load %arg7[%c0_6, %c0_7] : memref<128x64xf32, #tpu.memory_space<vmem>>, vector<128x64xf32>
    tpu.vector_store %arg7[%c0_6, %c0_7], %7 {strides = array<i32>} : memref<128x64xf32, #tpu.memory_space<vmem>>, vector<128x64xf32>,
    %c0_i32_8 = arith.constant 0 : i32
    %9 = arith.cmpi eq, %arg2, %c0_i32_8 : i32
    %10 = arith.extui %9 : i1 to i32
    %c0_i32_9 = arith.constant 0 : i32
    %11 = arith.cmpi ne, %10, %c0_i32_9 : i32
    scf.if %11 {
      %c0_10 = arith.constant 0 : index
      %c0_11 = arith.constant 0 : index
      %12 = vector.load %arg7[%c0_10, %c0_11] : memref<128x64xf32, #tpu.memory_space<vmem>>, vector<128x64xf32>
      %c0_12 = arith.constant 0 : index
      %c0_13 = arith.constant 0 : index
      %13 = vector.load %arg5[%c0_12, %c0_13] : memref<1x64xf32, #tpu.memory_space<vmem>>, vector<1x64xf32>
      %14 = vector.broadcast %13 : vector<1x64xf32> to vector<128x64xf32>
      %15 = arith.addf %12, %14 : vector<128x64xf32>
      %c0_14 = arith.constant 0 : index
      %c0_15 = arith.constant 0 : index
      %16 = vector.load %arg6[%c0_14, %c0_15] : memref<128x64xf32, #tpu.memory_space<vmem>>, vector<128x64xf32>
      %17 = arith.addf %15, %16 : vector<128x64xf32>
      %cst_16 = arith.constant 0.000000e+00 : f32
      %18 = vector.broadcast %cst_16 : f32 to vector<128x64xf32>
      %19 = arith.maximumf %17, %18 : vector<128x64xf32>
      %c0_17 = arith.constant 0 : index
      %c0_18 = arith.constant 0 : index
      %20 = vector.load %arg7[%c0_17, %c0_18] : memref<128x64xf32, #tpu.memory_space<vmem>>, vector<128x64xf32>
      tpu.vector_store %arg7[%c0_17, %c0_18], %19 {strides = array<i32>} : memref<128x64xf32, #tpu.memory_space<vmem>>, vector<128x64xf32>,
    } else {
    }
    return
  }
  func.func @transform_0(%arg0: i32, %arg1: i32, %arg2: i32) -> (i32, i32) {
    %c0_i32 = arith.constant 0 : i32
    return %arg0, %arg2 : i32, i32
  }
  func.func @transform_1(%arg0: i32, %arg1: i32, %arg2: i32) -> (i32, i32) {
    %c0_i32 = arith.constant 0 : i32
    return %arg2, %arg1 : i32, i32
  }
  func.func @transform_2(%arg0: i32, %arg1: i32, %arg2: i32) -> (i32, i32) {
    %c0_i32 = arith.constant 0 : i32
    %c0_i32_0 = arith.constant 0 : i32
    return %c0_i32, %arg1 : i32, i32
  }
  func.func @transform_3(%arg0: i32, %arg1: i32, %arg2: i32) -> (i32, i32) {
    %c0_i32 = arith.constant 0 : i32
    return %arg0, %arg1 : i32, i32
  }
  func.func @transform_4(%arg0: i32, %arg1: i32, %arg2: i32) -> (i32, i32) {
    %c0_i32 = arith.constant 0 : i32
    return %arg0, %arg1 : i32, i32
  }
}

module attributes {stable_mosaic.version = 11 : i64} {
  func.func @_fused_mm_kernel(%arg0: i32, %arg1: i32, %arg2: i32, %arg3: memref<128x576xbf16, #tpu.memory_space<vmem>>, %arg4: memref<576x128xbf16, #tpu.memory_space<vmem>>, %arg5: memref<1x128xf32, #tpu.memory_space<vmem>>, %arg6: memref<128x128xf32, #tpu.memory_space<vmem>>) attributes {dimension_semantics = [#tpu.dimension_semantics<parallel>, #tpu.dimension_semantics<parallel>, #tpu.dimension_semantics<arbitrary>], iteration_bounds = array<i64: 1, 1, 1>, scalar_prefetch = 0 : i64, scratch_operands = 0 : i64, tpu.core_type = #tpu.core_type<tc>, window_params = [{transform_indices = @transform_0, window_bounds = array<i64: 128, 576>}, {transform_indices = @transform_1, window_bounds = array<i64: 576, 128>}, {transform_indices = @transform_2, window_bounds = array<i64: 1, 128>}, {transform_indices = @transform_3, window_bounds = array<i64: 128, 128>}]} {
    %c0_i32 = arith.constant 0 : i32
    %0 = arith.cmpi eq, %arg2, %c0_i32 : i32
    %1 = arith.extui %0 : i1 to i32
    %c0_i32_0 = arith.constant 0 : i32
    %2 = arith.cmpi ne, %1, %c0_i32_0 : i32
    scf.if %2 {
      %cst_10 = arith.constant 0.000000e+00 : f32
      %12 = vector.broadcast %cst_10 : f32 to vector<128x128xf32>
      %c0_11 = arith.constant 0 : index
      %c0_12 = arith.constant 0 : index
      %13 = vector.load %arg6[%c0_11, %c0_12] : memref<128x128xf32, #tpu.memory_space<vmem>>, vector<128x128xf32>
      tpu.vector_store %arg6[%c0_11, %c0_12], %12 {strides = array<i32>} : memref<128x128xf32, #tpu.memory_space<vmem>>, vector<128x128xf32>,
    } else {
    }
    %c0 = arith.constant 0 : index
    %c0_1 = arith.constant 0 : index
    %3 = vector.load %arg6[%c0, %c0_1] : memref<128x128xf32, #tpu.memory_space<vmem>>, vector<128x128xf32>
    %c0_2 = arith.constant 0 : index
    %c0_3 = arith.constant 0 : index
    %4 = vector.load %arg3[%c0_2, %c0_3] : memref<128x576xbf16, #tpu.memory_space<vmem>>, vector<128x576xbf16>
    %c0_4 = arith.constant 0 : index
    %c0_5 = arith.constant 0 : index
    %5 = vector.load %arg4[%c0_4, %c0_5] : memref<576x128xbf16, #tpu.memory_space<vmem>>, vector<576x128xbf16>
    %cst = arith.constant dense<0.000000e+00> : vector<128x128xf32>
    %6 = tpu.matmul %4, %5, %cst {dimension_numbers = #tpu.dot_dimension_numbers<[1], [0], [0], [1], [0, 0, 1, 1], [], []>} : vector<128x576xbf16>, vector<576x128xbf16>, vector<128x128xf32> -> vector<128x128xf32>
    %7 = arith.addf %3, %6 : vector<128x128xf32>
    %c0_6 = arith.constant 0 : index
    %c0_7 = arith.constant 0 : index
    %8 = vector.load %arg6[%c0_6, %c0_7] : memref<128x128xf32, #tpu.memory_space<vmem>>, vector<128x128xf32>
    tpu.vector_store %arg6[%c0_6, %c0_7], %7 {strides = array<i32>} : memref<128x128xf32, #tpu.memory_space<vmem>>, vector<128x128xf32>,
    %c0_i32_8 = arith.constant 0 : i32
    %9 = arith.cmpi eq, %arg2, %c0_i32_8 : i32
    %10 = arith.extui %9 : i1 to i32
    %c0_i32_9 = arith.constant 0 : i32
    %11 = arith.cmpi ne, %10, %c0_i32_9 : i32
    scf.if %11 {
      %c0_10 = arith.constant 0 : index
      %c0_11 = arith.constant 0 : index
      %12 = vector.load %arg6[%c0_10, %c0_11] : memref<128x128xf32, #tpu.memory_space<vmem>>, vector<128x128xf32>
      %c0_12 = arith.constant 0 : index
      %c0_13 = arith.constant 0 : index
      %13 = vector.load %arg5[%c0_12, %c0_13] : memref<1x128xf32, #tpu.memory_space<vmem>>, vector<1x128xf32>
      %14 = vector.broadcast %13 : vector<1x128xf32> to vector<128x128xf32>
      %15 = arith.addf %12, %14 : vector<128x128xf32>
      %cst_14 = arith.constant 0.000000e+00 : f32
      %16 = vector.broadcast %cst_14 : f32 to vector<128x128xf32>
      %17 = arith.maximumf %15, %16 : vector<128x128xf32>
      %c0_15 = arith.constant 0 : index
      %c0_16 = arith.constant 0 : index
      %18 = vector.load %arg6[%c0_15, %c0_16] : memref<128x128xf32, #tpu.memory_space<vmem>>, vector<128x128xf32>
      tpu.vector_store %arg6[%c0_15, %c0_16], %17 {strides = array<i32>} : memref<128x128xf32, #tpu.memory_space<vmem>>, vector<128x128xf32>,
    } else {
    }
    return
  }
  func.func @transform_0(%arg0: i32, %arg1: i32, %arg2: i32) -> (i32, i32) {
    %c0_i32 = arith.constant 0 : i32
    return %arg0, %arg2 : i32, i32
  }
  func.func @transform_1(%arg0: i32, %arg1: i32, %arg2: i32) -> (i32, i32) {
    %c0_i32 = arith.constant 0 : i32
    return %arg2, %arg1 : i32, i32
  }
  func.func @transform_2(%arg0: i32, %arg1: i32, %arg2: i32) -> (i32, i32) {
    %c0_i32 = arith.constant 0 : i32
    %c0_i32_0 = arith.constant 0 : i32
    return %c0_i32, %arg1 : i32, i32
  }
  func.func @transform_3(%arg0: i32, %arg1: i32, %arg2: i32) -> (i32, i32) {
    %c0_i32 = arith.constant 0 : i32
    return %arg0, %arg1 : i32, i32
  }
}

module attributes {stable_mosaic.version = 11 : i64} {
  func.func @_fused_mm_kernel(%arg0: i32, %arg1: i32, %arg2: i32, %arg3: memref<128x64xbf16, #tpu.memory_space<vmem>>, %arg4: memref<64x128xbf16, #tpu.memory_space<vmem>>, %arg5: memref<1x128xf32, #tpu.memory_space<vmem>>, %arg6: memref<128x128xf32, #tpu.memory_space<vmem>>) attributes {dimension_semantics = [#tpu.dimension_semantics<parallel>, #tpu.dimension_semantics<parallel>, #tpu.dimension_semantics<arbitrary>], iteration_bounds = array<i64: 1, 1, 1>, scalar_prefetch = 0 : i64, scratch_operands = 0 : i64, tpu.core_type = #tpu.core_type<tc>, window_params = [{transform_indices = @transform_0, window_bounds = array<i64: 128, 64>}, {transform_indices = @transform_1, window_bounds = array<i64: 64, 128>}, {transform_indices = @transform_2, window_bounds = array<i64: 1, 128>}, {transform_indices = @transform_3, window_bounds = array<i64: 128, 128>}]} {
    %c0_i32 = arith.constant 0 : i32
    %0 = arith.cmpi eq, %arg2, %c0_i32 : i32
    %1 = arith.extui %0 : i1 to i32
    %c0_i32_0 = arith.constant 0 : i32
    %2 = arith.cmpi ne, %1, %c0_i32_0 : i32
    scf.if %2 {
      %cst_10 = arith.constant 0.000000e+00 : f32
      %12 = vector.broadcast %cst_10 : f32 to vector<128x128xf32>
      %c0_11 = arith.constant 0 : index
      %c0_12 = arith.constant 0 : index
      %13 = vector.load %arg6[%c0_11, %c0_12] : memref<128x128xf32, #tpu.memory_space<vmem>>, vector<128x128xf32>
      tpu.vector_store %arg6[%c0_11, %c0_12], %12 {strides = array<i32>} : memref<128x128xf32, #tpu.memory_space<vmem>>, vector<128x128xf32>,
    } else {
    }
    %c0 = arith.constant 0 : index
    %c0_1 = arith.constant 0 : index
    %3 = vector.load %arg6[%c0, %c0_1] : memref<128x128xf32, #tpu.memory_space<vmem>>, vector<128x128xf32>
    %c0_2 = arith.constant 0 : index
    %c0_3 = arith.constant 0 : index
    %4 = vector.load %arg3[%c0_2, %c0_3] : memref<128x64xbf16, #tpu.memory_space<vmem>>, vector<128x64xbf16>
    %c0_4 = arith.constant 0 : index
    %c0_5 = arith.constant 0 : index
    %5 = vector.load %arg4[%c0_4, %c0_5] : memref<64x128xbf16, #tpu.memory_space<vmem>>, vector<64x128xbf16>
    %cst = arith.constant dense<0.000000e+00> : vector<128x128xf32>
    %6 = tpu.matmul %4, %5, %cst {dimension_numbers = #tpu.dot_dimension_numbers<[1], [0], [0], [1], [0, 0, 1, 1], [], []>} : vector<128x64xbf16>, vector<64x128xbf16>, vector<128x128xf32> -> vector<128x128xf32>
    %7 = arith.addf %3, %6 : vector<128x128xf32>
    %c0_6 = arith.constant 0 : index
    %c0_7 = arith.constant 0 : index
    %8 = vector.load %arg6[%c0_6, %c0_7] : memref<128x128xf32, #tpu.memory_space<vmem>>, vector<128x128xf32>
    tpu.vector_store %arg6[%c0_6, %c0_7], %7 {strides = array<i32>} : memref<128x128xf32, #tpu.memory_space<vmem>>, vector<128x128xf32>,
    %c0_i32_8 = arith.constant 0 : i32
    %9 = arith.cmpi eq, %arg2, %c0_i32_8 : i32
    %10 = arith.extui %9 : i1 to i32
    %c0_i32_9 = arith.constant 0 : i32
    %11 = arith.cmpi ne, %10, %c0_i32_9 : i32
    scf.if %11 {
      %c0_10 = arith.constant 0 : index
      %c0_11 = arith.constant 0 : index
      %12 = vector.load %arg6[%c0_10, %c0_11] : memref<128x128xf32, #tpu.memory_space<vmem>>, vector<128x128xf32>
      %c0_12 = arith.constant 0 : index
      %c0_13 = arith.constant 0 : index
      %13 = vector.load %arg5[%c0_12, %c0_13] : memref<1x128xf32, #tpu.memory_space<vmem>>, vector<1x128xf32>
      %14 = vector.broadcast %13 : vector<1x128xf32> to vector<128x128xf32>
      %15 = arith.addf %12, %14 : vector<128x128xf32>
      %c0_14 = arith.constant 0 : index
      %c0_15 = arith.constant 0 : index
      %16 = vector.load %arg6[%c0_14, %c0_15] : memref<128x128xf32, #tpu.memory_space<vmem>>, vector<128x128xf32>
      tpu.vector_store %arg6[%c0_14, %c0_15], %15 {strides = array<i32>} : memref<128x128xf32, #tpu.memory_space<vmem>>, vector<128x128xf32>,
    } else {
    }
    return
  }
  func.func @transform_0(%arg0: i32, %arg1: i32, %arg2: i32) -> (i32, i32) {
    %c0_i32 = arith.constant 0 : i32
    return %arg0, %arg2 : i32, i32
  }
  func.func @transform_1(%arg0: i32, %arg1: i32, %arg2: i32) -> (i32, i32) {
    %c0_i32 = arith.constant 0 : i32
    return %arg2, %arg1 : i32, i32
  }
  func.func @transform_2(%arg0: i32, %arg1: i32, %arg2: i32) -> (i32, i32) {
    %c0_i32 = arith.constant 0 : i32
    %c0_i32_0 = arith.constant 0 : i32
    return %c0_i32, %arg1 : i32, i32
  }
  func.func @transform_3(%arg0: i32, %arg1: i32, %arg2: i32) -> (i32, i32) {
    %c0_i32 = arith.constant 0 : i32
    return %arg0, %arg1 : i32, i32
  }
}

module attributes {stable_mosaic.version = 11 : i64} {
  func.func @_fused_mm_kernel(%arg0: i32, %arg1: i32, %arg2: i32, %arg3: memref<128x128xbf16, #tpu.memory_space<vmem>>, %arg4: memref<128x128xbf16, #tpu.memory_space<vmem>>, %arg5: memref<1x128xf32, #tpu.memory_space<vmem>>, %arg6: memref<128x128xf32, #tpu.memory_space<vmem>>, %arg7: memref<128x128xf32, #tpu.memory_space<vmem>>) attributes {dimension_semantics = [#tpu.dimension_semantics<parallel>, #tpu.dimension_semantics<parallel>, #tpu.dimension_semantics<arbitrary>], iteration_bounds = array<i64: 1, 1, 9>, scalar_prefetch = 0 : i64, scratch_operands = 0 : i64, tpu.core_type = #tpu.core_type<tc>, window_params = [{transform_indices = @transform_0, window_bounds = array<i64: 128, 128>}, {transform_indices = @transform_1, window_bounds = array<i64: 128, 128>}, {transform_indices = @transform_2, window_bounds = array<i64: 1, 128>}, {transform_indices = @transform_3, window_bounds = array<i64: 128, 128>}, {transform_indices = @transform_4, window_bounds = array<i64: 128, 128>}]} {
    %c0_i32 = arith.constant 0 : i32
    %0 = arith.cmpi eq, %arg2, %c0_i32 : i32
    %1 = arith.extui %0 : i1 to i32
    %c0_i32_0 = arith.constant 0 : i32
    %2 = arith.cmpi ne, %1, %c0_i32_0 : i32
    scf.if %2 {
      %cst_9 = arith.constant 0.000000e+00 : f32
      %12 = vector.broadcast %cst_9 : f32 to vector<128x128xf32>
      %c0_10 = arith.constant 0 : index
      %c0_11 = arith.constant 0 : index
      %13 = vector.load %arg7[%c0_10, %c0_11] : memref<128x128xf32, #tpu.memory_space<vmem>>, vector<128x128xf32>
      tpu.vector_store %arg7[%c0_10, %c0_11], %12 {strides = array<i32>} : memref<128x128xf32, #tpu.memory_space<vmem>>, vector<128x128xf32>,
    } else {
    }
    %c0 = arith.constant 0 : index
    %c0_1 = arith.constant 0 : index
    %3 = vector.load %arg7[%c0, %c0_1] : memref<128x128xf32, #tpu.memory_space<vmem>>, vector<128x128xf32>
    %c0_2 = arith.constant 0 : index
    %c0_3 = arith.constant 0 : index
    %4 = vector.load %arg3[%c0_2, %c0_3] : memref<128x128xbf16, #tpu.memory_space<vmem>>, vector<128x128xbf16>
    %c0_4 = arith.constant 0 : index
    %c0_5 = arith.constant 0 : index
    %5 = vector.load %arg4[%c0_4, %c0_5] : memref<128x128xbf16, #tpu.memory_space<vmem>>, vector<128x128xbf16>
    %cst = arith.constant dense<0.000000e+00> : vector<128x128xf32>
    %6 = tpu.matmul %4, %5, %cst {dimension_numbers = #tpu.dot_dimension_numbers<[1], [0], [0], [1], [0, 0, 1, 1], [], []>} : vector<128x128xbf16>, vector<128x128xbf16>, vector<128x128xf32> -> vector<128x128xf32>
    %7 = arith.addf %3, %6 : vector<128x128xf32>
    %c0_6 = arith.constant 0 : index
    %c0_7 = arith.constant 0 : index
    %8 = vector.load %arg7[%c0_6, %c0_7] : memref<128x128xf32, #tpu.memory_space<vmem>>, vector<128x128xf32>
    tpu.vector_store %arg7[%c0_6, %c0_7], %7 {strides = array<i32>} : memref<128x128xf32, #tpu.memory_space<vmem>>, vector<128x128xf32>,
    %c8_i32 = arith.constant 8 : i32
    %9 = arith.cmpi eq, %arg2, %c8_i32 : i32
    %10 = arith.extui %9 : i1 to i32
    %c0_i32_8 = arith.constant 0 : i32
    %11 = arith.cmpi ne, %10, %c0_i32_8 : i32
    scf.if %11 {
      %c0_9 = arith.constant 0 : index
      %c0_10 = arith.constant 0 : index
      %12 = vector.load %arg7[%c0_9, %c0_10] : memref<128x128xf32, #tpu.memory_space<vmem>>, vector<128x128xf32>
      %c0_11 = arith.constant 0 : index
      %c0_12 = arith.constant 0 : index
      %13 = vector.load %arg5[%c0_11, %c0_12] : memref<1x128xf32, #tpu.memory_space<vmem>>, vector<1x128xf32>
      %14 = vector.broadcast %13 : vector<1x128xf32> to vector<128x128xf32>
      %15 = arith.addf %12, %14 : vector<128x128xf32>
      %c0_13 = arith.constant 0 : index
      %c0_14 = arith.constant 0 : index
      %16 = vector.load %arg6[%c0_13, %c0_14] : memref<128x128xf32, #tpu.memory_space<vmem>>, vector<128x128xf32>
      %17 = arith.addf %15, %16 : vector<128x128xf32>
      %cst_15 = arith.constant 0.000000e+00 : f32
      %18 = vector.broadcast %cst_15 : f32 to vector<128x128xf32>
      %19 = arith.maximumf %17, %18 : vector<128x128xf32>
      %c0_16 = arith.constant 0 : index
      %c0_17 = arith.constant 0 : index
      %20 = vector.load %arg7[%c0_16, %c0_17] : memref<128x128xf32, #tpu.memory_space<vmem>>, vector<128x128xf32>
      tpu.vector_store %arg7[%c0_16, %c0_17], %19 {strides = array<i32>} : memref<128x128xf32, #tpu.memory_space<vmem>>, vector<128x128xf32>,
    } else {
    }
    return
  }
  func.func @transform_0(%arg0: i32, %arg1: i32, %arg2: i32) -> (i32, i32) {
    %c0_i32 = arith.constant 0 : i32
    return %arg0, %arg2 : i32, i32
  }
  func.func @transform_1(%arg0: i32, %arg1: i32, %arg2: i32) -> (i32, i32) {
    %c0_i32 = arith.constant 0 : i32
    return %arg2, %arg1 : i32, i32
  }
  func.func @transform_2(%arg0: i32, %arg1: i32, %arg2: i32) -> (i32, i32) {
    %c0_i32 = arith.constant 0 : i32
    %c0_i32_0 = arith.constant 0 : i32
    return %c0_i32, %arg1 : i32, i32
  }
  func.func @transform_3(%arg0: i32, %arg1: i32, %arg2: i32) -> (i32, i32) {
    %c0_i32 = arith.constant 0 : i32
    return %arg0, %arg1 : i32, i32
  }
  func.func @transform_4(%arg0: i32, %arg1: i32, %arg2: i32) -> (i32, i32) {
    %c0_i32 = arith.constant 0 : i32
    return %arg0, %arg1 : i32, i32
  }
}

module attributes {stable_mosaic.version = 11 : i64} {
  func.func @_fused_mm_kernel(%arg0: i32, %arg1: i32, %arg2: i32, %arg3: memref<128x128xbf16, #tpu.memory_space<vmem>>, %arg4: memref<128x256xbf16, #tpu.memory_space<vmem>>, %arg5: memref<1x256xf32, #tpu.memory_space<vmem>>, %arg6: memref<128x256xf32, #tpu.memory_space<vmem>>) attributes {dimension_semantics = [#tpu.dimension_semantics<parallel>, #tpu.dimension_semantics<parallel>, #tpu.dimension_semantics<arbitrary>], iteration_bounds = array<i64: 1, 1, 9>, scalar_prefetch = 0 : i64, scratch_operands = 0 : i64, tpu.core_type = #tpu.core_type<tc>, window_params = [{transform_indices = @transform_0, window_bounds = array<i64: 128, 128>}, {transform_indices = @transform_1, window_bounds = array<i64: 128, 256>}, {transform_indices = @transform_2, window_bounds = array<i64: 1, 256>}, {transform_indices = @transform_3, window_bounds = array<i64: 128, 256>}]} {
    %c0_i32 = arith.constant 0 : i32
    %0 = arith.cmpi eq, %arg2, %c0_i32 : i32
    %1 = arith.extui %0 : i1 to i32
    %c0_i32_0 = arith.constant 0 : i32
    %2 = arith.cmpi ne, %1, %c0_i32_0 : i32
    scf.if %2 {
      %cst_9 = arith.constant 0.000000e+00 : f32
      %12 = vector.broadcast %cst_9 : f32 to vector<128x256xf32>
      %c0_10 = arith.constant 0 : index
      %c0_11 = arith.constant 0 : index
      %13 = vector.load %arg6[%c0_10, %c0_11] : memref<128x256xf32, #tpu.memory_space<vmem>>, vector<128x256xf32>
      tpu.vector_store %arg6[%c0_10, %c0_11], %12 {strides = array<i32>} : memref<128x256xf32, #tpu.memory_space<vmem>>, vector<128x256xf32>,
    } else {
    }
    %c0 = arith.constant 0 : index
    %c0_1 = arith.constant 0 : index
    %3 = vector.load %arg6[%c0, %c0_1] : memref<128x256xf32, #tpu.memory_space<vmem>>, vector<128x256xf32>
    %c0_2 = arith.constant 0 : index
    %c0_3 = arith.constant 0 : index
    %4 = vector.load %arg3[%c0_2, %c0_3] : memref<128x128xbf16, #tpu.memory_space<vmem>>, vector<128x128xbf16>
    %c0_4 = arith.constant 0 : index
    %c0_5 = arith.constant 0 : index
    %5 = vector.load %arg4[%c0_4, %c0_5] : memref<128x256xbf16, #tpu.memory_space<vmem>>, vector<128x256xbf16>
    %cst = arith.constant dense<0.000000e+00> : vector<128x256xf32>
    %6 = tpu.matmul %4, %5, %cst {dimension_numbers = #tpu.dot_dimension_numbers<[1], [0], [0], [1], [0, 0, 1, 1], [], []>} : vector<128x128xbf16>, vector<128x256xbf16>, vector<128x256xf32> -> vector<128x256xf32>
    %7 = arith.addf %3, %6 : vector<128x256xf32>
    %c0_6 = arith.constant 0 : index
    %c0_7 = arith.constant 0 : index
    %8 = vector.load %arg6[%c0_6, %c0_7] : memref<128x256xf32, #tpu.memory_space<vmem>>, vector<128x256xf32>
    tpu.vector_store %arg6[%c0_6, %c0_7], %7 {strides = array<i32>} : memref<128x256xf32, #tpu.memory_space<vmem>>, vector<128x256xf32>,
    %c8_i32 = arith.constant 8 : i32
    %9 = arith.cmpi eq, %arg2, %c8_i32 : i32
    %10 = arith.extui %9 : i1 to i32
    %c0_i32_8 = arith.constant 0 : i32
    %11 = arith.cmpi ne, %10, %c0_i32_8 : i32
    scf.if %11 {
      %c0_9 = arith.constant 0 : index
      %c0_10 = arith.constant 0 : index
      %12 = vector.load %arg6[%c0_9, %c0_10] : memref<128x256xf32, #tpu.memory_space<vmem>>, vector<128x256xf32>
      %c0_11 = arith.constant 0 : index
      %c0_12 = arith.constant 0 : index
      %13 = vector.load %arg5[%c0_11, %c0_12] : memref<1x256xf32, #tpu.memory_space<vmem>>, vector<1x256xf32>
      %14 = vector.broadcast %13 : vector<1x256xf32> to vector<128x256xf32>
      %15 = arith.addf %12, %14 : vector<128x256xf32>
      %cst_13 = arith.constant 0.000000e+00 : f32
      %16 = vector.broadcast %cst_13 : f32 to vector<128x256xf32>
      %17 = arith.maximumf %15, %16 : vector<128x256xf32>
      %c0_14 = arith.constant 0 : index
      %c0_15 = arith.constant 0 : index
      %18 = vector.load %arg6[%c0_14, %c0_15] : memref<128x256xf32, #tpu.memory_space<vmem>>, vector<128x256xf32>
      tpu.vector_store %arg6[%c0_14, %c0_15], %17 {strides = array<i32>} : memref<128x256xf32, #tpu.memory_space<vmem>>, vector<128x256xf32>,
    } else {
    }
    return
  }
  func.func @transform_0(%arg0: i32, %arg1: i32, %arg2: i32) -> (i32, i32) {
    %c0_i32 = arith.constant 0 : i32
    return %arg0, %arg2 : i32, i32
  }
  func.func @transform_1(%arg0: i32, %arg1: i32, %arg2: i32) -> (i32, i32) {
    %c0_i32 = arith.constant 0 : i32
    return %arg2, %arg1 : i32, i32
  }
  func.func @transform_2(%arg0: i32, %arg1: i32, %arg2: i32) -> (i32, i32) {
    %c0_i32 = arith.constant 0 : i32
    %c0_i32_0 = arith.constant 0 : i32
    return %c0_i32, %arg1 : i32, i32
  }
  func.func @transform_3(%arg0: i32, %arg1: i32, %arg2: i32) -> (i32, i32) {
    %c0_i32 = arith.constant 0 : i32
    return %arg0, %arg1 : i32, i32
  }
}

module attributes {stable_mosaic.version = 11 : i64} {
  func.func @_fused_mm_kernel(%arg0: i32, %arg1: i32, %arg2: i32, %arg3: memref<128x128xbf16, #tpu.memory_space<vmem>>, %arg4: memref<128x256xbf16, #tpu.memory_space<vmem>>, %arg5: memref<1x256xf32, #tpu.memory_space<vmem>>, %arg6: memref<128x256xf32, #tpu.memory_space<vmem>>) attributes {dimension_semantics = [#tpu.dimension_semantics<parallel>, #tpu.dimension_semantics<parallel>, #tpu.dimension_semantics<arbitrary>], iteration_bounds = array<i64: 1, 1, 1>, scalar_prefetch = 0 : i64, scratch_operands = 0 : i64, tpu.core_type = #tpu.core_type<tc>, window_params = [{transform_indices = @transform_0, window_bounds = array<i64: 128, 128>}, {transform_indices = @transform_1, window_bounds = array<i64: 128, 256>}, {transform_indices = @transform_2, window_bounds = array<i64: 1, 256>}, {transform_indices = @transform_3, window_bounds = array<i64: 128, 256>}]} {
    %c0_i32 = arith.constant 0 : i32
    %0 = arith.cmpi eq, %arg2, %c0_i32 : i32
    %1 = arith.extui %0 : i1 to i32
    %c0_i32_0 = arith.constant 0 : i32
    %2 = arith.cmpi ne, %1, %c0_i32_0 : i32
    scf.if %2 {
      %cst_10 = arith.constant 0.000000e+00 : f32
      %12 = vector.broadcast %cst_10 : f32 to vector<128x256xf32>
      %c0_11 = arith.constant 0 : index
      %c0_12 = arith.constant 0 : index
      %13 = vector.load %arg6[%c0_11, %c0_12] : memref<128x256xf32, #tpu.memory_space<vmem>>, vector<128x256xf32>
      tpu.vector_store %arg6[%c0_11, %c0_12], %12 {strides = array<i32>} : memref<128x256xf32, #tpu.memory_space<vmem>>, vector<128x256xf32>,
    } else {
    }
    %c0 = arith.constant 0 : index
    %c0_1 = arith.constant 0 : index
    %3 = vector.load %arg6[%c0, %c0_1] : memref<128x256xf32, #tpu.memory_space<vmem>>, vector<128x256xf32>
    %c0_2 = arith.constant 0 : index
    %c0_3 = arith.constant 0 : index
    %4 = vector.load %arg3[%c0_2, %c0_3] : memref<128x128xbf16, #tpu.memory_space<vmem>>, vector<128x128xbf16>
    %c0_4 = arith.constant 0 : index
    %c0_5 = arith.constant 0 : index
    %5 = vector.load %arg4[%c0_4, %c0_5] : memref<128x256xbf16, #tpu.memory_space<vmem>>, vector<128x256xbf16>
    %cst = arith.constant dense<0.000000e+00> : vector<128x256xf32>
    %6 = tpu.matmul %4, %5, %cst {dimension_numbers = #tpu.dot_dimension_numbers<[1], [0], [0], [1], [0, 0, 1, 1], [], []>} : vector<128x128xbf16>, vector<128x256xbf16>, vector<128x256xf32> -> vector<128x256xf32>
    %7 = arith.addf %3, %6 : vector<128x256xf32>
    %c0_6 = arith.constant 0 : index
    %c0_7 = arith.constant 0 : index
    %8 = vector.load %arg6[%c0_6, %c0_7] : memref<128x256xf32, #tpu.memory_space<vmem>>, vector<128x256xf32>
    tpu.vector_store %arg6[%c0_6, %c0_7], %7 {strides = array<i32>} : memref<128x256xf32, #tpu.memory_space<vmem>>, vector<128x256xf32>,
    %c0_i32_8 = arith.constant 0 : i32
    %9 = arith.cmpi eq, %arg2, %c0_i32_8 : i32
    %10 = arith.extui %9 : i1 to i32
    %c0_i32_9 = arith.constant 0 : i32
    %11 = arith.cmpi ne, %10, %c0_i32_9 : i32
    scf.if %11 {
      %c0_10 = arith.constant 0 : index
      %c0_11 = arith.constant 0 : index
      %12 = vector.load %arg6[%c0_10, %c0_11] : memref<128x256xf32, #tpu.memory_space<vmem>>, vector<128x256xf32>
      %c0_12 = arith.constant 0 : index
      %c0_13 = arith.constant 0 : index
      %13 = vector.load %arg5[%c0_12, %c0_13] : memref<1x256xf32, #tpu.memory_space<vmem>>, vector<1x256xf32>
      %14 = vector.broadcast %13 : vector<1x256xf32> to vector<128x256xf32>
      %15 = arith.addf %12, %14 : vector<128x256xf32>
      %c0_14 = arith.constant 0 : index
      %c0_15 = arith.constant 0 : index
      %16 = vector.load %arg6[%c0_14, %c0_15] : memref<128x256xf32, #tpu.memory_space<vmem>>, vector<128x256xf32>
      tpu.vector_store %arg6[%c0_14, %c0_15], %15 {strides = array<i32>} : memref<128x256xf32, #tpu.memory_space<vmem>>, vector<128x256xf32>,
    } else {
    }
    return
  }
  func.func @transform_0(%arg0: i32, %arg1: i32, %arg2: i32) -> (i32, i32) {
    %c0_i32 = arith.constant 0 : i32
    return %arg0, %arg2 : i32, i32
  }
  func.func @transform_1(%arg0: i32, %arg1: i32, %arg2: i32) -> (i32, i32) {
    %c0_i32 = arith.constant 0 : i32
    return %arg2, %arg1 : i32, i32
  }
  func.func @transform_2(%arg0: i32, %arg1: i32, %arg2: i32) -> (i32, i32) {
    %c0_i32 = arith.constant 0 : i32
    %c0_i32_0 = arith.constant 0 : i32
    return %c0_i32, %arg1 : i32, i32
  }
  func.func @transform_3(%arg0: i32, %arg1: i32, %arg2: i32) -> (i32, i32) {
    %c0_i32 = arith.constant 0 : i32
    return %arg0, %arg1 : i32, i32
  }
}

module attributes {stable_mosaic.version = 11 : i64} {
  func.func @_fused_mm_kernel(%arg0: i32, %arg1: i32, %arg2: i32, %arg3: memref<128x256xbf16, #tpu.memory_space<vmem>>, %arg4: memref<256x256xbf16, #tpu.memory_space<vmem>>, %arg5: memref<1x256xf32, #tpu.memory_space<vmem>>, %arg6: memref<128x256xf32, #tpu.memory_space<vmem>>, %arg7: memref<128x256xf32, #tpu.memory_space<vmem>>) attributes {dimension_semantics = [#tpu.dimension_semantics<parallel>, #tpu.dimension_semantics<parallel>, #tpu.dimension_semantics<arbitrary>], iteration_bounds = array<i64: 1, 1, 9>, scalar_prefetch = 0 : i64, scratch_operands = 0 : i64, tpu.core_type = #tpu.core_type<tc>, window_params = [{transform_indices = @transform_0, window_bounds = array<i64: 128, 256>}, {transform_indices = @transform_1, window_bounds = array<i64: 256, 256>}, {transform_indices = @transform_2, window_bounds = array<i64: 1, 256>}, {transform_indices = @transform_3, window_bounds = array<i64: 128, 256>}, {transform_indices = @transform_4, window_bounds = array<i64: 128, 256>}]} {
    %c0_i32 = arith.constant 0 : i32
    %0 = arith.cmpi eq, %arg2, %c0_i32 : i32
    %1 = arith.extui %0 : i1 to i32
    %c0_i32_0 = arith.constant 0 : i32
    %2 = arith.cmpi ne, %1, %c0_i32_0 : i32
    scf.if %2 {
      %cst_9 = arith.constant 0.000000e+00 : f32
      %12 = vector.broadcast %cst_9 : f32 to vector<128x256xf32>
      %c0_10 = arith.constant 0 : index
      %c0_11 = arith.constant 0 : index
      %13 = vector.load %arg7[%c0_10, %c0_11] : memref<128x256xf32, #tpu.memory_space<vmem>>, vector<128x256xf32>
      tpu.vector_store %arg7[%c0_10, %c0_11], %12 {strides = array<i32>} : memref<128x256xf32, #tpu.memory_space<vmem>>, vector<128x256xf32>,
    } else {
    }
    %c0 = arith.constant 0 : index
    %c0_1 = arith.constant 0 : index
    %3 = vector.load %arg7[%c0, %c0_1] : memref<128x256xf32, #tpu.memory_space<vmem>>, vector<128x256xf32>
    %c0_2 = arith.constant 0 : index
    %c0_3 = arith.constant 0 : index
    %4 = vector.load %arg3[%c0_2, %c0_3] : memref<128x256xbf16, #tpu.memory_space<vmem>>, vector<128x256xbf16>
    %c0_4 = arith.constant 0 : index
    %c0_5 = arith.constant 0 : index
    %5 = vector.load %arg4[%c0_4, %c0_5] : memref<256x256xbf16, #tpu.memory_space<vmem>>, vector<256x256xbf16>
    %cst = arith.constant dense<0.000000e+00> : vector<128x256xf32>
    %6 = tpu.matmul %4, %5, %cst {dimension_numbers = #tpu.dot_dimension_numbers<[1], [0], [0], [1], [0, 0, 1, 1], [], []>} : vector<128x256xbf16>, vector<256x256xbf16>, vector<128x256xf32> -> vector<128x256xf32>
    %7 = arith.addf %3, %6 : vector<128x256xf32>
    %c0_6 = arith.constant 0 : index
    %c0_7 = arith.constant 0 : index
    %8 = vector.load %arg7[%c0_6, %c0_7] : memref<128x256xf32, #tpu.memory_space<vmem>>, vector<128x256xf32>
    tpu.vector_store %arg7[%c0_6, %c0_7], %7 {strides = array<i32>} : memref<128x256xf32, #tpu.memory_space<vmem>>, vector<128x256xf32>,
    %c8_i32 = arith.constant 8 : i32
    %9 = arith.cmpi eq, %arg2, %c8_i32 : i32
    %10 = arith.extui %9 : i1 to i32
    %c0_i32_8 = arith.constant 0 : i32
    %11 = arith.cmpi ne, %10, %c0_i32_8 : i32
    scf.if %11 {
      %c0_9 = arith.constant 0 : index
      %c0_10 = arith.constant 0 : index
      %12 = vector.load %arg7[%c0_9, %c0_10] : memref<128x256xf32, #tpu.memory_space<vmem>>, vector<128x256xf32>
      %c0_11 = arith.constant 0 : index
      %c0_12 = arith.constant 0 : index
      %13 = vector.load %arg5[%c0_11, %c0_12] : memref<1x256xf32, #tpu.memory_space<vmem>>, vector<1x256xf32>
      %14 = vector.broadcast %13 : vector<1x256xf32> to vector<128x256xf32>
      %15 = arith.addf %12, %14 : vector<128x256xf32>
      %c0_13 = arith.constant 0 : index
      %c0_14 = arith.constant 0 : index
      %16 = vector.load %arg6[%c0_13, %c0_14] : memref<128x256xf32, #tpu.memory_space<vmem>>, vector<128x256xf32>
      %17 = arith.addf %15, %16 : vector<128x256xf32>
      %cst_15 = arith.constant 0.000000e+00 : f32
      %18 = vector.broadcast %cst_15 : f32 to vector<128x256xf32>
      %19 = arith.maximumf %17, %18 : vector<128x256xf32>
      %c0_16 = arith.constant 0 : index
      %c0_17 = arith.constant 0 : index
      %20 = vector.load %arg7[%c0_16, %c0_17] : memref<128x256xf32, #tpu.memory_space<vmem>>, vector<128x256xf32>
      tpu.vector_store %arg7[%c0_16, %c0_17], %19 {strides = array<i32>} : memref<128x256xf32, #tpu.memory_space<vmem>>, vector<128x256xf32>,
    } else {
    }
    return
  }
  func.func @transform_0(%arg0: i32, %arg1: i32, %arg2: i32) -> (i32, i32) {
    %c0_i32 = arith.constant 0 : i32
    return %arg0, %arg2 : i32, i32
  }
  func.func @transform_1(%arg0: i32, %arg1: i32, %arg2: i32) -> (i32, i32) {
    %c0_i32 = arith.constant 0 : i32
    return %arg2, %arg1 : i32, i32
  }
  func.func @transform_2(%arg0: i32, %arg1: i32, %arg2: i32) -> (i32, i32) {
    %c0_i32 = arith.constant 0 : i32
    %c0_i32_0 = arith.constant 0 : i32
    return %c0_i32, %arg1 : i32, i32
  }
  func.func @transform_3(%arg0: i32, %arg1: i32, %arg2: i32) -> (i32, i32) {
    %c0_i32 = arith.constant 0 : i32
    return %arg0, %arg1 : i32, i32
  }
  func.func @transform_4(%arg0: i32, %arg1: i32, %arg2: i32) -> (i32, i32) {
    %c0_i32 = arith.constant 0 : i32
    return %arg0, %arg1 : i32, i32
  }
}

module attributes {stable_mosaic.version = 11 : i64} {
  func.func @_fused_mm_kernel(%arg0: i32, %arg1: i32, %arg2: i32, %arg3: memref<128x256xbf16, #tpu.memory_space<vmem>>, %arg4: memref<256x256xbf16, #tpu.memory_space<vmem>>, %arg5: memref<1x256xf32, #tpu.memory_space<vmem>>, %arg6: memref<128x256xf32, #tpu.memory_space<vmem>>) attributes {dimension_semantics = [#tpu.dimension_semantics<parallel>, #tpu.dimension_semantics<parallel>, #tpu.dimension_semantics<arbitrary>], iteration_bounds = array<i64: 1, 2, 9>, scalar_prefetch = 0 : i64, scratch_operands = 0 : i64, tpu.core_type = #tpu.core_type<tc>, window_params = [{transform_indices = @transform_0, window_bounds = array<i64: 128, 256>}, {transform_indices = @transform_1, window_bounds = array<i64: 256, 256>}, {transform_indices = @transform_2, window_bounds = array<i64: 1, 256>}, {transform_indices = @transform_3, window_bounds = array<i64: 128, 256>}]} {
    %c0_i32 = arith.constant 0 : i32
    %0 = arith.cmpi eq, %arg2, %c0_i32 : i32
    %1 = arith.extui %0 : i1 to i32
    %c0_i32_0 = arith.constant 0 : i32
    %2 = arith.cmpi ne, %1, %c0_i32_0 : i32
    scf.if %2 {
      %cst_9 = arith.constant 0.000000e+00 : f32
      %12 = vector.broadcast %cst_9 : f32 to vector<128x256xf32>
      %c0_10 = arith.constant 0 : index
      %c0_11 = arith.constant 0 : index
      %13 = vector.load %arg6[%c0_10, %c0_11] : memref<128x256xf32, #tpu.memory_space<vmem>>, vector<128x256xf32>
      tpu.vector_store %arg6[%c0_10, %c0_11], %12 {strides = array<i32>} : memref<128x256xf32, #tpu.memory_space<vmem>>, vector<128x256xf32>,
    } else {
    }
    %c0 = arith.constant 0 : index
    %c0_1 = arith.constant 0 : index
    %3 = vector.load %arg6[%c0, %c0_1] : memref<128x256xf32, #tpu.memory_space<vmem>>, vector<128x256xf32>
    %c0_2 = arith.constant 0 : index
    %c0_3 = arith.constant 0 : index
    %4 = vector.load %arg3[%c0_2, %c0_3] : memref<128x256xbf16, #tpu.memory_space<vmem>>, vector<128x256xbf16>
    %c0_4 = arith.constant 0 : index
    %c0_5 = arith.constant 0 : index
    %5 = vector.load %arg4[%c0_4, %c0_5] : memref<256x256xbf16, #tpu.memory_space<vmem>>, vector<256x256xbf16>
    %cst = arith.constant dense<0.000000e+00> : vector<128x256xf32>
    %6 = tpu.matmul %4, %5, %cst {dimension_numbers = #tpu.dot_dimension_numbers<[1], [0], [0], [1], [0, 0, 1, 1], [], []>} : vector<128x256xbf16>, vector<256x256xbf16>, vector<128x256xf32> -> vector<128x256xf32>
    %7 = arith.addf %3, %6 : vector<128x256xf32>
    %c0_6 = arith.constant 0 : index
    %c0_7 = arith.constant 0 : index
    %8 = vector.load %arg6[%c0_6, %c0_7] : memref<128x256xf32, #tpu.memory_space<vmem>>, vector<128x256xf32>
    tpu.vector_store %arg6[%c0_6, %c0_7], %7 {strides = array<i32>} : memref<128x256xf32, #tpu.memory_space<vmem>>, vector<128x256xf32>,
    %c8_i32 = arith.constant 8 : i32
    %9 = arith.cmpi eq, %arg2, %c8_i32 : i32
    %10 = arith.extui %9 : i1 to i32
    %c0_i32_8 = arith.constant 0 : i32
    %11 = arith.cmpi ne, %10, %c0_i32_8 : i32
    scf.if %11 {
      %c0_9 = arith.constant 0 : index
      %c0_10 = arith.constant 0 : index
      %12 = vector.load %arg6[%c0_9, %c0_10] : memref<128x256xf32, #tpu.memory_space<vmem>>, vector<128x256xf32>
      %c0_11 = arith.constant 0 : index
      %c0_12 = arith.constant 0 : index
      %13 = vector.load %arg5[%c0_11, %c0_12] : memref<1x256xf32, #tpu.memory_space<vmem>>, vector<1x256xf32>
      %14 = vector.broadcast %13 : vector<1x256xf32> to vector<128x256xf32>
      %15 = arith.addf %12, %14 : vector<128x256xf32>
      %cst_13 = arith.constant 0.000000e+00 : f32
      %16 = vector.broadcast %cst_13 : f32 to vector<128x256xf32>
      %17 = arith.maximumf %15, %16 : vector<128x256xf32>
      %c0_14 = arith.constant 0 : index
      %c0_15 = arith.constant 0 : index
      %18 = vector.load %arg6[%c0_14, %c0_15] : memref<128x256xf32, #tpu.memory_space<vmem>>, vector<128x256xf32>
      tpu.vector_store %arg6[%c0_14, %c0_15], %17 {strides = array<i32>} : memref<128x256xf32, #tpu.memory_space<vmem>>, vector<128x256xf32>,
    } else {
    }
    return
  }
  func.func @transform_0(%arg0: i32, %arg1: i32, %arg2: i32) -> (i32, i32) {
    %c0_i32 = arith.constant 0 : i32
    return %arg0, %arg2 : i32, i32
  }
  func.func @transform_1(%arg0: i32, %arg1: i32, %arg2: i32) -> (i32, i32) {
    %c0_i32 = arith.constant 0 : i32
    return %arg2, %arg1 : i32, i32
  }
  func.func @transform_2(%arg0: i32, %arg1: i32, %arg2: i32) -> (i32, i32) {
    %c0_i32 = arith.constant 0 : i32
    %c0_i32_0 = arith.constant 0 : i32
    return %c0_i32, %arg1 : i32, i32
  }
  func.func @transform_3(%arg0: i32, %arg1: i32, %arg2: i32) -> (i32, i32) {
    %c0_i32 = arith.constant 0 : i32
    return %arg0, %arg1 : i32, i32
  }
}

module attributes {stable_mosaic.version = 11 : i64} {
  func.func @_fused_mm_kernel(%arg0: i32, %arg1: i32, %arg2: i32, %arg3: memref<128x256xbf16, #tpu.memory_space<vmem>>, %arg4: memref<256x256xbf16, #tpu.memory_space<vmem>>, %arg5: memref<1x256xf32, #tpu.memory_space<vmem>>, %arg6: memref<128x256xf32, #tpu.memory_space<vmem>>) attributes {dimension_semantics = [#tpu.dimension_semantics<parallel>, #tpu.dimension_semantics<parallel>, #tpu.dimension_semantics<arbitrary>], iteration_bounds = array<i64: 1, 2, 1>, scalar_prefetch = 0 : i64, scratch_operands = 0 : i64, tpu.core_type = #tpu.core_type<tc>, window_params = [{transform_indices = @transform_0, window_bounds = array<i64: 128, 256>}, {transform_indices = @transform_1, window_bounds = array<i64: 256, 256>}, {transform_indices = @transform_2, window_bounds = array<i64: 1, 256>}, {transform_indices = @transform_3, window_bounds = array<i64: 128, 256>}]} {
    %c0_i32 = arith.constant 0 : i32
    %0 = arith.cmpi eq, %arg2, %c0_i32 : i32
    %1 = arith.extui %0 : i1 to i32
    %c0_i32_0 = arith.constant 0 : i32
    %2 = arith.cmpi ne, %1, %c0_i32_0 : i32
    scf.if %2 {
      %cst_10 = arith.constant 0.000000e+00 : f32
      %12 = vector.broadcast %cst_10 : f32 to vector<128x256xf32>
      %c0_11 = arith.constant 0 : index
      %c0_12 = arith.constant 0 : index
      %13 = vector.load %arg6[%c0_11, %c0_12] : memref<128x256xf32, #tpu.memory_space<vmem>>, vector<128x256xf32>
      tpu.vector_store %arg6[%c0_11, %c0_12], %12 {strides = array<i32>} : memref<128x256xf32, #tpu.memory_space<vmem>>, vector<128x256xf32>,
    } else {
    }
    %c0 = arith.constant 0 : index
    %c0_1 = arith.constant 0 : index
    %3 = vector.load %arg6[%c0, %c0_1] : memref<128x256xf32, #tpu.memory_space<vmem>>, vector<128x256xf32>
    %c0_2 = arith.constant 0 : index
    %c0_3 = arith.constant 0 : index
    %4 = vector.load %arg3[%c0_2, %c0_3] : memref<128x256xbf16, #tpu.memory_space<vmem>>, vector<128x256xbf16>
    %c0_4 = arith.constant 0 : index
    %c0_5 = arith.constant 0 : index
    %5 = vector.load %arg4[%c0_4, %c0_5] : memref<256x256xbf16, #tpu.memory_space<vmem>>, vector<256x256xbf16>
    %cst = arith.constant dense<0.000000e+00> : vector<128x256xf32>
    %6 = tpu.matmul %4, %5, %cst {dimension_numbers = #tpu.dot_dimension_numbers<[1], [0], [0], [1], [0, 0, 1, 1], [], []>} : vector<128x256xbf16>, vector<256x256xbf16>, vector<128x256xf32> -> vector<128x256xf32>
    %7 = arith.addf %3, %6 : vector<128x256xf32>
    %c0_6 = arith.constant 0 : index
    %c0_7 = arith.constant 0 : index
    %8 = vector.load %arg6[%c0_6, %c0_7] : memref<128x256xf32, #tpu.memory_space<vmem>>, vector<128x256xf32>
    tpu.vector_store %arg6[%c0_6, %c0_7], %7 {strides = array<i32>} : memref<128x256xf32, #tpu.memory_space<vmem>>, vector<128x256xf32>,
    %c0_i32_8 = arith.constant 0 : i32
    %9 = arith.cmpi eq, %arg2, %c0_i32_8 : i32
    %10 = arith.extui %9 : i1 to i32
    %c0_i32_9 = arith.constant 0 : i32
    %11 = arith.cmpi ne, %10, %c0_i32_9 : i32
    scf.if %11 {
      %c0_10 = arith.constant 0 : index
      %c0_11 = arith.constant 0 : index
      %12 = vector.load %arg6[%c0_10, %c0_11] : memref<128x256xf32, #tpu.memory_space<vmem>>, vector<128x256xf32>
      %c0_12 = arith.constant 0 : index
      %c0_13 = arith.constant 0 : index
      %13 = vector.load %arg5[%c0_12, %c0_13] : memref<1x256xf32, #tpu.memory_space<vmem>>, vector<1x256xf32>
      %14 = vector.broadcast %13 : vector<1x256xf32> to vector<128x256xf32>
      %15 = arith.addf %12, %14 : vector<128x256xf32>
      %c0_14 = arith.constant 0 : index
      %c0_15 = arith.constant 0 : index
      %16 = vector.load %arg6[%c0_14, %c0_15] : memref<128x256xf32, #tpu.memory_space<vmem>>, vector<128x256xf32>
      tpu.vector_store %arg6[%c0_14, %c0_15], %15 {strides = array<i32>} : memref<128x256xf32, #tpu.memory_space<vmem>>, vector<128x256xf32>,
    } else {
    }
    return
  }
  func.func @transform_0(%arg0: i32, %arg1: i32, %arg2: i32) -> (i32, i32) {
    %c0_i32 = arith.constant 0 : i32
    return %arg0, %arg2 : i32, i32
  }
  func.func @transform_1(%arg0: i32, %arg1: i32, %arg2: i32) -> (i32, i32) {
    %c0_i32 = arith.constant 0 : i32
    return %arg2, %arg1 : i32, i32
  }
  func.func @transform_2(%arg0: i32, %arg1: i32, %arg2: i32) -> (i32, i32) {
    %c0_i32 = arith.constant 0 : i32
    %c0_i32_0 = arith.constant 0 : i32
    return %c0_i32, %arg1 : i32, i32
  }
  func.func @transform_3(%arg0: i32, %arg1: i32, %arg2: i32) -> (i32, i32) {
    %c0_i32 = arith.constant 0 : i32
    return %arg0, %arg1 : i32, i32
  }
}

module attributes {stable_mosaic.version = 11 : i64} {
  func.func @_fused_mm_kernel(%arg0: i32, %arg1: i32, %arg2: i32, %arg3: memref<128x256xbf16, #tpu.memory_space<vmem>>, %arg4: memref<256x256xbf16, #tpu.memory_space<vmem>>, %arg5: memref<1x256xf32, #tpu.memory_space<vmem>>, %arg6: memref<128x256xf32, #tpu.memory_space<vmem>>, %arg7: memref<128x256xf32, #tpu.memory_space<vmem>>) attributes {dimension_semantics = [#tpu.dimension_semantics<parallel>, #tpu.dimension_semantics<parallel>, #tpu.dimension_semantics<arbitrary>], iteration_bounds = array<i64: 1, 2, 18>, scalar_prefetch = 0 : i64, scratch_operands = 0 : i64, tpu.core_type = #tpu.core_type<tc>, window_params = [{transform_indices = @transform_0, window_bounds = array<i64: 128, 256>}, {transform_indices = @transform_1, window_bounds = array<i64: 256, 256>}, {transform_indices = @transform_2, window_bounds = array<i64: 1, 256>}, {transform_indices = @transform_3, window_bounds = array<i64: 128, 256>}, {transform_indices = @transform_4, window_bounds = array<i64: 128, 256>}]} {
    %c0_i32 = arith.constant 0 : i32
    %0 = arith.cmpi eq, %arg2, %c0_i32 : i32
    %1 = arith.extui %0 : i1 to i32
    %c0_i32_0 = arith.constant 0 : i32
    %2 = arith.cmpi ne, %1, %c0_i32_0 : i32
    scf.if %2 {
      %cst_9 = arith.constant 0.000000e+00 : f32
      %12 = vector.broadcast %cst_9 : f32 to vector<128x256xf32>
      %c0_10 = arith.constant 0 : index
      %c0_11 = arith.constant 0 : index
      %13 = vector.load %arg7[%c0_10, %c0_11] : memref<128x256xf32, #tpu.memory_space<vmem>>, vector<128x256xf32>
      tpu.vector_store %arg7[%c0_10, %c0_11], %12 {strides = array<i32>} : memref<128x256xf32, #tpu.memory_space<vmem>>, vector<128x256xf32>,
    } else {
    }
    %c0 = arith.constant 0 : index
    %c0_1 = arith.constant 0 : index
    %3 = vector.load %arg7[%c0, %c0_1] : memref<128x256xf32, #tpu.memory_space<vmem>>, vector<128x256xf32>
    %c0_2 = arith.constant 0 : index
    %c0_3 = arith.constant 0 : index
    %4 = vector.load %arg3[%c0_2, %c0_3] : memref<128x256xbf16, #tpu.memory_space<vmem>>, vector<128x256xbf16>
    %c0_4 = arith.constant 0 : index
    %c0_5 = arith.constant 0 : index
    %5 = vector.load %arg4[%c0_4, %c0_5] : memref<256x256xbf16, #tpu.memory_space<vmem>>, vector<256x256xbf16>
    %cst = arith.constant dense<0.000000e+00> : vector<128x256xf32>
    %6 = tpu.matmul %4, %5, %cst {dimension_numbers = #tpu.dot_dimension_numbers<[1], [0], [0], [1], [0, 0, 1, 1], [], []>} : vector<128x256xbf16>, vector<256x256xbf16>, vector<128x256xf32> -> vector<128x256xf32>
    %7 = arith.addf %3, %6 : vector<128x256xf32>
    %c0_6 = arith.constant 0 : index
    %c0_7 = arith.constant 0 : index
    %8 = vector.load %arg7[%c0_6, %c0_7] : memref<128x256xf32, #tpu.memory_space<vmem>>, vector<128x256xf32>
    tpu.vector_store %arg7[%c0_6, %c0_7], %7 {strides = array<i32>} : memref<128x256xf32, #tpu.memory_space<vmem>>, vector<128x256xf32>,
    %c17_i32 = arith.constant 17 : i32
    %9 = arith.cmpi eq, %arg2, %c17_i32 : i32
    %10 = arith.extui %9 : i1 to i32
    %c0_i32_8 = arith.constant 0 : i32
    %11 = arith.cmpi ne, %10, %c0_i32_8 : i32
    scf.if %11 {
      %c0_9 = arith.constant 0 : index
      %c0_10 = arith.constant 0 : index
      %12 = vector.load %arg7[%c0_9, %c0_10] : memref<128x256xf32, #tpu.memory_space<vmem>>, vector<128x256xf32>
      %c0_11 = arith.constant 0 : index
      %c0_12 = arith.constant 0 : index
      %13 = vector.load %arg5[%c0_11, %c0_12] : memref<1x256xf32, #tpu.memory_space<vmem>>, vector<1x256xf32>
      %14 = vector.broadcast %13 : vector<1x256xf32> to vector<128x256xf32>
      %15 = arith.addf %12, %14 : vector<128x256xf32>
      %c0_13 = arith.constant 0 : index
      %c0_14 = arith.constant 0 : index
      %16 = vector.load %arg6[%c0_13, %c0_14] : memref<128x256xf32, #tpu.memory_space<vmem>>, vector<128x256xf32>
      %17 = arith.addf %15, %16 : vector<128x256xf32>
      %cst_15 = arith.constant 0.000000e+00 : f32
      %18 = vector.broadcast %cst_15 : f32 to vector<128x256xf32>
      %19 = arith.maximumf %17, %18 : vector<128x256xf32>
      %c0_16 = arith.constant 0 : index
      %c0_17 = arith.constant 0 : index
      %20 = vector.load %arg7[%c0_16, %c0_17] : memref<128x256xf32, #tpu.memory_space<vmem>>, vector<128x256xf32>
      tpu.vector_store %arg7[%c0_16, %c0_17], %19 {strides = array<i32>} : memref<128x256xf32, #tpu.memory_space<vmem>>, vector<128x256xf32>,
    } else {
    }
    return
  }
  func.func @transform_0(%arg0: i32, %arg1: i32, %arg2: i32) -> (i32, i32) {
    %c0_i32 = arith.constant 0 : i32
    return %arg0, %arg2 : i32, i32
  }
  func.func @transform_1(%arg0: i32, %arg1: i32, %arg2: i32) -> (i32, i32) {
    %c0_i32 = arith.constant 0 : i32
    return %arg2, %arg1 : i32, i32
  }
  func.func @transform_2(%arg0: i32, %arg1: i32, %arg2: i32) -> (i32, i32) {
    %c0_i32 = arith.constant 0 : i32
    %c0_i32_0 = arith.constant 0 : i32
    return %c0_i32, %arg1 : i32, i32
  }
  func.func @transform_3(%arg0: i32, %arg1: i32, %arg2: i32) -> (i32, i32) {
    %c0_i32 = arith.constant 0 : i32
    return %arg0, %arg1 : i32, i32
  }
  func.func @transform_4(%arg0: i32, %arg1: i32, %arg2: i32) -> (i32, i32) {
    %c0_i32 = arith.constant 0 : i32
    return %arg0, %arg1 : i32, i32
  }
}

module attributes {stable_mosaic.version = 11 : i64} {
  func.func @_head_kernel(%arg0: memref<2x64x512xf32, #tpu.memory_space<vmem>>, %arg1: memref<512x128xf32, #tpu.memory_space<vmem>>, %arg2: memref<1x128xf32, #tpu.memory_space<vmem>>, %arg3: memref<2x128xf32, #tpu.memory_space<vmem>>) attributes {dimension_semantics = [], scalar_prefetch = 0 : i64, scratch_operands = 0 : i64, tpu.core_type = #tpu.core_type<tc>} {
    %c0 = arith.constant 0 : index
    %c0_0 = arith.constant 0 : index
    %c0_1 = arith.constant 0 : index
    %0 = vector.load %arg0[%c0, %c0_0, %c0_1] : memref<2x64x512xf32, #tpu.memory_space<vmem>>, vector<2x64x512xf32>
    %cst = arith.constant dense<0.000000e+00> : vector<2x512xf32>
    %1 = vector.multi_reduction <add>, %0, %cst [1] : vector<2x64x512xf32> to vector<2x512xf32>
    %cst_2 = arith.constant 6.400000e+01 : f32
    %2 = vector.broadcast %cst_2 : f32 to vector<2x512xf32>
    %3 = arith.divf %1, %2 : vector<2x512xf32>
    %c0_3 = arith.constant 0 : index
    %c0_4 = arith.constant 0 : index
    %4 = vector.load %arg1[%c0_3, %c0_4] : memref<512x128xf32, #tpu.memory_space<vmem>>, vector<512x128xf32>
    %cst_5 = arith.constant dense<0.000000e+00> : vector<2x128xf32>
    %5 = tpu.matmul %3, %4, %cst_5 {dimension_numbers = #tpu.dot_dimension_numbers<[1], [0], [0], [1], [0, 0, 1, 1], [], []>} : vector<2x512xf32>, vector<512x128xf32>, vector<2x128xf32> -> vector<2x128xf32>
    %c0_6 = arith.constant 0 : index
    %c0_7 = arith.constant 0 : index
    %6 = vector.load %arg2[%c0_6, %c0_7] : memref<1x128xf32, #tpu.memory_space<vmem>>, vector<1x128xf32>
    %7 = vector.broadcast %6 : vector<1x128xf32> to vector<2x128xf32>
    %8 = arith.addf %5, %7 : vector<2x128xf32>
    %c0_8 = arith.constant 0 : index
    %c0_9 = arith.constant 0 : index
    %9 = vector.load %arg3[%c0_8, %c0_9] : memref<2x128xf32, #tpu.memory_space<vmem>>, vector<2x128xf32>
    tpu.vector_store %arg3[%c0_8, %c0_9], %8 {strides = array<i32>} : memref<2x128xf32, #tpu.memory_space<vmem>>, vector<2x128xf32>,
    return
  }
}

</mosaic_0001>

<bundles_post_ra>
// kernel: model_forward.13
= control target key start
LH: loop header
LB: loop body
LE: loop exit
PB: predicated region body
PF: predicated region fallthrough
CT: control target
= control target key end

     0   :  { %s1192_s12 = smov 0   ;;  %s1194_s13 = smov 0   ;;  %s1563_s0 = inlined_call_operand.vmem [shape: bf16[512,36], index: 0, kind: input, shape index: {}]   ;;  %s1564_s1 = inlined_call_operand.vmem [shape: bf16[36,64], index: 1, kind: input, shape index: {}]   ;;  %s1565_s2 = inlined_call_operand.vmem [shape: f32[1,64], index: 2, kind: input, shape index: {}]   ;;  %s1566_s3 = inlined_call_operand.vmem [shape: f32[512,64], index: 3, kind: output, shape index: {}]  }
   0x1   :  { %s1196_s14 = smov 0  }
   0x2 LB: > { %s32_s15 = sadd.s32 1, %s1165_s13  ;;  %p995_p0 = scmp.ge.s32.totalorder %s1169_s14, 1  ;;  %s1169_s14 = sphi %s1196_s14, %s13_s14   ;;  %s1165_s13 = sphi %s1194_s13, %s1568_s13   ;;  %s1161_s12 = sphi %s1192_s12, %s1567_s12  }
   0x3   : > { %p34_p1 = scmp.ge.s32.totalorder %s32_s15, 2  ;;  %p188_p2 = scmp.lt.s32.totalorder %s1169_s14, 3 }
   0x5   : > { %s1570_s15 = smov (%p34_p1, %s32_s15), 0  ;;  %p189_p3 = pnand %p995_p0, %p188_p2 }
   0x6   : > { %v1128_v0 = vld [vmem:[%s1564_s1] sm:$0xff] (!%p189_p3)   ;;  %v1129_v1 = vld [vmem:[%s1564_s1 + $0x8] sm:$0xff] (!%p189_p3)   ;;  %s996_s20 = sshll.u32 (!%p189_p3), %s1161_s12, 5  ;;  %v1130_v2 = vld [vmem:[%s1564_s1 + $0x10] ss:$0 sps:$4 sm:$0x33] (!%p189_p3)  }
   0x7   : > { %192 = sbr.rel (%p189_p3) target bundleno = 275 (0x113), region = 32  ;;  %1057 = vmatprep.subr.bf16.mxu0 (!%p189_p3), %v1128_v0  ;;  %1095 = vmatprep.subr.bf16.mxu1 (!%p189_p3), %v1128_v0  ;;  %p230_p4 = scmp.lt.s32.totalorder (!%p189_p3), %s996_s20, 63  ;;  %vm510_vm0 = vcmask (!%p189_p3), 1041408   ;;  %vm264_vm1 = vcmask (!%p189_p3), 523264   ;;  %vm461_vm2 = vcmask (!%p189_p3), 293888   ;;  %v1171_v5 = vmov (!%p189_p3), 0.0  }
   0x8   : > { %1058 = vmatpush3.bf16.msra.mxu0 (!%p189_p3), %v1128_v0  ;;  %1098 = vmatpush3.bf16.msra.mxu1 (!%p189_p3), %v1128_v0  ;;  %v512_v3 = vsel (!%p189_p3), %vm510_vm0, %v1130_v2, 0  ;;  %v1356_v49 = vld [vmem:[%s1565_s2] ss:$0 sm:$0xff] (!%p189_p3) }
   0x9   : > { %1059 = vmatprep.subr.bf16.mxu0 (!%p189_p3), %v1129_v1  ;;  %1096 = vmatprep.subr.bf16.mxu1 (!%p189_p3), %v1129_v1 }
   0xc   : > { %1060 = vmatpush3.bf16.msra.mxu0 (!%p189_p3), %v1129_v1  ;;  %1099 = vmatpush3.bf16.msra.mxu1 (!%p189_p3), %v1129_v1 }
   0xd   : > { %1101 = vmatprep.subr.msk.bf16.mxu0 (!%p189_p3), %vm510_vm0, %v1130_v2  ;;  %1102 = vmatprep.subr.msk.bf16.mxu1 (!%p189_p3), %vm510_vm0, %v1130_v2 }
   0xe   : > { %s1572_s20 = smov (!%p230_p4, %s996_s20), 63 }
   0xf   : > { %s997_s23 = sshll.u32 %s1572_s20, 2  ;;  %s999_s24 = sshll.u32 %s1572_s20, 3 }
  0x10   : > { %s1222_s27 = scalar_lea.vmem %s1563_s0, %s997_s23  ;;  %s1227_s30 = scalar_lea.vmem %s1566_s3, %s999_s24  ;;  %1062 = vmatpush3.bf16.msra.mxu0 %v512_v3  ;;  %1100 = vmatpush3.bf16.msra.mxu1 %v512_v3 }
  0x11   : > { %v1131_v4 = vld [vmem:[%s1222_s27] sm:$0xff]   ;;  %267 = vst.msk [vmem:[%s1227_s30 + $0x10] sm:$0xff] %vm264_vm1, %v1171_v5  ;;  %265 = vst.msk [vmem:[%s1227_s30] sm:$0xff] %vm264_vm1, %v1171_v5  ;;  %v1133_v7 = vld [vmem:[%s1222_s27 + $0x8] sm:$0xff]  }
  0x12   : > { %266 = vst.msk [vmem:[%s1227_s30 + $0x8] sm:$0xff] %vm264_vm1, %v1171_v5  ;;  %268 = vst.msk [vmem:[%s1227_s30 + $0x18] sm:$0xff] %vm264_vm1, %v1171_v5  ;;  %v1132_v6 = vld [vmem:[%s1222_s27 + $0x40] sm:$0xff]   ;;  %1063 = vmatprep.mubr.msk.bf16.mxu0 %vm461_vm2, %v1131_v4  ;;  %v1134_v8 = vld [vmem:[%s1222_s27 + $0x48] sm:$0xff]  }
  0x13   : > { %269 = vst.msk [vmem:[%s1227_s30 + $0x20] sm:$0xff] %vm264_vm1, %v1171_v5  ;;  %270 = vst.msk [vmem:[%s1227_s30 + $0x28] sm:$0xff] %vm264_vm1, %v1171_v5  ;;  %1079 = vmatprep.mubr.msk.bf16.mxu1 %vm461_vm2, %v1132_v6  ;;  %v1135_v9 = vld [vmem:[%s1222_s27 + $0x10] sm:$0xff]   ;;  %1064 = vmatmul.mubr.msk.bf16.vlgmr.msra.gmra.mrb[0].mxu0 %vm461_vm2, %v1133_v7  ;;  %v1137_v11 = vld [vmem:[%s1222_s27 + $0x18] sm:$0xff]  }
  0x14   : > { %271 = vst.msk [vmem:[%s1227_s30 + $0x30] sm:$0xff] %vm264_vm1, %v1171_v5  ;;  %272 = vst.msk [vmem:[%s1227_s30 + $0x38] sm:$0xff] %vm264_vm1, %v1171_v5  ;;  %v1136_v10 = vld [vmem:[%s1222_s27 + $0x50] sm:$0xff]   ;;  %1080 = vmatmul.mubr.msk.bf16.vlgmr.msra.gmra.mrb[0].mxu1 %vm461_vm2, %v1134_v8  ;;  %1067 = vmatprep.mubr.msk.bf16.mxu0 %vm461_vm2, %v1135_v9  ;;  %v1138_v12 = vld [vmem:[%s1222_s27 + $0x58] sm:$0xff]  }
  0x15   : > { %273 = vst.msk [vmem:[%s1227_s30 + $0x40] sm:$0xff] %vm264_vm1, %v1171_v5  ;;  %274 = vst.msk [vmem:[%s1227_s30 + $0x48] sm:$0xff] %vm264_vm1, %v1171_v5  ;;  %1083 = vmatprep.mubr.msk.bf16.mxu1 %vm461_vm2, %v1136_v10  ;;  %v1139_v13 = vld [vmem:[%s1222_s27 + $0x20] sm:$0xff]   ;;  %v1141_v15 = vld [vmem:[%s1222_s27 + $0x28] sm:$0xff]  }
  0x16   : > { %275 = vst.msk [vmem:[%s1227_s30 + $0x50] sm:$0xff] %vm264_vm1, %v1171_v5  ;;  %276 = vst.msk [vmem:[%s1227_s30 + $0x58] sm:$0xff] %vm264_vm1, %v1171_v5  ;;  %v1140_v14 = vld [vmem:[%s1222_s27 + $0x60] sm:$0xff]   ;;  %v1142_v16 = vld [vmem:[%s1222_s27 + $0x68] sm:$0xff]  }
  0x17   : > { %277 = vst.msk [vmem:[%s1227_s30 + $0x60] sm:$0xff] %vm264_vm1, %v1171_v5  ;;  %278 = vst.msk [vmem:[%s1227_s30 + $0x68] sm:$0xff] %vm264_vm1, %v1171_v5  ;;  %v1143_v17 = vld [vmem:[%s1222_s27 + $0x30] sm:$0xff]   ;;  %v1145_v19 = vld [vmem:[%s1222_s27 + $0x38] sm:$0xff]  }
  0x18   : > { %279 = vst.msk [vmem:[%s1227_s30 + $0x70] sm:$0xff] %vm264_vm1, %v1171_v5  ;;  %280 = vst.msk [vmem:[%s1227_s30 + $0x78] sm:$0xff] %vm264_vm1, %v1171_v5  ;;  %v1144_v18 = vld [vmem:[%s1222_s27 + $0x70] sm:$0xff]   ;;  %v1146_v20 = vld [vmem:[%s1222_s27 + $0x78] sm:$0xff]  }
  0x19   : > { %281 = vst.msk [vmem:[%s1227_s30 + $0x80] sm:$0xff] %vm264_vm1, %v1171_v5  ;;  %282 = vst.msk [vmem:[%s1227_s30 + $0x88] sm:$0xff] %vm264_vm1, %v1171_v5  ;;  %v299_v21 = vld [vmem:[%s1227_s30 + $0x10] sm:$0xff]  ;;  %v297_v23 = vld [vmem:[%s1227_s30] sm:$0xff] }
  0x1a   : > { %283 = vst.msk [vmem:[%s1227_s30 + $0x90] sm:$0xff] %vm264_vm1, %v1171_v5  ;;  %284 = vst.msk [vmem:[%s1227_s30 + $0x98] sm:$0xff] %vm264_vm1, %v1171_v5  ;;  %v300_v27 = vld [vmem:[%s1227_s30 + $0x18] sm:$0xff]  ;;  %v298_v33 = vld [vmem:[%s1227_s30 + $0x8] sm:$0xff] }
  0x1b   : > { %285 = vst.msk [vmem:[%s1227_s30 + $0xa0] sm:$0xff] %vm264_vm1, %v1171_v5  ;;  %286 = vst.msk [vmem:[%s1227_s30 + $0xa8] sm:$0xff] %vm264_vm1, %v1171_v5  ;;  %1068 = vmatmul.mubr.msk.bf16.gmra.mrb[4].mxu0 %vm461_vm2, %v1137_v11  ;;  %v303_v45 = vld [vmem:[%s1227_s30 + $0x30] sm:$0xff]  ;;  %v301_v47 = vld [vmem:[%s1227_s30 + $0x20] sm:$0xff] }
  0x1c   : > { %287 = vst.msk [vmem:[%s1227_s30 + $0xb0] sm:$0xff] %vm264_vm1, %v1171_v5  ;;  %288 = vst.msk [vmem:[%s1227_s30 + $0xb8] sm:$0xff] %vm264_vm1, %v1171_v5  ;;  %1084 = vmatmul.mubr.msk.bf16.gmra.mrb[4].mxu1 %vm461_vm2, %v1138_v12  ;;  %1071 = vmatprep.mubr.msk.bf16.mxu0 %vm461_vm2, %v1139_v13  ;;  %v304_v52 = vld [vmem:[%s1227_s30 + $0x38] sm:$0xff]  ;;  %v302_v58 = vld [vmem:[%s1227_s30 + $0x28] sm:$0xff] }
  0x1d   : > { %289 = vst.msk [vmem:[%s1227_s30 + $0xc0] sm:$0xff] %vm264_vm1, %v1171_v5  ;;  %290 = vst.msk [vmem:[%s1227_s30 + $0xc8] sm:$0xff] %vm264_vm1, %v1171_v5  ;;  %1087 = vmatprep.mubr.msk.bf16.mxu1 %vm461_vm2, %v1140_v14 }
  0x1e   : > { %291 = vst.msk [vmem:[%s1227_s30 + $0xd0] sm:$0xff] %vm264_vm1, %v1171_v5  ;;  %292 = vst.msk [vmem:[%s1227_s30 + $0xd8] sm:$0xff] %vm264_vm1, %v1171_v5 }
  0x1f   : > { %293 = vst.msk [vmem:[%s1227_s30 + $0xe0] sm:$0xff] %vm264_vm1, %v1171_v5  ;;  %294 = vst.msk [vmem:[%s1227_s30 + $0xe8] sm:$0xff] %vm264_vm1, %v1171_v5 }
  0x20   : > { %295 = vst.msk [vmem:[%s1227_s30 + $0xf0] sm:$0xff] %vm264_vm1, %v1171_v5  ;;  %296 = vst.msk [vmem:[%s1227_s30 + $0xf8] sm:$0xff] %vm264_vm1, %v1171_v5  ;;  %v313_v24 = vld [vmem:[%s1227_s30 + $0x80] sm:$0xff]  ;;  %v314_v34 = vld [vmem:[%s1227_s30 + $0x88] sm:$0xff] }
  0x21   : > { %v315_v22 = vld [vmem:[%s1227_s30 + $0x90] sm:$0xff]  ;;  %v316_v28 = vld [vmem:[%s1227_s30 + $0x98] sm:$0xff] }
  0x22   : > { %v317_v48 = vld [vmem:[%s1227_s30 + $0xa0] sm:$0xff]  ;;  %v318_v59 = vld [vmem:[%s1227_s30 + $0xa8] sm:$0xff] }
  0x23   : > { %1072 = vmatmul.mubr.msk.bf16.gmra.mrb[8].mxu0 %vm461_vm2, %v1141_v15  ;;  %v319_v46 = vld [vmem:[%s1227_s30 + $0xb0] sm:$0xff]  ;;  %v320_v53 = vld [vmem:[%s1227_s30 + $0xb8] sm:$0xff] }
  0x24   : > { %1088 = vmatmul.mubr.msk.bf16.gmra.mrb[8].mxu1 %vm461_vm2, %v1142_v16  ;;  %1075 = vmatprep.mubr.msk.bf16.mxu0 %vm461_vm2, %v1143_v17 }
  0x25   : > { %1091 = vmatprep.mubr.msk.bf16.mxu1 %vm461_vm2, %v1144_v18 }
  0x2b   : > { %1076 = vmatmul.mubr.msk.bf16.gmra.mrb[12].mxu0 %vm461_vm2, %v1145_v19 }
  0x2c   : > { %1092 = vmatmul.mubr.msk.bf16.gmra.mrb[12].mxu1 %vm461_vm2, %v1146_v20 }
  0xe6   : > { %v1065_v25 = vpop.f32.mrb[0].mxu0 }
  0xe7   : > { %v1081_v26 = vpop.f32.mrb[0].mxu1  ;;  %v677_v29 = vadd.f32 %v1065_v25, %v299_v21  ;;  %v548_v31 = vpop.f32.mrb[1].mxu0 }
  0xe8   : > { %v693_v30 = vadd.f32 %v1081_v26, %v315_v22  ;;  %v612_v32 = vpop.f32.mrb[1].mxu1  ;;  %v675_v35 = vadd.f32 %v548_v31, %v297_v23  ;;  %v1066_v37 = vpop.f32.mrb[2].mxu0  ;;  %v307_v26 = vld [vmem:[%s1227_s30 + $0x50] sm:$0xff]  ;;  %v321_v31 = vld [vmem:[%s1227_s30 + $0xc0] sm:$0xff] }
  0xe9   : > { %v691_v36 = vadd.f32 %v612_v32, %v313_v24  ;;  %v1082_v38 = vpop.f32.mrb[2].mxu1  ;;  %710 = vst.msk [vmem:[%s1227_s30 + $0x10] sm:$0xff] %vm264_vm1, %v677_v29  ;;  %v678_v39 = vadd.f32 %v1066_v37, %v300_v27  ;;  %v551_v41 = vpop.f32.mrb[3].mxu0  ;;  %v323_v27 = vld [vmem:[%s1227_s30 + $0xd0] sm:$0xff]  ;;  %v324_v37 = vld [vmem:[%s1227_s30 + $0xd8] sm:$0xff] }
  0xea   : > { %726 = vst.msk [vmem:[%s1227_s30 + $0x90] sm:$0xff] %vm264_vm1, %v693_v30  ;;  %v694_v40 = vadd.f32 %v1082_v38, %v316_v28  ;;  %v615_v42 = vpop.f32.mrb[3].mxu1  ;;  %708 = vst.msk [vmem:[%s1227_s30] sm:$0xff] %vm264_vm1, %v675_v35  ;;  %v676_v43 = vadd.f32 %v551_v41, %v298_v33  ;;  %v305_v30 = vld [vmem:[%s1227_s30 + $0x40] sm:$0xff] }
  0xeb   : > { %724 = vst.msk [vmem:[%s1227_s30 + $0x80] sm:$0xff] %vm264_vm1, %v691_v36  ;;  %v692_v44 = vadd.f32 %v615_v42, %v314_v34  ;;  %711 = vst.msk [vmem:[%s1227_s30 + $0x18] sm:$0xff] %vm264_vm1, %v678_v39  ;;  %v308_v36 = vld [vmem:[%s1227_s30 + $0x58] sm:$0xff]  ;;  %v306_v42 = vld [vmem:[%s1227_s30 + $0x48] sm:$0xff] }
  0xec   : > { %727 = vst.msk [vmem:[%s1227_s30 + $0x98] sm:$0xff] %vm264_vm1, %v694_v40  ;;  %709 = vst.msk [vmem:[%s1227_s30 + $0x8] sm:$0xff] %vm264_vm1, %v676_v43  ;;  %v322_v43 = vld [vmem:[%s1227_s30 + $0xc8] sm:$0xff] }
  0xed   : > { %725 = vst.msk [vmem:[%s1227_s30 + $0x88] sm:$0xff] %vm264_vm1, %v692_v44 }
  0xee   : > { %v1069_v50 = vpop.f32.mrb[4].mxu0 }
  0xef   : > { %v1085_v51 = vpop.f32.mrb[4].mxu1  ;;  %v681_v54 = vadd.f32 %v1069_v50, %v303_v45  ;;  %v564_v56 = vpop.f32.mrb[5].mxu0 }
  0xf0   : > { %v697_v55 = vadd.f32 %v1085_v51, %v319_v46  ;;  %v628_v57 = vpop.f32.mrb[5].mxu1  ;;  %v745_v60 = vld [vmem:[%s1227_s30 + $0x10] sm:$0xff]  ;;  %v679_v62 = vadd.f32 %v564_v56, %v301_v47  ;;  %v1070_v0 = vpop.f32.mrb[6].mxu0 }
  0xf1   : > { %v761_v61 = vld [vmem:[%s1227_s30 + $0x90] sm:$0xff]  ;;  %v695_v63 = vadd.f32 %v628_v57, %v317_v48  ;;  %v1086_v1 = vpop.f32.mrb[6].mxu1  ;;  %v784_v2 = vadd.f32 %v1356_v49, %v745_v60  ;;  %v743_v4 = vld [vmem:[%s1227_s30] sm:$0xff]  ;;  %714 = vst.msk [vmem:[%s1227_s30 + $0x30] sm:$0xff] %vm264_vm1, %v681_v54  ;;  %v682_v6 = vadd.f32 %v1070_v0, %v304_v52  ;;  %v567_v8 = vpop.f32.mrb[7].mxu0 }
  0xf2   : > { %v800_v3 = vadd.f32 %v1356_v49, %v761_v61  ;;  %v759_v5 = vld [vmem:[%s1227_s30 + $0x80] sm:$0xff]  ;;  %730 = vst.msk [vmem:[%s1227_s30 + $0xb0] sm:$0xff] %vm264_vm1, %v697_v55  ;;  %v698_v7 = vadd.f32 %v1086_v1, %v320_v53  ;;  %v631_v9 = vpop.f32.mrb[7].mxu1  ;;  %v782_v10 = vadd.f32 %v1356_v49, %v743_v4  ;;  %v746_v12 = vld [vmem:[%s1227_s30 + $0x18] sm:$0xff]  ;;  %712 = vst.msk [vmem:[%s1227_s30 + $0x20] sm:$0xff] %vm264_vm1, %v679_v62 }
  0xf3   : > { %v798_v11 = vadd.f32 %v1356_v49, %v759_v5  ;;  %v762_v13 = vld [vmem:[%s1227_s30 + $0x98] sm:$0xff]  ;;  %728 = vst.msk [vmem:[%s1227_s30 + $0xa0] sm:$0xff] %vm264_vm1, %v695_v63  ;;  %v680_v14 = vadd.f32 %v567_v8, %v302_v58  ;;  %v696_v15 = vadd.f32 %v631_v9, %v318_v59  ;;  %v816_v16 = vmax.f32 %v784_v2, 0.0  ;;  %v744_v20 = vld [vmem:[%s1227_s30 + $0x8] sm:$0xff]  ;;  %715 = vst.msk [vmem:[%s1227_s30 + $0x38] sm:$0xff] %vm264_vm1, %v682_v6 }
  0xf4   : > { %v832_v17 = vmax.f32 %v800_v3, 0.0  ;;  %v785_v18 = vadd.f32 %v1356_v49, %v746_v12  ;;  %v801_v19 = vadd.f32 %v1356_v49, %v762_v13  ;;  %v760_v21 = vld [vmem:[%s1227_s30 + $0x88] sm:$0xff]  ;;  %731 = vst.msk [vmem:[%s1227_s30 + $0xb8] sm:$0xff] %vm264_vm1, %v698_v7  ;;  %v814_v22 = vmax.f32 %v782_v10, 0.0  ;;  %v327_v12 = vld [vmem:[%s1227_s30 + $0xf0] sm:$0xff] }
  0xf5   : > { %v830_v23 = vmax.f32 %v798_v11, 0.0  ;;  %v783_v24 = vadd.f32 %v1356_v49, %v744_v20  ;;  %v799_v25 = vadd.f32 %v1356_v49, %v760_v21  ;;  %713 = vst.msk [vmem:[%s1227_s30 + $0x28] sm:$0xff] %vm264_vm1, %v680_v14  ;;  %729 = vst.msk [vmem:[%s1227_s30 + $0xa8] sm:$0xff] %vm264_vm1, %v696_v15  ;;  %v311_v11 = vld [vmem:[%s1227_s30 + $0x70] sm:$0xff]  ;;  %v309_v15 = vld [vmem:[%s1227_s30 + $0x60] sm:$0xff] }
  0xf6   : > { %848 = vst.msk [vmem:[%s1227_s30 + $0x10] sm:$0xff] %vm264_vm1, %v816_v16  ;;  %864 = vst.msk [vmem:[%s1227_s30 + $0x90] sm:$0xff] %vm264_vm1, %v832_v17  ;;  %v817_v28 = vmax.f32 %v785_v18, 0.0  ;;  %v833_v29 = vmax.f32 %v801_v19, 0.0  ;;  %v1073_v34 = vpop.f32.mrb[8].mxu0  ;;  %v325_v16 = vld [vmem:[%s1227_s30 + $0xe0] sm:$0xff] }
  0xf7   : > { %846 = vst.msk [vmem:[%s1227_s30] sm:$0xff] %vm264_vm1, %v814_v22  ;;  %862 = vst.msk [vmem:[%s1227_s30 + $0x80] sm:$0xff] %vm264_vm1, %v830_v23  ;;  %v815_v32 = vmax.f32 %v783_v24, 0.0  ;;  %v831_v33 = vmax.f32 %v799_v25, 0.0  ;;  %v1089_v35 = vpop.f32.mrb[8].mxu1  ;;  %v685_v38 = vadd.f32 %v1073_v34, %v307_v26  ;;  %v580_v40 = vpop.f32.mrb[9].mxu0 }
  0xf8   : > { %849 = vst.msk [vmem:[%s1227_s30 + $0x18] sm:$0xff] %vm264_vm1, %v817_v28  ;;  %865 = vst.msk [vmem:[%s1227_s30 + $0x98] sm:$0xff] %vm264_vm1, %v833_v29  ;;  %v701_v39 = vadd.f32 %v1089_v35, %v323_v27  ;;  %v644_v41 = vpop.f32.mrb[9].mxu1  ;;  %v749_v44 = vld [vmem:[%s1227_s30 + $0x30] sm:$0xff]  ;;  %v683_v46 = vadd.f32 %v580_v40, %v305_v30  ;;  %v1074_v48 = vpop.f32.mrb[10].mxu0  ;;  %v312_v21 = vld [vmem:[%s1227_s30 + $0x78] sm:$0xff] }
  0xf9   : > { %847 = vst.msk [vmem:[%s1227_s30 + $0x8] sm:$0xff] %vm264_vm1, %v815_v32  ;;  %863 = vst.msk [vmem:[%s1227_s30 + $0x88] sm:$0xff] %vm264_vm1, %v831_v33  ;;  %v765_v45 = vld [vmem:[%s1227_s30 + $0xb0] sm:$0xff]  ;;  %v699_v47 = vadd.f32 %v644_v41, %v321_v31  ;;  %v1090_v50 = vpop.f32.mrb[10].mxu1  ;;  %v788_v51 = vadd.f32 %v1356_v49, %v749_v44  ;;  %v747_v53 = vld [vmem:[%s1227_s30 + $0x20] sm:$0xff]  ;;  %v686_v55 = vadd.f32 %v1074_v48, %v308_v36  ;;  %v583_v57 = vpop.f32.mrb[11].mxu0 }
  0xfa   : > { %v804_v52 = vadd.f32 %v1356_v49, %v765_v45  ;;  %v763_v54 = vld [vmem:[%s1227_s30 + $0xa0] sm:$0xff]  ;;  %718 = vst.msk [vmem:[%s1227_s30 + $0x50] sm:$0xff] %vm264_vm1, %v685_v38  ;;  %734 = vst.msk [vmem:[%s1227_s30 + $0xd0] sm:$0xff] %vm264_vm1, %v701_v39  ;;  %v702_v56 = vadd.f32 %v1090_v50, %v324_v37  ;;  %v647_v58 = vpop.f32.mrb[11].mxu1  ;;  %v786_v59 = vadd.f32 %v1356_v49, %v747_v53  ;;  %v750_v61 = vld [vmem:[%s1227_s30 + $0x38] sm:$0xff] }
  0xfb   : > { %v802_v60 = vadd.f32 %v1356_v49, %v763_v54  ;;  %v766_v62 = vld [vmem:[%s1227_s30 + $0xb8] sm:$0xff]  ;;  %716 = vst.msk [vmem:[%s1227_s30 + $0x40] sm:$0xff] %vm264_vm1, %v683_v46  ;;  %732 = vst.msk [vmem:[%s1227_s30 + $0xc0] sm:$0xff] %vm264_vm1, %v699_v47  ;;  %v684_v63 = vadd.f32 %v583_v57, %v306_v42  ;;  %v700_v0 = vadd.f32 %v647_v58, %v322_v43  ;;  %v820_v1 = vmax.f32 %v788_v51, 0.0  ;;  %v310_v27 = vld [vmem:[%s1227_s30 + $0x68] sm:$0xff] }
  0xfc   : > { %v836_v2 = vmax.f32 %v804_v52, 0.0  ;;  %v789_v3 = vadd.f32 %v1356_v49, %v750_v61  ;;  %v805_v4 = vadd.f32 %v1356_v49, %v766_v62  ;;  %v748_v5 = vld [vmem:[%s1227_s30 + $0x28] sm:$0xff]  ;;  %719 = vst.msk [vmem:[%s1227_s30 + $0x58] sm:$0xff] %vm264_vm1, %v686_v55  ;;  %735 = vst.msk [vmem:[%s1227_s30 + $0xd8] sm:$0xff] %vm264_vm1, %v702_v56  ;;  %v818_v7 = vmax.f32 %v786_v59, 0.0  ;;  %v328_v22 = vld [vmem:[%s1227_s30 + $0xf8] sm:$0xff] }
  0xfd   : > { %v764_v6 = vld [vmem:[%s1227_s30 + $0xa8] sm:$0xff]  ;;  %v834_v8 = vmax.f32 %v802_v60, 0.0  ;;  %v787_v9 = vadd.f32 %v1356_v49, %v748_v5  ;;  %717 = vst.msk [vmem:[%s1227_s30 + $0x48] sm:$0xff] %vm264_vm1, %v684_v63  ;;  %733 = vst.msk [vmem:[%s1227_s30 + $0xc8] sm:$0xff] %vm264_vm1, %v700_v0 }
  0xfe   : > { %v803_v10 = vadd.f32 %v1356_v49, %v764_v6  ;;  %852 = vst.msk [vmem:[%s1227_s30 + $0x30] sm:$0xff] %vm264_vm1, %v820_v1  ;;  %868 = vst.msk [vmem:[%s1227_s30 + $0xb0] sm:$0xff] %vm264_vm1, %v836_v2  ;;  %v821_v13 = vmax.f32 %v789_v3, 0.0  ;;  %v837_v14 = vmax.f32 %v805_v4, 0.0  ;;  %v1077_v19 = vpop.f32.mrb[12].mxu0  ;;  %v326_v28 = vld [vmem:[%s1227_s30 + $0xe8] sm:$0xff] }
  0xff   : > { %850 = vst.msk [vmem:[%s1227_s30 + $0x20] sm:$0xff] %vm264_vm1, %v818_v7  ;;  %866 = vst.msk [vmem:[%s1227_s30 + $0xa0] sm:$0xff] %vm264_vm1, %v834_v8  ;;  %v819_v17 = vmax.f32 %v787_v9, 0.0  ;;  %v1093_v20 = vpop.f32.mrb[12].mxu1  ;;  %v689_v23 = vadd.f32 %v1077_v19, %v311_v11  ;;  %v596_v25 = vpop.f32.mrb[13].mxu0 }
 0x100   : > { %v835_v18 = vmax.f32 %v803_v10, 0.0  ;;  %853 = vst.msk [vmem:[%s1227_s30 + $0x38] sm:$0xff] %vm264_vm1, %v821_v13  ;;  %869 = vst.msk [vmem:[%s1227_s30 + $0xb8] sm:$0xff] %vm264_vm1, %v837_v14  ;;  %v705_v24 = vadd.f32 %v1093_v20, %v327_v12  ;;  %v660_v26 = vpop.f32.mrb[13].mxu1  ;;  %v687_v31 = vadd.f32 %v596_v25, %v309_v15  ;;  %v1078_v33 = vpop.f32.mrb[14].mxu0 }
 0x101   : > { %851 = vst.msk [vmem:[%s1227_s30 + $0x28] sm:$0xff] %vm264_vm1, %v819_v17  ;;  %v753_v29 = vld [vmem:[%s1227_s30 + $0x50] sm:$0xff]  ;;  %v703_v32 = vadd.f32 %v660_v26, %v325_v16  ;;  %v1094_v34 = vpop.f32.mrb[14].mxu1  ;;  %722 = vst.msk [vmem:[%s1227_s30 + $0x70] sm:$0xff] %vm264_vm1, %v689_v23  ;;  %v690_v39 = vadd.f32 %v1078_v33, %v312_v21  ;;  %v599_v41 = vpop.f32.mrb[15].mxu0 }
 0x102   : > { %867 = vst.msk [vmem:[%s1227_s30 + $0xa8] sm:$0xff] %vm264_vm1, %v835_v18  ;;  %v769_v30 = vld [vmem:[%s1227_s30 + $0xd0] sm:$0xff]  ;;  %v792_v35 = vadd.f32 %v1356_v49, %v753_v29  ;;  %v751_v37 = vld [vmem:[%s1227_s30 + $0x40] sm:$0xff]  ;;  %738 = vst.msk [vmem:[%s1227_s30 + $0xf0] sm:$0xff] %vm264_vm1, %v705_v24  ;;  %v706_v40 = vadd.f32 %v1094_v34, %v328_v22  ;;  %v663_v42 = vpop.f32.mrb[15].mxu1  ;;  %v688_v47 = vadd.f32 %v599_v41, %v310_v27 }
 0x103   : > { %v808_v36 = vadd.f32 %v1356_v49, %v769_v30  ;;  %v767_v38 = vld [vmem:[%s1227_s30 + $0xc0] sm:$0xff]  ;;  %v790_v43 = vadd.f32 %v1356_v49, %v751_v37  ;;  %v754_v45 = vld [vmem:[%s1227_s30 + $0x58] sm:$0xff]  ;;  %720 = vst.msk [vmem:[%s1227_s30 + $0x60] sm:$0xff] %vm264_vm1, %v687_v31  ;;  %736 = vst.msk [vmem:[%s1227_s30 + $0xe0] sm:$0xff] %vm264_vm1, %v703_v32  ;;  %v704_v48 = vadd.f32 %v663_v42, %v326_v28 }
 0x104   : > { %v806_v44 = vadd.f32 %v1356_v49, %v767_v38  ;;  %v770_v46 = vld [vmem:[%s1227_s30 + $0xd8] sm:$0xff]  ;;  %v824_v50 = vmax.f32 %v792_v35, 0.0  ;;  %v793_v52 = vadd.f32 %v1356_v49, %v754_v45  ;;  %v752_v54 = vld [vmem:[%s1227_s30 + $0x48] sm:$0xff]  ;;  %723 = vst.msk [vmem:[%s1227_s30 + $0x78] sm:$0xff] %vm264_vm1, %v690_v39  ;;  %739 = vst.msk [vmem:[%s1227_s30 + $0xf8] sm:$0xff] %vm264_vm1, %v706_v40 }
 0x105   : > { %v840_v51 = vmax.f32 %v808_v36, 0.0  ;;  %v809_v53 = vadd.f32 %v1356_v49, %v770_v46  ;;  %v768_v55 = vld [vmem:[%s1227_s30 + $0xc8] sm:$0xff]  ;;  %v822_v56 = vmax.f32 %v790_v43, 0.0  ;;  %v791_v58 = vadd.f32 %v1356_v49, %v752_v54  ;;  %721 = vst.msk [vmem:[%s1227_s30 + $0x68] sm:$0xff] %vm264_vm1, %v688_v47  ;;  %737 = vst.msk [vmem:[%s1227_s30 + $0xe8] sm:$0xff] %vm264_vm1, %v704_v48 }
 0x106   : > { %v838_v57 = vmax.f32 %v806_v44, 0.0  ;;  %v807_v59 = vadd.f32 %v1356_v49, %v768_v55  ;;  %856 = vst.msk [vmem:[%s1227_s30 + $0x50] sm:$0xff] %vm264_vm1, %v824_v50  ;;  %v825_v60 = vmax.f32 %v793_v52, 0.0 }
 0x107   : > { %872 = vst.msk [vmem:[%s1227_s30 + $0xd0] sm:$0xff] %vm264_vm1, %v840_v51  ;;  %v841_v61 = vmax.f32 %v809_v53, 0.0  ;;  %854 = vst.msk [vmem:[%s1227_s30 + $0x40] sm:$0xff] %vm264_vm1, %v822_v56  ;;  %v823_v62 = vmax.f32 %v791_v58, 0.0 }
 0x108   : > { %870 = vst.msk [vmem:[%s1227_s30 + $0xc0] sm:$0xff] %vm264_vm1, %v838_v57  ;;  %v839_v63 = vmax.f32 %v807_v59, 0.0  ;;  %857 = vst.msk [vmem:[%s1227_s30 + $0x58] sm:$0xff] %vm264_vm1, %v825_v60  ;;  %v757_v0 = vld [vmem:[%s1227_s30 + $0x70] sm:$0xff] }
 0x109   : > { %873 = vst.msk [vmem:[%s1227_s30 + $0xd8] sm:$0xff] %vm264_vm1, %v841_v61  ;;  %855 = vst.msk [vmem:[%s1227_s30 + $0x48] sm:$0xff] %vm264_vm1, %v823_v62  ;;  %v773_v1 = vld [vmem:[%s1227_s30 + $0xf0] sm:$0xff]  ;;  %v796_v2 = vadd.f32 %v1356_v49, %v757_v0 }
 0x10a   : > { %871 = vst.msk [vmem:[%s1227_s30 + $0xc8] sm:$0xff] %vm264_vm1, %v839_v63  ;;  %v812_v3 = vadd.f32 %v1356_v49, %v773_v1  ;;  %v755_v4 = vld [vmem:[%s1227_s30 + $0x60] sm:$0xff] }
 0x10b   : > { %v771_v5 = vld [vmem:[%s1227_s30 + $0xe0] sm:$0xff]  ;;  %v794_v6 = vadd.f32 %v1356_v49, %v755_v4  ;;  %v758_v8 = vld [vmem:[%s1227_s30 + $0x78] sm:$0xff]  ;;  %v828_v10 = vmax.f32 %v796_v2, 0.0 }
 0x10c   : > { %v810_v7 = vadd.f32 %v1356_v49, %v771_v5  ;;  %v774_v9 = vld [vmem:[%s1227_s30 + $0xf8] sm:$0xff]  ;;  %v844_v11 = vmax.f32 %v812_v3, 0.0  ;;  %v797_v12 = vadd.f32 %v1356_v49, %v758_v8  ;;  %v756_v14 = vld [vmem:[%s1227_s30 + $0x68] sm:$0xff] }
 0x10d   : > { %v813_v13 = vadd.f32 %v1356_v49, %v774_v9  ;;  %v772_v15 = vld [vmem:[%s1227_s30 + $0xe8] sm:$0xff]  ;;  %v826_v16 = vmax.f32 %v794_v6, 0.0  ;;  %v795_v18 = vadd.f32 %v1356_v49, %v756_v14  ;;  %860 = vst.msk [vmem:[%s1227_s30 + $0x70] sm:$0xff] %vm264_vm1, %v828_v10 }
 0x10e   : > { %v842_v17 = vmax.f32 %v810_v7, 0.0  ;;  %v811_v19 = vadd.f32 %v1356_v49, %v772_v15  ;;  %876 = vst.msk [vmem:[%s1227_s30 + $0xf0] sm:$0xff] %vm264_vm1, %v844_v11  ;;  %v829_v20 = vmax.f32 %v797_v12, 0.0 }
 0x10f   : > { %v845_v21 = vmax.f32 %v813_v13, 0.0  ;;  %858 = vst.msk [vmem:[%s1227_s30 + $0x60] sm:$0xff] %vm264_vm1, %v826_v16  ;;  %v827_v22 = vmax.f32 %v795_v18, 0.0 }
 0x110   : > { %874 = vst.msk [vmem:[%s1227_s30 + $0xe0] sm:$0xff] %vm264_vm1, %v842_v17  ;;  %v843_v23 = vmax.f32 %v811_v19, 0.0  ;;  %861 = vst.msk [vmem:[%s1227_s30 + $0x78] sm:$0xff] %vm264_vm1, %v829_v20 }
 0x111   : > { %877 = vst.msk [vmem:[%s1227_s30 + $0xf8] sm:$0xff] %vm264_vm1, %v845_v21  ;;  %859 = vst.msk [vmem:[%s1227_s30 + $0x68] sm:$0xff] %vm264_vm1, %v827_v22 }
 0x112   : > { %875 = vst.msk [vmem:[%s1227_s30 + $0xe8] sm:$0xff] %vm264_vm1, %v843_v23 }
 0x113 PF: > { %s13_s14 = sadd.s32 1, %s1169_s14   ;;  %s1567_s12 = smov %s1165_s13 }
 0x114   : > { %p10_p5 = scmp.ge.s32.totalorder %s13_s14, 4   ;;  %s1568_s13 = smov %s1570_s15 }
 0x116   :  { %12 = sbr.rel (!%p10_p5) target bundleno = 2 (0x2), region = 76 }

// kernel: model_forward.14
= control target key start
LH: loop header
LB: loop body
LE: loop exit
PB: predicated region body
PF: predicated region fallthrough
CT: control target
= control target key end

     0   :  { %vm19_vm0 = vcmask 523264   ;;  %s1966_s1 = inlined_call_operand.vmem [shape: bf16[576,64], index: 1, kind: input, shape index: {}]   ;;  %s1967_s0 = inlined_call_operand.vmem [shape: bf16[128,576], index: 0, kind: input, shape index: {}]   ;;  %s1968_s3 = inlined_call_operand.vmem [shape: f32[128,64], index: 3, kind: output, shape index: {}]   ;;  %s1969_s2 = inlined_call_operand.vmem [shape: f32[1,64], index: 2, kind: input, shape index: {}]  }
   0x1   :  { %v1272_v0 = vld [vmem:[%s1966_s1 + $0x40] sm:$0xff]   ;;  %v1276_v4 = vld [vmem:[%s1966_s1 + $0x48] sm:$0xff]   ;;  %v1280_v8 = vld [vmem:[%s1966_s1 + $0x50] sm:$0xff]  }
   0x2   :  { %v1273_v1 = vld [vmem:[%s1966_s1 + $0xc0] sm:$0xff]   ;;  %1099 = vmatprep.subr.bf16.mxu0 %v1272_v0  ;;  %v1277_v5 = vld [vmem:[%s1966_s1 + $0xc8] sm:$0xff]   ;;  %v1281_v9 = vld [vmem:[%s1966_s1 + $0xd0] sm:$0xff]  }
   0x3   :  { %v1274_v2 = vld [vmem:[%s1966_s1] sm:$0xff]   ;;  %1163 = vmatprep.subr.bf16.mxu1 %v1273_v1  ;;  %v1278_v6 = vld [vmem:[%s1966_s1 + $0x8] sm:$0xff]   ;;  %v1282_v10 = vld [vmem:[%s1966_s1 + $0x10] sm:$0xff]  }
   0x4   :  { %v1275_v3 = vld [vmem:[%s1966_s1 + $0x80] sm:$0xff]   ;;  %1100 = vmatpush3.bf16.msra.mxu0 %v1274_v2  ;;  %v1279_v7 = vld [vmem:[%s1966_s1 + $0x88] sm:$0xff]   ;;  %v1283_v11 = vld [vmem:[%s1966_s1 + $0x90] sm:$0xff]  }
   0x5   :  { %1164 = vmatpush3.bf16.msra.mxu1 %v1275_v3  ;;  %1101 = vmatprep.subr.bf16.mxu0 %v1276_v4  ;;  %v1284_v12 = vld [vmem:[%s1966_s1 + $0x58] sm:$0xff]   ;;  %v1288_v16 = vld [vmem:[%s1966_s1 + $0x60] sm:$0xff]   ;;  %v1292_v20 = vld [vmem:[%s1966_s1 + $0x68] sm:$0xff]  }
   0x6   :  { %1165 = vmatprep.subr.bf16.mxu1 %v1277_v5  ;;  %v1285_v13 = vld [vmem:[%s1966_s1 + $0xd8] sm:$0xff]   ;;  %v1289_v17 = vld [vmem:[%s1966_s1 + $0xe0] sm:$0xff]   ;;  %v1293_v21 = vld [vmem:[%s1966_s1 + $0xe8] sm:$0xff]  }
   0x7   :  { %v1286_v14 = vld [vmem:[%s1966_s1 + $0x18] sm:$0xff]   ;;  %v1290_v18 = vld [vmem:[%s1966_s1 + $0x20] sm:$0xff]   ;;  %v1294_v22 = vld [vmem:[%s1966_s1 + $0x28] sm:$0xff]  }
   0x8   :  { %1102 = vmatpush3.bf16.msra.mxu0 %v1278_v6  ;;  %v1287_v15 = vld [vmem:[%s1966_s1 + $0x98] sm:$0xff]   ;;  %v1291_v19 = vld [vmem:[%s1966_s1 + $0xa0] sm:$0xff]   ;;  %v1295_v23 = vld [vmem:[%s1966_s1 + $0xa8] sm:$0xff]  }
   0x9   :  { %1166 = vmatpush3.bf16.msra.mxu1 %v1279_v7  ;;  %1103 = vmatprep.subr.bf16.mxu0 %v1280_v8  ;;  %v1296_v24 = vld [vmem:[%s1966_s1 + $0x70] sm:$0xff]   ;;  %v1300_v28 = vld [vmem:[%s1966_s1 + $0x78] sm:$0xff]   ;;  %v1309_v35 = vld [vmem:[%s1967_s0 + $0xc] ss:$20 sps:$4 sm:$0xff]  }
   0xa   :  { %1167 = vmatprep.subr.bf16.mxu1 %v1281_v9  ;;  %v1297_v25 = vld [vmem:[%s1966_s1 + $0xf0] sm:$0xff]   ;;  %v1301_v29 = vld [vmem:[%s1966_s1 + $0xf8] sm:$0xff]   ;;  %v1310_v36 = vld [vmem:[%s1966_s1 + $0x100] sm:$0xff]   ;;  %742 = vmatprep.mubr.bf16.mxu1 %v1309_v35 }
   0xb   :  { %v1298_v26 = vld [vmem:[%s1966_s1 + $0x30] sm:$0xff]   ;;  %v1302_v30 = vld [vmem:[%s1966_s1 + $0x38] sm:$0xff]   ;;  %v1311_v37 = vld [vmem:[%s1967_s0 + $0x2c] ss:$20 sps:$4 sm:$0xff]  }
   0xc   :  { %1104 = vmatpush3.bf16.msra.mxu0 %v1282_v10  ;;  %v1299_v27 = vld [vmem:[%s1966_s1 + $0xb0] sm:$0xff]   ;;  %v1303_v31 = vld [vmem:[%s1966_s1 + $0xb8] sm:$0xff]   ;;  %v1323_v42 = vld [vmem:[%s1966_s1 + $0x108] sm:$0xff]  }
   0xd   :  { %1168 = vmatpush3.bf16.msra.mxu1 %v1283_v11  ;;  %1105 = vmatprep.subr.bf16.mxu0 %v1284_v12  ;;  %v1304_v32 = vld [vmem:[%s1967_s0] ss:$20 sps:$4 sm:$0xff]   ;;  %v1306_v33 = vld [vmem:[%s1967_s0 + $0x4] ss:$20 sps:$4 sm:$0xff]   ;;  %v1307_v34 = vld [vmem:[%s1967_s0 + $0x8] ss:$20 sps:$4 sm:$0xff]  }
   0xe   :  { %1169 = vmatprep.subr.bf16.mxu1 %v1285_v13  ;;  %645 = vmatprep.mubr.bf16.mxu0 %v1306_v33  ;;  %v1313_v38 = vld [vmem:[%s1967_s0 + $0x34] ss:$20 sps:$4 sm:$0xff]   ;;  %v1316_v40 = vld [vmem:[%s1967_s0 + $0x30] ss:$20 sps:$4 sm:$0xff]   ;;  %v1322_v45 = vld [vmem:[%s1967_s0 + $0x58] ss:$20 sps:$4 sm:$0xff]  }
   0xf   :  { %v1315_v39 = vld [vmem:[%s1967_s0 + $0x28] ss:$20 sps:$4 sm:$0xff]   ;;  %v1321_v44 = vld [vmem:[%s1967_s0 + $0x50] ss:$20 sps:$4 sm:$0xff]   ;;  %v1328_v50 = vld [vmem:[%s1967_s0 + $0x78] ss:$20 sps:$4 sm:$0xff]  }
  0x10   :  { %1106 = vmatpush3.bf16.msra.mxu0 %v1286_v14  ;;  %v1317_v41 = vld [vmem:[%s1967_s0 + $0x54] ss:$20 sps:$4 sm:$0xff]   ;;  %v1319_v43 = vld [vmem:[%s1967_s0 + $0x5c] ss:$20 sps:$4 sm:$0xff]   ;;  %v1326_v48 = vld [vmem:[%s1967_s0 + $0x84] ss:$20 sps:$4 sm:$0xff]  }
  0x11   :  { %1170 = vmatpush3.bf16.msra.mxu1 %v1287_v15  ;;  %1107 = vmatprep.subr.bf16.mxu0 %v1288_v16  ;;  %v1336_v46 = vld [vmem:[%s1966_s1 + $0x110] sm:$0xff]   ;;  %v1349_v49 = vld [vmem:[%s1966_s1 + $0x118] sm:$0xff]   ;;  %v1332_v53 = vld [vmem:[%s1967_s0 + $0xac] ss:$20 sps:$4 sm:$0xff]   ;;  %v1364_v12 = vmov 0.0  }
  0x12   :  { %1171 = vmatprep.subr.bf16.mxu1 %v1289_v17  ;;  %v1324_v47 = vld [vmem:[%s1967_s0 + $0x7c] ss:$20 sps:$4 sm:$0xff]   ;;  %v1329_v51 = vld [vmem:[%s1967_s0 + $0x80] ss:$20 sps:$4 sm:$0xff]   ;;  %v1330_v52 = vld [vmem:[%s1967_s0 + $0xa4] ss:$20 sps:$4 sm:$0xff]  }
  0x13   :  { %v1334_v54 = vld [vmem:[%s1967_s0 + $0xa0] ss:$20 sps:$4 sm:$0xff]   ;;  %v1335_v55 = vld [vmem:[%s1967_s0 + $0xa8] ss:$20 sps:$4 sm:$0xff]   ;;  %v1342_v59 = vld [vmem:[%s1967_s0 + $0xd0] ss:$20 sps:$4 sm:$0xff]  }
  0x14   :  { %1108 = vmatpush3.bf16.msra.mxu0 %v1290_v18  ;;  %v1337_v56 = vld [vmem:[%s1967_s0 + $0xcc] ss:$20 sps:$4 sm:$0xff]   ;;  %v1339_v57 = vld [vmem:[%s1967_s0 + $0xd4] ss:$20 sps:$4 sm:$0xff]   ;;  %v1345_v61 = vld [vmem:[%s1967_s0 + $0xfc] ss:$20 sps:$4 sm:$0xff]  }
  0x15   :  { %1172 = vmatpush3.bf16.msra.mxu1 %v1291_v19  ;;  %1109 = vmatprep.subr.bf16.mxu0 %v1292_v20  ;;  %v1341_v58 = vld [vmem:[%s1967_s0 + $0xc8] ss:$20 sps:$4 sm:$0xff]   ;;  %v1347_v62 = vld [vmem:[%s1967_s0 + $0xf0] ss:$20 sps:$4 sm:$0xff]   ;;  %v1348_v63 = vld [vmem:[%s1967_s0 + $0xf8] ss:$20 sps:$4 sm:$0xff]  }
  0x16   :  { %1173 = vmatprep.subr.bf16.mxu1 %v1293_v21  ;;  %v1343_v60 = vld [vmem:[%s1967_s0 + $0xf4] ss:$20 sps:$4 sm:$0xff]   ;;  %v1350_v0 = vld [vmem:[%s1967_s0 + $0x11c] ss:$20 sps:$4 sm:$0xff]   ;;  %v1352_v1 = vld [vmem:[%s1967_s0 + $0x124] ss:$20 sps:$4 sm:$0xff]  }
  0x17   :  { %v1354_v2 = vld [vmem:[%s1967_s0 + $0x118] ss:$20 sps:$4 sm:$0xff]   ;;  %v1355_v3 = vld [vmem:[%s1967_s0 + $0x120] ss:$20 sps:$4 sm:$0xff]   ;;  %v1356_v4 = vld [vmem:[%s1967_s0 + $0x10] ss:$20 sps:$4 sm:$0xff]  }
  0x18   :  { %1110 = vmatpush3.bf16.msra.mxu0 %v1294_v22  ;;  %v1357_v5 = vld [vmem:[%s1967_s0 + $0xb0] ss:$20 sps:$4 sm:$0xff]   ;;  %v1358_v6 = vld [vmem:[%s1967_s0 + $0x38] ss:$20 sps:$4 sm:$0xff]   ;;  %v1360_v8 = vld [vmem:[%s1967_s0 + $0x60] ss:$20 sps:$4 sm:$0xff]  }
  0x19   :  { %1174 = vmatpush3.bf16.msra.mxu1 %v1295_v23  ;;  %1111 = vmatprep.subr.bf16.mxu0 %v1296_v24  ;;  %v1359_v7 = vld [vmem:[%s1967_s0 + $0xd8] ss:$20 sps:$4 sm:$0xff]   ;;  %v1361_v9 = vld [vmem:[%s1967_s0 + $0x100] ss:$20 sps:$4 sm:$0xff]   ;;  %v1362_v10 = vld [vmem:[%s1967_s0 + $0x88] ss:$20 sps:$4 sm:$0xff]  }
  0x1a   :  { %1175 = vmatprep.subr.bf16.mxu1 %v1297_v25  ;;  %v1363_v11 = vld [vmem:[%s1967_s0 + $0x128] ss:$20 sps:$4 sm:$0xff]   ;;  %22 = vst.msk [vmem:[%s1968_s3 + $0x10] sm:$0xff] %vm19_vm0, %v1364_v12  ;;  %20 = vst.msk [vmem:[%s1968_s3] sm:$0xff] %vm19_vm0, %v1364_v12 }
  0x1b   :  { %21 = vst.msk [vmem:[%s1968_s3 + $0x8] sm:$0xff] %vm19_vm0, %v1364_v12  ;;  %23 = vst.msk [vmem:[%s1968_s3 + $0x18] sm:$0xff] %vm19_vm0, %v1364_v12 }
  0x1c   :  { %1112 = vmatpush3.bf16.msra.mxu0 %v1298_v26  ;;  %24 = vst.msk [vmem:[%s1968_s3 + $0x20] sm:$0xff] %vm19_vm0, %v1364_v12  ;;  %25 = vst.msk [vmem:[%s1968_s3 + $0x28] sm:$0xff] %vm19_vm0, %v1364_v12 }
  0x1d   :  { %1176 = vmatpush3.bf16.msra.mxu1 %v1299_v27  ;;  %1113 = vmatprep.subr.bf16.mxu0 %v1300_v28  ;;  %26 = vst.msk [vmem:[%s1968_s3 + $0x30] sm:$0xff] %vm19_vm0, %v1364_v12  ;;  %27 = vst.msk [vmem:[%s1968_s3 + $0x38] sm:$0xff] %vm19_vm0, %v1364_v12 }
  0x1e   :  { %1177 = vmatprep.subr.bf16.mxu1 %v1301_v29  ;;  %28 = vst.msk [vmem:[%s1968_s3 + $0x40] sm:$0xff] %vm19_vm0, %v1364_v12  ;;  %29 = vst.msk [vmem:[%s1968_s3 + $0x48] sm:$0xff] %vm19_vm0, %v1364_v12 }
  0x1f   :  { %30 = vst.msk [vmem:[%s1968_s3 + $0x50] sm:$0xff] %vm19_vm0, %v1364_v12  ;;  %31 = vst.msk [vmem:[%s1968_s3 + $0x58] sm:$0xff] %vm19_vm0, %v1364_v12 }
  0x20   :  { %1114 = vmatpush3.bf16.msra.mxu0 %v1302_v30  ;;  %32 = vst.msk [vmem:[%s1968_s3 + $0x60] sm:$0xff] %vm19_vm0, %v1364_v12  ;;  %33 = vst.msk [vmem:[%s1968_s3 + $0x68] sm:$0xff] %vm19_vm0, %v1364_v12 }
  0x21   :  { %1178 = vmatpush3.bf16.msra.mxu1 %v1303_v31  ;;  %1239 = vmatprep.subr.bf16.mxu0 %v1310_v36  ;;  %34 = vst.msk [vmem:[%s1968_s3 + $0x70] sm:$0xff] %vm19_vm0, %v1364_v12  ;;  %35 = vst.msk [vmem:[%s1968_s3 + $0x78] sm:$0xff] %vm19_vm0, %v1364_v12 }
  0x22   :  { %1263 = vmatprep.subr.bf16.mxu1 %v1310_v36 }
  0x23   :  { %646 = vmatmul.mubr.bf16.vlgmr.msra.gmra.mrb[0].mxu0 %v1304_v32 }
  0x24   :  { %743 = vmatmul.mubr.bf16.vlgmr.msra.gmra.mrb[0].mxu1 %v1307_v34  ;;  %1240 = vmatpush3.bf16.msra.mxu0 %v1310_v36 }
  0x25   :  { %1267 = vmatpush3.bf16.msra.mxu1 %v1310_v36  ;;  %653 = vmatprep.mubr.bf16.mxu0 %v1311_v37 }
  0x26   :  { %750 = vmatprep.mubr.bf16.mxu1 %v1313_v38  ;;  %1241 = vmatprep.subr.bf16.mxu0 %v1323_v42 }
  0x27   :  { %1264 = vmatprep.subr.bf16.mxu1 %v1323_v42 }
  0x28   :  { %1242 = vmatpush3.bf16.msra.mxu0 %v1323_v42 }
  0x29   :  { %1268 = vmatpush3.bf16.msra.mxu1 %v1323_v42  ;;  %1243 = vmatprep.subr.bf16.mxu0 %v1336_v46 }
  0x2a   :  { %1265 = vmatprep.subr.bf16.mxu1 %v1336_v46 }
  0x2b   :  { %654 = vmatmul.mubr.bf16.gmra.mrb[4].mxu0 %v1315_v39 }
  0x2c   :  { %751 = vmatmul.mubr.bf16.gmra.mrb[4].mxu1 %v1316_v40  ;;  %661 = vmatprep.mubr.bf16.mxu0 %v1317_v41 }
  0x2d   :  { %758 = vmatprep.mubr.bf16.mxu1 %v1319_v43  ;;  %1244 = vmatpush3.bf16.msra.mxu0 %v1336_v46 }
  0x2e   :  { %1269 = vmatpush3.bf16.msra.mxu1 %v1336_v46  ;;  %1245 = vmatprep.subr.bf16.mxu0 %v1349_v49 }
  0x2f   :  { %1266 = vmatprep.subr.bf16.mxu1 %v1349_v49 }
  0x31   :  { %1246 = vmatpush3.bf16.msra.mxu0 %v1349_v49 }
  0x32   :  { %1270 = vmatpush3.bf16.msra.mxu1 %v1349_v49 }
  0x33   :  { %662 = vmatmul.mubr.bf16.gmra.mrb[8].mxu0 %v1321_v44 }
  0x34   :  { %759 = vmatmul.mubr.bf16.gmra.mrb[8].mxu1 %v1322_v45  ;;  %669 = vmatprep.mubr.bf16.mxu0 %v1324_v47 }
  0x35   :  { %766 = vmatprep.mubr.bf16.mxu1 %v1326_v48 }
  0x3b   :  { %670 = vmatmul.mubr.bf16.gmra.mrb[12].mxu0 %v1328_v50 }
  0x3c   :  { %767 = vmatmul.mubr.bf16.gmra.mrb[12].mxu1 %v1329_v51  ;;  %677 = vmatprep.mubr.bf16.mxu0 %v1330_v52 }
  0x3d   :  { %774 = vmatprep.mubr.bf16.mxu1 %v1332_v53 }
  0x43   :  { %678 = vmatmul.mubr.bf16.gmra.mrb[16].mxu0 %v1334_v54 }
  0x44   :  { %775 = vmatmul.mubr.bf16.gmra.mrb[16].mxu1 %v1335_v55  ;;  %685 = vmatprep.mubr.bf16.mxu0 %v1337_v56 }
  0x45   :  { %782 = vmatprep.mubr.bf16.mxu1 %v1339_v57 }
  0x4b   :  { %686 = vmatmul.mubr.bf16.gmra.mrb[20].mxu0 %v1341_v58 }
  0x4c   :  { %783 = vmatmul.mubr.bf16.gmra.mrb[20].mxu1 %v1342_v59  ;;  %693 = vmatprep.mubr.bf16.mxu0 %v1343_v60 }
  0x4d   :  { %790 = vmatprep.mubr.bf16.mxu1 %v1345_v61 }
  0x53   :  { %694 = vmatmul.mubr.bf16.gmra.mrb[24].mxu0 %v1347_v62 }
  0x54   :  { %791 = vmatmul.mubr.bf16.gmra.mrb[24].mxu1 %v1348_v63  ;;  %701 = vmatprep.mubr.bf16.mxu0 %v1350_v0 }
  0x55   :  { %798 = vmatprep.mubr.bf16.mxu1 %v1352_v1 }
  0x5b   :  { %702 = vmatmul.mubr.bf16.gmra.mrb[28].mxu0 %v1354_v2 }
  0x5c   :  { %799 = vmatmul.mubr.bf16.gmra.mrb[28].mxu1 %v1355_v3  ;;  %1247 = vmatprep.mubr.msk.bf16.mxu0 %vm19_vm0, %v1356_v4 }
  0x5d   :  { %1255 = vmatprep.mubr.msk.bf16.mxu1 %vm19_vm0, %v1357_v5 }
  0x63   :  { %1248 = vmatmul.mubr.msk.bf16.vlgmr.msra.gmra.mrb[32].mxu0 %vm19_vm0, %v1358_v6 }
  0x64   :  { %1256 = vmatmul.mubr.msk.bf16.vlgmr.msra.gmra.mrb[32].mxu1 %vm19_vm0, %v1359_v7  ;;  %1251 = vmatprep.mubr.msk.bf16.mxu0 %vm19_vm0, %v1360_v8 }
  0x65   :  { %1259 = vmatprep.mubr.msk.bf16.mxu1 %vm19_vm0, %v1361_v9 }
  0x6b   :  { %1252 = vmatmul.mubr.msk.bf16.gmra.mrb[36].mxu0 %vm19_vm0, %v1362_v10 }
  0x6c   :  { %1260 = vmatmul.mubr.msk.bf16.gmra.mrb[36].mxu1 %vm19_vm0, %v1363_v11 }
  0xf6   :  { %v1115_v13 = vpop.f32.mrb[0].mxu0 }
  0xf7   :  { %v1179_v14 = vpop.f32.mrb[0].mxu1  ;;  %v1116_v15 = vpop.f32.mrb[1].mxu0 }
  0xf8   :  { %v1117_v16 = vadd.f32 %v1116_v15, %v1115_v13  ;;  %v1180_v17 = vpop.f32.mrb[1].mxu1  ;;  %v1118_v18 = vpop.f32.mrb[2].mxu0 }
  0xf9   :  { %v1181_v19 = vadd.f32 %v1180_v17, %v1179_v14  ;;  %v1182_v20 = vpop.f32.mrb[2].mxu1  ;;  %v1119_v21 = vpop.f32.mrb[3].mxu0 }
  0xfa   :  { %v1120_v22 = vadd.f32 %v1119_v21, %v1118_v18  ;;  %v1183_v23 = vpop.f32.mrb[3].mxu1 }
  0xfb   :  { %v1184_v24 = vadd.f32 %v1183_v23, %v1182_v20  ;;  %v1685_v25 = vadd.f32 %v1181_v19, %v1117_v16 }
  0xfd   :  { %v1687_v26 = vadd.f32 %v1184_v24, %v1120_v22 }
  0xfe   :  { %v1121_v27 = vpop.f32.mrb[4].mxu0 }
  0xff   :  { %v1185_v28 = vpop.f32.mrb[4].mxu1  ;;  %v1122_v29 = vpop.f32.mrb[5].mxu0 }
 0x100   :  { %v1123_v30 = vadd.f32 %v1122_v29, %v1121_v27  ;;  %v1186_v31 = vpop.f32.mrb[5].mxu1  ;;  %v1124_v32 = vpop.f32.mrb[6].mxu0 }
 0x101   :  { %v1187_v33 = vadd.f32 %v1186_v31, %v1185_v28  ;;  %v1188_v34 = vpop.f32.mrb[6].mxu1  ;;  %v1125_v35 = vpop.f32.mrb[7].mxu0 }
 0x102   :  { %v1126_v36 = vadd.f32 %v1125_v35, %v1124_v32  ;;  %v1189_v37 = vpop.f32.mrb[7].mxu1 }
 0x103   :  { %v1190_v38 = vadd.f32 %v1189_v37, %v1188_v34  ;;  %v1689_v39 = vadd.f32 %v1187_v33, %v1123_v30 }
 0x105   :  { %v1691_v40 = vadd.f32 %v1190_v38, %v1126_v36 }
 0x106   :  { %v1127_v41 = vpop.f32.mrb[8].mxu0 }
 0x107   :  { %v1191_v42 = vpop.f32.mrb[8].mxu1  ;;  %v1128_v43 = vpop.f32.mrb[9].mxu0 }
 0x108   :  { %v1129_v44 = vadd.f32 %v1128_v43, %v1127_v41  ;;  %v1192_v45 = vpop.f32.mrb[9].mxu1  ;;  %v1130_v46 = vpop.f32.mrb[10].mxu0 }
 0x109   :  { %v1193_v47 = vadd.f32 %v1192_v45, %v1191_v42  ;;  %v1194_v48 = vpop.f32.mrb[10].mxu1  ;;  %v1131_v49 = vpop.f32.mrb[11].mxu0 }
 0x10a   :  { %v1132_v50 = vadd.f32 %v1131_v49, %v1130_v46  ;;  %v1195_v51 = vpop.f32.mrb[11].mxu1 }
 0x10b   :  { %v1196_v52 = vadd.f32 %v1195_v51, %v1194_v48  ;;  %v1693_v53 = vadd.f32 %v1193_v47, %v1129_v44 }
 0x10d   :  { %v1695_v54 = vadd.f32 %v1196_v52, %v1132_v50 }
 0x10e   :  { %v1133_v55 = vpop.f32.mrb[12].mxu0 }
 0x10f   :  { %v1197_v56 = vpop.f32.mrb[12].mxu1  ;;  %v1134_v57 = vpop.f32.mrb[13].mxu0 }
 0x110   :  { %v1135_v58 = vadd.f32 %v1134_v57, %v1133_v55  ;;  %v1198_v59 = vpop.f32.mrb[13].mxu1  ;;  %v1136_v60 = vpop.f32.mrb[14].mxu0 }
 0x111   :  { %v1199_v61 = vadd.f32 %v1198_v59, %v1197_v56  ;;  %v1200_v62 = vpop.f32.mrb[14].mxu1  ;;  %v1137_v63 = vpop.f32.mrb[15].mxu0 }
 0x112   :  { %v1138_v0 = vadd.f32 %v1137_v63, %v1136_v60  ;;  %v1201_v1 = vpop.f32.mrb[15].mxu1 }
 0x113   :  { %v1202_v2 = vadd.f32 %v1201_v1, %v1200_v62  ;;  %v1697_v3 = vadd.f32 %v1199_v61, %v1135_v58 }
 0x115   :  { %v1699_v4 = vadd.f32 %v1202_v2, %v1138_v0 }
 0x116   :  { %v1139_v5 = vpop.f32.mrb[16].mxu0 }
 0x117   :  { %v1203_v6 = vpop.f32.mrb[16].mxu1  ;;  %v1140_v7 = vpop.f32.mrb[17].mxu0 }
 0x118   :  { %v1141_v8 = vadd.f32 %v1140_v7, %v1139_v5  ;;  %v1204_v9 = vpop.f32.mrb[17].mxu1  ;;  %v1142_v10 = vpop.f32.mrb[18].mxu0  ;;  %v38_v5 = vld [vmem:[%s1968_s3 + $0x10] sm:$0xff] }
 0x119   :  { %v1205_v11 = vadd.f32 %v1204_v9, %v1203_v6  ;;  %v1206_v12 = vpop.f32.mrb[18].mxu1  ;;  %v1143_v13 = vpop.f32.mrb[19].mxu0 }
 0x11a   :  { %v1144_v14 = vadd.f32 %v1143_v13, %v1142_v10  ;;  %v1207_v15 = vpop.f32.mrb[19].mxu1  ;;  %v36_v10 = vld [vmem:[%s1968_s3] sm:$0xff] }
 0x11b   :  { %v1208_v16 = vadd.f32 %v1207_v15, %v1206_v12  ;;  %v777_v17 = vadd.f32 %v1205_v11, %v1141_v8  ;;  %v46_v8 = vld [vmem:[%s1968_s3 + $0x50] sm:$0xff] }
 0x11d   :  { %v1701_v18 = vadd.f32 %v1208_v16, %v1144_v14  ;;  %v44_v14 = vld [vmem:[%s1968_s3 + $0x40] sm:$0xff] }
 0x11e   :  { %v1145_v19 = vpop.f32.mrb[20].mxu0 }
 0x11f   :  { %v1209_v20 = vpop.f32.mrb[20].mxu1  ;;  %v1146_v21 = vpop.f32.mrb[21].mxu0 }
 0x120   :  { %v1147_v22 = vadd.f32 %v1146_v21, %v1145_v19  ;;  %v1210_v23 = vpop.f32.mrb[21].mxu1  ;;  %v1148_v24 = vpop.f32.mrb[22].mxu0 }
 0x121   :  { %v1211_v27 = vadd.f32 %v1210_v23, %v1209_v20  ;;  %v1212_v28 = vpop.f32.mrb[22].mxu1  ;;  %v1149_v29 = vpop.f32.mrb[23].mxu0 }
 0x122   :  { %v1150_v30 = vadd.f32 %v1149_v29, %v1148_v24  ;;  %v1213_v31 = vpop.f32.mrb[23].mxu1 }
 0x123   :  { %v1214_v32 = vadd.f32 %v1213_v31, %v1212_v28  ;;  %v785_v33 = vadd.f32 %v1211_v27, %v1147_v22  ;;  %v47_v22 = vld [vmem:[%s1968_s3 + $0x58] sm:$0xff] }
 0x125   :  { %v788_v34 = vadd.f32 %v1214_v32, %v1150_v30 }
 0x126   :  { %v1151_v35 = vpop.f32.mrb[24].mxu0 }
 0x127   :  { %v1215_v36 = vpop.f32.mrb[24].mxu1  ;;  %v1152_v37 = vpop.f32.mrb[25].mxu0 }
 0x128   :  { %v1153_v38 = vadd.f32 %v1152_v37, %v1151_v35  ;;  %v1216_v41 = vpop.f32.mrb[25].mxu1  ;;  %v1154_v42 = vpop.f32.mrb[26].mxu0  ;;  %v42_v35 = vld [vmem:[%s1968_s3 + $0x30] sm:$0xff] }
 0x129   :  { %v1217_v43 = vadd.f32 %v1216_v41, %v1215_v36  ;;  %v1218_v44 = vpop.f32.mrb[26].mxu1  ;;  %v1155_v45 = vpop.f32.mrb[27].mxu0 }
 0x12a   :  { %v1156_v46 = vadd.f32 %v1155_v45, %v1154_v42  ;;  %v1219_v47 = vpop.f32.mrb[27].mxu1  ;;  %v40_v42 = vld [vmem:[%s1968_s3 + $0x20] sm:$0xff] }
 0x12b   :  { %v1220_v48 = vadd.f32 %v1219_v47, %v1218_v44  ;;  %v1703_v49 = vadd.f32 %v1217_v43, %v1153_v38  ;;  %v50_v38 = vld [vmem:[%s1968_s3 + $0x70] sm:$0xff]  ;;  %v1783_v44 = vld [vmem:[%s1969_s2] ss:$0 sm:$0xff] }
 0x12d   :  { %v1705_v50 = vadd.f32 %v1220_v48, %v1156_v46  ;;  %v43_v48 = vld [vmem:[%s1968_s3 + $0x38] sm:$0xff] }
 0x12e   :  { %v1157_v51 = vpop.f32.mrb[28].mxu0 }
 0x12f   :  { %v1221_v52 = vpop.f32.mrb[28].mxu1  ;;  %v1158_v55 = vpop.f32.mrb[29].mxu0 }
 0x130   :  { %v1159_v56 = vadd.f32 %v1158_v55, %v1157_v51  ;;  %v1222_v57 = vpop.f32.mrb[29].mxu1  ;;  %v1160_v58 = vpop.f32.mrb[30].mxu0 }
 0x131   :  { %v1223_v59 = vadd.f32 %v1222_v57, %v1221_v52  ;;  %v1224_v60 = vpop.f32.mrb[30].mxu1  ;;  %v1161_v61 = vpop.f32.mrb[31].mxu0  ;;  %v51_v57 = vld [vmem:[%s1968_s3 + $0x78] sm:$0xff] }
 0x132   :  { %v1162_v62 = vadd.f32 %v1161_v61, %v1160_v58  ;;  %v1225_v63 = vpop.f32.mrb[31].mxu1  ;;  %v41_v58 = vld [vmem:[%s1968_s3 + $0x28] sm:$0xff] }
 0x133   :  { %v1226_v0 = vadd.f32 %v1225_v63, %v1224_v60  ;;  %v801_v1 = vadd.f32 %v1223_v59, %v1159_v56  ;;  %v49_v63 = vld [vmem:[%s1968_s3 + $0x68] sm:$0xff] }
 0x135   :  { %v1707_v2 = vadd.f32 %v1226_v0, %v1162_v62 }
 0x136   :  { %v1249_v6 = vpop.f32.mrb[32].mxu0 }
 0x137   :  { %v850_v7 = vadd.f32 %v1249_v6, %v1689_v39  ;;  %v1257_v9 = vpop.f32.mrb[32].mxu1  ;;  %v841_v11 = vpop.f32.mrb[33].mxu0  ;;  %v39_v39 = vld [vmem:[%s1968_s3 + $0x18] sm:$0xff] }
 0x138   :  { %v882_v12 = vadd.f32 %v1257_v9, %v785_v33  ;;  %v842_v13 = vadd.f32 %v841_v11, %v1685_v25  ;;  %v873_v15 = vpop.f32.mrb[33].mxu1  ;;  %v1250_v16 = vpop.f32.mrb[34].mxu0  ;;  %v37_v25 = vld [vmem:[%s1968_s3 + $0x8] sm:$0xff] }
 0x139   :  { %v906_v19 = vadd.f32 %v850_v7, %v38_v5  ;;  %v874_v20 = vadd.f32 %v873_v15, %v777_v17  ;;  %v853_v21 = vadd.f32 %v1250_v16, %v1691_v40  ;;  %v1258_v23 = vpop.f32.mrb[34].mxu1  ;;  %v844_v24 = vpop.f32.mrb[35].mxu0  ;;  %v45_v17 = vld [vmem:[%s1968_s3 + $0x48] sm:$0xff] }
 0x13a   :  { %v914_v27 = vadd.f32 %v882_v12, %v46_v8  ;;  %v904_v28 = vadd.f32 %v842_v13, %v36_v10  ;;  %v885_v29 = vadd.f32 %v1258_v23, %v788_v34  ;;  %v845_v30 = vadd.f32 %v844_v24, %v1687_v26  ;;  %v876_v40 = vpop.f32.mrb[35].mxu1 }
 0x13b   :  { %922 = vst.msk [vmem:[%s1968_s3 + $0x10] sm:$0xff] %vm19_vm0, %v906_v19  ;;  %v912_v31 = vadd.f32 %v874_v20, %v44_v14  ;;  %v907_v32 = vadd.f32 %v853_v21, %v39_v39  ;;  %v877_v33 = vadd.f32 %v876_v40, %v1701_v18 }
 0x13c   :  { %930 = vst.msk [vmem:[%s1968_s3 + $0x50] sm:$0xff] %vm19_vm0, %v914_v27  ;;  %920 = vst.msk [vmem:[%s1968_s3] sm:$0xff] %vm19_vm0, %v904_v28  ;;  %v915_v26 = vadd.f32 %v885_v29, %v47_v22  ;;  %v905_v34 = vadd.f32 %v845_v30, %v37_v25 }
 0x13d   :  { %928 = vst.msk [vmem:[%s1968_s3 + $0x40] sm:$0xff] %vm19_vm0, %v912_v31  ;;  %923 = vst.msk [vmem:[%s1968_s3 + $0x18] sm:$0xff] %vm19_vm0, %v907_v32  ;;  %v913_v18 = vadd.f32 %v877_v33, %v45_v17 }
 0x13e   :  { %931 = vst.msk [vmem:[%s1968_s3 + $0x58] sm:$0xff] %vm19_vm0, %v915_v26  ;;  %921 = vst.msk [vmem:[%s1968_s3 + $0x8] sm:$0xff] %vm19_vm0, %v905_v34  ;;  %v1253_v36 = vpop.f32.mrb[36].mxu0 }
 0x13f   :  { %929 = vst.msk [vmem:[%s1968_s3 + $0x48] sm:$0xff] %vm19_vm0, %v913_v18  ;;  %v866_v37 = vadd.f32 %v1253_v36, %v1697_v3  ;;  %v1261_v41 = vpop.f32.mrb[36].mxu1  ;;  %v857_v43 = vpop.f32.mrb[37].mxu0  ;;  %v48_v3 = vld [vmem:[%s1968_s3 + $0x60] sm:$0xff] }
 0x140   :  { %v898_v45 = vadd.f32 %v1261_v41, %v801_v1  ;;  %v858_v46 = vadd.f32 %v857_v43, %v1693_v53  ;;  %v889_v47 = vpop.f32.mrb[37].mxu1  ;;  %v1254_v51 = vpop.f32.mrb[38].mxu0 }
 0x141   :  { %v910_v52 = vadd.f32 %v866_v37, %v42_v35  ;;  %v890_v55 = vadd.f32 %v889_v47, %v1703_v49  ;;  %v869_v56 = vadd.f32 %v1254_v51, %v1699_v4  ;;  %v1262_v53 = vpop.f32.mrb[38].mxu1  ;;  %v860_v59 = vpop.f32.mrb[39].mxu0 }
 0x142   :  { %v941_v60 = vld [vmem:[%s1968_s3 + $0x10] sm:$0xff]  ;;  %v918_v61 = vadd.f32 %v898_v45, %v50_v38  ;;  %v908_v62 = vadd.f32 %v858_v46, %v40_v42  ;;  %v901_v49 = vadd.f32 %v1262_v53, %v1707_v2  ;;  %v861_v4 = vadd.f32 %v860_v59, %v1695_v54  ;;  %v892_v0 = vpop.f32.mrb[39].mxu1 }
 0x143   :  { %v964_v1 = vadd.f32 %v1783_v44, %v941_v60  ;;  %v949_v5 = vld [vmem:[%s1968_s3 + $0x50] sm:$0xff]  ;;  %v939_v6 = vld [vmem:[%s1968_s3] sm:$0xff]  ;;  %926 = vst.msk [vmem:[%s1968_s3 + $0x30] sm:$0xff] %vm19_vm0, %v910_v52  ;;  %v916_v54 = vadd.f32 %v890_v55, %v48_v3  ;;  %v911_v2 = vadd.f32 %v869_v56, %v43_v48  ;;  %v893_v7 = vadd.f32 %v892_v0, %v1705_v50 }
 0x144   :  { %v972_v8 = vadd.f32 %v1783_v44, %v949_v5  ;;  %v962_v9 = vadd.f32 %v1783_v44, %v939_v6  ;;  %v947_v10 = vld [vmem:[%s1968_s3 + $0x40] sm:$0xff]  ;;  %v942_v11 = vld [vmem:[%s1968_s3 + $0x18] sm:$0xff]  ;;  %934 = vst.msk [vmem:[%s1968_s3 + $0x70] sm:$0xff] %vm19_vm0, %v918_v61  ;;  %924 = vst.msk [vmem:[%s1968_s3 + $0x20] sm:$0xff] %vm19_vm0, %v908_v62  ;;  %v919_v50 = vadd.f32 %v901_v49, %v51_v57 }
 0x145   :  { %v909_v12 = vadd.f32 %v861_v4, %v41_v58  ;;  %v980_v13 = vmax.f32 %v964_v1, 0.0  ;;  %v970_v14 = vadd.f32 %v1783_v44, %v947_v10  ;;  %v965_v15 = vadd.f32 %v1783_v44, %v942_v11  ;;  %v950_v39 = vld [vmem:[%s1968_s3 + $0x58] sm:$0xff]  ;;  %v940_v16 = vld [vmem:[%s1968_s3 + $0x8] sm:$0xff]  ;;  %932 = vst.msk [vmem:[%s1968_s3 + $0x60] sm:$0xff] %vm19_vm0, %v916_v54  ;;  %927 = vst.msk [vmem:[%s1968_s3 + $0x38] sm:$0xff] %vm19_vm0, %v911_v2 }
 0x146   :  { %v917_v19 = vadd.f32 %v893_v7, %v49_v63  ;;  %v988_v20 = vmax.f32 %v972_v8, 0.0  ;;  %v978_v21 = vmax.f32 %v962_v9, 0.0  ;;  %v973_v22 = vadd.f32 %v1783_v44, %v950_v39  ;;  %v948_v25 = vld [vmem:[%s1968_s3 + $0x48] sm:$0xff]  ;;  %935 = vst.msk [vmem:[%s1968_s3 + $0x78] sm:$0xff] %vm19_vm0, %v919_v50 }
 0x147   :  { %v963_v23 = vadd.f32 %v1783_v44, %v940_v16  ;;  %925 = vst.msk [vmem:[%s1968_s3 + $0x28] sm:$0xff] %vm19_vm0, %v909_v12  ;;  %996 = vst.msk [vmem:[%s1968_s3 + $0x10] sm:$0xff] %vm19_vm0, %v980_v13  ;;  %v986_v24 = vmax.f32 %v970_v14, 0.0  ;;  %v981_v27 = vmax.f32 %v965_v15, 0.0  ;;  %v971_v28 = vadd.f32 %v1783_v44, %v948_v25 }
 0x148   :  { %933 = vst.msk [vmem:[%s1968_s3 + $0x68] sm:$0xff] %vm19_vm0, %v917_v19  ;;  %1004 = vst.msk [vmem:[%s1968_s3 + $0x50] sm:$0xff] %vm19_vm0, %v988_v20  ;;  %v989_v29 = vmax.f32 %v973_v22, 0.0 }
 0x149   :  { %994 = vst.msk [vmem:[%s1968_s3] sm:$0xff] %vm19_vm0, %v978_v21  ;;  %v979_v30 = vmax.f32 %v963_v23, 0.0  ;;  %1002 = vst.msk [vmem:[%s1968_s3 + $0x40] sm:$0xff] %vm19_vm0, %v986_v24  ;;  %v987_v17 = vmax.f32 %v971_v28, 0.0 }
 0x14a   :  { %997 = vst.msk [vmem:[%s1968_s3 + $0x18] sm:$0xff] %vm19_vm0, %v981_v27  ;;  %1005 = vst.msk [vmem:[%s1968_s3 + $0x58] sm:$0xff] %vm19_vm0, %v989_v29  ;;  %v945_v40 = vld [vmem:[%s1968_s3 + $0x30] sm:$0xff] }
 0x14b   :  { %995 = vst.msk [vmem:[%s1968_s3 + $0x8] sm:$0xff] %vm19_vm0, %v979_v30  ;;  %1003 = vst.msk [vmem:[%s1968_s3 + $0x48] sm:$0xff] %vm19_vm0, %v987_v17  ;;  %v968_v31 = vadd.f32 %v1783_v44, %v945_v40  ;;  %v953_v32 = vld [vmem:[%s1968_s3 + $0x70] sm:$0xff]  ;;  %v943_v33 = vld [vmem:[%s1968_s3 + $0x20] sm:$0xff] }
 0x14c   :  { %v976_v26 = vadd.f32 %v1783_v44, %v953_v32  ;;  %v966_v34 = vadd.f32 %v1783_v44, %v943_v33  ;;  %v951_v18 = vld [vmem:[%s1968_s3 + $0x60] sm:$0xff]  ;;  %v946_v35 = vld [vmem:[%s1968_s3 + $0x38] sm:$0xff] }
 0x14d   :  { %v984_v36 = vmax.f32 %v968_v31, 0.0  ;;  %v974_v37 = vadd.f32 %v1783_v44, %v951_v18  ;;  %v969_v38 = vadd.f32 %v1783_v44, %v946_v35  ;;  %v954_v41 = vld [vmem:[%s1968_s3 + $0x78] sm:$0xff] }
 0x14e   :  { %v944_v42 = vld [vmem:[%s1968_s3 + $0x28] sm:$0xff]  ;;  %v992_v43 = vmax.f32 %v976_v26, 0.0  ;;  %v982_v45 = vmax.f32 %v966_v34, 0.0  ;;  %v977_v46 = vadd.f32 %v1783_v44, %v954_v41 }
 0x14f   :  { %v967_v3 = vadd.f32 %v1783_v44, %v944_v42  ;;  %v952_v47 = vld [vmem:[%s1968_s3 + $0x68] sm:$0xff]  ;;  %1000 = vst.msk [vmem:[%s1968_s3 + $0x30] sm:$0xff] %vm19_vm0, %v984_v36  ;;  %v990_v48 = vmax.f32 %v974_v37, 0.0  ;;  %v985_v51 = vmax.f32 %v969_v38, 0.0 }
 0x150   :  { %v975_v52 = vadd.f32 %v1783_v44, %v952_v47  ;;  %1008 = vst.msk [vmem:[%s1968_s3 + $0x70] sm:$0xff] %vm19_vm0, %v992_v43  ;;  %998 = vst.msk [vmem:[%s1968_s3 + $0x20] sm:$0xff] %vm19_vm0, %v982_v45  ;;  %v993_v55 = vmax.f32 %v977_v46, 0.0 }
 0x151   :  { %v983_v56 = vmax.f32 %v967_v3, 0.0  ;;  %1006 = vst.msk [vmem:[%s1968_s3 + $0x60] sm:$0xff] %vm19_vm0, %v990_v48  ;;  %1001 = vst.msk [vmem:[%s1968_s3 + $0x38] sm:$0xff] %vm19_vm0, %v985_v51 }
 0x152   :  { %v991_v44 = vmax.f32 %v975_v52, 0.0  ;;  %1009 = vst.msk [vmem:[%s1968_s3 + $0x78] sm:$0xff] %vm19_vm0, %v993_v55 }
 0x153   :  { %999 = vst.msk [vmem:[%s1968_s3 + $0x28] sm:$0xff] %vm19_vm0, %v983_v56 }
 0x154   :  { %1007 = vst.msk [vmem:[%s1968_s3 + $0x68] sm:$0xff] %vm19_vm0, %v991_v44 }

// kernel: model_forward.15
= control target key start
LH: loop header
LB: loop body
LE: loop exit
PB: predicated region body
PF: predicated region fallthrough
CT: control target
= control target key end

     0   :  { %vm22_vm0 = vcmask 523264   ;;  %s2054_s1 = inlined_call_operand.vmem [shape: bf16[576,64], index: 1, kind: input, shape index: {}]   ;;  %s2055_s0 = inlined_call_operand.vmem [shape: bf16[128,576], index: 0, kind: input, shape index: {}]   ;;  %s2056_s4 = inlined_call_operand.vmem [shape: f32[128,64], index: 4, kind: output, shape index: {}]   ;;  %s2057_s2 = inlined_call_operand.vmem [shape: f32[1,64], index: 2, kind: input, shape index: {}]   ;;  %s2058_s3 = inlined_call_operand.vmem [shape: f32[128,64], index: 3, kind: input, shape index: {}]  }
   0x1   :  { %v1307_v0 = vld [vmem:[%s2054_s1 + $0x40] sm:$0xff]   ;;  %v1311_v4 = vld [vmem:[%s2054_s1 + $0x48] sm:$0xff]   ;;  %v1315_v8 = vld [vmem:[%s2054_s1 + $0x50] sm:$0xff]  }
   0x2   :  { %v1308_v1 = vld [vmem:[%s2054_s1 + $0xc0] sm:$0xff]   ;;  %1134 = vmatprep.subr.bf16.mxu0 %v1307_v0  ;;  %v1312_v5 = vld [vmem:[%s2054_s1 + $0xc8] sm:$0xff]   ;;  %v1316_v9 = vld [vmem:[%s2054_s1 + $0xd0] sm:$0xff]  }
   0x3   :  { %v1309_v2 = vld [vmem:[%s2054_s1] sm:$0xff]   ;;  %1198 = vmatprep.subr.bf16.mxu1 %v1308_v1  ;;  %v1313_v6 = vld [vmem:[%s2054_s1 + $0x8] sm:$0xff]   ;;  %v1317_v10 = vld [vmem:[%s2054_s1 + $0x10] sm:$0xff]  }
   0x4   :  { %v1310_v3 = vld [vmem:[%s2054_s1 + $0x80] sm:$0xff]   ;;  %1135 = vmatpush3.bf16.msra.mxu0 %v1309_v2  ;;  %v1314_v7 = vld [vmem:[%s2054_s1 + $0x88] sm:$0xff]   ;;  %v1318_v11 = vld [vmem:[%s2054_s1 + $0x90] sm:$0xff]  }
   0x5   :  { %1199 = vmatpush3.bf16.msra.mxu1 %v1310_v3  ;;  %1136 = vmatprep.subr.bf16.mxu0 %v1311_v4  ;;  %v1319_v12 = vld [vmem:[%s2054_s1 + $0x58] sm:$0xff]   ;;  %v1323_v16 = vld [vmem:[%s2054_s1 + $0x60] sm:$0xff]   ;;  %v1327_v20 = vld [vmem:[%s2054_s1 + $0x68] sm:$0xff]  }
   0x6   :  { %1200 = vmatprep.subr.bf16.mxu1 %v1312_v5  ;;  %v1320_v13 = vld [vmem:[%s2054_s1 + $0xd8] sm:$0xff]   ;;  %v1324_v17 = vld [vmem:[%s2054_s1 + $0xe0] sm:$0xff]   ;;  %v1328_v21 = vld [vmem:[%s2054_s1 + $0xe8] sm:$0xff]  }
   0x7   :  { %v1321_v14 = vld [vmem:[%s2054_s1 + $0x18] sm:$0xff]   ;;  %v1325_v18 = vld [vmem:[%s2054_s1 + $0x20] sm:$0xff]   ;;  %v1329_v22 = vld [vmem:[%s2054_s1 + $0x28] sm:$0xff]  }
   0x8   :  { %1137 = vmatpush3.bf16.msra.mxu0 %v1313_v6  ;;  %v1322_v15 = vld [vmem:[%s2054_s1 + $0x98] sm:$0xff]   ;;  %v1326_v19 = vld [vmem:[%s2054_s1 + $0xa0] sm:$0xff]   ;;  %v1330_v23 = vld [vmem:[%s2054_s1 + $0xa8] sm:$0xff]  }
   0x9   :  { %1201 = vmatpush3.bf16.msra.mxu1 %v1314_v7  ;;  %1138 = vmatprep.subr.bf16.mxu0 %v1315_v8  ;;  %v1331_v24 = vld [vmem:[%s2054_s1 + $0x70] sm:$0xff]   ;;  %v1335_v28 = vld [vmem:[%s2054_s1 + $0x78] sm:$0xff]   ;;  %v1344_v35 = vld [vmem:[%s2055_s0 + $0xc] ss:$20 sps:$4 sm:$0xff]  }
   0xa   :  { %1202 = vmatprep.subr.bf16.mxu1 %v1316_v9  ;;  %v1332_v25 = vld [vmem:[%s2054_s1 + $0xf0] sm:$0xff]   ;;  %v1336_v29 = vld [vmem:[%s2054_s1 + $0xf8] sm:$0xff]   ;;  %v1345_v36 = vld [vmem:[%s2054_s1 + $0x100] sm:$0xff]   ;;  %745 = vmatprep.mubr.bf16.mxu1 %v1344_v35 }
   0xb   :  { %v1333_v26 = vld [vmem:[%s2054_s1 + $0x30] sm:$0xff]   ;;  %v1337_v30 = vld [vmem:[%s2054_s1 + $0x38] sm:$0xff]   ;;  %v1346_v37 = vld [vmem:[%s2055_s0 + $0x2c] ss:$20 sps:$4 sm:$0xff]  }
   0xc   :  { %1139 = vmatpush3.bf16.msra.mxu0 %v1317_v10  ;;  %v1334_v27 = vld [vmem:[%s2054_s1 + $0xb0] sm:$0xff]   ;;  %v1338_v31 = vld [vmem:[%s2054_s1 + $0xb8] sm:$0xff]   ;;  %v1358_v42 = vld [vmem:[%s2054_s1 + $0x108] sm:$0xff]  }
   0xd   :  { %1203 = vmatpush3.bf16.msra.mxu1 %v1318_v11  ;;  %1140 = vmatprep.subr.bf16.mxu0 %v1319_v12  ;;  %v1339_v32 = vld [vmem:[%s2055_s0] ss:$20 sps:$4 sm:$0xff]   ;;  %v1341_v33 = vld [vmem:[%s2055_s0 + $0x4] ss:$20 sps:$4 sm:$0xff]   ;;  %v1342_v34 = vld [vmem:[%s2055_s0 + $0x8] ss:$20 sps:$4 sm:$0xff]  }
   0xe   :  { %1204 = vmatprep.subr.bf16.mxu1 %v1320_v13  ;;  %648 = vmatprep.mubr.bf16.mxu0 %v1341_v33  ;;  %v1348_v38 = vld [vmem:[%s2055_s0 + $0x34] ss:$20 sps:$4 sm:$0xff]   ;;  %v1351_v40 = vld [vmem:[%s2055_s0 + $0x30] ss:$20 sps:$4 sm:$0xff]   ;;  %v1357_v45 = vld [vmem:[%s2055_s0 + $0x58] ss:$20 sps:$4 sm:$0xff]  }
   0xf   :  { %v1350_v39 = vld [vmem:[%s2055_s0 + $0x28] ss:$20 sps:$4 sm:$0xff]   ;;  %v1356_v44 = vld [vmem:[%s2055_s0 + $0x50] ss:$20 sps:$4 sm:$0xff]   ;;  %v1363_v50 = vld [vmem:[%s2055_s0 + $0x78] ss:$20 sps:$4 sm:$0xff]  }
  0x10   :  { %1141 = vmatpush3.bf16.msra.mxu0 %v1321_v14  ;;  %v1352_v41 = vld [vmem:[%s2055_s0 + $0x54] ss:$20 sps:$4 sm:$0xff]   ;;  %v1354_v43 = vld [vmem:[%s2055_s0 + $0x5c] ss:$20 sps:$4 sm:$0xff]   ;;  %v1361_v48 = vld [vmem:[%s2055_s0 + $0x84] ss:$20 sps:$4 sm:$0xff]  }
  0x11   :  { %1205 = vmatpush3.bf16.msra.mxu1 %v1322_v15  ;;  %1142 = vmatprep.subr.bf16.mxu0 %v1323_v16  ;;  %v1371_v46 = vld [vmem:[%s2054_s1 + $0x110] sm:$0xff]   ;;  %v1384_v49 = vld [vmem:[%s2054_s1 + $0x118] sm:$0xff]   ;;  %v1367_v53 = vld [vmem:[%s2055_s0 + $0xac] ss:$20 sps:$4 sm:$0xff]   ;;  %v1399_v12 = vmov 0.0  }
  0x12   :  { %1206 = vmatprep.subr.bf16.mxu1 %v1324_v17  ;;  %v1359_v47 = vld [vmem:[%s2055_s0 + $0x7c] ss:$20 sps:$4 sm:$0xff]   ;;  %v1364_v51 = vld [vmem:[%s2055_s0 + $0x80] ss:$20 sps:$4 sm:$0xff]   ;;  %v1365_v52 = vld [vmem:[%s2055_s0 + $0xa4] ss:$20 sps:$4 sm:$0xff]  }
  0x13   :  { %v1369_v54 = vld [vmem:[%s2055_s0 + $0xa0] ss:$20 sps:$4 sm:$0xff]   ;;  %v1370_v55 = vld [vmem:[%s2055_s0 + $0xa8] ss:$20 sps:$4 sm:$0xff]   ;;  %v1377_v59 = vld [vmem:[%s2055_s0 + $0xd0] ss:$20 sps:$4 sm:$0xff]  }
  0x14   :  { %1143 = vmatpush3.bf16.msra.mxu0 %v1325_v18  ;;  %v1372_v56 = vld [vmem:[%s2055_s0 + $0xcc] ss:$20 sps:$4 sm:$0xff]   ;;  %v1374_v57 = vld [vmem:[%s2055_s0 + $0xd4] ss:$20 sps:$4 sm:$0xff]   ;;  %v1380_v61 = vld [vmem:[%s2055_s0 + $0xfc] ss:$20 sps:$4 sm:$0xff]  }
  0x15   :  { %1207 = vmatpush3.bf16.msra.mxu1 %v1326_v19  ;;  %1144 = vmatprep.subr.bf16.mxu0 %v1327_v20  ;;  %v1376_v58 = vld [vmem:[%s2055_s0 + $0xc8] ss:$20 sps:$4 sm:$0xff]   ;;  %v1382_v62 = vld [vmem:[%s2055_s0 + $0xf0] ss:$20 sps:$4 sm:$0xff]   ;;  %v1383_v63 = vld [vmem:[%s2055_s0 + $0xf8] ss:$20 sps:$4 sm:$0xff]  }
  0x16   :  { %1208 = vmatprep.subr.bf16.mxu1 %v1328_v21  ;;  %v1378_v60 = vld [vmem:[%s2055_s0 + $0xf4] ss:$20 sps:$4 sm:$0xff]   ;;  %v1385_v0 = vld [vmem:[%s2055_s0 + $0x11c] ss:$20 sps:$4 sm:$0xff]   ;;  %v1387_v1 = vld [vmem:[%s2055_s0 + $0x124] ss:$20 sps:$4 sm:$0xff]  }
  0x17   :  { %v1389_v2 = vld [vmem:[%s2055_s0 + $0x118] ss:$20 sps:$4 sm:$0xff]   ;;  %v1390_v3 = vld [vmem:[%s2055_s0 + $0x120] ss:$20 sps:$4 sm:$0xff]   ;;  %v1391_v4 = vld [vmem:[%s2055_s0 + $0x10] ss:$20 sps:$4 sm:$0xff]  }
  0x18   :  { %1145 = vmatpush3.bf16.msra.mxu0 %v1329_v22  ;;  %v1392_v5 = vld [vmem:[%s2055_s0 + $0xb0] ss:$20 sps:$4 sm:$0xff]   ;;  %v1393_v6 = vld [vmem:[%s2055_s0 + $0x38] ss:$20 sps:$4 sm:$0xff]   ;;  %v1395_v8 = vld [vmem:[%s2055_s0 + $0x60] ss:$20 sps:$4 sm:$0xff]  }
  0x19   :  { %1209 = vmatpush3.bf16.msra.mxu1 %v1330_v23  ;;  %1146 = vmatprep.subr.bf16.mxu0 %v1331_v24  ;;  %v1394_v7 = vld [vmem:[%s2055_s0 + $0xd8] ss:$20 sps:$4 sm:$0xff]   ;;  %v1396_v9 = vld [vmem:[%s2055_s0 + $0x100] ss:$20 sps:$4 sm:$0xff]   ;;  %v1397_v10 = vld [vmem:[%s2055_s0 + $0x88] ss:$20 sps:$4 sm:$0xff]  }
  0x1a   :  { %1210 = vmatprep.subr.bf16.mxu1 %v1332_v25  ;;  %v1398_v11 = vld [vmem:[%s2055_s0 + $0x128] ss:$20 sps:$4 sm:$0xff]   ;;  %25 = vst.msk [vmem:[%s2056_s4 + $0x10] sm:$0xff] %vm22_vm0, %v1399_v12  ;;  %23 = vst.msk [vmem:[%s2056_s4] sm:$0xff] %vm22_vm0, %v1399_v12 }
  0x1b   :  { %24 = vst.msk [vmem:[%s2056_s4 + $0x8] sm:$0xff] %vm22_vm0, %v1399_v12  ;;  %26 = vst.msk [vmem:[%s2056_s4 + $0x18] sm:$0xff] %vm22_vm0, %v1399_v12 }
  0x1c   :  { %1147 = vmatpush3.bf16.msra.mxu0 %v1333_v26  ;;  %27 = vst.msk [vmem:[%s2056_s4 + $0x20] sm:$0xff] %vm22_vm0, %v1399_v12  ;;  %28 = vst.msk [vmem:[%s2056_s4 + $0x28] sm:$0xff] %vm22_vm0, %v1399_v12 }
  0x1d   :  { %1211 = vmatpush3.bf16.msra.mxu1 %v1334_v27  ;;  %1148 = vmatprep.subr.bf16.mxu0 %v1335_v28  ;;  %29 = vst.msk [vmem:[%s2056_s4 + $0x30] sm:$0xff] %vm22_vm0, %v1399_v12  ;;  %30 = vst.msk [vmem:[%s2056_s4 + $0x38] sm:$0xff] %vm22_vm0, %v1399_v12 }
  0x1e   :  { %1212 = vmatprep.subr.bf16.mxu1 %v1336_v29  ;;  %31 = vst.msk [vmem:[%s2056_s4 + $0x40] sm:$0xff] %vm22_vm0, %v1399_v12  ;;  %32 = vst.msk [vmem:[%s2056_s4 + $0x48] sm:$0xff] %vm22_vm0, %v1399_v12 }
  0x1f   :  { %33 = vst.msk [vmem:[%s2056_s4 + $0x50] sm:$0xff] %vm22_vm0, %v1399_v12  ;;  %34 = vst.msk [vmem:[%s2056_s4 + $0x58] sm:$0xff] %vm22_vm0, %v1399_v12 }
  0x20   :  { %1149 = vmatpush3.bf16.msra.mxu0 %v1337_v30  ;;  %35 = vst.msk [vmem:[%s2056_s4 + $0x60] sm:$0xff] %vm22_vm0, %v1399_v12  ;;  %36 = vst.msk [vmem:[%s2056_s4 + $0x68] sm:$0xff] %vm22_vm0, %v1399_v12 }
  0x21   :  { %1213 = vmatpush3.bf16.msra.mxu1 %v1338_v31  ;;  %1274 = vmatprep.subr.bf16.mxu0 %v1345_v36  ;;  %37 = vst.msk [vmem:[%s2056_s4 + $0x70] sm:$0xff] %vm22_vm0, %v1399_v12  ;;  %38 = vst.msk [vmem:[%s2056_s4 + $0x78] sm:$0xff] %vm22_vm0, %v1399_v12 }
  0x22   :  { %1298 = vmatprep.subr.bf16.mxu1 %v1345_v36 }
  0x23   :  { %649 = vmatmul.mubr.bf16.vlgmr.msra.gmra.mrb[0].mxu0 %v1339_v32 }
  0x24   :  { %746 = vmatmul.mubr.bf16.vlgmr.msra.gmra.mrb[0].mxu1 %v1342_v34  ;;  %1275 = vmatpush3.bf16.msra.mxu0 %v1345_v36 }
  0x25   :  { %1302 = vmatpush3.bf16.msra.mxu1 %v1345_v36  ;;  %656 = vmatprep.mubr.bf16.mxu0 %v1346_v37 }
  0x26   :  { %753 = vmatprep.mubr.bf16.mxu1 %v1348_v38  ;;  %1276 = vmatprep.subr.bf16.mxu0 %v1358_v42 }
  0x27   :  { %1299 = vmatprep.subr.bf16.mxu1 %v1358_v42 }
  0x28   :  { %1277 = vmatpush3.bf16.msra.mxu0 %v1358_v42 }
  0x29   :  { %1303 = vmatpush3.bf16.msra.mxu1 %v1358_v42  ;;  %1278 = vmatprep.subr.bf16.mxu0 %v1371_v46 }
  0x2a   :  { %1300 = vmatprep.subr.bf16.mxu1 %v1371_v46 }
  0x2b   :  { %657 = vmatmul.mubr.bf16.gmra.mrb[4].mxu0 %v1350_v39 }
  0x2c   :  { %754 = vmatmul.mubr.bf16.gmra.mrb[4].mxu1 %v1351_v40  ;;  %664 = vmatprep.mubr.bf16.mxu0 %v1352_v41 }
  0x2d   :  { %761 = vmatprep.mubr.bf16.mxu1 %v1354_v43  ;;  %1279 = vmatpush3.bf16.msra.mxu0 %v1371_v46 }
  0x2e   :  { %1304 = vmatpush3.bf16.msra.mxu1 %v1371_v46  ;;  %1280 = vmatprep.subr.bf16.mxu0 %v1384_v49 }
  0x2f   :  { %1301 = vmatprep.subr.bf16.mxu1 %v1384_v49 }
  0x31   :  { %1281 = vmatpush3.bf16.msra.mxu0 %v1384_v49 }
  0x32   :  { %1305 = vmatpush3.bf16.msra.mxu1 %v1384_v49 }
  0x33   :  { %665 = vmatmul.mubr.bf16.gmra.mrb[8].mxu0 %v1356_v44 }
  0x34   :  { %762 = vmatmul.mubr.bf16.gmra.mrb[8].mxu1 %v1357_v45  ;;  %672 = vmatprep.mubr.bf16.mxu0 %v1359_v47 }
  0x35   :  { %769 = vmatprep.mubr.bf16.mxu1 %v1361_v48 }
  0x3b   :  { %673 = vmatmul.mubr.bf16.gmra.mrb[12].mxu0 %v1363_v50 }
  0x3c   :  { %770 = vmatmul.mubr.bf16.gmra.mrb[12].mxu1 %v1364_v51  ;;  %680 = vmatprep.mubr.bf16.mxu0 %v1365_v52 }
  0x3d   :  { %777 = vmatprep.mubr.bf16.mxu1 %v1367_v53 }
  0x43   :  { %681 = vmatmul.mubr.bf16.gmra.mrb[16].mxu0 %v1369_v54 }
  0x44   :  { %778 = vmatmul.mubr.bf16.gmra.mrb[16].mxu1 %v1370_v55  ;;  %688 = vmatprep.mubr.bf16.mxu0 %v1372_v56 }
  0x45   :  { %785 = vmatprep.mubr.bf16.mxu1 %v1374_v57 }
  0x4b   :  { %689 = vmatmul.mubr.bf16.gmra.mrb[20].mxu0 %v1376_v58 }
  0x4c   :  { %786 = vmatmul.mubr.bf16.gmra.mrb[20].mxu1 %v1377_v59  ;;  %696 = vmatprep.mubr.bf16.mxu0 %v1378_v60 }
  0x4d   :  { %793 = vmatprep.mubr.bf16.mxu1 %v1380_v61 }
  0x53   :  { %697 = vmatmul.mubr.bf16.gmra.mrb[24].mxu0 %v1382_v62 }
  0x54   :  { %794 = vmatmul.mubr.bf16.gmra.mrb[24].mxu1 %v1383_v63  ;;  %704 = vmatprep.mubr.bf16.mxu0 %v1385_v0 }
  0x55   :  { %801 = vmatprep.mubr.bf16.mxu1 %v1387_v1 }
  0x5b   :  { %705 = vmatmul.mubr.bf16.gmra.mrb[28].mxu0 %v1389_v2 }
  0x5c   :  { %802 = vmatmul.mubr.bf16.gmra.mrb[28].mxu1 %v1390_v3  ;;  %1282 = vmatprep.mubr.msk.bf16.mxu0 %vm22_vm0, %v1391_v4 }
  0x5d   :  { %1290 = vmatprep.mubr.msk.bf16.mxu1 %vm22_vm0, %v1392_v5 }
  0x63   :  { %1283 = vmatmul.mubr.msk.bf16.vlgmr.msra.gmra.mrb[32].mxu0 %vm22_vm0, %v1393_v6 }
  0x64   :  { %1291 = vmatmul.mubr.msk.bf16.vlgmr.msra.gmra.mrb[32].mxu1 %vm22_vm0, %v1394_v7  ;;  %1286 = vmatprep.mubr.msk.bf16.mxu0 %vm22_vm0, %v1395_v8 }
  0x65   :  { %1294 = vmatprep.mubr.msk.bf16.mxu1 %vm22_vm0, %v1396_v9 }
  0x6b   :  { %1287 = vmatmul.mubr.msk.bf16.gmra.mrb[36].mxu0 %vm22_vm0, %v1397_v10 }
  0x6c   :  { %1295 = vmatmul.mubr.msk.bf16.gmra.mrb[36].mxu1 %vm22_vm0, %v1398_v11 }
  0xf6   :  { %v1150_v13 = vpop.f32.mrb[0].mxu0 }
  0xf7   :  { %v1214_v14 = vpop.f32.mrb[0].mxu1  ;;  %v1151_v15 = vpop.f32.mrb[1].mxu0 }
  0xf8   :  { %v1152_v16 = vadd.f32 %v1151_v15, %v1150_v13  ;;  %v1215_v17 = vpop.f32.mrb[1].mxu1  ;;  %v1153_v18 = vpop.f32.mrb[2].mxu0 }
  0xf9   :  { %v1216_v19 = vadd.f32 %v1215_v17, %v1214_v14  ;;  %v1217_v20 = vpop.f32.mrb[2].mxu1  ;;  %v1154_v21 = vpop.f32.mrb[3].mxu0 }
  0xfa   :  { %v1155_v22 = vadd.f32 %v1154_v21, %v1153_v18  ;;  %v1218_v23 = vpop.f32.mrb[3].mxu1 }
  0xfb   :  { %v1219_v24 = vadd.f32 %v1218_v23, %v1217_v20  ;;  %v1725_v25 = vadd.f32 %v1216_v19, %v1152_v16 }
  0xfd   :  { %v1727_v26 = vadd.f32 %v1219_v24, %v1155_v22 }
  0xfe   :  { %v1156_v27 = vpop.f32.mrb[4].mxu0 }
  0xff   :  { %v1220_v28 = vpop.f32.mrb[4].mxu1  ;;  %v1157_v29 = vpop.f32.mrb[5].mxu0 }
 0x100   :  { %v1158_v30 = vadd.f32 %v1157_v29, %v1156_v27  ;;  %v1221_v31 = vpop.f32.mrb[5].mxu1  ;;  %v1159_v32 = vpop.f32.mrb[6].mxu0 }
 0x101   :  { %v1222_v33 = vadd.f32 %v1221_v31, %v1220_v28  ;;  %v1223_v34 = vpop.f32.mrb[6].mxu1  ;;  %v1160_v35 = vpop.f32.mrb[7].mxu0 }
 0x102   :  { %v1161_v36 = vadd.f32 %v1160_v35, %v1159_v32  ;;  %v1224_v37 = vpop.f32.mrb[7].mxu1 }
 0x103   :  { %v1225_v38 = vadd.f32 %v1224_v37, %v1223_v34  ;;  %v1729_v39 = vadd.f32 %v1222_v33, %v1158_v30 }
 0x105   :  { %v1731_v40 = vadd.f32 %v1225_v38, %v1161_v36 }
 0x106   :  { %v1162_v41 = vpop.f32.mrb[8].mxu0 }
 0x107   :  { %v1226_v42 = vpop.f32.mrb[8].mxu1  ;;  %v1163_v43 = vpop.f32.mrb[9].mxu0 }
 0x108   :  { %v1164_v44 = vadd.f32 %v1163_v43, %v1162_v41  ;;  %v1227_v45 = vpop.f32.mrb[9].mxu1  ;;  %v1165_v46 = vpop.f32.mrb[10].mxu0 }
 0x109   :  { %v1228_v47 = vadd.f32 %v1227_v45, %v1226_v42  ;;  %v1229_v48 = vpop.f32.mrb[10].mxu1  ;;  %v1166_v49 = vpop.f32.mrb[11].mxu0 }
 0x10a   :  { %v1167_v50 = vadd.f32 %v1166_v49, %v1165_v46  ;;  %v1230_v51 = vpop.f32.mrb[11].mxu1 }
 0x10b   :  { %v1231_v52 = vadd.f32 %v1230_v51, %v1229_v48  ;;  %v1733_v53 = vadd.f32 %v1228_v47, %v1164_v44 }
 0x10d   :  { %v1735_v54 = vadd.f32 %v1231_v52, %v1167_v50 }
 0x10e   :  { %v1168_v55 = vpop.f32.mrb[12].mxu0 }
 0x10f   :  { %v1232_v56 = vpop.f32.mrb[12].mxu1  ;;  %v1169_v57 = vpop.f32.mrb[13].mxu0 }
 0x110   :  { %v1170_v58 = vadd.f32 %v1169_v57, %v1168_v55  ;;  %v1233_v59 = vpop.f32.mrb[13].mxu1  ;;  %v1171_v60 = vpop.f32.mrb[14].mxu0 }
 0x111   :  { %v1234_v61 = vadd.f32 %v1233_v59, %v1232_v56  ;;  %v1235_v62 = vpop.f32.mrb[14].mxu1  ;;  %v1172_v63 = vpop.f32.mrb[15].mxu0 }
 0x112   :  { %v1173_v0 = vadd.f32 %v1172_v63, %v1171_v60  ;;  %v1236_v1 = vpop.f32.mrb[15].mxu1 }
 0x113   :  { %v1237_v2 = vadd.f32 %v1236_v1, %v1235_v62  ;;  %v1737_v3 = vadd.f32 %v1234_v61, %v1170_v58 }
 0x115   :  { %v1739_v4 = vadd.f32 %v1237_v2, %v1173_v0 }
 0x116   :  { %v1174_v5 = vpop.f32.mrb[16].mxu0 }
 0x117   :  { %v1238_v6 = vpop.f32.mrb[16].mxu1  ;;  %v1175_v7 = vpop.f32.mrb[17].mxu0 }
 0x118   :  { %v1176_v8 = vadd.f32 %v1175_v7, %v1174_v5  ;;  %v1239_v9 = vpop.f32.mrb[17].mxu1  ;;  %v1177_v10 = vpop.f32.mrb[18].mxu0  ;;  %v41_v5 = vld [vmem:[%s2056_s4 + $0x10] sm:$0xff] }
 0x119   :  { %v1240_v11 = vadd.f32 %v1239_v9, %v1238_v6  ;;  %v1241_v12 = vpop.f32.mrb[18].mxu1  ;;  %v1178_v13 = vpop.f32.mrb[19].mxu0 }
 0x11a   :  { %v1179_v14 = vadd.f32 %v1178_v13, %v1177_v10  ;;  %v1242_v15 = vpop.f32.mrb[19].mxu1  ;;  %v39_v10 = vld [vmem:[%s2056_s4] sm:$0xff] }
 0x11b   :  { %v1243_v16 = vadd.f32 %v1242_v15, %v1241_v12  ;;  %v780_v17 = vadd.f32 %v1240_v11, %v1176_v8  ;;  %v49_v8 = vld [vmem:[%s2056_s4 + $0x50] sm:$0xff] }
 0x11d   :  { %v1741_v18 = vadd.f32 %v1243_v16, %v1179_v14  ;;  %v47_v14 = vld [vmem:[%s2056_s4 + $0x40] sm:$0xff] }
 0x11e   :  { %v1180_v19 = vpop.f32.mrb[20].mxu0 }
 0x11f   :  { %v1244_v20 = vpop.f32.mrb[20].mxu1  ;;  %v1181_v21 = vpop.f32.mrb[21].mxu0 }
 0x120   :  { %v1182_v22 = vadd.f32 %v1181_v21, %v1180_v19  ;;  %v1245_v23 = vpop.f32.mrb[21].mxu1  ;;  %v1183_v24 = vpop.f32.mrb[22].mxu0 }
 0x121   :  { %v1246_v27 = vadd.f32 %v1245_v23, %v1244_v20  ;;  %v1247_v28 = vpop.f32.mrb[22].mxu1  ;;  %v1184_v29 = vpop.f32.mrb[23].mxu0 }
 0x122   :  { %v1185_v30 = vadd.f32 %v1184_v29, %v1183_v24  ;;  %v1248_v31 = vpop.f32.mrb[23].mxu1 }
 0x123   :  { %v1249_v32 = vadd.f32 %v1248_v31, %v1247_v28  ;;  %v788_v33 = vadd.f32 %v1246_v27, %v1182_v22  ;;  %v50_v22 = vld [vmem:[%s2056_s4 + $0x58] sm:$0xff] }
 0x125   :  { %v791_v34 = vadd.f32 %v1249_v32, %v1185_v30 }
 0x126   :  { %v1186_v35 = vpop.f32.mrb[24].mxu0 }
 0x127   :  { %v1250_v36 = vpop.f32.mrb[24].mxu1  ;;  %v1187_v37 = vpop.f32.mrb[25].mxu0 }
 0x128   :  { %v1188_v38 = vadd.f32 %v1187_v37, %v1186_v35  ;;  %v1251_v41 = vpop.f32.mrb[25].mxu1  ;;  %v1189_v42 = vpop.f32.mrb[26].mxu0  ;;  %v45_v35 = vld [vmem:[%s2056_s4 + $0x30] sm:$0xff] }
 0x129   :  { %v1252_v43 = vadd.f32 %v1251_v41, %v1250_v36  ;;  %v1253_v44 = vpop.f32.mrb[26].mxu1  ;;  %v1190_v45 = vpop.f32.mrb[27].mxu0  ;;  %v53_v37 = vld [vmem:[%s2056_s4 + $0x70] sm:$0xff] }
 0x12a   :  { %v1191_v46 = vadd.f32 %v1190_v45, %v1189_v42  ;;  %v1254_v47 = vpop.f32.mrb[27].mxu1  ;;  %v51_v45 = vld [vmem:[%s2056_s4 + $0x60] sm:$0xff] }
 0x12b   :  { %v1255_v48 = vadd.f32 %v1254_v47, %v1253_v44  ;;  %v1743_v49 = vadd.f32 %v1252_v43, %v1188_v38  ;;  %v1815_v38 = vld [vmem:[%s2057_s2] ss:$0 sm:$0xff] }
 0x12c   :  { %v43_v43 = vld [vmem:[%s2056_s4 + $0x20] sm:$0xff] }
 0x12d   :  { %v1745_v50 = vadd.f32 %v1255_v48, %v1191_v46  ;;  %v983_v46 = vld [vmem:[%s2058_s3 + $0x10] sm:$0xff] }
 0x12e   :  { %v1192_v51 = vpop.f32.mrb[28].mxu0 }
 0x12f   :  { %v1256_v52 = vpop.f32.mrb[28].mxu1  ;;  %v1193_v55 = vpop.f32.mrb[29].mxu0 }
 0x130   :  { %v1194_v56 = vadd.f32 %v1193_v55, %v1192_v51  ;;  %v1257_v57 = vpop.f32.mrb[29].mxu1  ;;  %v1195_v58 = vpop.f32.mrb[30].mxu0  ;;  %v54_v55 = vld [vmem:[%s2056_s4 + $0x78] sm:$0xff] }
 0x131   :  { %v1258_v59 = vadd.f32 %v1257_v57, %v1256_v52  ;;  %v1259_v60 = vpop.f32.mrb[30].mxu1  ;;  %v1196_v61 = vpop.f32.mrb[31].mxu0 }
 0x132   :  { %v1197_v62 = vadd.f32 %v1196_v61, %v1195_v58  ;;  %v1260_v63 = vpop.f32.mrb[31].mxu1 }
 0x133   :  { %v1261_v0 = vadd.f32 %v1260_v63, %v1259_v60  ;;  %v804_v1 = vadd.f32 %v1258_v59, %v1194_v56  ;;  %v991_v56 = vld [vmem:[%s2058_s3 + $0x50] sm:$0xff]  ;;  %v44_v60 = vld [vmem:[%s2056_s4 + $0x28] sm:$0xff] }
 0x135   :  { %v1747_v2 = vadd.f32 %v1261_v0, %v1197_v62  ;;  %v52_v62 = vld [vmem:[%s2056_s4 + $0x68] sm:$0xff] }
 0x136   :  { %v1284_v6 = vpop.f32.mrb[32].mxu0 }
 0x137   :  { %v853_v7 = vadd.f32 %v1284_v6, %v1729_v39  ;;  %v1292_v9 = vpop.f32.mrb[32].mxu1  ;;  %v844_v11 = vpop.f32.mrb[33].mxu0  ;;  %v42_v39 = vld [vmem:[%s2056_s4 + $0x18] sm:$0xff] }
 0x138   :  { %v885_v12 = vadd.f32 %v1292_v9, %v788_v33  ;;  %v845_v13 = vadd.f32 %v844_v11, %v1725_v25  ;;  %v876_v15 = vpop.f32.mrb[33].mxu1  ;;  %v1285_v16 = vpop.f32.mrb[34].mxu0  ;;  %v40_v25 = vld [vmem:[%s2056_s4 + $0x8] sm:$0xff]  ;;  %v984_v11 = vld [vmem:[%s2058_s3 + $0x18] sm:$0xff] }
 0x139   :  { %v909_v19 = vadd.f32 %v853_v7, %v41_v5  ;;  %v877_v20 = vadd.f32 %v876_v15, %v780_v17  ;;  %v856_v21 = vadd.f32 %v1285_v16, %v1731_v40  ;;  %v1293_v23 = vpop.f32.mrb[34].mxu1  ;;  %v847_v24 = vpop.f32.mrb[35].mxu0  ;;  %v48_v17 = vld [vmem:[%s2056_s4 + $0x48] sm:$0xff]  ;;  %v992_v16 = vld [vmem:[%s2058_s3 + $0x58] sm:$0xff] }
 0x13a   :  { %v917_v27 = vadd.f32 %v885_v12, %v49_v8  ;;  %v907_v28 = vadd.f32 %v845_v13, %v39_v10  ;;  %v888_v29 = vadd.f32 %v1293_v23, %v791_v34  ;;  %v848_v30 = vadd.f32 %v847_v24, %v1727_v26  ;;  %v879_v40 = vpop.f32.mrb[35].mxu1  ;;  %v982_v24 = vld [vmem:[%s2058_s3 + $0x8] sm:$0xff] }
 0x13b   :  { %925 = vst.msk [vmem:[%s2056_s4 + $0x10] sm:$0xff] %vm22_vm0, %v909_v19  ;;  %v915_v31 = vadd.f32 %v877_v20, %v47_v14  ;;  %v910_v32 = vadd.f32 %v856_v21, %v42_v39  ;;  %v880_v33 = vadd.f32 %v879_v40, %v1741_v18 }
 0x13c   :  { %933 = vst.msk [vmem:[%s2056_s4 + $0x50] sm:$0xff] %vm22_vm0, %v917_v27  ;;  %923 = vst.msk [vmem:[%s2056_s4] sm:$0xff] %vm22_vm0, %v907_v28  ;;  %v918_v26 = vadd.f32 %v888_v29, %v50_v22  ;;  %v908_v34 = vadd.f32 %v848_v30, %v40_v25 }
 0x13d   :  { %931 = vst.msk [vmem:[%s2056_s4 + $0x40] sm:$0xff] %vm22_vm0, %v915_v31  ;;  %926 = vst.msk [vmem:[%s2056_s4 + $0x18] sm:$0xff] %vm22_vm0, %v910_v32  ;;  %v916_v18 = vadd.f32 %v880_v33, %v48_v17  ;;  %v990_v31 = vld [vmem:[%s2058_s3 + $0x48] sm:$0xff] }
 0x13e   :  { %934 = vst.msk [vmem:[%s2056_s4 + $0x58] sm:$0xff] %vm22_vm0, %v918_v26  ;;  %924 = vst.msk [vmem:[%s2056_s4 + $0x8] sm:$0xff] %vm22_vm0, %v908_v34  ;;  %v1288_v36 = vpop.f32.mrb[36].mxu0 }
 0x13f   :  { %932 = vst.msk [vmem:[%s2056_s4 + $0x48] sm:$0xff] %vm22_vm0, %v916_v18  ;;  %v869_v41 = vadd.f32 %v1288_v36, %v1737_v3  ;;  %v1296_v42 = vpop.f32.mrb[36].mxu1  ;;  %v860_v44 = vpop.f32.mrb[37].mxu0  ;;  %v46_v3 = vld [vmem:[%s2056_s4 + $0x38] sm:$0xff] }
 0x140   :  { %v901_v47 = vadd.f32 %v1296_v42, %v804_v1  ;;  %v861_v48 = vadd.f32 %v860_v44, %v1733_v53  ;;  %v892_v51 = vpop.f32.mrb[37].mxu1  ;;  %v1289_v52 = vpop.f32.mrb[38].mxu0  ;;  %v987_v44 = vld [vmem:[%s2058_s3 + $0x30] sm:$0xff] }
 0x141   :  { %v913_v57 = vadd.f32 %v869_v41, %v45_v35  ;;  %v893_v58 = vadd.f32 %v892_v51, %v1743_v49  ;;  %v872_v59 = vadd.f32 %v1289_v52, %v1739_v4  ;;  %v1297_v53 = vpop.f32.mrb[38].mxu1  ;;  %v863_v61 = vpop.f32.mrb[39].mxu0  ;;  %v981_v49 = vld [vmem:[%s2058_s3] sm:$0xff] }
 0x142   :  { %v944_v63 = vld [vmem:[%s2056_s4 + $0x10] sm:$0xff]  ;;  %v989_v4 = vld [vmem:[%s2058_s3 + $0x40] sm:$0xff]  ;;  %v921_v0 = vadd.f32 %v901_v47, %v53_v37  ;;  %v911_v1 = vadd.f32 %v861_v48, %v43_v43  ;;  %v904_v5 = vadd.f32 %v1297_v53, %v1747_v2  ;;  %v864_v6 = vadd.f32 %v863_v61, %v1735_v54  ;;  %v895_v7 = vpop.f32.mrb[39].mxu1 }
 0x143   :  { %v967_v8 = vadd.f32 %v1815_v38, %v944_v63  ;;  %v952_v9 = vld [vmem:[%s2056_s4 + $0x50] sm:$0xff]  ;;  %v942_v10 = vld [vmem:[%s2056_s4] sm:$0xff]  ;;  %929 = vst.msk [vmem:[%s2056_s4 + $0x30] sm:$0xff] %vm22_vm0, %v913_v57  ;;  %v919_v54 = vadd.f32 %v893_v58, %v51_v45  ;;  %v914_v2 = vadd.f32 %v872_v59, %v46_v3  ;;  %v896_v12 = vadd.f32 %v895_v7, %v1745_v50  ;;  %v988_v58 = vld [vmem:[%s2058_s3 + $0x38] sm:$0xff] }
 0x144   :  { %v975_v13 = vadd.f32 %v1815_v38, %v952_v9  ;;  %v965_v14 = vadd.f32 %v1815_v38, %v942_v10  ;;  %v950_v15 = vld [vmem:[%s2056_s4 + $0x40] sm:$0xff]  ;;  %v945_v39 = vld [vmem:[%s2056_s4 + $0x18] sm:$0xff]  ;;  %937 = vst.msk [vmem:[%s2056_s4 + $0x70] sm:$0xff] %vm22_vm0, %v921_v0  ;;  %927 = vst.msk [vmem:[%s2056_s4 + $0x20] sm:$0xff] %vm22_vm0, %v911_v1  ;;  %v922_v50 = vadd.f32 %v904_v5, %v54_v55 }
 0x145   :  { %v912_v19 = vadd.f32 %v864_v6, %v44_v60  ;;  %v999_v20 = vadd.f32 %v983_v46, %v967_v8  ;;  %v973_v21 = vadd.f32 %v1815_v38, %v950_v15  ;;  %v968_v22 = vadd.f32 %v1815_v38, %v945_v39  ;;  %v953_v23 = vld [vmem:[%s2056_s4 + $0x58] sm:$0xff]  ;;  %v943_v25 = vld [vmem:[%s2056_s4 + $0x8] sm:$0xff]  ;;  %935 = vst.msk [vmem:[%s2056_s4 + $0x60] sm:$0xff] %vm22_vm0, %v919_v54  ;;  %v995_v45 = vld [vmem:[%s2058_s3 + $0x70] sm:$0xff] }
 0x146   :  { %930 = vst.msk [vmem:[%s2056_s4 + $0x38] sm:$0xff] %vm22_vm0, %v914_v2  ;;  %v920_v27 = vadd.f32 %v896_v12, %v52_v62  ;;  %v1007_v28 = vadd.f32 %v991_v56, %v975_v13  ;;  %v997_v29 = vadd.f32 %v981_v49, %v965_v14  ;;  %v976_v30 = vadd.f32 %v1815_v38, %v953_v23  ;;  %v951_v40 = vld [vmem:[%s2056_s4 + $0x48] sm:$0xff]  ;;  %v985_v51 = vld [vmem:[%s2058_s3 + $0x20] sm:$0xff]  ;;  %v996_v62 = vld [vmem:[%s2058_s3 + $0x78] sm:$0xff] }
 0x147   :  { %v966_v17 = vadd.f32 %v1815_v38, %v943_v25  ;;  %938 = vst.msk [vmem:[%s2056_s4 + $0x78] sm:$0xff] %vm22_vm0, %v922_v50  ;;  %928 = vst.msk [vmem:[%s2056_s4 + $0x28] sm:$0xff] %vm22_vm0, %v912_v19  ;;  %v1015_v32 = vmax.f32 %v999_v20, 0.0  ;;  %v1005_v33 = vadd.f32 %v989_v4, %v973_v21  ;;  %v1000_v26 = vadd.f32 %v984_v11, %v968_v22  ;;  %v993_v3 = vld [vmem:[%s2058_s3 + $0x60] sm:$0xff]  ;;  %v986_v5 = vld [vmem:[%s2058_s3 + $0x28] sm:$0xff] }
 0x148   :  { %v974_v34 = vadd.f32 %v1815_v38, %v951_v40  ;;  %936 = vst.msk [vmem:[%s2056_s4 + $0x68] sm:$0xff] %vm22_vm0, %v920_v27  ;;  %v1023_v18 = vmax.f32 %v1007_v28, 0.0  ;;  %v1013_v35 = vmax.f32 %v997_v29, 0.0  ;;  %v1008_v36 = vadd.f32 %v992_v16, %v976_v30  ;;  %v994_v11 = vld [vmem:[%s2058_s3 + $0x68] sm:$0xff] }
 0x149   :  { %v998_v37 = vadd.f32 %v982_v24, %v966_v17  ;;  %1031 = vst.msk [vmem:[%s2056_s4 + $0x10] sm:$0xff] %vm22_vm0, %v1015_v32  ;;  %v1021_v41 = vmax.f32 %v1005_v33, 0.0  ;;  %v1016_v42 = vmax.f32 %v1000_v26, 0.0 }
 0x14a   :  { %v1006_v43 = vadd.f32 %v990_v31, %v974_v34  ;;  %1039 = vst.msk [vmem:[%s2056_s4 + $0x50] sm:$0xff] %vm22_vm0, %v1023_v18  ;;  %1029 = vst.msk [vmem:[%s2056_s4] sm:$0xff] %vm22_vm0, %v1013_v35  ;;  %v1024_v46 = vmax.f32 %v1008_v36, 0.0  ;;  %v948_v48 = vld [vmem:[%s2056_s4 + $0x30] sm:$0xff] }
 0x14b   :  { %v1014_v47 = vmax.f32 %v998_v37, 0.0  ;;  %1037 = vst.msk [vmem:[%s2056_s4 + $0x40] sm:$0xff] %vm22_vm0, %v1021_v41  ;;  %1032 = vst.msk [vmem:[%s2056_s4 + $0x18] sm:$0xff] %vm22_vm0, %v1016_v42  ;;  %v971_v55 = vadd.f32 %v1815_v38, %v948_v48  ;;  %v956_v56 = vld [vmem:[%s2056_s4 + $0x70] sm:$0xff]  ;;  %v946_v57 = vld [vmem:[%s2056_s4 + $0x20] sm:$0xff] }
 0x14c   :  { %v1022_v52 = vmax.f32 %v1006_v43, 0.0  ;;  %1040 = vst.msk [vmem:[%s2056_s4 + $0x58] sm:$0xff] %vm22_vm0, %v1024_v46  ;;  %v979_v59 = vadd.f32 %v1815_v38, %v956_v56  ;;  %v969_v53 = vadd.f32 %v1815_v38, %v946_v57  ;;  %v954_v60 = vld [vmem:[%s2056_s4 + $0x60] sm:$0xff] }
 0x14d   :  { %1030 = vst.msk [vmem:[%s2056_s4 + $0x8] sm:$0xff] %vm22_vm0, %v1014_v47  ;;  %v949_v61 = vld [vmem:[%s2056_s4 + $0x38] sm:$0xff]  ;;  %v1003_v63 = vadd.f32 %v987_v44, %v971_v55  ;;  %v977_v49 = vadd.f32 %v1815_v38, %v954_v60 }
 0x14e   :  { %1038 = vst.msk [vmem:[%s2056_s4 + $0x48] sm:$0xff] %vm22_vm0, %v1022_v52  ;;  %v972_v4 = vadd.f32 %v1815_v38, %v949_v61  ;;  %v957_v0 = vld [vmem:[%s2056_s4 + $0x78] sm:$0xff]  ;;  %v947_v1 = vld [vmem:[%s2056_s4 + $0x28] sm:$0xff]  ;;  %v1011_v6 = vadd.f32 %v995_v45, %v979_v59  ;;  %v1001_v7 = vadd.f32 %v985_v51, %v969_v53 }
 0x14f   :  { %v980_v8 = vadd.f32 %v1815_v38, %v957_v0  ;;  %v970_v9 = vadd.f32 %v1815_v38, %v947_v1  ;;  %v955_v10 = vld [vmem:[%s2056_s4 + $0x68] sm:$0xff]  ;;  %v1019_v54 = vmax.f32 %v1003_v63, 0.0  ;;  %v1009_v2 = vadd.f32 %v993_v3, %v977_v49 }
 0x150   :  { %v1004_v12 = vadd.f32 %v988_v58, %v972_v4  ;;  %v978_v13 = vadd.f32 %v1815_v38, %v955_v10  ;;  %v1027_v14 = vmax.f32 %v1011_v6, 0.0  ;;  %v1017_v15 = vmax.f32 %v1001_v7, 0.0 }
 0x151   :  { %v1012_v39 = vadd.f32 %v996_v62, %v980_v8  ;;  %v1002_v16 = vadd.f32 %v986_v5, %v970_v9  ;;  %1035 = vst.msk [vmem:[%s2056_s4 + $0x30] sm:$0xff] %vm22_vm0, %v1019_v54  ;;  %v1025_v50 = vmax.f32 %v1009_v2, 0.0 }
 0x152   :  { %v1020_v19 = vmax.f32 %v1004_v12, 0.0  ;;  %v1010_v20 = vadd.f32 %v994_v11, %v978_v13  ;;  %1043 = vst.msk [vmem:[%s2056_s4 + $0x70] sm:$0xff] %vm22_vm0, %v1027_v14  ;;  %1033 = vst.msk [vmem:[%s2056_s4 + $0x20] sm:$0xff] %vm22_vm0, %v1017_v15 }
 0x153   :  { %v1028_v38 = vmax.f32 %v1012_v39, 0.0  ;;  %v1018_v21 = vmax.f32 %v1002_v16, 0.0  ;;  %1041 = vst.msk [vmem:[%s2056_s4 + $0x60] sm:$0xff] %vm22_vm0, %v1025_v50 }
 0x154   :  { %1036 = vst.msk [vmem:[%s2056_s4 + $0x38] sm:$0xff] %vm22_vm0, %v1020_v19  ;;  %v1026_v22 = vmax.f32 %v1010_v20, 0.0 }
 0x155   :  { %1044 = vst.msk [vmem:[%s2056_s4 + $0x78] sm:$0xff] %vm22_vm0, %v1028_v38  ;;  %1034 = vst.msk [vmem:[%s2056_s4 + $0x28] sm:$0xff] %vm22_vm0, %v1018_v21 }
 0x156   :  { %1042 = vst.msk [vmem:[%s2056_s4 + $0x68] sm:$0xff] %vm22_vm0, %v1026_v22 }

// kernel: model_forward.17
= control target key start
LH: loop header
LB: loop body
LE: loop exit
PB: predicated region body
PF: predicated region fallthrough
CT: control target
= control target key end

     0   :  { %vm587_vm0 = vcmask 523264   ;;  %s1718_s1 = inlined_call_operand.vmem [shape: bf16[576,128], index: 1, kind: input, shape index: {}]   ;;  %s1719_s0 = inlined_call_operand.vmem [shape: bf16[128,576], index: 0, kind: input, shape index: {}]   ;;  %s1720_s2 = inlined_call_operand.vmem [shape: f32[1,128], index: 2, kind: input, shape index: {}]   ;;  %s1721_s3 = inlined_call_operand.vmem [shape: f32[128,128], index: 3, kind: output, shape index: {}]  }
   0x1   :  { %v1271_v0 = vld [vmem:[%s1718_s1 + $0x40] sm:$0xff]   ;;  %v1275_v4 = vld [vmem:[%s1718_s1 + $0x48] sm:$0xff]   ;;  %v1279_v8 = vld [vmem:[%s1718_s1 + $0x50] sm:$0xff]  }
   0x2   :  { %v1272_v1 = vld [vmem:[%s1718_s1 + $0xc0] sm:$0xff]   ;;  %1098 = vmatprep.subr.bf16.mxu0 %v1271_v0  ;;  %v1276_v5 = vld [vmem:[%s1718_s1 + $0xc8] sm:$0xff]   ;;  %v1280_v9 = vld [vmem:[%s1718_s1 + $0xd0] sm:$0xff]  }
   0x3   :  { %v1273_v2 = vld [vmem:[%s1718_s1] sm:$0xff]   ;;  %1162 = vmatprep.subr.bf16.mxu1 %v1272_v1  ;;  %v1277_v6 = vld [vmem:[%s1718_s1 + $0x8] sm:$0xff]   ;;  %v1281_v10 = vld [vmem:[%s1718_s1 + $0x10] sm:$0xff]  }
   0x4   :  { %v1274_v3 = vld [vmem:[%s1718_s1 + $0x80] sm:$0xff]   ;;  %1099 = vmatpush3.bf16.msra.mxu0 %v1273_v2  ;;  %v1278_v7 = vld [vmem:[%s1718_s1 + $0x88] sm:$0xff]   ;;  %v1282_v11 = vld [vmem:[%s1718_s1 + $0x90] sm:$0xff]  }
   0x5   :  { %1163 = vmatpush3.bf16.msra.mxu1 %v1274_v3  ;;  %1100 = vmatprep.subr.bf16.mxu0 %v1275_v4  ;;  %v1283_v12 = vld [vmem:[%s1718_s1 + $0x58] sm:$0xff]   ;;  %v1287_v16 = vld [vmem:[%s1718_s1 + $0x60] sm:$0xff]   ;;  %v1291_v20 = vld [vmem:[%s1718_s1 + $0x68] sm:$0xff]  }
   0x6   :  { %1164 = vmatprep.subr.bf16.mxu1 %v1276_v5  ;;  %v1284_v13 = vld [vmem:[%s1718_s1 + $0xd8] sm:$0xff]   ;;  %v1288_v17 = vld [vmem:[%s1718_s1 + $0xe0] sm:$0xff]   ;;  %v1292_v21 = vld [vmem:[%s1718_s1 + $0xe8] sm:$0xff]  }
   0x7   :  { %v1285_v14 = vld [vmem:[%s1718_s1 + $0x18] sm:$0xff]   ;;  %v1289_v18 = vld [vmem:[%s1718_s1 + $0x20] sm:$0xff]   ;;  %v1293_v22 = vld [vmem:[%s1718_s1 + $0x28] sm:$0xff]  }
   0x8   :  { %1101 = vmatpush3.bf16.msra.mxu0 %v1277_v6  ;;  %v1286_v15 = vld [vmem:[%s1718_s1 + $0x98] sm:$0xff]   ;;  %v1290_v19 = vld [vmem:[%s1718_s1 + $0xa0] sm:$0xff]   ;;  %v1294_v23 = vld [vmem:[%s1718_s1 + $0xa8] sm:$0xff]  }
   0x9   :  { %1165 = vmatpush3.bf16.msra.mxu1 %v1278_v7  ;;  %1102 = vmatprep.subr.bf16.mxu0 %v1279_v8  ;;  %v1295_v24 = vld [vmem:[%s1718_s1 + $0x70] sm:$0xff]   ;;  %v1299_v28 = vld [vmem:[%s1718_s1 + $0x78] sm:$0xff]   ;;  %v1308_v35 = vld [vmem:[%s1719_s0 + $0xc] ss:$20 sps:$4 sm:$0xff]  }
   0xa   :  { %1166 = vmatprep.subr.bf16.mxu1 %v1280_v9  ;;  %v1296_v25 = vld [vmem:[%s1718_s1 + $0xf0] sm:$0xff]   ;;  %v1300_v29 = vld [vmem:[%s1718_s1 + $0xf8] sm:$0xff]   ;;  %v1309_v36 = vld [vmem:[%s1718_s1 + $0x100] sm:$0xff]   ;;  %741 = vmatprep.mubr.bf16.mxu1 %v1308_v35 }
   0xb   :  { %v1297_v26 = vld [vmem:[%s1718_s1 + $0x30] sm:$0xff]   ;;  %v1301_v30 = vld [vmem:[%s1718_s1 + $0x38] sm:$0xff]   ;;  %v1310_v37 = vld [vmem:[%s1719_s0 + $0x2c] ss:$20 sps:$4 sm:$0xff]  }
   0xc   :  { %1103 = vmatpush3.bf16.msra.mxu0 %v1281_v10  ;;  %v1298_v27 = vld [vmem:[%s1718_s1 + $0xb0] sm:$0xff]   ;;  %v1302_v31 = vld [vmem:[%s1718_s1 + $0xb8] sm:$0xff]   ;;  %v1322_v42 = vld [vmem:[%s1718_s1 + $0x108] sm:$0xff]  }
   0xd   :  { %1167 = vmatpush3.bf16.msra.mxu1 %v1282_v11  ;;  %1104 = vmatprep.subr.bf16.mxu0 %v1283_v12  ;;  %v1303_v32 = vld [vmem:[%s1719_s0] ss:$20 sps:$4 sm:$0xff]   ;;  %v1305_v33 = vld [vmem:[%s1719_s0 + $0x4] ss:$20 sps:$4 sm:$0xff]   ;;  %v1306_v34 = vld [vmem:[%s1719_s0 + $0x8] ss:$20 sps:$4 sm:$0xff]  }
   0xe   :  { %1168 = vmatprep.subr.bf16.mxu1 %v1284_v13  ;;  %644 = vmatprep.mubr.bf16.mxu0 %v1305_v33  ;;  %v1312_v38 = vld [vmem:[%s1719_s0 + $0x34] ss:$20 sps:$4 sm:$0xff]   ;;  %v1315_v40 = vld [vmem:[%s1719_s0 + $0x30] ss:$20 sps:$4 sm:$0xff]   ;;  %v1321_v45 = vld [vmem:[%s1719_s0 + $0x58] ss:$20 sps:$4 sm:$0xff]  }
   0xf   :  { %v1314_v39 = vld [vmem:[%s1719_s0 + $0x28] ss:$20 sps:$4 sm:$0xff]   ;;  %v1320_v44 = vld [vmem:[%s1719_s0 + $0x50] ss:$20 sps:$4 sm:$0xff]   ;;  %v1327_v50 = vld [vmem:[%s1719_s0 + $0x78] ss:$20 sps:$4 sm:$0xff]  }
  0x10   :  { %1105 = vmatpush3.bf16.msra.mxu0 %v1285_v14  ;;  %v1316_v41 = vld [vmem:[%s1719_s0 + $0x54] ss:$20 sps:$4 sm:$0xff]   ;;  %v1318_v43 = vld [vmem:[%s1719_s0 + $0x5c] ss:$20 sps:$4 sm:$0xff]   ;;  %v1325_v48 = vld [vmem:[%s1719_s0 + $0x84] ss:$20 sps:$4 sm:$0xff]  }
  0x11   :  { %1169 = vmatpush3.bf16.msra.mxu1 %v1286_v15  ;;  %1106 = vmatprep.subr.bf16.mxu0 %v1287_v16  ;;  %v1335_v46 = vld [vmem:[%s1718_s1 + $0x110] sm:$0xff]   ;;  %v1348_v49 = vld [vmem:[%s1718_s1 + $0x118] sm:$0xff]   ;;  %v1331_v53 = vld [vmem:[%s1719_s0 + $0xac] ss:$20 sps:$4 sm:$0xff]  }
  0x12   :  { %1170 = vmatprep.subr.bf16.mxu1 %v1288_v17  ;;  %v1323_v47 = vld [vmem:[%s1719_s0 + $0x7c] ss:$20 sps:$4 sm:$0xff]   ;;  %v1328_v51 = vld [vmem:[%s1719_s0 + $0x80] ss:$20 sps:$4 sm:$0xff]   ;;  %v1329_v52 = vld [vmem:[%s1719_s0 + $0xa4] ss:$20 sps:$4 sm:$0xff]  }
  0x13   :  { %v1333_v54 = vld [vmem:[%s1719_s0 + $0xa0] ss:$20 sps:$4 sm:$0xff]   ;;  %v1334_v55 = vld [vmem:[%s1719_s0 + $0xa8] ss:$20 sps:$4 sm:$0xff]   ;;  %v1341_v59 = vld [vmem:[%s1719_s0 + $0xd0] ss:$20 sps:$4 sm:$0xff]  }
  0x14   :  { %1107 = vmatpush3.bf16.msra.mxu0 %v1289_v18  ;;  %v1336_v56 = vld [vmem:[%s1719_s0 + $0xcc] ss:$20 sps:$4 sm:$0xff]   ;;  %v1338_v57 = vld [vmem:[%s1719_s0 + $0xd4] ss:$20 sps:$4 sm:$0xff]   ;;  %v1344_v61 = vld [vmem:[%s1719_s0 + $0xfc] ss:$20 sps:$4 sm:$0xff]  }
  0x15   :  { %1171 = vmatpush3.bf16.msra.mxu1 %v1290_v19  ;;  %1108 = vmatprep.subr.bf16.mxu0 %v1291_v20  ;;  %v1340_v58 = vld [vmem:[%s1719_s0 + $0xc8] ss:$20 sps:$4 sm:$0xff]   ;;  %v1346_v62 = vld [vmem:[%s1719_s0 + $0xf0] ss:$20 sps:$4 sm:$0xff]   ;;  %v1347_v63 = vld [vmem:[%s1719_s0 + $0xf8] ss:$20 sps:$4 sm:$0xff]  }
  0x16   :  { %1172 = vmatprep.subr.bf16.mxu1 %v1292_v21  ;;  %v1342_v60 = vld [vmem:[%s1719_s0 + $0xf4] ss:$20 sps:$4 sm:$0xff]   ;;  %v1349_v0 = vld [vmem:[%s1719_s0 + $0x11c] ss:$20 sps:$4 sm:$0xff]   ;;  %v1351_v1 = vld [vmem:[%s1719_s0 + $0x124] ss:$20 sps:$4 sm:$0xff]  }
  0x17   :  { %v1353_v2 = vld [vmem:[%s1719_s0 + $0x118] ss:$20 sps:$4 sm:$0xff]   ;;  %v1354_v3 = vld [vmem:[%s1719_s0 + $0x120] ss:$20 sps:$4 sm:$0xff]   ;;  %v1355_v4 = vld [vmem:[%s1719_s0 + $0x10] ss:$20 sps:$4 sm:$0xff]  }
  0x18   :  { %1109 = vmatpush3.bf16.msra.mxu0 %v1293_v22  ;;  %v1356_v5 = vld [vmem:[%s1719_s0 + $0xb0] ss:$20 sps:$4 sm:$0xff]   ;;  %v1357_v6 = vld [vmem:[%s1719_s0 + $0x38] ss:$20 sps:$4 sm:$0xff]   ;;  %v1359_v8 = vld [vmem:[%s1719_s0 + $0x60] ss:$20 sps:$4 sm:$0xff]  }
  0x19   :  { %1173 = vmatpush3.bf16.msra.mxu1 %v1294_v23  ;;  %1110 = vmatprep.subr.bf16.mxu0 %v1295_v24  ;;  %v1358_v7 = vld [vmem:[%s1719_s0 + $0xd8] ss:$20 sps:$4 sm:$0xff]   ;;  %v1360_v9 = vld [vmem:[%s1719_s0 + $0x100] ss:$20 sps:$4 sm:$0xff]   ;;  %v1361_v10 = vld [vmem:[%s1719_s0 + $0x88] ss:$20 sps:$4 sm:$0xff]  }
  0x1a   :  { %1174 = vmatprep.subr.bf16.mxu1 %v1296_v25  ;;  %v1362_v11 = vld [vmem:[%s1719_s0 + $0x128] ss:$20 sps:$4 sm:$0xff]  }
  0x1c   :  { %1111 = vmatpush3.bf16.msra.mxu0 %v1297_v26 }
  0x1d   :  { %1175 = vmatpush3.bf16.msra.mxu1 %v1298_v27  ;;  %1112 = vmatprep.subr.bf16.mxu0 %v1299_v28 }
  0x1e   :  { %1176 = vmatprep.subr.bf16.mxu1 %v1300_v29 }
  0x20   :  { %1113 = vmatpush3.bf16.msra.mxu0 %v1301_v30 }
  0x21   :  { %1177 = vmatpush3.bf16.msra.mxu1 %v1302_v31  ;;  %1238 = vmatprep.subr.bf16.mxu0 %v1309_v36 }
  0x22   :  { %1262 = vmatprep.subr.bf16.mxu1 %v1309_v36 }
  0x23   :  { %645 = vmatmul.mubr.bf16.vlgmr.msra.gmra.mrb[0].mxu0 %v1303_v32 }
  0x24   :  { %742 = vmatmul.mubr.bf16.vlgmr.msra.gmra.mrb[0].mxu1 %v1306_v34  ;;  %1239 = vmatpush3.bf16.msra.mxu0 %v1309_v36 }
  0x25   :  { %1266 = vmatpush3.bf16.msra.mxu1 %v1309_v36  ;;  %652 = vmatprep.mubr.bf16.mxu0 %v1310_v37 }
  0x26   :  { %749 = vmatprep.mubr.bf16.mxu1 %v1312_v38  ;;  %1240 = vmatprep.subr.bf16.mxu0 %v1322_v42 }
  0x27   :  { %1263 = vmatprep.subr.bf16.mxu1 %v1322_v42 }
  0x28   :  { %1241 = vmatpush3.bf16.msra.mxu0 %v1322_v42 }
  0x29   :  { %1267 = vmatpush3.bf16.msra.mxu1 %v1322_v42  ;;  %1242 = vmatprep.subr.bf16.mxu0 %v1335_v46 }
  0x2a   :  { %1264 = vmatprep.subr.bf16.mxu1 %v1335_v46 }
  0x2b   :  { %653 = vmatmul.mubr.bf16.gmra.mrb[4].mxu0 %v1314_v39 }
  0x2c   :  { %750 = vmatmul.mubr.bf16.gmra.mrb[4].mxu1 %v1315_v40  ;;  %660 = vmatprep.mubr.bf16.mxu0 %v1316_v41 }
  0x2d   :  { %757 = vmatprep.mubr.bf16.mxu1 %v1318_v43  ;;  %1243 = vmatpush3.bf16.msra.mxu0 %v1335_v46 }
  0x2e   :  { %1268 = vmatpush3.bf16.msra.mxu1 %v1335_v46  ;;  %1244 = vmatprep.subr.bf16.mxu0 %v1348_v49 }
  0x2f   :  { %1265 = vmatprep.subr.bf16.mxu1 %v1348_v49 }
  0x31   :  { %1245 = vmatpush3.bf16.msra.mxu0 %v1348_v49 }
  0x32   :  { %1269 = vmatpush3.bf16.msra.mxu1 %v1348_v49 }
  0x33   :  { %661 = vmatmul.mubr.bf16.gmra.mrb[8].mxu0 %v1320_v44 }
  0x34   :  { %758 = vmatmul.mubr.bf16.gmra.mrb[8].mxu1 %v1321_v45  ;;  %668 = vmatprep.mubr.bf16.mxu0 %v1323_v47 }
  0x35   :  { %765 = vmatprep.mubr.bf16.mxu1 %v1325_v48 }
  0x3b   :  { %669 = vmatmul.mubr.bf16.gmra.mrb[12].mxu0 %v1327_v50 }
  0x3c   :  { %766 = vmatmul.mubr.bf16.gmra.mrb[12].mxu1 %v1328_v51  ;;  %676 = vmatprep.mubr.bf16.mxu0 %v1329_v52 }
  0x3d   :  { %773 = vmatprep.mubr.bf16.mxu1 %v1331_v53 }
  0x43   :  { %677 = vmatmul.mubr.bf16.gmra.mrb[16].mxu0 %v1333_v54 }
  0x44   :  { %774 = vmatmul.mubr.bf16.gmra.mrb[16].mxu1 %v1334_v55  ;;  %684 = vmatprep.mubr.bf16.mxu0 %v1336_v56 }
  0x45   :  { %781 = vmatprep.mubr.bf16.mxu1 %v1338_v57 }
  0x4b   :  { %685 = vmatmul.mubr.bf16.gmra.mrb[20].mxu0 %v1340_v58 }
  0x4c   :  { %782 = vmatmul.mubr.bf16.gmra.mrb[20].mxu1 %v1341_v59  ;;  %692 = vmatprep.mubr.bf16.mxu0 %v1342_v60 }
  0x4d   :  { %789 = vmatprep.mubr.bf16.mxu1 %v1344_v61 }
  0x53   :  { %693 = vmatmul.mubr.bf16.gmra.mrb[24].mxu0 %v1346_v62 }
  0x54   :  { %790 = vmatmul.mubr.bf16.gmra.mrb[24].mxu1 %v1347_v63  ;;  %700 = vmatprep.mubr.bf16.mxu0 %v1349_v0 }
  0x55   :  { %797 = vmatprep.mubr.bf16.mxu1 %v1351_v1 }
  0x5b   :  { %701 = vmatmul.mubr.bf16.gmra.mrb[28].mxu0 %v1353_v2 }
  0x5c   :  { %798 = vmatmul.mubr.bf16.gmra.mrb[28].mxu1 %v1354_v3  ;;  %1246 = vmatprep.mubr.msk.bf16.mxu0 %vm587_vm0, %v1355_v4 }
  0x5d   :  { %1254 = vmatprep.mubr.msk.bf16.mxu1 %vm587_vm0, %v1356_v5 }
  0x63   :  { %1247 = vmatmul.mubr.msk.bf16.vlgmr.msra.gmra.mrb[32].mxu0 %vm587_vm0, %v1357_v6 }
  0x64   :  { %1255 = vmatmul.mubr.msk.bf16.vlgmr.msra.gmra.mrb[32].mxu1 %vm587_vm0, %v1358_v7  ;;  %1250 = vmatprep.mubr.msk.bf16.mxu0 %vm587_vm0, %v1359_v8 }
  0x65   :  { %1258 = vmatprep.mubr.msk.bf16.mxu1 %vm587_vm0, %v1360_v9 }
  0x6b   :  { %1251 = vmatmul.mubr.msk.bf16.gmra.mrb[36].mxu0 %vm587_vm0, %v1361_v10 }
  0x6c   :  { %1259 = vmatmul.mubr.msk.bf16.gmra.mrb[36].mxu1 %vm587_vm0, %v1362_v11 }
  0xf6   :  { %v1114_v12 = vpop.f32.mrb[0].mxu0 }
  0xf7   :  { %v1178_v13 = vpop.f32.mrb[0].mxu1  ;;  %v1115_v14 = vpop.f32.mrb[1].mxu0 }
  0xf8   :  { %v1116_v15 = vadd.f32 %v1115_v14, %v1114_v12  ;;  %v1179_v16 = vpop.f32.mrb[1].mxu1  ;;  %v1117_v17 = vpop.f32.mrb[2].mxu0 }
  0xf9   :  { %v1180_v18 = vadd.f32 %v1179_v16, %v1178_v13  ;;  %v1181_v19 = vpop.f32.mrb[2].mxu1  ;;  %v1118_v20 = vpop.f32.mrb[3].mxu0 }
  0xfa   :  { %v1119_v21 = vadd.f32 %v1118_v20, %v1117_v17  ;;  %v1182_v22 = vpop.f32.mrb[3].mxu1 }
  0xfb   :  { %v1183_v23 = vadd.f32 %v1182_v22, %v1181_v19  ;;  %v1619_v24 = vadd.f32 %v1180_v18, %v1116_v15 }
  0xfd   :  { %v1621_v25 = vadd.f32 %v1183_v23, %v1119_v21 }
  0xfe   :  { %v1120_v26 = vpop.f32.mrb[4].mxu0 }
  0xff   :  { %v1184_v27 = vpop.f32.mrb[4].mxu1  ;;  %v1121_v28 = vpop.f32.mrb[5].mxu0 }
 0x100   :  { %v1122_v29 = vadd.f32 %v1121_v28, %v1120_v26  ;;  %v1185_v30 = vpop.f32.mrb[5].mxu1  ;;  %v1123_v31 = vpop.f32.mrb[6].mxu0 }
 0x101   :  { %v1186_v32 = vadd.f32 %v1185_v30, %v1184_v27  ;;  %v1187_v33 = vpop.f32.mrb[6].mxu1  ;;  %v1124_v34 = vpop.f32.mrb[7].mxu0 }
 0x102   :  { %v1125_v35 = vadd.f32 %v1124_v34, %v1123_v31  ;;  %v1188_v36 = vpop.f32.mrb[7].mxu1 }
 0x103   :  { %v1189_v37 = vadd.f32 %v1188_v36, %v1187_v33  ;;  %v1623_v38 = vadd.f32 %v1186_v32, %v1122_v29 }
 0x105   :  { %v1625_v39 = vadd.f32 %v1189_v37, %v1125_v35 }
 0x106   :  { %v1126_v40 = vpop.f32.mrb[8].mxu0 }
 0x107   :  { %v1190_v41 = vpop.f32.mrb[8].mxu1  ;;  %v1127_v42 = vpop.f32.mrb[9].mxu0 }
 0x108   :  { %v1128_v43 = vadd.f32 %v1127_v42, %v1126_v40  ;;  %v1191_v44 = vpop.f32.mrb[9].mxu1  ;;  %v1129_v45 = vpop.f32.mrb[10].mxu0 }
 0x109   :  { %v1192_v46 = vadd.f32 %v1191_v44, %v1190_v41  ;;  %v1193_v47 = vpop.f32.mrb[10].mxu1  ;;  %v1130_v48 = vpop.f32.mrb[11].mxu0 }
 0x10a   :  { %v1131_v49 = vadd.f32 %v1130_v48, %v1129_v45  ;;  %v1194_v50 = vpop.f32.mrb[11].mxu1 }
 0x10b   :  { %v1195_v51 = vadd.f32 %v1194_v50, %v1193_v47  ;;  %v1627_v52 = vadd.f32 %v1192_v46, %v1128_v43 }
 0x10d   :  { %v1629_v53 = vadd.f32 %v1195_v51, %v1131_v49 }
 0x10e   :  { %v1132_v54 = vpop.f32.mrb[12].mxu0 }
 0x10f   :  { %v1196_v55 = vpop.f32.mrb[12].mxu1  ;;  %v1133_v56 = vpop.f32.mrb[13].mxu0 }
 0x110   :  { %v1134_v57 = vadd.f32 %v1133_v56, %v1132_v54  ;;  %v1197_v58 = vpop.f32.mrb[13].mxu1  ;;  %v1135_v59 = vpop.f32.mrb[14].mxu0 }
 0x111   :  { %v1198_v60 = vadd.f32 %v1197_v58, %v1196_v55  ;;  %v1199_v61 = vpop.f32.mrb[14].mxu1  ;;  %v1136_v62 = vpop.f32.mrb[15].mxu0 }
 0x112   :  { %v1137_v63 = vadd.f32 %v1136_v62, %v1135_v59  ;;  %v1200_v0 = vpop.f32.mrb[15].mxu1 }
 0x113   :  { %v1201_v1 = vadd.f32 %v1200_v0, %v1199_v61  ;;  %v1631_v2 = vadd.f32 %v1198_v60, %v1134_v57 }
 0x115   :  { %v1633_v3 = vadd.f32 %v1201_v1, %v1137_v63 }
 0x116   :  { %v1138_v4 = vpop.f32.mrb[16].mxu0 }
 0x117   :  { %v1202_v5 = vpop.f32.mrb[16].mxu1  ;;  %v1139_v6 = vpop.f32.mrb[17].mxu0 }
 0x118   :  { %v1140_v7 = vadd.f32 %v1139_v6, %v1138_v4  ;;  %v1203_v8 = vpop.f32.mrb[17].mxu1  ;;  %v1141_v9 = vpop.f32.mrb[18].mxu0 }
 0x119   :  { %v1204_v10 = vadd.f32 %v1203_v8, %v1202_v5  ;;  %v1205_v11 = vpop.f32.mrb[18].mxu1  ;;  %v1142_v12 = vpop.f32.mrb[19].mxu0  ;;  %v1643_v8 = vld [vmem:[%s1720_s2] ss:$0 sm:$0xff] }
 0x11a   :  { %v1143_v13 = vadd.f32 %v1142_v12, %v1141_v9  ;;  %v1206_v14 = vpop.f32.mrb[19].mxu1 }
 0x11b   :  { %v1207_v15 = vadd.f32 %v1206_v14, %v1205_v11  ;;  %v776_v16 = vadd.f32 %v1204_v10, %v1140_v7 }
 0x11d   :  { %v779_v17 = vadd.f32 %v1207_v15, %v1143_v13 }
 0x11e   :  { %v1144_v18 = vpop.f32.mrb[20].mxu0 }
 0x11f   :  { %v1208_v19 = vpop.f32.mrb[20].mxu1  ;;  %v1145_v20 = vpop.f32.mrb[21].mxu0 }
 0x120   :  { %v1146_v21 = vadd.f32 %v1145_v20, %v1144_v18  ;;  %v1209_v22 = vpop.f32.mrb[21].mxu1  ;;  %v1147_v23 = vpop.f32.mrb[22].mxu0 }
 0x121   :  { %v1210_v26 = vadd.f32 %v1209_v22, %v1208_v19  ;;  %v1211_v27 = vpop.f32.mrb[22].mxu1  ;;  %v1148_v28 = vpop.f32.mrb[23].mxu0 }
 0x122   :  { %v1149_v29 = vadd.f32 %v1148_v28, %v1147_v23  ;;  %v1212_v30 = vpop.f32.mrb[23].mxu1 }
 0x123   :  { %v1213_v31 = vadd.f32 %v1212_v30, %v1211_v27  ;;  %v784_v32 = vadd.f32 %v1210_v26, %v1146_v21 }
 0x125   :  { %v787_v33 = vadd.f32 %v1213_v31, %v1149_v29 }
 0x126   :  { %v1150_v34 = vpop.f32.mrb[24].mxu0 }
 0x127   :  { %v1214_v35 = vpop.f32.mrb[24].mxu1  ;;  %v1151_v36 = vpop.f32.mrb[25].mxu0 }
 0x128   :  { %v1152_v37 = vadd.f32 %v1151_v36, %v1150_v34  ;;  %v1215_v40 = vpop.f32.mrb[25].mxu1  ;;  %v1153_v41 = vpop.f32.mrb[26].mxu0 }
 0x129   :  { %v1216_v42 = vadd.f32 %v1215_v40, %v1214_v35  ;;  %v1217_v43 = vpop.f32.mrb[26].mxu1  ;;  %v1154_v44 = vpop.f32.mrb[27].mxu0 }
 0x12a   :  { %v1155_v45 = vadd.f32 %v1154_v44, %v1153_v41  ;;  %v1218_v46 = vpop.f32.mrb[27].mxu1 }
 0x12b   :  { %v1219_v47 = vadd.f32 %v1218_v46, %v1217_v43  ;;  %v1635_v48 = vadd.f32 %v1216_v42, %v1152_v37 }
 0x12d   :  { %v1637_v49 = vadd.f32 %v1219_v47, %v1155_v45 }
 0x12e   :  { %v1156_v50 = vpop.f32.mrb[28].mxu0 }
 0x12f   :  { %v1220_v51 = vpop.f32.mrb[28].mxu1  ;;  %v1157_v54 = vpop.f32.mrb[29].mxu0 }
 0x130   :  { %v1158_v55 = vadd.f32 %v1157_v54, %v1156_v50  ;;  %v1221_v56 = vpop.f32.mrb[29].mxu1  ;;  %v1159_v57 = vpop.f32.mrb[30].mxu0 }
 0x131   :  { %v1222_v58 = vadd.f32 %v1221_v56, %v1220_v51  ;;  %v1223_v59 = vpop.f32.mrb[30].mxu1  ;;  %v1160_v60 = vpop.f32.mrb[31].mxu0 }
 0x132   :  { %v1161_v61 = vadd.f32 %v1160_v60, %v1159_v57  ;;  %v1224_v62 = vpop.f32.mrb[31].mxu1 }
 0x133   :  { %v1225_v63 = vadd.f32 %v1224_v62, %v1223_v59  ;;  %v800_v0 = vadd.f32 %v1222_v58, %v1158_v55 }
 0x135   :  { %v803_v1 = vadd.f32 %v1225_v63, %v1161_v61 }
 0x136   :  { %v1248_v4 = vpop.f32.mrb[32].mxu0 }
 0x137   :  { %v849_v5 = vadd.f32 %v1248_v4, %v1623_v38  ;;  %v1256_v6 = vpop.f32.mrb[32].mxu1  ;;  %v840_v7 = vpop.f32.mrb[33].mxu0 }
 0x138   :  { %v881_v9 = vadd.f32 %v1256_v6, %v784_v32  ;;  %v841_v10 = vadd.f32 %v840_v7, %v1619_v24  ;;  %v872_v11 = vpop.f32.mrb[33].mxu1  ;;  %v1249_v12 = vpop.f32.mrb[34].mxu0 }
 0x139   :  { %v873_v13 = vadd.f32 %v872_v11, %v776_v16  ;;  %v852_v14 = vadd.f32 %v1249_v12, %v1625_v39  ;;  %v1257_v15 = vpop.f32.mrb[34].mxu1  ;;  %v843_v18 = vpop.f32.mrb[35].mxu0  ;;  %v963_v21 = vadd.f32 %v1643_v8, %v849_v5 }
 0x13a   :  { %v884_v19 = vadd.f32 %v1257_v15, %v787_v33  ;;  %v844_v38 = vadd.f32 %v843_v18, %v1621_v25  ;;  %v875_v20 = vpop.f32.mrb[35].mxu1  ;;  %v971_v23 = vadd.f32 %v1643_v8, %v881_v9  ;;  %v961_v26 = vadd.f32 %v1643_v8, %v841_v10 }
 0x13b   :  { %v876_v22 = vadd.f32 %v875_v20, %v779_v17  ;;  %v979_v27 = vmax.f32 %v963_v21, 0.0  ;;  %v969_v24 = vadd.f32 %v1643_v8, %v873_v13  ;;  %v964_v16 = vadd.f32 %v1643_v8, %v852_v14 }
 0x13c   :  { %v987_v28 = vmax.f32 %v971_v23, 0.0  ;;  %v977_v39 = vmax.f32 %v961_v26, 0.0  ;;  %v972_v29 = vadd.f32 %v1643_v8, %v884_v19  ;;  %v962_v30 = vadd.f32 %v1643_v8, %v844_v38 }
 0x13d   :  { %995 = vst [vmem:[%s1721_s3 + $0x10] sm:$0xff] %v979_v27  ;;  %v985_v17 = vmax.f32 %v969_v24, 0.0  ;;  %v980_v31 = vmax.f32 %v964_v16, 0.0  ;;  %v970_v32 = vadd.f32 %v1643_v8, %v876_v22 }
 0x13e   :  { %v1252_v25 = vpop.f32.mrb[36].mxu0  ;;  %1003 = vst [vmem:[%s1721_s3 + $0x50] sm:$0xff] %v987_v28  ;;  %993 = vst [vmem:[%s1721_s3] sm:$0xff] %v977_v39  ;;  %v988_v36 = vmax.f32 %v972_v29, 0.0  ;;  %v978_v37 = vmax.f32 %v962_v30, 0.0 }
 0x13f   :  { %v865_v33 = vadd.f32 %v1252_v25, %v1631_v2  ;;  %v1260_v34 = vpop.f32.mrb[36].mxu1  ;;  %v856_v35 = vpop.f32.mrb[37].mxu0  ;;  %1001 = vst [vmem:[%s1721_s3 + $0x40] sm:$0xff] %v985_v17  ;;  %996 = vst [vmem:[%s1721_s3 + $0x18] sm:$0xff] %v980_v31  ;;  %v986_v2 = vmax.f32 %v970_v32, 0.0 }
 0x140   :  { %v897_v40 = vadd.f32 %v1260_v34, %v800_v0  ;;  %v857_v41 = vadd.f32 %v856_v35, %v1627_v52  ;;  %v888_v42 = vpop.f32.mrb[37].mxu1  ;;  %v1253_v43 = vpop.f32.mrb[38].mxu0  ;;  %1004 = vst [vmem:[%s1721_s3 + $0x58] sm:$0xff] %v988_v36  ;;  %994 = vst [vmem:[%s1721_s3 + $0x8] sm:$0xff] %v978_v37 }
 0x141   :  { %v889_v44 = vadd.f32 %v888_v42, %v1635_v48  ;;  %v868_v45 = vadd.f32 %v1253_v43, %v1633_v3  ;;  %v1261_v46 = vpop.f32.mrb[38].mxu1  ;;  %v859_v47 = vpop.f32.mrb[39].mxu0  ;;  %1002 = vst [vmem:[%s1721_s3 + $0x48] sm:$0xff] %v986_v2  ;;  %v967_v3 = vadd.f32 %v1643_v8, %v865_v33 }
 0x142   :  { %v900_v52 = vadd.f32 %v1261_v46, %v803_v1  ;;  %v860_v50 = vadd.f32 %v859_v47, %v1629_v53  ;;  %v891_v51 = vpop.f32.mrb[39].mxu1  ;;  %v975_v54 = vadd.f32 %v1643_v8, %v897_v40  ;;  %v965_v55 = vadd.f32 %v1643_v8, %v857_v41 }
 0x143   :  { %v892_v48 = vadd.f32 %v891_v51, %v1637_v49  ;;  %v983_v56 = vmax.f32 %v967_v3, 0.0  ;;  %v973_v57 = vadd.f32 %v1643_v8, %v889_v44  ;;  %v968_v58 = vadd.f32 %v1643_v8, %v868_v45 }
 0x144   :  { %v991_v59 = vmax.f32 %v975_v54, 0.0  ;;  %v981_v53 = vmax.f32 %v965_v55, 0.0  ;;  %v976_v60 = vadd.f32 %v1643_v8, %v900_v52  ;;  %v966_v61 = vadd.f32 %v1643_v8, %v860_v50 }
 0x145   :  { %999 = vst [vmem:[%s1721_s3 + $0x30] sm:$0xff] %v983_v56  ;;  %v989_v49 = vmax.f32 %v973_v57, 0.0  ;;  %v984_v62 = vmax.f32 %v968_v58, 0.0  ;;  %v974_v63 = vadd.f32 %v1643_v8, %v892_v48 }
 0x146   :  { %1007 = vst [vmem:[%s1721_s3 + $0x70] sm:$0xff] %v991_v59  ;;  %997 = vst [vmem:[%s1721_s3 + $0x20] sm:$0xff] %v981_v53  ;;  %v992_v0 = vmax.f32 %v976_v60, 0.0  ;;  %v982_v1 = vmax.f32 %v966_v61, 0.0 }
 0x147   :  { %1005 = vst [vmem:[%s1721_s3 + $0x60] sm:$0xff] %v989_v49  ;;  %1000 = vst [vmem:[%s1721_s3 + $0x38] sm:$0xff] %v984_v62  ;;  %v990_v4 = vmax.f32 %v974_v63, 0.0 }
 0x148   :  { %1008 = vst [vmem:[%s1721_s3 + $0x78] sm:$0xff] %v992_v0  ;;  %998 = vst [vmem:[%s1721_s3 + $0x28] sm:$0xff] %v982_v1 }
 0x149   :  { %1006 = vst [vmem:[%s1721_s3 + $0x68] sm:$0xff] %v990_v4 }

// kernel: model_forward.16
= control target key start
LH: loop header
LB: loop body
LE: loop exit
PB: predicated region body
PF: predicated region fallthrough
CT: control target
= control target key end

     0   :  { %vm139_vm0 = vcmask 523264   ;;  %s548_s1 = inlined_call_operand.vmem [shape: bf16[64,128], index: 1, kind: input, shape index: {}]   ;;  %s549_s0 = inlined_call_operand.vmem [shape: bf16[128,64], index: 0, kind: input, shape index: {}]   ;;  %s550_s2 = inlined_call_operand.vmem [shape: f32[1,128], index: 2, kind: input, shape index: {}]   ;;  %s551_s3 = inlined_call_operand.vmem [shape: f32[128,128], index: 3, kind: output, shape index: {}]  }
   0x1   :  { %v421_v0 = vld [vmem:[%s548_s1] sm:$0xff]   ;;  %v422_v1 = vld [vmem:[%s548_s1 + $0x8] sm:$0xff]   ;;  %v423_v2 = vld [vmem:[%s548_s1 + $0x10] sm:$0xff]  }
   0x2   :  { %388 = vmatprep.subr.bf16.mxu0 %v421_v0  ;;  %412 = vmatprep.subr.bf16.mxu1 %v421_v0  ;;  %v425_v3 = vld [vmem:[%s549_s0] sm:$0xff]   ;;  %v424_v5 = vld [vmem:[%s548_s1 + $0x18] sm:$0xff]   ;;  %v427_v6 = vld [vmem:[%s549_s0 + $0x8] sm:$0xff]  }
   0x3   :  { %389 = vmatpush3.bf16.msra.mxu0 %v421_v0  ;;  %416 = vmatpush3.bf16.msra.mxu1 %v421_v0  ;;  %v426_v4 = vld [vmem:[%s549_s0 + $0x20] sm:$0xff]   ;;  %v428_v7 = vld [vmem:[%s549_s0 + $0x28] sm:$0xff]   ;;  %v429_v8 = vld [vmem:[%s549_s0 + $0x10] sm:$0xff]  }
   0x4   :  { %390 = vmatprep.subr.bf16.mxu0 %v422_v1  ;;  %413 = vmatprep.subr.bf16.mxu1 %v422_v1  ;;  %v430_v9 = vld [vmem:[%s549_s0 + $0x30] sm:$0xff]   ;;  %v431_v10 = vld [vmem:[%s549_s0 + $0x18] sm:$0xff]   ;;  %v375_v13 = vld [vmem:[%s550_s2] ss:$0 sm:$0xff] }
   0x5   :  { %396 = vmatprep.mubr.msk.bf16.mxu0 %vm139_vm0, %v425_v3  ;;  %404 = vmatprep.mubr.msk.bf16.mxu1 %vm139_vm0, %v426_v4  ;;  %v432_v11 = vld [vmem:[%s549_s0 + $0x38] sm:$0xff]  }
   0x7   :  { %391 = vmatpush3.bf16.msra.mxu0 %v422_v1  ;;  %417 = vmatpush3.bf16.msra.mxu1 %v422_v1 }
   0x8   :  { %392 = vmatprep.subr.bf16.mxu0 %v423_v2  ;;  %414 = vmatprep.subr.bf16.mxu1 %v423_v2 }
   0xb   :  { %393 = vmatpush3.bf16.msra.mxu0 %v423_v2  ;;  %418 = vmatpush3.bf16.msra.mxu1 %v423_v2 }
   0xc   :  { %394 = vmatprep.subr.bf16.mxu0 %v424_v5  ;;  %415 = vmatprep.subr.bf16.mxu1 %v424_v5 }
   0xf   :  { %395 = vmatpush3.bf16.msra.mxu0 %v424_v5  ;;  %419 = vmatpush3.bf16.msra.mxu1 %v424_v5 }
  0x12   :  { %397 = vmatmul.mubr.msk.bf16.vlgmr.msra.gmra.mrb[0].mxu0 %vm139_vm0, %v427_v6  ;;  %405 = vmatmul.mubr.msk.bf16.vlgmr.msra.gmra.mrb[0].mxu1 %vm139_vm0, %v428_v7 }
  0x13   :  { %400 = vmatprep.mubr.msk.bf16.mxu0 %vm139_vm0, %v429_v8  ;;  %408 = vmatprep.mubr.msk.bf16.mxu1 %vm139_vm0, %v430_v9 }
  0x1a   :  { %401 = vmatmul.mubr.msk.bf16.gmra.mrb[4].mxu0 %vm139_vm0, %v431_v10  ;;  %409 = vmatmul.mubr.msk.bf16.gmra.mrb[4].mxu1 %vm139_vm0, %v432_v11 }
  0xe5   :  { %v398_v12 = vpop.f32.mrb[0].mxu0  ;;  %v406_v14 = vpop.f32.mrb[0].mxu1 }
  0xe6   :  { %v198_v15 = vpop.f32.mrb[1].mxu0  ;;  %v230_v16 = vpop.f32.mrb[1].mxu1  ;;  %v321_v19 = vadd.f32 %v398_v12, %v375_v13  ;;  %v329_v20 = vadd.f32 %v406_v14, %v375_v13 }
  0xe7   :  { %v399_v17 = vpop.f32.mrb[2].mxu0  ;;  %v407_v18 = vpop.f32.mrb[2].mxu1  ;;  %v319_v23 = vadd.f32 %v375_v13, %v198_v15  ;;  %v327_v24 = vadd.f32 %v375_v13, %v230_v16 }
  0xe8   :  { %v201_v21 = vpop.f32.mrb[3].mxu0  ;;  %v233_v22 = vpop.f32.mrb[3].mxu1  ;;  %337 = vst [vmem:[%s551_s3 + $0x10] sm:$0xff] %v321_v19  ;;  %345 = vst [vmem:[%s551_s3 + $0x50] sm:$0xff] %v329_v20  ;;  %v322_v25 = vadd.f32 %v399_v17, %v375_v13  ;;  %v330_v26 = vadd.f32 %v407_v18, %v375_v13 }
  0xe9   :  { %335 = vst [vmem:[%s551_s3] sm:$0xff] %v319_v23  ;;  %343 = vst [vmem:[%s551_s3 + $0x40] sm:$0xff] %v327_v24  ;;  %v320_v27 = vadd.f32 %v375_v13, %v201_v21  ;;  %v328_v28 = vadd.f32 %v375_v13, %v233_v22 }
  0xea   :  { %338 = vst [vmem:[%s551_s3 + $0x18] sm:$0xff] %v322_v25  ;;  %346 = vst [vmem:[%s551_s3 + $0x58] sm:$0xff] %v330_v26 }
  0xeb   :  { %336 = vst [vmem:[%s551_s3 + $0x8] sm:$0xff] %v320_v27  ;;  %344 = vst [vmem:[%s551_s3 + $0x48] sm:$0xff] %v328_v28 }
  0xed   :  { %v402_v29 = vpop.f32.mrb[4].mxu0  ;;  %v410_v30 = vpop.f32.mrb[4].mxu1 }
  0xee   :  { %v214_v31 = vpop.f32.mrb[5].mxu0  ;;  %v246_v32 = vpop.f32.mrb[5].mxu1  ;;  %v325_v35 = vadd.f32 %v402_v29, %v375_v13  ;;  %v333_v36 = vadd.f32 %v410_v30, %v375_v13 }
  0xef   :  { %v403_v33 = vpop.f32.mrb[6].mxu0  ;;  %v411_v34 = vpop.f32.mrb[6].mxu1  ;;  %v323_v39 = vadd.f32 %v375_v13, %v214_v31  ;;  %v331_v40 = vadd.f32 %v375_v13, %v246_v32 }
  0xf0   :  { %v217_v37 = vpop.f32.mrb[7].mxu0  ;;  %v249_v38 = vpop.f32.mrb[7].mxu1  ;;  %341 = vst [vmem:[%s551_s3 + $0x30] sm:$0xff] %v325_v35  ;;  %349 = vst [vmem:[%s551_s3 + $0x70] sm:$0xff] %v333_v36  ;;  %v326_v41 = vadd.f32 %v403_v33, %v375_v13  ;;  %v334_v42 = vadd.f32 %v411_v34, %v375_v13 }
  0xf1   :  { %339 = vst [vmem:[%s551_s3 + $0x20] sm:$0xff] %v323_v39  ;;  %347 = vst [vmem:[%s551_s3 + $0x60] sm:$0xff] %v331_v40  ;;  %v324_v43 = vadd.f32 %v375_v13, %v217_v37  ;;  %v332_v44 = vadd.f32 %v375_v13, %v249_v38 }
  0xf2   :  { %342 = vst [vmem:[%s551_s3 + $0x38] sm:$0xff] %v326_v41  ;;  %350 = vst [vmem:[%s551_s3 + $0x78] sm:$0xff] %v334_v42 }
  0xf3   :  { %340 = vst [vmem:[%s551_s3 + $0x28] sm:$0xff] %v324_v43  ;;  %348 = vst [vmem:[%s551_s3 + $0x68] sm:$0xff] %v332_v44 }

// kernel: model_forward.18
= control target key start
LH: loop header
LB: loop body
LE: loop exit
PB: predicated region body
PF: predicated region fallthrough
CT: control target
= control target key end

     0   :  { %s1163_s15 = smov 0   ;;  %s1165_s16 = smov 0   ;;  %s1577_s0 = inlined_call_operand.vmem [shape: bf16[128,1152], index: 0, kind: input, shape index: {}]   ;;  %s1578_s1 = inlined_call_operand.vmem [shape: bf16[1152,128], index: 1, kind: input, shape index: {}]   ;;  %s1579_s2 = inlined_call_operand.vmem [shape: f32[1,128], index: 2, kind: input, shape index: {}]   ;;  %s1580_s3 = inlined_call_operand.vmem [shape: f32[128,128], index: 3, kind: input, shape index: {}]   ;;  %s1581_s4 = inlined_call_operand.vmem [shape: f32[128,128], index: 4, kind: output, shape index: {}]  }
   0x1   :  { %s1167_s17 = smov 0   ;;  %s1169_s18 = smov 0  }
   0x2   :  { %s1171_s19 = smov 0  }
   0x3 LB: > { %s26_s20 = sadd.s32 1, %s1131_s18  ;;  %p49_p1 = scmp.ne.s32.totalorder %s1123_s16, %s1119_s15  ;;  %s1135_s19 = sphi %s1171_s19, %s14_s19   ;;  %s1131_s18 = sphi %s1169_s18, %s1585_s18   ;;  %s1127_s17 = sphi %s1167_s17, %s1584_s17   ;;  %s1123_s16 = sphi %s1165_s16, %s1583_s16   ;;  %s1119_s15 = sphi %s1163_s15, %s1582_s15  }
   0x4   : > { %p27_p0 = scmp.ge.s32.totalorder %s26_s20, 9  ;;  %p50_p2 = scmp.eq.s32.totalorder %s1135_s19, 0 }
   0x5   : > { %s42_s22 = sadd.s32 1, %s1123_s16  ;;  %p946_p5 = scmp.ge.s32.totalorder %s1135_s19, 9 }
   0x6   : > { %s1587_s20 = smov (%p27_p0, %s26_s20), 0  ;;  %p51_p3 = por %p50_p2, %p49_p1 }
   0x7   : > { %s38_s21 = ssub.s32 %s1131_s18, %s1587_s20  ;;  %203 = sbr.rel (%p946_p5) target bundleno = 28 (0x1c), region = 24 }
   0x8   : > { %p40_p4 = scmp.eq.s32.totalorder %s38_s21, 0 }
   0xa   : > { %s1198_s23 = scalar_select %p40_p4, %s1123_s16, %s42_s22  }
   0xe   : > { %206 = sbr.rel (!%p51_p3) target bundleno = 28 (0x1c), region = 28  ;;  %s208_s24 = sand.u32 (%p51_p3), 1, %s1123_s16  }
   0xf   : > { %s948_s25 = sshll.u32 (%p51_p3), %s1131_s18, 2  ;;  %s947_s26 = sshll.u32 (%p51_p3), %s208_s24, 6 }
  0x10   : > { %s1206_s29 = scalar_lea.vmem (%p51_p3), %s1577_s0, %s948_s25  ;;  %s210_s30 = scalar_lea.vmem (%p51_p3), [#allocation2], %s947_s26 }
  0x11   : > { %v231_v0 = vld [vmem:[%s1206_s29] sm:$0xf] (%p51_p3)  ;;  %v233_v1 = vld [vmem:[%s1206_s29 + $0x24] sm:$0xf] (%p51_p3)  ;;  %v235_v2 = vld [vmem:[%s1206_s29 + $0x48] sm:$0xf] (%p51_p3) }
  0x12   : > { %232 = vst [vmem:[%s210_s30] sm:$0xf] (%p51_p3), %v231_v0  ;;  %234 = vst [vmem:[%s210_s30 + $0x4] sm:$0xf] (%p51_p3), %v233_v1  ;;  %v237_v3 = vld [vmem:[%s1206_s29 + $0x6c] sm:$0xf] (%p51_p3) }
  0x13   : > { %v239_v4 = vld [vmem:[%s1206_s29 + $0x90] sm:$0xf] (%p51_p3)  ;;  %236 = vst [vmem:[%s210_s30 + $0x8] sm:$0xf] (%p51_p3), %v235_v2  ;;  %238 = vst [vmem:[%s210_s30 + $0xc] sm:$0xf] (%p51_p3), %v237_v3 }
  0x14   : > { %240 = vst [vmem:[%s210_s30 + $0x10] sm:$0xf] (%p51_p3), %v239_v4  ;;  %v241_v5 = vld [vmem:[%s1206_s29 + $0xb4] sm:$0xf] (%p51_p3)  ;;  %v243_v6 = vld [vmem:[%s1206_s29 + $0xd8] sm:$0xf] (%p51_p3) }
  0x15   : > { %v245_v7 = vld [vmem:[%s1206_s29 + $0xfc] sm:$0xf]  ;;  %242 = vst [vmem:[%s210_s30 + $0x14] sm:$0xf] %v241_v5  ;;  %244 = vst [vmem:[%s210_s30 + $0x18] sm:$0xf] %v243_v6 }
  0x16   : > { %246 = vst [vmem:[%s210_s30 + $0x1c] sm:$0xf] %v245_v7  ;;  %v247_v8 = vld [vmem:[%s1206_s29 + $0x120] sm:$0xf]  ;;  %v249_v9 = vld [vmem:[%s1206_s29 + $0x144] sm:$0xf] }
  0x17   : > { %v251_v10 = vld [vmem:[%s1206_s29 + $0x168] sm:$0xf]  ;;  %248 = vst [vmem:[%s210_s30 + $0x20] sm:$0xf] %v247_v8  ;;  %250 = vst [vmem:[%s210_s30 + $0x24] sm:$0xf] %v249_v9 }
  0x18   : > { %252 = vst [vmem:[%s210_s30 + $0x28] sm:$0xf] %v251_v10  ;;  %v253_v11 = vld [vmem:[%s1206_s29 + $0x18c] sm:$0xf]  ;;  %v255_v12 = vld [vmem:[%s1206_s29 + $0x1b0] sm:$0xf] }
  0x19   : > { %v257_v13 = vld [vmem:[%s1206_s29 + $0x1d4] sm:$0xf]  ;;  %254 = vst [vmem:[%s210_s30 + $0x2c] sm:$0xf] %v253_v11  ;;  %256 = vst [vmem:[%s210_s30 + $0x30] sm:$0xf] %v255_v12 }
  0x1a   : > { %258 = vst [vmem:[%s210_s30 + $0x34] sm:$0xf] %v257_v13  ;;  %v259_v14 = vld [vmem:[%s1206_s29 + $0x1f8] sm:$0xf]  ;;  %v261_v15 = vld [vmem:[%s1206_s29 + $0x21c] sm:$0xf] }
  0x1b   : > { %260 = vst [vmem:[%s210_s30 + $0x38] sm:$0xf] %v259_v14  ;;  %262 = vst [vmem:[%s210_s30 + $0x3c] sm:$0xf] %v261_v15 }
  0x1c PF: > { %p949_p6 = scmp.ge.s32.totalorder %s1135_s19, 1  ;;  %p328_p7 = scmp.lt.s32.totalorder %s1135_s19, 10 }
  0x1e   : > { %p329_p8 = pnand %p949_p6, %p328_p7 }
  0x1f   : > { %s335_s5 = sand.u32 (!%p329_p8), 1, %s1119_s15   ;;  %s951_s6 = sshll.u32 (!%p329_p8), %s1127_s17, 4 }
  0x20   : > { %332 = sbr.rel (%p329_p8) target bundleno = 323 (0x143), region = 73  ;;  %s950_s7 = sshll.u32 (!%p329_p8), %s335_s5, 6 }
  0x21   : > { %p384_p9 = scmp.lt.s32.totalorder (!%p329_p8), %s951_s6, 143  ;;  %s1233_s12 = scalar_lea.vmem (!%p329_p8), [#allocation2], %s950_s7 }
  0x22   : > { %p953_p10 = scmp.ne.s32.totalorder (!%p329_p8), %s1127_s17, 0 }
  0x27   : > { %s1589_s6 = smov (!%p384_p9, %s951_s6), 143  ;;  %417 = sbr.rel (%p953_p10) target bundleno = 49 (0x31), region = 81 }
  0x28   : > { %s952_s8 = sshll.u32 %s1589_s6, 2  ;;  %v1137_v16 = vmov (!%p953_p10), 0.0  }
  0x29   : > { %s1231_s11 = scalar_lea.vmem %s1578_s1, %s952_s8  ;;  %418 = vst [vmem:[%s1581_s4] sm:$0xff] (!%p953_p10), %v1137_v16  ;;  %419 = vst [vmem:[%s1581_s4 + $0x8] sm:$0xff] (!%p953_p10), %v1137_v16 }
  0x2a   : > { %420 = vst [vmem:[%s1581_s4 + $0x10] sm:$0xff] (!%p953_p10), %v1137_v16  ;;  %421 = vst [vmem:[%s1581_s4 + $0x18] sm:$0xff] (!%p953_p10), %v1137_v16 }
  0x2b   : > { %422 = vst [vmem:[%s1581_s4 + $0x20] sm:$0xff] (!%p953_p10), %v1137_v16  ;;  %423 = vst [vmem:[%s1581_s4 + $0x28] sm:$0xff] (!%p953_p10), %v1137_v16 }
  0x2c   : > { %424 = vst [vmem:[%s1581_s4 + $0x30] sm:$0xff] (!%p953_p10), %v1137_v16  ;;  %425 = vst [vmem:[%s1581_s4 + $0x38] sm:$0xff] (!%p953_p10), %v1137_v16 }
  0x2d   : > { %426 = vst [vmem:[%s1581_s4 + $0x40] sm:$0xff] (!%p953_p10), %v1137_v16  ;;  %427 = vst [vmem:[%s1581_s4 + $0x48] sm:$0xff] (!%p953_p10), %v1137_v16 }
  0x2e   : > { %428 = vst [vmem:[%s1581_s4 + $0x50] sm:$0xff] %v1137_v16  ;;  %429 = vst [vmem:[%s1581_s4 + $0x58] sm:$0xff] %v1137_v16 }
  0x2f   : > { %430 = vst [vmem:[%s1581_s4 + $0x60] sm:$0xff] %v1137_v16  ;;  %431 = vst [vmem:[%s1581_s4 + $0x68] sm:$0xff] %v1137_v16 }
  0x30   : > { %432 = vst [vmem:[%s1581_s4 + $0x70] sm:$0xff] %v1137_v16  ;;  %433 = vst [vmem:[%s1581_s4 + $0x78] sm:$0xff] %v1137_v16 }
  0x31 PF: > { %v1081_v17 = vld [vmem:[%s1231_s11] sm:$0xff]   ;;  %v1082_v18 = vld [vmem:[%s1231_s11 + $0x8] sm:$0xff]   ;;  %v1083_v19 = vld [vmem:[%s1231_s11 + $0x10] sm:$0xff]   ;;  %p970_p11 = scmp.ne.s32.totalorder %s1127_s17, 8 }
  0x32   : > { %992 = vmatprep.subr.bf16.mxu0 %v1081_v17  ;;  %1024 = vmatprep.subr.bf16.mxu1 %v1081_v17  ;;  %v1084_v20 = vld [vmem:[%s1231_s11 + $0x18] sm:$0xff]   ;;  %v1089_v21 = vld [vmem:[%s1233_s12] sm:$0xff]   ;;  %v1086_v24 = vld [vmem:[%s1231_s11 + $0x28] sm:$0xff]  }
  0x33   : > { %993 = vmatpush3.bf16.msra.mxu0 %v1081_v17  ;;  %1032 = vmatpush3.bf16.msra.mxu1 %v1081_v17  ;;  %v1090_v22 = vld [vmem:[%s1233_s12 + $0x20] sm:$0xff]   ;;  %v1087_v25 = vld [vmem:[%s1231_s11 + $0x30] sm:$0xff]   ;;  %v1088_v26 = vld [vmem:[%s1231_s11 + $0x38] sm:$0xff]  }
  0x34   : > { %994 = vmatprep.subr.bf16.mxu0 %v1082_v18  ;;  %1025 = vmatprep.subr.bf16.mxu1 %v1082_v18  ;;  %v1085_v23 = vld [vmem:[%s1231_s11 + $0x20] sm:$0xff]   ;;  %v1091_v27 = vld [vmem:[%s1233_s12 + $0x8] sm:$0xff]   ;;  %v1093_v29 = vld [vmem:[%s1233_s12 + $0x10] sm:$0xff]  }
  0x35   : > { %1008 = vmatprep.mubr.bf16.mxu0 %v1089_v21  ;;  %1016 = vmatprep.mubr.bf16.mxu1 %v1090_v22  ;;  %v1092_v28 = vld [vmem:[%s1233_s12 + $0x28] sm:$0xff]   ;;  %v1094_v30 = vld [vmem:[%s1233_s12 + $0x30] sm:$0xff]   ;;  %v1095_v31 = vld [vmem:[%s1233_s12 + $0x18] sm:$0xff]  }
  0x36   : > { %v1096_v32 = vld [vmem:[%s1233_s12 + $0x38] sm:$0xff]   ;;  %v436_v33 = vld [vmem:[%s1581_s4 + $0x10] sm:$0xff]  ;;  %v434_v35 = vld [vmem:[%s1581_s4] sm:$0xff] }
  0x37   : > { %995 = vmatpush3.bf16.msra.mxu0 %v1082_v18  ;;  %1033 = vmatpush3.bf16.msra.mxu1 %v1082_v18  ;;  %v444_v34 = vld [vmem:[%s1581_s4 + $0x50] sm:$0xff]  ;;  %v442_v36 = vld [vmem:[%s1581_s4 + $0x40] sm:$0xff]  ;;  %v437_v39 = vld [vmem:[%s1581_s4 + $0x18] sm:$0xff] }
  0x38   : > { %996 = vmatprep.subr.bf16.mxu0 %v1083_v19  ;;  %1026 = vmatprep.subr.bf16.mxu1 %v1083_v19  ;;  %v445_v40 = vld [vmem:[%s1581_s4 + $0x58] sm:$0xff]  ;;  %v435_v45 = vld [vmem:[%s1581_s4 + $0x8] sm:$0xff]  ;;  %v440_v57 = vld [vmem:[%s1581_s4 + $0x30] sm:$0xff] }
  0x39   : > { %v443_v46 = vld [vmem:[%s1581_s4 + $0x48] sm:$0xff]  ;;  %v448_v58 = vld [vmem:[%s1581_s4 + $0x70] sm:$0xff]  ;;  %v438_v59 = vld [vmem:[%s1581_s4 + $0x20] sm:$0xff] }
  0x3a   : > { %v446_v60 = vld [vmem:[%s1581_s4 + $0x60] sm:$0xff]  ;;  %v441_v63 = vld [vmem:[%s1581_s4 + $0x38] sm:$0xff]  ;;  %v439_v5 = vld [vmem:[%s1581_s4 + $0x28] sm:$0xff] }
  0x3b   : > { %997 = vmatpush3.bf16.msra.mxu0 %v1083_v19  ;;  %1034 = vmatpush3.bf16.msra.mxu1 %v1083_v19  ;;  %v449_v0 = vld [vmem:[%s1581_s4 + $0x78] sm:$0xff]  ;;  %v447_v6 = vld [vmem:[%s1581_s4 + $0x68] sm:$0xff]  ;;  %v1403_v18 = vld [vmem:[%s1579_s2] ss:$0 sm:$0xff] (!%p970_p11) }
  0x3c   : > { %998 = vmatprep.subr.bf16.mxu0 %v1084_v20  ;;  %1027 = vmatprep.subr.bf16.mxu1 %v1084_v20  ;;  %v750_v19 = vld [vmem:[%s1580_s3] sm:$0xff] (!%p970_p11)  ;;  %v751_v22 = vld [vmem:[%s1580_s3 + $0x8] sm:$0xff] (!%p970_p11) }
  0x3f   : > { %999 = vmatpush3.bf16.msra.mxu0 %v1084_v20  ;;  %1035 = vmatpush3.bf16.msra.mxu1 %v1084_v20 }
  0x40   : > { %1000 = vmatprep.subr.bf16.mxu0 %v1085_v23  ;;  %1028 = vmatprep.subr.bf16.mxu1 %v1085_v23 }
  0x43   : > { %1001 = vmatpush3.bf16.msra.mxu0 %v1085_v23  ;;  %1036 = vmatpush3.bf16.msra.mxu1 %v1085_v23 }
  0x44   : > { %1002 = vmatprep.subr.bf16.mxu0 %v1086_v24  ;;  %1029 = vmatprep.subr.bf16.mxu1 %v1086_v24 }
  0x47   : > { %1003 = vmatpush3.bf16.msra.mxu0 %v1086_v24  ;;  %1037 = vmatpush3.bf16.msra.mxu1 %v1086_v24 }
  0x48   : > { %1004 = vmatprep.subr.bf16.mxu0 %v1087_v25  ;;  %1030 = vmatprep.subr.bf16.mxu1 %v1087_v25 }
  0x4b   : > { %1005 = vmatpush3.bf16.msra.mxu0 %v1087_v25  ;;  %1038 = vmatpush3.bf16.msra.mxu1 %v1087_v25 }
  0x4c   : > { %1006 = vmatprep.subr.bf16.mxu0 %v1088_v26  ;;  %1031 = vmatprep.subr.bf16.mxu1 %v1088_v26 }
  0x4f   : > { %1007 = vmatpush3.bf16.msra.mxu0 %v1088_v26  ;;  %1039 = vmatpush3.bf16.msra.mxu1 %v1088_v26  ;;  %v752_v26 = vld [vmem:[%s1580_s3 + $0x10] sm:$0xff] (!%p970_p11) }
  0x52   : > { %1009 = vmatmul.mubr.bf16.vlgmr.msra.gmra.mrb[0].mxu0 %v1091_v27  ;;  %1017 = vmatmul.mubr.bf16.vlgmr.msra.gmra.mrb[0].mxu1 %v1092_v28  ;;  %v753_v28 = vld [vmem:[%s1580_s3 + $0x18] sm:$0xff] (!%p970_p11) }
  0x53   : > { %1012 = vmatprep.mubr.bf16.mxu0 %v1093_v29  ;;  %1020 = vmatprep.mubr.bf16.mxu1 %v1094_v30 }
  0x5a   : > { %1013 = vmatmul.mubr.bf16.gmra.mrb[4].mxu0 %v1095_v31  ;;  %1021 = vmatmul.mubr.bf16.gmra.mrb[4].mxu1 %v1096_v32  ;;  %v754_v32 = vld [vmem:[%s1580_s3 + $0x20] sm:$0xff] (!%p970_p11) }
 0x125   : > { %v1010_v37 = vpop.f32.mrb[0].mxu0  ;;  %v1018_v38 = vpop.f32.mrb[0].mxu1 }
 0x126   : > { %v677_v41 = vadd.f32 %v1010_v37, %v436_v33  ;;  %v685_v42 = vadd.f32 %v1018_v38, %v444_v34  ;;  %v612_v43 = vpop.f32.mrb[1].mxu0  ;;  %v644_v44 = vpop.f32.mrb[1].mxu1  ;;  %v755_v38 = vld [vmem:[%s1580_s3 + $0x28] sm:$0xff] (!%p970_p11) }
 0x127   : > { %v675_v47 = vadd.f32 %v612_v43, %v434_v35  ;;  %v683_v48 = vadd.f32 %v644_v44, %v442_v36  ;;  %v1011_v49 = vpop.f32.mrb[2].mxu0  ;;  %v1019_v50 = vpop.f32.mrb[2].mxu1 }
 0x128   : > { %693 = vst [vmem:[%s1581_s4 + $0x10] sm:$0xff] %v677_v41  ;;  %701 = vst [vmem:[%s1581_s4 + $0x50] sm:$0xff] %v685_v42  ;;  %v678_v51 = vadd.f32 %v1011_v49, %v437_v39  ;;  %v686_v52 = vadd.f32 %v1019_v50, %v445_v40  ;;  %v615_v53 = vpop.f32.mrb[3].mxu0  ;;  %v647_v54 = vpop.f32.mrb[3].mxu1  ;;  %v756_v40 = vld [vmem:[%s1580_s3 + $0x30] sm:$0xff] (!%p970_p11) }
 0x129   : > { %691 = vst [vmem:[%s1581_s4] sm:$0xff] %v675_v47  ;;  %699 = vst [vmem:[%s1581_s4 + $0x40] sm:$0xff] %v683_v48  ;;  %v676_v55 = vadd.f32 %v615_v53, %v435_v45  ;;  %v684_v56 = vadd.f32 %v647_v54, %v443_v46  ;;  %v757_v45 = vld [vmem:[%s1580_s3 + $0x38] sm:$0xff] (!%p970_p11)  ;;  %v759_v53 = vld [vmem:[%s1580_s3 + $0x48] sm:$0xff] (!%p970_p11) }
 0x12a   : > { %694 = vst [vmem:[%s1581_s4 + $0x18] sm:$0xff] %v678_v51  ;;  %702 = vst [vmem:[%s1581_s4 + $0x58] sm:$0xff] %v686_v52  ;;  %v758_v51 = vld [vmem:[%s1580_s3 + $0x40] sm:$0xff] (!%p970_p11) }
 0x12b   : > { %692 = vst [vmem:[%s1581_s4 + $0x8] sm:$0xff] %v676_v55  ;;  %700 = vst [vmem:[%s1581_s4 + $0x48] sm:$0xff] %v684_v56 }
 0x12d   : > { %v1014_v61 = vpop.f32.mrb[4].mxu0  ;;  %v1022_v62 = vpop.f32.mrb[4].mxu1  ;;  %710 = sbr.rel (%p970_p11) target bundleno = 323 (0x143), region = 85 }
 0x12e   : > { %v681_v1 = vadd.f32 %v1014_v61, %v440_v57  ;;  %v689_v2 = vadd.f32 %v1022_v62, %v448_v58  ;;  %v628_v3 = vpop.f32.mrb[5].mxu0  ;;  %v660_v4 = vpop.f32.mrb[5].mxu1 }
 0x12f   : > { %v679_v7 = vadd.f32 %v628_v3, %v438_v59  ;;  %v687_v8 = vadd.f32 %v660_v4, %v446_v60  ;;  %v1015_v9 = vpop.f32.mrb[6].mxu0  ;;  %v1023_v10 = vpop.f32.mrb[6].mxu1  ;;  %v713_v23 = vld [vmem:[%s1581_s4 + $0x10] sm:$0xff] (!%p970_p11)  ;;  %v762_v3 = vld [vmem:[%s1580_s3 + $0x60] sm:$0xff] (!%p970_p11) }
 0x130   : > { %697 = vst [vmem:[%s1581_s4 + $0x30] sm:$0xff] %v681_v1  ;;  %705 = vst [vmem:[%s1581_s4 + $0x70] sm:$0xff] %v689_v2  ;;  %v682_v11 = vadd.f32 %v1015_v9, %v441_v63  ;;  %v690_v12 = vadd.f32 %v1023_v10, %v449_v0  ;;  %v631_v13 = vpop.f32.mrb[7].mxu0  ;;  %v663_v14 = vpop.f32.mrb[7].mxu1  ;;  %v711_v17 = vld [vmem:[%s1581_s4] sm:$0xff] (!%p970_p11)  ;;  %v736_v25 = vadd.f32 (!%p970_p11), %v1403_v18, %v713_v23  ;;  %v721_v58 = vld [vmem:[%s1581_s4 + $0x50] sm:$0xff] (!%p970_p11) }
 0x131   : > { %695 = vst [vmem:[%s1581_s4 + $0x20] sm:$0xff] %v679_v7  ;;  %703 = vst [vmem:[%s1581_s4 + $0x60] sm:$0xff] %v687_v8  ;;  %v680_v15 = vadd.f32 %v631_v13, %v439_v5  ;;  %v688_v16 = vadd.f32 %v663_v14, %v447_v6  ;;  %v734_v20 = vadd.f32 (!%p970_p11), %v1403_v18, %v711_v17  ;;  %v714_v27 = vld [vmem:[%s1581_s4 + $0x18] sm:$0xff] (!%p970_p11)  ;;  %v719_v46 = vld [vmem:[%s1581_s4 + $0x40] sm:$0xff] (!%p970_p11) }
 0x132   : > { %698 = vst [vmem:[%s1581_s4 + $0x38] sm:$0xff] %v682_v11  ;;  %706 = vst [vmem:[%s1581_s4 + $0x78] sm:$0xff] %v690_v12  ;;  %v712_v21 = vld [vmem:[%s1581_s4 + $0x8] sm:$0xff] (!%p970_p11)  ;;  %v737_v30 = vadd.f32 (!%p970_p11), %v1403_v18, %v714_v27  ;;  %v768_v35 = vadd.f32 (!%p970_p11), %v752_v26, %v736_v25  ;;  %v742_v57 = vadd.f32 (!%p970_p11), %v1403_v18, %v719_v46  ;;  %v760_v59 = vld [vmem:[%s1580_s3 + $0x50] sm:$0xff] (!%p970_p11) }
 0x133   : > { %696 = vst [vmem:[%s1581_s4 + $0x28] sm:$0xff] %v680_v15  ;;  %704 = vst [vmem:[%s1581_s4 + $0x68] sm:$0xff] %v688_v16  ;;  %v735_v24 = vadd.f32 (!%p970_p11), %v1403_v18, %v712_v21  ;;  %v766_v29 = vadd.f32 (!%p970_p11), %v750_v19, %v734_v20  ;;  %v720_v52 = vld [vmem:[%s1581_s4 + $0x48] sm:$0xff] (!%p970_p11)  ;;  %v722_v60 = vld [vmem:[%s1581_s4 + $0x58] sm:$0xff] (!%p970_p11)  ;;  %v744_v0 = vadd.f32 (!%p970_p11), %v1403_v18, %v721_v58 }
 0x134   : > { %v769_v42 = vadd.f32 %v753_v28, %v737_v30  ;;  %v784_v48 = vmax.f32 %v768_v35, 0.0  ;;  %v743_v63 = vadd.f32 %v1403_v18, %v720_v52  ;;  %v761_v1 = vld [vmem:[%s1580_s3 + $0x58] sm:$0xff]  ;;  %v774_v6 = vadd.f32 %v758_v51, %v742_v57  ;;  %v763_v9 = vld [vmem:[%s1580_s3 + $0x68] sm:$0xff]  ;;  %v764_v15 = vld [vmem:[%s1580_s3 + $0x70] sm:$0xff] }
 0x135   : > { %v767_v34 = vadd.f32 %v751_v22, %v735_v24  ;;  %v782_v41 = vmax.f32 %v766_v29, 0.0  ;;  %v745_v7 = vadd.f32 %v1403_v18, %v722_v60  ;;  %v776_v12 = vadd.f32 %v760_v59, %v744_v0  ;;  %v765_v26 = vld [vmem:[%s1580_s3 + $0x78] sm:$0xff] }
 0x136   : > { %v785_v54 = vmax.f32 %v769_v42, 0.0  ;;  %800 = vst [vmem:[%s1581_s4 + $0x10] sm:$0xff] %v784_v48  ;;  %v775_v11 = vadd.f32 %v759_v53, %v743_v63  ;;  %v790_v19 = vmax.f32 %v774_v6, 0.0 }
 0x137   : > { %v717_v39 = vld [vmem:[%s1581_s4 + $0x30] sm:$0xff]  ;;  %v783_v47 = vmax.f32 %v767_v34, 0.0  ;;  %798 = vst [vmem:[%s1581_s4] sm:$0xff] %v782_v41  ;;  %v777_v20 = vadd.f32 %v761_v1, %v745_v7  ;;  %v792_v23 = vmax.f32 %v776_v12, 0.0 }
 0x138   : > { %v715_v31 = vld [vmem:[%s1581_s4 + $0x20] sm:$0xff]  ;;  %v740_v43 = vadd.f32 %v1403_v18, %v717_v39  ;;  %801 = vst [vmem:[%s1581_s4 + $0x18] sm:$0xff] %v785_v54  ;;  %v725_v10 = vld [vmem:[%s1581_s4 + $0x70] sm:$0xff]  ;;  %v791_v22 = vmax.f32 %v775_v11, 0.0  ;;  %806 = vst [vmem:[%s1581_s4 + $0x40] sm:$0xff] %v790_v19 }
 0x139   : > { %v738_v36 = vadd.f32 %v1403_v18, %v715_v31  ;;  %v718_v44 = vld [vmem:[%s1581_s4 + $0x38] sm:$0xff]  ;;  %799 = vst [vmem:[%s1581_s4 + $0x8] sm:$0xff] %v783_v47  ;;  %v723_v2 = vld [vmem:[%s1581_s4 + $0x60] sm:$0xff]  ;;  %v748_v21 = vadd.f32 %v1403_v18, %v725_v10  ;;  %v793_v27 = vmax.f32 %v777_v20, 0.0  ;;  %808 = vst [vmem:[%s1581_s4 + $0x50] sm:$0xff] %v792_v23 }
 0x13a   : > { %v716_v33 = vld [vmem:[%s1581_s4 + $0x28] sm:$0xff]  ;;  %v772_v55 = vadd.f32 %v756_v40, %v740_v43  ;;  %v741_v56 = vadd.f32 %v1403_v18, %v718_v44  ;;  %v746_v13 = vadd.f32 %v1403_v18, %v723_v2  ;;  %v726_v16 = vld [vmem:[%s1581_s4 + $0x78] sm:$0xff]  ;;  %807 = vst [vmem:[%s1581_s4 + $0x48] sm:$0xff] %v791_v22 }
 0x13b   : > { %v739_v37 = vadd.f32 %v1403_v18, %v716_v33  ;;  %v770_v49 = vadd.f32 %v754_v32, %v738_v36  ;;  %v724_v8 = vld [vmem:[%s1581_s4 + $0x68] sm:$0xff]  ;;  %v780_v28 = vadd.f32 %v764_v15, %v748_v21  ;;  %v749_v29 = vadd.f32 %v1403_v18, %v726_v16  ;;  %809 = vst [vmem:[%s1581_s4 + $0x58] sm:$0xff] %v793_v27 }
 0x13c   : > { %v788_v4 = vmax.f32 %v772_v55, 0.0  ;;  %v773_v5 = vadd.f32 %v757_v45, %v741_v56  ;;  %v747_v14 = vadd.f32 %v1403_v18, %v724_v8  ;;  %v778_v24 = vadd.f32 %v762_v3, %v746_v13 }
 0x13d   : > { %v771_v50 = vadd.f32 %v755_v38, %v739_v37  ;;  %v786_v61 = vmax.f32 %v770_v49, 0.0  ;;  %v796_v32 = vmax.f32 %v780_v28, 0.0  ;;  %v781_v33 = vadd.f32 %v765_v26, %v749_v29 }
 0x13e   : > { %804 = vst [vmem:[%s1581_s4 + $0x30] sm:$0xff] %v788_v4  ;;  %v789_v17 = vmax.f32 %v773_v5, 0.0  ;;  %v779_v25 = vadd.f32 %v763_v9, %v747_v14  ;;  %v794_v30 = vmax.f32 %v778_v24, 0.0 }
 0x13f   : > { %v787_v62 = vmax.f32 %v771_v50, 0.0  ;;  %802 = vst [vmem:[%s1581_s4 + $0x20] sm:$0xff] %v786_v61  ;;  %812 = vst [vmem:[%s1581_s4 + $0x70] sm:$0xff] %v796_v32  ;;  %v797_v18 = vmax.f32 %v781_v33, 0.0 }
 0x140   : > { %805 = vst [vmem:[%s1581_s4 + $0x38] sm:$0xff] %v789_v17  ;;  %v795_v31 = vmax.f32 %v779_v25, 0.0  ;;  %810 = vst [vmem:[%s1581_s4 + $0x60] sm:$0xff] %v794_v30 }
 0x141   : > { %803 = vst [vmem:[%s1581_s4 + $0x28] sm:$0xff] %v787_v62  ;;  %813 = vst [vmem:[%s1581_s4 + $0x78] sm:$0xff] %v797_v18 }
 0x142   : > { %811 = vst [vmem:[%s1581_s4 + $0x68] sm:$0xff] %v795_v31 }
 0x143 PF: > { %s14_s19 = sadd.s32 1, %s1135_s19   ;;  %s1582_s15 = smov %s1123_s16 }
 0x144   : > { %p11_p12 = scmp.ge.s32.totalorder %s14_s19, 11   ;;  %s1583_s16 = smov %s1198_s23 }
 0x145   : > { %s1584_s17 = smov %s1131_s18  ;;  %s1585_s18 = smov %s1587_s20 }
 0x146   :  { %13 = sbr.rel (!%p11_p12) target bundleno = 3 (0x3), region = 129 }

// kernel: model_forward.20
= control target key start
LH: loop header
LB: loop body
LE: loop exit
PB: predicated region body
PF: predicated region fallthrough
CT: control target
= control target key end

     0   :  { %s1237_s12 = smov 0   ;;  %s1239_s13 = smov 0   ;;  %s1877_s0 = inlined_call_operand.vmem [shape: bf16[128,1152], index: 0, kind: input, shape index: {}]   ;;  %s1878_s1 = inlined_call_operand.vmem [shape: bf16[1152,256], index: 1, kind: input, shape index: {}]   ;;  %s1879_s2 = inlined_call_operand.vmem [shape: f32[1,256], index: 2, kind: input, shape index: {}]   ;;  %s1880_s3 = inlined_call_operand.vmem [shape: f32[128,256], index: 3, kind: output, shape index: {}]  }
   0x1   :  { %s1241_s14 = smov 0   ;;  %s1243_s15 = smov 0  }
   0x2   :  { %s1245_s16 = smov 0  }
   0x3 LB: > { %s25_s17 = sadd.s32 1, %s1209_s15  ;;  %p48_p1 = scmp.ne.s32.totalorder %s1201_s13, %s1197_s12  ;;  %s1213_s16 = sphi %s1245_s16, %s13_s16   ;;  %s1209_s15 = sphi %s1243_s15, %s1884_s15   ;;  %s1205_s14 = sphi %s1241_s14, %s1883_s14   ;;  %s1201_s13 = sphi %s1239_s13, %s1882_s13   ;;  %s1197_s12 = sphi %s1237_s12, %s1881_s12  }
   0x4   : > { %p26_p0 = scmp.ge.s32.totalorder %s25_s17, 9  ;;  %p49_p2 = scmp.eq.s32.totalorder %s1213_s16, 0 }
   0x5   : > { %s41_s19 = sadd.s32 1, %s1201_s13  ;;  %p1046_p5 = scmp.ge.s32.totalorder %s1213_s16, 9 }
   0x6   : > { %s1886_s17 = smov (%p26_p0, %s25_s17), 0  ;;  %p50_p3 = por %p49_p2, %p48_p1 }
   0x7   : > { %s37_s18 = ssub.s32 %s1209_s15, %s1886_s17  ;;  %164 = sbr.rel (%p1046_p5) target bundleno = 28 (0x1c), region = 20 }
   0x8   : > { %p39_p4 = scmp.eq.s32.totalorder %s37_s18, 0 }
   0xa   : > { %s1272_s20 = scalar_select %p39_p4, %s1201_s13, %s41_s19  }
   0xe   : > { %167 = sbr.rel (!%p50_p3) target bundleno = 28 (0x1c), region = 24  ;;  %s169_s21 = sand.u32 (%p50_p3), 1, %s1201_s13  }
   0xf   : > { %s1048_s22 = sshll.u32 (%p50_p3), %s1209_s15, 2  ;;  %s1047_s23 = sshll.u32 (%p50_p3), %s169_s21, 6 }
  0x10   : > { %s1280_s26 = scalar_lea.vmem (%p50_p3), %s1877_s0, %s1048_s22  ;;  %s171_s27 = scalar_lea.vmem (%p50_p3), [#allocation2], %s1047_s23 }
  0x11   : > { %v192_v0 = vld [vmem:[%s1280_s26] sm:$0xf] (%p50_p3)  ;;  %v194_v1 = vld [vmem:[%s1280_s26 + $0x24] sm:$0xf] (%p50_p3)  ;;  %v196_v2 = vld [vmem:[%s1280_s26 + $0x48] sm:$0xf] (%p50_p3) }
  0x12   : > { %193 = vst [vmem:[%s171_s27] sm:$0xf] (%p50_p3), %v192_v0  ;;  %195 = vst [vmem:[%s171_s27 + $0x4] sm:$0xf] (%p50_p3), %v194_v1  ;;  %v198_v3 = vld [vmem:[%s1280_s26 + $0x6c] sm:$0xf] (%p50_p3) }
  0x13   : > { %v200_v4 = vld [vmem:[%s1280_s26 + $0x90] sm:$0xf] (%p50_p3)  ;;  %197 = vst [vmem:[%s171_s27 + $0x8] sm:$0xf] (%p50_p3), %v196_v2  ;;  %199 = vst [vmem:[%s171_s27 + $0xc] sm:$0xf] (%p50_p3), %v198_v3 }
  0x14   : > { %201 = vst [vmem:[%s171_s27 + $0x10] sm:$0xf] (%p50_p3), %v200_v4  ;;  %v202_v5 = vld [vmem:[%s1280_s26 + $0xb4] sm:$0xf] (%p50_p3)  ;;  %v204_v6 = vld [vmem:[%s1280_s26 + $0xd8] sm:$0xf] (%p50_p3) }
  0x15   : > { %v206_v7 = vld [vmem:[%s1280_s26 + $0xfc] sm:$0xf]  ;;  %203 = vst [vmem:[%s171_s27 + $0x14] sm:$0xf] %v202_v5  ;;  %205 = vst [vmem:[%s171_s27 + $0x18] sm:$0xf] %v204_v6 }
  0x16   : > { %207 = vst [vmem:[%s171_s27 + $0x1c] sm:$0xf] %v206_v7  ;;  %v208_v8 = vld [vmem:[%s1280_s26 + $0x120] sm:$0xf]  ;;  %v210_v9 = vld [vmem:[%s1280_s26 + $0x144] sm:$0xf] }
  0x17   : > { %v212_v10 = vld [vmem:[%s1280_s26 + $0x168] sm:$0xf]  ;;  %209 = vst [vmem:[%s171_s27 + $0x20] sm:$0xf] %v208_v8  ;;  %211 = vst [vmem:[%s171_s27 + $0x24] sm:$0xf] %v210_v9 }
  0x18   : > { %213 = vst [vmem:[%s171_s27 + $0x28] sm:$0xf] %v212_v10  ;;  %v214_v11 = vld [vmem:[%s1280_s26 + $0x18c] sm:$0xf]  ;;  %v216_v12 = vld [vmem:[%s1280_s26 + $0x1b0] sm:$0xf] }
  0x19   : > { %v218_v13 = vld [vmem:[%s1280_s26 + $0x1d4] sm:$0xf]  ;;  %215 = vst [vmem:[%s171_s27 + $0x2c] sm:$0xf] %v214_v11  ;;  %217 = vst [vmem:[%s171_s27 + $0x30] sm:$0xf] %v216_v12 }
  0x1a   : > { %219 = vst [vmem:[%s171_s27 + $0x34] sm:$0xf] %v218_v13  ;;  %v220_v14 = vld [vmem:[%s1280_s26 + $0x1f8] sm:$0xf]  ;;  %v222_v15 = vld [vmem:[%s1280_s26 + $0x21c] sm:$0xf] }
  0x1b   : > { %221 = vst [vmem:[%s171_s27 + $0x38] sm:$0xf] %v220_v14  ;;  %223 = vst [vmem:[%s171_s27 + $0x3c] sm:$0xf] %v222_v15 }
  0x1c PF: > { %p1049_p6 = scmp.ge.s32.totalorder %s1213_s16, 1  ;;  %p292_p7 = scmp.lt.s32.totalorder %s1213_s16, 10 }
  0x1e   : > { %p293_p8 = pnand %p1049_p6, %p292_p7 }
  0x1f   : > { %s299_s28 = sand.u32 (!%p293_p8), 1, %s1197_s12   ;;  %s1051_s29 = sshll.u32 (!%p293_p8), %s1205_s14, 4 }
  0x20   : > { %296 = sbr.rel (%p293_p8) target bundleno = 347 (0x15b), region = 69  ;;  %s1050_s30 = sshll.u32 (!%p293_p8), %s299_s28, 6 }
  0x21   : > { %p344_p9 = scmp.lt.s32.totalorder (!%p293_p8), %s1051_s29, 143  ;;  %s1307_s8 = scalar_lea.vmem (!%p293_p8), [#allocation2], %s1050_s30 }
  0x22   : > { %p1054_p10 = scmp.ne.s32.totalorder (!%p293_p8), %s1205_s14, 0 }
  0x27   : > { %s1888_s29 = smov (!%p344_p9, %s1051_s29), 143  ;;  %375 = sbr.rel (%p1054_p10) target bundleno = 57 (0x39), region = 77 }
  0x28   : > { %s1084_s4 = sshll.u32 %s1888_s29, 3  ;;  %v1215_v16 = vmov (!%p1054_p10), 0.0  }
  0x29   : > { %s1305_s7 = scalar_lea.vmem %s1878_s1, %s1084_s4  ;;  %376 = vst [vmem:[%s1880_s3] sm:$0xff] (!%p1054_p10), %v1215_v16  ;;  %377 = vst [vmem:[%s1880_s3 + $0x8] sm:$0xff] (!%p1054_p10), %v1215_v16 }
  0x2a   : > { %378 = vst [vmem:[%s1880_s3 + $0x10] sm:$0xff] (!%p1054_p10), %v1215_v16  ;;  %379 = vst [vmem:[%s1880_s3 + $0x18] sm:$0xff] (!%p1054_p10), %v1215_v16 }
  0x2b   : > { %380 = vst [vmem:[%s1880_s3 + $0x20] sm:$0xff] (!%p1054_p10), %v1215_v16  ;;  %381 = vst [vmem:[%s1880_s3 + $0x28] sm:$0xff] (!%p1054_p10), %v1215_v16 }
  0x2c   : > { %382 = vst [vmem:[%s1880_s3 + $0x30] sm:$0xff] (!%p1054_p10), %v1215_v16  ;;  %383 = vst [vmem:[%s1880_s3 + $0x38] sm:$0xff] (!%p1054_p10), %v1215_v16 }
  0x2d   : > { %384 = vst [vmem:[%s1880_s3 + $0x40] sm:$0xff] (!%p1054_p10), %v1215_v16  ;;  %385 = vst [vmem:[%s1880_s3 + $0x48] sm:$0xff] (!%p1054_p10), %v1215_v16 }
  0x2e   : > { %386 = vst [vmem:[%s1880_s3 + $0x50] sm:$0xff] %v1215_v16  ;;  %387 = vst [vmem:[%s1880_s3 + $0x58] sm:$0xff] %v1215_v16 }
  0x2f   : > { %388 = vst [vmem:[%s1880_s3 + $0x60] sm:$0xff] %v1215_v16  ;;  %389 = vst [vmem:[%s1880_s3 + $0x68] sm:$0xff] %v1215_v16 }
  0x30   : > { %390 = vst [vmem:[%s1880_s3 + $0x70] sm:$0xff] %v1215_v16  ;;  %391 = vst [vmem:[%s1880_s3 + $0x78] sm:$0xff] %v1215_v16 }
  0x31   : > { %392 = vst [vmem:[%s1880_s3 + $0x80] sm:$0xff] %v1215_v16  ;;  %393 = vst [vmem:[%s1880_s3 + $0x88] sm:$0xff] %v1215_v16 }
  0x32   : > { %394 = vst [vmem:[%s1880_s3 + $0x90] sm:$0xff] %v1215_v16  ;;  %395 = vst [vmem:[%s1880_s3 + $0x98] sm:$0xff] %v1215_v16 }
  0x33   : > { %396 = vst [vmem:[%s1880_s3 + $0xa0] sm:$0xff] %v1215_v16  ;;  %397 = vst [vmem:[%s1880_s3 + $0xa8] sm:$0xff] %v1215_v16 }
  0x34   : > { %398 = vst [vmem:[%s1880_s3 + $0xb0] sm:$0xff] %v1215_v16  ;;  %399 = vst [vmem:[%s1880_s3 + $0xb8] sm:$0xff] %v1215_v16 }
  0x35   : > { %400 = vst [vmem:[%s1880_s3 + $0xc0] sm:$0xff] %v1215_v16  ;;  %401 = vst [vmem:[%s1880_s3 + $0xc8] sm:$0xff] %v1215_v16 }
  0x36   : > { %402 = vst [vmem:[%s1880_s3 + $0xd0] sm:$0xff] %v1215_v16  ;;  %403 = vst [vmem:[%s1880_s3 + $0xd8] sm:$0xff] %v1215_v16 }
  0x37   : > { %404 = vst [vmem:[%s1880_s3 + $0xe0] sm:$0xff] %v1215_v16  ;;  %405 = vst [vmem:[%s1880_s3 + $0xe8] sm:$0xff] %v1215_v16 }
  0x38   : > { %406 = vst [vmem:[%s1880_s3 + $0xf0] sm:$0xff] %v1215_v16  ;;  %407 = vst [vmem:[%s1880_s3 + $0xf8] sm:$0xff] %v1215_v16 }
  0x39 PF: > { %v1143_v17 = vld [vmem:[%s1305_s7 + $0x4] ss:$8 sps:$4 sm:$0xff]   ;;  %v1145_v18 = vld [vmem:[%s1305_s7] ss:$8 sps:$4 sm:$0xff]   ;;  %v1216_v19 = vmov 0   ;;  %v1171_v38 = vld [vmem:[%s1307_s8 + $0x10] sm:$0xff]  }
  0x3a   : > { %632 = vmatprep.mubr.bf16.mxu0 %v1216_v19  ;;  %672 = vmatprep.mubr.bf16.mxu1 %v1216_v19  ;;  %v1146_v20 = vld [vmem:[%s1305_s7 + $0x14] ss:$8 sps:$4 sm:$0xff]   ;;  %v1148_v21 = vld [vmem:[%s1305_s7 + $0x10] ss:$8 sps:$4 sm:$0xff]   ;;  %v1149_v22 = vld [vmem:[%s1305_s7 + $0x24] ss:$8 sps:$4 sm:$0xff]  }
  0x3b   : > { %600 = vmatprep.subr.bf16.mxu0 %v1143_v17  ;;  %1085 = vmatprep.subr.bf16.mxu1 %v1143_v17  ;;  %v1151_v23 = vld [vmem:[%s1305_s7 + $0x20] ss:$8 sps:$4 sm:$0xff]   ;;  %v1152_v24 = vld [vmem:[%s1305_s7 + $0x34] ss:$8 sps:$4 sm:$0xff]   ;;  %v1154_v25 = vld [vmem:[%s1305_s7 + $0x30] ss:$8 sps:$4 sm:$0xff]  }
  0x3c   : > { %601 = vmatpush1.bf16.msra.mxu0 %v1145_v18  ;;  %1093 = vmatpush1.bf16.msra.mxu1 %v1145_v18  ;;  %v1155_v26 = vld [vmem:[%s1305_s7 + $0x44] ss:$8 sps:$4 sm:$0xff]   ;;  %v1157_v27 = vld [vmem:[%s1305_s7 + $0x40] ss:$8 sps:$4 sm:$0xff]   ;;  %v1158_v28 = vld [vmem:[%s1305_s7 + $0x54] ss:$8 sps:$4 sm:$0xff]  }
  0x3d   : > { %602 = vmatprep.subr.bf16.mxu0 %v1146_v20  ;;  %1086 = vmatprep.subr.bf16.mxu1 %v1146_v20  ;;  %v1160_v29 = vld [vmem:[%s1305_s7 + $0x50] ss:$8 sps:$4 sm:$0xff]   ;;  %v1161_v30 = vld [vmem:[%s1305_s7 + $0x64] ss:$8 sps:$4 sm:$0xff]   ;;  %v1163_v31 = vld [vmem:[%s1305_s7 + $0x60] ss:$8 sps:$4 sm:$0xff]  }
  0x3e   : > { %v1164_v32 = vld [vmem:[%s1305_s7 + $0x74] ss:$8 sps:$4 sm:$0xff]   ;;  %v1166_v33 = vld [vmem:[%s1305_s7 + $0x70] ss:$8 sps:$4 sm:$0xff]   ;;  %v1167_v34 = vld [vmem:[%s1307_s8] sm:$0xff]   ;;  %p1079_p11 = scmp.ne.s32.totalorder %s1205_s14, 8 }
  0x3f   : > { %v1168_v35 = vld [vmem:[%s1307_s8 + $0x20] sm:$0xff]   ;;  %v1169_v36 = vld [vmem:[%s1307_s8 + $0x8] sm:$0xff]   ;;  %v1172_v39 = vld [vmem:[%s1307_s8 + $0x30] sm:$0xff]  }
  0x40   : > { %603 = vmatpush1.bf16.msra.mxu0 %v1148_v21  ;;  %1094 = vmatpush1.bf16.msra.mxu1 %v1148_v21  ;;  %v1170_v37 = vld [vmem:[%s1307_s8 + $0x28] sm:$0xff]   ;;  %v1173_v40 = vld [vmem:[%s1307_s8 + $0x18] sm:$0xff]   ;;  %v408_v42 = vld [vmem:[%s1880_s3] sm:$0xff] }
  0x41   : > { %604 = vmatprep.subr.bf16.mxu0 %v1149_v22  ;;  %1087 = vmatprep.subr.bf16.mxu1 %v1149_v22  ;;  %v1174_v41 = vld [vmem:[%s1307_s8 + $0x38] sm:$0xff]   ;;  %v424_v43 = vld [vmem:[%s1880_s3 + $0x80] sm:$0xff]  ;;  %v409_v44 = vld [vmem:[%s1880_s3 + $0x8] sm:$0xff] }
  0x42   : > { %v425_v45 = vld [vmem:[%s1880_s3 + $0x88] sm:$0xff]  ;;  %v410_v48 = vld [vmem:[%s1880_s3 + $0x10] sm:$0xff]  ;;  %v411_v54 = vld [vmem:[%s1880_s3 + $0x18] sm:$0xff] }
  0x43   : > { %v426_v49 = vld [vmem:[%s1880_s3 + $0x90] sm:$0xff]  ;;  %v427_v55 = vld [vmem:[%s1880_s3 + $0x98] sm:$0xff]  ;;  %v412_v2 = vld [vmem:[%s1880_s3 + $0x20] sm:$0xff] }
  0x44   : > { %605 = vmatpush1.bf16.msra.mxu0 %v1151_v23  ;;  %1095 = vmatpush1.bf16.msra.mxu1 %v1151_v23  ;;  %v428_v3 = vld [vmem:[%s1880_s3 + $0xa0] sm:$0xff]  ;;  %v413_v4 = vld [vmem:[%s1880_s3 + $0x28] sm:$0xff]  ;;  %v414_v8 = vld [vmem:[%s1880_s3 + $0x30] sm:$0xff] }
  0x45   : > { %606 = vmatprep.subr.bf16.mxu0 %v1152_v24  ;;  %1088 = vmatprep.subr.bf16.mxu1 %v1152_v24  ;;  %v429_v5 = vld [vmem:[%s1880_s3 + $0xa8] sm:$0xff]  ;;  %v430_v9 = vld [vmem:[%s1880_s3 + $0xb0] sm:$0xff]  ;;  %v415_v14 = vld [vmem:[%s1880_s3 + $0x38] sm:$0xff] }
  0x46   : > { %v431_v15 = vld [vmem:[%s1880_s3 + $0xb8] sm:$0xff] }
  0x48   : > { %607 = vmatpush1.bf16.msra.mxu0 %v1154_v25  ;;  %1096 = vmatpush1.bf16.msra.mxu1 %v1154_v25 }
  0x49   : > { %608 = vmatprep.subr.bf16.mxu0 %v1155_v26  ;;  %1089 = vmatprep.subr.bf16.mxu1 %v1155_v26  ;;  %v416_v26 = vld [vmem:[%s1880_s3 + $0x40] sm:$0xff] }
  0x4c   : > { %609 = vmatpush1.bf16.msra.mxu0 %v1157_v27  ;;  %1097 = vmatpush1.bf16.msra.mxu1 %v1157_v27  ;;  %v432_v27 = vld [vmem:[%s1880_s3 + $0xc0] sm:$0xff] }
  0x4d   : > { %610 = vmatprep.subr.bf16.mxu0 %v1158_v28  ;;  %1090 = vmatprep.subr.bf16.mxu1 %v1158_v28  ;;  %v417_v28 = vld [vmem:[%s1880_s3 + $0x48] sm:$0xff] }
  0x50   : > { %611 = vmatpush1.bf16.msra.mxu0 %v1160_v29  ;;  %1098 = vmatpush1.bf16.msra.mxu1 %v1160_v29  ;;  %v433_v29 = vld [vmem:[%s1880_s3 + $0xc8] sm:$0xff] }
  0x51   : > { %612 = vmatprep.subr.bf16.mxu0 %v1161_v30  ;;  %1091 = vmatprep.subr.bf16.mxu1 %v1161_v30 }
  0x54   : > { %613 = vmatpush1.bf16.msra.mxu0 %v1163_v31  ;;  %1099 = vmatpush1.bf16.msra.mxu1 %v1163_v31 }
  0x55   : > { %614 = vmatprep.subr.bf16.mxu0 %v1164_v32  ;;  %1092 = vmatprep.subr.bf16.mxu1 %v1164_v32  ;;  %v418_v32 = vld [vmem:[%s1880_s3 + $0x50] sm:$0xff] }
  0x58   : > { %615 = vmatpush1.bf16.msra.mxu0 %v1166_v33  ;;  %1100 = vmatpush1.bf16.msra.mxu1 %v1166_v33  ;;  %v434_v33 = vld [vmem:[%s1880_s3 + $0xd0] sm:$0xff] }
  0x5b   : > { %633 = vmatmul.mubr.bf16.vlgmr.msra.gmra.mrb[0].mxu0 %v1167_v34  ;;  %673 = vmatmul.mubr.bf16.vlgmr.msra.gmra.mrb[0].mxu1 %v1168_v35 }
  0x5c   : > { %642 = vmatprep.mubr.bf16.mxu0 %v1216_v19  ;;  %682 = vmatprep.mubr.bf16.mxu1 %v1216_v19 }
  0x63   : > { %643 = vmatmul.mubr.bf16.gmra.mrb[4].mxu0 %v1169_v36  ;;  %683 = vmatmul.mubr.bf16.gmra.mrb[4].mxu1 %v1170_v37 }
  0x64   : > { %652 = vmatprep.mubr.bf16.mxu0 %v1216_v19  ;;  %692 = vmatprep.mubr.bf16.mxu1 %v1216_v19 }
  0x6b   : > { %653 = vmatmul.mubr.bf16.gmra.mrb[8].mxu0 %v1171_v38  ;;  %693 = vmatmul.mubr.bf16.gmra.mrb[8].mxu1 %v1172_v39  ;;  %v419_v38 = vld [vmem:[%s1880_s3 + $0x58] sm:$0xff] }
  0x6c   : > { %662 = vmatprep.mubr.bf16.mxu0 %v1216_v19  ;;  %702 = vmatprep.mubr.bf16.mxu1 %v1216_v19  ;;  %v435_v39 = vld [vmem:[%s1880_s3 + $0xd8] sm:$0xff] }
  0x73   : > { %663 = vmatmul.mubr.bf16.gmra.mrb[12].mxu0 %v1173_v40  ;;  %703 = vmatmul.mubr.bf16.gmra.mrb[12].mxu1 %v1174_v41 }
 0x12e   : > { %v634_v46 = vpop.f32.mrb[0].mxu0  ;;  %v674_v47 = vpop.f32.mrb[0].mxu1 }
 0x12f   : > { %v713_v50 = vadd.f32 %v634_v46, %v408_v42  ;;  %v729_v51 = vadd.f32 %v674_v47, %v424_v43  ;;  %v636_v52 = vpop.f32.mrb[1].mxu0  ;;  %v676_v53 = vpop.f32.mrb[1].mxu1 }
 0x130   : > { %v714_v56 = vadd.f32 %v636_v52, %v409_v44  ;;  %v730_v57 = vadd.f32 %v676_v53, %v425_v45  ;;  %v638_v58 = vpop.f32.mrb[2].mxu0  ;;  %v678_v59 = vpop.f32.mrb[2].mxu1  ;;  %v421_v52 = vld [vmem:[%s1880_s3 + $0x68] sm:$0xff] }
 0x131   : > { %745 = vst [vmem:[%s1880_s3] sm:$0xff] %v713_v50  ;;  %761 = vst [vmem:[%s1880_s3 + $0x80] sm:$0xff] %v729_v51  ;;  %v715_v60 = vadd.f32 %v638_v58, %v410_v48  ;;  %v731_v61 = vadd.f32 %v678_v59, %v426_v49  ;;  %v640_v62 = vpop.f32.mrb[3].mxu0  ;;  %v680_v63 = vpop.f32.mrb[3].mxu1  ;;  %v420_v50 = vld [vmem:[%s1880_s3 + $0x60] sm:$0xff]  ;;  %v437_v53 = vld [vmem:[%s1880_s3 + $0xe8] sm:$0xff] }
 0x132   : > { %746 = vst [vmem:[%s1880_s3 + $0x8] sm:$0xff] %v714_v56  ;;  %762 = vst [vmem:[%s1880_s3 + $0x88] sm:$0xff] %v730_v57  ;;  %v716_v0 = vadd.f32 %v640_v62, %v411_v54  ;;  %v732_v1 = vadd.f32 %v680_v63, %v427_v55  ;;  %v436_v51 = vld [vmem:[%s1880_s3 + $0xe0] sm:$0xff]  ;;  %v422_v56 = vld [vmem:[%s1880_s3 + $0x70] sm:$0xff] }
 0x133   : > { %747 = vst [vmem:[%s1880_s3 + $0x10] sm:$0xff] %v715_v60  ;;  %763 = vst [vmem:[%s1880_s3 + $0x90] sm:$0xff] %v731_v61  ;;  %v438_v57 = vld [vmem:[%s1880_s3 + $0xf0] sm:$0xff]  ;;  %v423_v62 = vld [vmem:[%s1880_s3 + $0x78] sm:$0xff] }
 0x134   : > { %748 = vst [vmem:[%s1880_s3 + $0x18] sm:$0xff] %v716_v0  ;;  %764 = vst [vmem:[%s1880_s3 + $0x98] sm:$0xff] %v732_v1  ;;  %v439_v63 = vld [vmem:[%s1880_s3 + $0xf8] sm:$0xff] }
 0x136   : > { %v644_v6 = vpop.f32.mrb[4].mxu0  ;;  %v684_v7 = vpop.f32.mrb[4].mxu1 }
 0x137   : > { %v717_v10 = vadd.f32 %v644_v6, %v412_v2  ;;  %v733_v11 = vadd.f32 %v684_v7, %v428_v3  ;;  %v646_v12 = vpop.f32.mrb[5].mxu0  ;;  %v686_v13 = vpop.f32.mrb[5].mxu1 }
 0x138   : > { %v718_v16 = vadd.f32 %v646_v12, %v413_v4  ;;  %v734_v17 = vadd.f32 %v686_v13, %v429_v5  ;;  %v648_v18 = vpop.f32.mrb[6].mxu0  ;;  %v688_v19 = vpop.f32.mrb[6].mxu1  ;;  %v813_v12 = vld [vmem:[%s1879_s2] sm:$0x3] (!%p1079_p11) }
 0x139   : > { %749 = vst [vmem:[%s1880_s3 + $0x20] sm:$0xff] %v717_v10  ;;  %765 = vst [vmem:[%s1880_s3 + $0xa0] sm:$0xff] %v733_v11  ;;  %v719_v20 = vadd.f32 %v648_v18, %v414_v8  ;;  %v735_v21 = vadd.f32 %v688_v19, %v430_v9  ;;  %v650_v22 = vpop.f32.mrb[7].mxu0  ;;  %v690_v23 = vpop.f32.mrb[7].mxu1  ;;  %v815_v10 = vlaneseq (!%p1079_p11)  ;;  %v781_v13 = vld [vmem:[%s1880_s3] sm:$0xff] (!%p1079_p11) }
 0x13a   : > { %750 = vst [vmem:[%s1880_s3 + $0x28] sm:$0xff] %v718_v16  ;;  %766 = vst [vmem:[%s1880_s3 + $0xa8] sm:$0xff] %v734_v17  ;;  %v720_v24 = vadd.f32 %v650_v22, %v415_v14  ;;  %v736_v25 = vadd.f32 %v690_v23, %v431_v15  ;;  %v782_v15 = vld [vmem:[%s1880_s3 + $0x8] sm:$0xff] (!%p1079_p11)  ;;  %v783_v17 = vld [vmem:[%s1880_s3 + $0x10] sm:$0xff] (!%p1079_p11) }
 0x13b   : > { %751 = vst [vmem:[%s1880_s3 + $0x30] sm:$0xff] %v719_v20  ;;  %767 = vst [vmem:[%s1880_s3 + $0xb0] sm:$0xff] %v735_v21  ;;  %v816_v11 = vshrl.u32 (!%p1079_p11), %v815_v10, 7  ;;  %v784_v18 = vld [vmem:[%s1880_s3 + $0x18] sm:$0xff] (!%p1079_p11) }
 0x13c   : > { %752 = vst [vmem:[%s1880_s3 + $0x38] sm:$0xff] %v720_v24  ;;  %768 = vst [vmem:[%s1880_s3 + $0xb8] sm:$0xff] %v736_v25 }
 0x13d   : > { %v817_v14 = vsub.s32 (!%p1079_p11), 0, %v816_v11  ;;  %v821_v16 = vsub.s32 (!%p1079_p11), 1, %v816_v11 }
 0x13e   : > { %v654_v30 = vpop.f32.mrb[8].mxu0  ;;  %v694_v31 = vpop.f32.mrb[8].mxu1 }
 0x13f   : > { %v721_v34 = vadd.f32 %v654_v30, %v416_v26  ;;  %v737_v35 = vadd.f32 %v694_v31, %v432_v27  ;;  %v656_v36 = vpop.f32.mrb[9].mxu0  ;;  %v696_v37 = vpop.f32.mrb[9].mxu1  ;;  %v1649_v20 = vrot.slane (!%p1079_p11), %v813_v12, %v817_v14  ;;  %v1651_v21 = vrot.slane (!%p1079_p11), %v813_v12, %v821_v16 }
 0x140   : > { %v722_v40 = vadd.f32 %v656_v36, %v417_v28  ;;  %v738_v41 = vadd.f32 %v696_v37, %v433_v29  ;;  %v658_v42 = vpop.f32.mrb[10].mxu0  ;;  %v698_v43 = vpop.f32.mrb[10].mxu1  ;;  %v785_v19 = vld [vmem:[%s1880_s3 + $0x20] sm:$0xff] (!%p1079_p11) }
 0x141   : > { %753 = vst [vmem:[%s1880_s3 + $0x40] sm:$0xff] %v721_v34  ;;  %769 = vst [vmem:[%s1880_s3 + $0xc0] sm:$0xff] %v737_v35  ;;  %v723_v44 = vadd.f32 %v658_v42, %v418_v32  ;;  %v739_v45 = vadd.f32 %v698_v43, %v434_v33  ;;  %v660_v46 = vpop.f32.mrb[11].mxu0  ;;  %v700_v47 = vpop.f32.mrb[11].mxu1  ;;  %v786_v22 = vld [vmem:[%s1880_s3 + $0x28] sm:$0xff] (!%p1079_p11)  ;;  %v825_v25 = vadd.f32 (!%p1079_p11), %v1649_v20, %v781_v13 }
 0x142   : > { %754 = vst [vmem:[%s1880_s3 + $0x48] sm:$0xff] %v722_v40  ;;  %770 = vst [vmem:[%s1880_s3 + $0xc8] sm:$0xff] %v738_v41  ;;  %v724_v48 = vadd.f32 %v660_v46, %v419_v38  ;;  %v740_v49 = vadd.f32 %v700_v47, %v435_v39  ;;  %v787_v23 = vld [vmem:[%s1880_s3 + $0x30] sm:$0xff] (!%p1079_p11)  ;;  %v826_v26 = vadd.f32 (!%p1079_p11), %v1651_v21, %v782_v15 }
 0x143   : > { %755 = vst [vmem:[%s1880_s3 + $0x50] sm:$0xff] %v723_v44  ;;  %771 = vst [vmem:[%s1880_s3 + $0xd0] sm:$0xff] %v739_v45  ;;  %v788_v24 = vld [vmem:[%s1880_s3 + $0x38] sm:$0xff] (!%p1079_p11)  ;;  %v827_v27 = vadd.f32 (!%p1079_p11), %v1649_v20, %v783_v17  ;;  %v828_v28 = vadd.f32 (!%p1079_p11), %v1651_v21, %v784_v18  ;;  %v829_v32 = vadd.f32 (!%p1079_p11), %v1649_v20, %v785_v19  ;;  %v857_v39 = vmax.f32 (!%p1079_p11), %v825_v25, 0.0 }
 0x144   : > { %756 = vst [vmem:[%s1880_s3 + $0x58] sm:$0xff] %v724_v48  ;;  %772 = vst [vmem:[%s1880_s3 + $0xd8] sm:$0xff] %v740_v49  ;;  %v830_v33 = vadd.f32 (!%p1079_p11), %v1651_v21, %v786_v22  ;;  %v831_v34 = vadd.f32 (!%p1079_p11), %v1649_v20, %v787_v23  ;;  %v832_v35 = vadd.f32 (!%p1079_p11), %v1651_v21, %v788_v24  ;;  %v858_v40 = vmax.f32 (!%p1079_p11), %v826_v26, 0.0 }
 0x145   : > { %v859_v41 = vmax.f32 (!%p1079_p11), %v827_v27, 0.0  ;;  %v860_v42 = vmax.f32 (!%p1079_p11), %v828_v28, 0.0  ;;  %v861_v45 = vmax.f32 (!%p1079_p11), %v829_v32, 0.0  ;;  %889 = vst [vmem:[%s1880_s3] sm:$0xff] (!%p1079_p11), %v857_v39 }
 0x146   : > { %v664_v54 = vpop.f32.mrb[12].mxu0  ;;  %v704_v55 = vpop.f32.mrb[12].mxu1  ;;  %780 = sbr.rel (%p1079_p11) target bundleno = 347 (0x15b), region = 81  ;;  %v862_v46 = vmax.f32 (!%p1079_p11), %v830_v33, 0.0  ;;  %v863_v47 = vmax.f32 (!%p1079_p11), %v831_v34, 0.0  ;;  %v864_v48 = vmax.f32 (!%p1079_p11), %v832_v35, 0.0 }
 0x147   : > { %v725_v58 = vadd.f32 %v664_v54, %v420_v50  ;;  %v741_v59 = vadd.f32 %v704_v55, %v436_v51  ;;  %v666_v60 = vpop.f32.mrb[13].mxu0  ;;  %v706_v61 = vpop.f32.mrb[13].mxu1  ;;  %890 = vst [vmem:[%s1880_s3 + $0x8] sm:$0xff] (!%p1079_p11), %v858_v40  ;;  %891 = vst [vmem:[%s1880_s3 + $0x10] sm:$0xff] (!%p1079_p11), %v859_v41  ;;  %v798_v54 = vld [vmem:[%s1880_s3 + $0x88] sm:$0xff] (!%p1079_p11)  ;;  %v799_v55 = vld [vmem:[%s1880_s3 + $0x90] sm:$0xff] (!%p1079_p11) }
 0x148   : > { %v726_v0 = vadd.f32 %v666_v60, %v421_v52  ;;  %v742_v1 = vadd.f32 %v706_v61, %v437_v53  ;;  %v668_v2 = vpop.f32.mrb[14].mxu0  ;;  %v708_v3 = vpop.f32.mrb[14].mxu1  ;;  %v789_v29 = vld [vmem:[%s1880_s3 + $0x40] sm:$0xff] (!%p1079_p11)  ;;  %892 = vst [vmem:[%s1880_s3 + $0x18] sm:$0xff] (!%p1079_p11), %v860_v42  ;;  %893 = vst [vmem:[%s1880_s3 + $0x20] sm:$0xff] (!%p1079_p11), %v861_v45  ;;  %v800_v60 = vld [vmem:[%s1880_s3 + $0x98] sm:$0xff] (!%p1079_p11)  ;;  %v842_v10 = vadd.f32 (!%p1079_p11), %v1651_v21, %v798_v54 }
 0x149   : > { %757 = vst [vmem:[%s1880_s3 + $0x60] sm:$0xff] %v725_v58  ;;  %773 = vst [vmem:[%s1880_s3 + $0xe0] sm:$0xff] %v741_v59  ;;  %v727_v4 = vadd.f32 %v668_v2, %v422_v56  ;;  %v743_v5 = vadd.f32 %v708_v3, %v438_v57  ;;  %v670_v6 = vpop.f32.mrb[15].mxu0  ;;  %v710_v7 = vpop.f32.mrb[15].mxu1  ;;  %v790_v30 = vld [vmem:[%s1880_s3 + $0x48] sm:$0xff] (!%p1079_p11)  ;;  %v833_v49 = vadd.f32 (!%p1079_p11), %v1649_v20, %v789_v29  ;;  %v797_v53 = vld [vmem:[%s1880_s3 + $0x80] sm:$0xff] (!%p1079_p11) }
 0x14a   : > { %758 = vst [vmem:[%s1880_s3 + $0x68] sm:$0xff] %v726_v0  ;;  %774 = vst [vmem:[%s1880_s3 + $0xe8] sm:$0xff] %v742_v1  ;;  %v728_v8 = vadd.f32 %v670_v6, %v423_v62  ;;  %v744_v9 = vadd.f32 %v710_v7, %v439_v63  ;;  %v791_v31 = vld [vmem:[%s1880_s3 + $0x50] sm:$0xff] (!%p1079_p11)  ;;  %v834_v50 = vadd.f32 (!%p1079_p11), %v1651_v21, %v790_v30  ;;  %v801_v61 = vld [vmem:[%s1880_s3 + $0xa0] sm:$0xff] (!%p1079_p11)  ;;  %v874_v26 = vmax.f32 (!%p1079_p11), %v842_v10, 0.0 }
 0x14b   : > { %759 = vst [vmem:[%s1880_s3 + $0x70] sm:$0xff] %v727_v4  ;;  %775 = vst [vmem:[%s1880_s3 + $0xf0] sm:$0xff] %v743_v5  ;;  %v792_v36 = vld [vmem:[%s1880_s3 + $0x58] sm:$0xff] (!%p1079_p11)  ;;  %v835_v51 = vadd.f32 (!%p1079_p11), %v1649_v20, %v791_v31  ;;  %v802_v62 = vld [vmem:[%s1880_s3 + $0xa8] sm:$0xff] (!%p1079_p11)  ;;  %v865_v63 = vmax.f32 (!%p1079_p11), %v833_v49, 0.0  ;;  %v843_v11 = vadd.f32 (!%p1079_p11), %v1649_v20, %v799_v55  ;;  %v844_v12 = vadd.f32 (!%p1079_p11), %v1651_v21, %v800_v60 }
 0x14c   : > { %760 = vst [vmem:[%s1880_s3 + $0x78] sm:$0xff] %v728_v8  ;;  %776 = vst [vmem:[%s1880_s3 + $0xf8] sm:$0xff] %v744_v9  ;;  %v836_v52 = vadd.f32 (!%p1079_p11), %v1651_v21, %v792_v36  ;;  %v866_v0 = vmax.f32 (!%p1079_p11), %v834_v50, 0.0  ;;  %v803_v3 = vld [vmem:[%s1880_s3 + $0xb0] sm:$0xff] (!%p1079_p11)  ;;  %v804_v4 = vld [vmem:[%s1880_s3 + $0xb8] sm:$0xff] (!%p1079_p11)  ;;  %v841_v9 = vadd.f32 (!%p1079_p11), %v1649_v20, %v797_v53  ;;  %v845_v16 = vadd.f32 (!%p1079_p11), %v1649_v20, %v801_v61 }
 0x14d   : > { %894 = vst [vmem:[%s1880_s3 + $0x28] sm:$0xff] %v862_v46  ;;  %895 = vst [vmem:[%s1880_s3 + $0x30] sm:$0xff] %v863_v47  ;;  %v867_v1 = vmax.f32 %v835_v51, 0.0  ;;  %v805_v13 = vld [vmem:[%s1880_s3 + $0xc0] sm:$0xff]  ;;  %v806_v14 = vld [vmem:[%s1880_s3 + $0xc8] sm:$0xff]  ;;  %v846_v17 = vadd.f32 %v1651_v21, %v802_v62  ;;  %v847_v18 = vadd.f32 %v1649_v20, %v803_v3  ;;  %v848_v19 = vadd.f32 %v1651_v21, %v804_v4 }
 0x14e   : > { %896 = vst [vmem:[%s1880_s3 + $0x38] sm:$0xff] %v864_v48  ;;  %v868_v2 = vmax.f32 %v836_v52, 0.0  ;;  %897 = vst [vmem:[%s1880_s3 + $0x40] sm:$0xff] %v865_v63  ;;  %v807_v15 = vld [vmem:[%s1880_s3 + $0xd0] sm:$0xff]  ;;  %v808_v22 = vld [vmem:[%s1880_s3 + $0xd8] sm:$0xff]  ;;  %v873_v25 = vmax.f32 %v841_v9, 0.0  ;;  %v849_v35 = vadd.f32 %v1649_v20, %v805_v13  ;;  %v850_v36 = vadd.f32 %v1651_v21, %v806_v14 }
 0x14f   : > { %898 = vst [vmem:[%s1880_s3 + $0x48] sm:$0xff] %v866_v0  ;;  %899 = vst [vmem:[%s1880_s3 + $0x50] sm:$0xff] %v867_v1  ;;  %v875_v27 = vmax.f32 %v843_v11, 0.0  ;;  %v876_v28 = vmax.f32 %v844_v12, 0.0  ;;  %v877_v31 = vmax.f32 %v845_v16, 0.0  ;;  %v878_v32 = vmax.f32 %v846_v17, 0.0 }
 0x150   : > { %v793_v37 = vld [vmem:[%s1880_s3 + $0x60] sm:$0xff]  ;;  %900 = vst [vmem:[%s1880_s3 + $0x58] sm:$0xff] %v868_v2  ;;  %v879_v33 = vmax.f32 %v847_v18, 0.0  ;;  %v880_v34 = vmax.f32 %v848_v19, 0.0  ;;  %905 = vst [vmem:[%s1880_s3 + $0x80] sm:$0xff] %v873_v25 }
 0x151   : > { %v794_v38 = vld [vmem:[%s1880_s3 + $0x68] sm:$0xff]  ;;  %v837_v56 = vadd.f32 %v1649_v20, %v793_v37  ;;  %v809_v23 = vld [vmem:[%s1880_s3 + $0xe0] sm:$0xff]  ;;  %906 = vst [vmem:[%s1880_s3 + $0x88] sm:$0xff] %v874_v26  ;;  %907 = vst [vmem:[%s1880_s3 + $0x90] sm:$0xff] %v875_v27  ;;  %v851_v37 = vadd.f32 %v1649_v20, %v807_v15 }
 0x152   : > { %v795_v43 = vld [vmem:[%s1880_s3 + $0x70] sm:$0xff]  ;;  %v838_v57 = vadd.f32 %v1651_v21, %v794_v38  ;;  %v810_v24 = vld [vmem:[%s1880_s3 + $0xe8] sm:$0xff]  ;;  %908 = vst [vmem:[%s1880_s3 + $0x98] sm:$0xff] %v876_v28  ;;  %v852_v38 = vadd.f32 %v1651_v21, %v808_v22  ;;  %909 = vst [vmem:[%s1880_s3 + $0xa0] sm:$0xff] %v877_v31  ;;  %v853_v39 = vadd.f32 %v1649_v20, %v809_v23 }
 0x153   : > { %v796_v44 = vld [vmem:[%s1880_s3 + $0x78] sm:$0xff]  ;;  %v839_v58 = vadd.f32 %v1649_v20, %v795_v43  ;;  %v869_v5 = vmax.f32 %v837_v56, 0.0  ;;  %v811_v29 = vld [vmem:[%s1880_s3 + $0xf0] sm:$0xff]  ;;  %910 = vst [vmem:[%s1880_s3 + $0xa8] sm:$0xff] %v878_v32  ;;  %911 = vst [vmem:[%s1880_s3 + $0xb0] sm:$0xff] %v879_v33  ;;  %v854_v40 = vadd.f32 %v1651_v21, %v810_v24  ;;  %v881_v43 = vmax.f32 %v849_v35, 0.0 }
 0x154   : > { %v840_v59 = vadd.f32 %v1651_v21, %v796_v44  ;;  %v870_v6 = vmax.f32 %v838_v57, 0.0  ;;  %v812_v30 = vld [vmem:[%s1880_s3 + $0xf8] sm:$0xff]  ;;  %912 = vst [vmem:[%s1880_s3 + $0xb8] sm:$0xff] %v880_v34  ;;  %v855_v41 = vadd.f32 %v1649_v20, %v811_v29  ;;  %v882_v44 = vmax.f32 %v850_v36, 0.0 }
 0x155   : > { %v871_v7 = vmax.f32 %v839_v58, 0.0  ;;  %901 = vst [vmem:[%s1880_s3 + $0x60] sm:$0xff] %v869_v5  ;;  %v856_v42 = vadd.f32 %v1651_v21, %v812_v30  ;;  %v883_v45 = vmax.f32 %v851_v37, 0.0  ;;  %v884_v46 = vmax.f32 %v852_v38, 0.0  ;;  %913 = vst [vmem:[%s1880_s3 + $0xc0] sm:$0xff] %v881_v43 }
 0x156   : > { %v872_v8 = vmax.f32 %v840_v59, 0.0  ;;  %902 = vst [vmem:[%s1880_s3 + $0x68] sm:$0xff] %v870_v6  ;;  %v885_v47 = vmax.f32 %v853_v39, 0.0  ;;  %v886_v48 = vmax.f32 %v854_v40, 0.0  ;;  %v887_v49 = vmax.f32 %v855_v41, 0.0  ;;  %914 = vst [vmem:[%s1880_s3 + $0xc8] sm:$0xff] %v882_v44 }
 0x157   : > { %903 = vst [vmem:[%s1880_s3 + $0x70] sm:$0xff] %v871_v7  ;;  %v888_v50 = vmax.f32 %v856_v42, 0.0  ;;  %915 = vst [vmem:[%s1880_s3 + $0xd0] sm:$0xff] %v883_v45 }
 0x158   : > { %904 = vst [vmem:[%s1880_s3 + $0x78] sm:$0xff] %v872_v8  ;;  %916 = vst [vmem:[%s1880_s3 + $0xd8] sm:$0xff] %v884_v46 }
 0x159   : > { %917 = vst [vmem:[%s1880_s3 + $0xe0] sm:$0xff] %v885_v47  ;;  %918 = vst [vmem:[%s1880_s3 + $0xe8] sm:$0xff] %v886_v48 }
 0x15a   : > { %919 = vst [vmem:[%s1880_s3 + $0xf0] sm:$0xff] %v887_v49  ;;  %920 = vst [vmem:[%s1880_s3 + $0xf8] sm:$0xff] %v888_v50 }
 0x15b PF: > { %s13_s16 = sadd.s32 1, %s1213_s16   ;;  %s1881_s12 = smov %s1201_s13 }
 0x15c   : > { %p10_p12 = scmp.ge.s32.totalorder %s13_s16, 11   ;;  %s1882_s13 = smov %s1272_s20 }
 0x15d   : > { %s1883_s14 = smov %s1209_s15  ;;  %s1884_s15 = smov %s1886_s17 }
 0x15e   :  { %12 = sbr.rel (!%p10_p12) target bundleno = 3 (0x3), region = 122 }

// kernel: model_forward.19
= control target key start
LH: loop header
LB: loop body
LE: loop exit
PB: predicated region body
PF: predicated region fallthrough
CT: control target
= control target key end

     0   :  { %v609_v1 = vmov 0   ;;  %v457_v25 = vlaneseq  ;;  %s845_s1 = inlined_call_operand.vmem [shape: bf16[128,256], index: 1, kind: input, shape index: {}]   ;;  %s846_s0 = inlined_call_operand.vmem [shape: bf16[128,128], index: 0, kind: input, shape index: {}]   ;;  %s847_s2 = inlined_call_operand.vmem [shape: f32[1,256], index: 2, kind: input, shape index: {}]   ;;  %s848_s3 = inlined_call_operand.vmem [shape: f32[128,256], index: 3, kind: output, shape index: {}]  }
   0x1   :  { %v577_v0 = vld [vmem:[%s845_s1 + $0x4] ss:$8 sps:$4 sm:$0xff]   ;;  %275 = vmatprep.mubr.bf16.mxu0 %v609_v1  ;;  %315 = vmatprep.mubr.bf16.mxu1 %v609_v1  ;;  %v579_v2 = vld [vmem:[%s845_s1] ss:$8 sps:$4 sm:$0xff]   ;;  %v580_v3 = vld [vmem:[%s845_s1 + $0x14] ss:$8 sps:$4 sm:$0xff]  }
   0x2   :  { %243 = vmatprep.subr.bf16.mxu0 %v577_v0  ;;  %559 = vmatprep.subr.bf16.mxu1 %v577_v0  ;;  %v582_v4 = vld [vmem:[%s845_s1 + $0x10] ss:$8 sps:$4 sm:$0xff]   ;;  %v583_v5 = vld [vmem:[%s845_s1 + $0x24] ss:$8 sps:$4 sm:$0xff]   ;;  %v585_v6 = vld [vmem:[%s845_s1 + $0x20] ss:$8 sps:$4 sm:$0xff]  }
   0x3   :  { %244 = vmatpush1.bf16.msra.mxu0 %v579_v2  ;;  %567 = vmatpush1.bf16.msra.mxu1 %v579_v2  ;;  %v586_v7 = vld [vmem:[%s845_s1 + $0x34] ss:$8 sps:$4 sm:$0xff]   ;;  %v588_v8 = vld [vmem:[%s845_s1 + $0x30] ss:$8 sps:$4 sm:$0xff]   ;;  %v589_v9 = vld [vmem:[%s845_s1 + $0x44] ss:$8 sps:$4 sm:$0xff]  }
   0x4   :  { %245 = vmatprep.subr.bf16.mxu0 %v580_v3  ;;  %560 = vmatprep.subr.bf16.mxu1 %v580_v3  ;;  %v591_v10 = vld [vmem:[%s845_s1 + $0x40] ss:$8 sps:$4 sm:$0xff]   ;;  %v592_v11 = vld [vmem:[%s845_s1 + $0x54] ss:$8 sps:$4 sm:$0xff]   ;;  %v594_v12 = vld [vmem:[%s845_s1 + $0x50] ss:$8 sps:$4 sm:$0xff]  }
   0x5   :  { %v595_v13 = vld [vmem:[%s845_s1 + $0x64] ss:$8 sps:$4 sm:$0xff]   ;;  %v597_v14 = vld [vmem:[%s845_s1 + $0x60] ss:$8 sps:$4 sm:$0xff]   ;;  %v598_v15 = vld [vmem:[%s845_s1 + $0x74] ss:$8 sps:$4 sm:$0xff]  }
   0x6   :  { %v600_v16 = vld [vmem:[%s845_s1 + $0x70] ss:$8 sps:$4 sm:$0xff]   ;;  %v601_v17 = vld [vmem:[%s846_s0] sm:$0xff]   ;;  %v603_v19 = vld [vmem:[%s846_s0 + $0x8] sm:$0xff]   ;;  %v458_v26 = vshrl.u32 %v457_v25, 7 }
   0x7   :  { %246 = vmatpush1.bf16.msra.mxu0 %v582_v4  ;;  %568 = vmatpush1.bf16.msra.mxu1 %v582_v4  ;;  %v602_v18 = vld [vmem:[%s846_s0 + $0x20] sm:$0xff]   ;;  %v604_v20 = vld [vmem:[%s846_s0 + $0x28] sm:$0xff]   ;;  %v605_v21 = vld [vmem:[%s846_s0 + $0x10] sm:$0xff]  }
   0x8   :  { %247 = vmatprep.subr.bf16.mxu0 %v583_v5  ;;  %561 = vmatprep.subr.bf16.mxu1 %v583_v5  ;;  %v606_v22 = vld [vmem:[%s846_s0 + $0x30] sm:$0xff]   ;;  %v607_v23 = vld [vmem:[%s846_s0 + $0x18] sm:$0xff]   ;;  %v459_v27 = vsub.s32 0, %v458_v26  ;;  %v455_v28 = vld [vmem:[%s847_s2] sm:$0x3]  ;;  %v463_v29 = vsub.s32 1, %v458_v26 }
   0x9   :  { %v608_v24 = vld [vmem:[%s846_s0 + $0x38] sm:$0xff]  }
   0xa   :  { %v713_v30 = vrot.slane %v455_v28, %v459_v27  ;;  %v715_v33 = vrot.slane %v455_v28, %v463_v29 }
   0xb   :  { %248 = vmatpush1.bf16.msra.mxu0 %v585_v6  ;;  %569 = vmatpush1.bf16.msra.mxu1 %v585_v6 }
   0xc   :  { %249 = vmatprep.subr.bf16.mxu0 %v586_v7  ;;  %562 = vmatprep.subr.bf16.mxu1 %v586_v7 }
   0xf   :  { %250 = vmatpush1.bf16.msra.mxu0 %v588_v8  ;;  %570 = vmatpush1.bf16.msra.mxu1 %v588_v8 }
  0x10   :  { %251 = vmatprep.subr.bf16.mxu0 %v589_v9  ;;  %563 = vmatprep.subr.bf16.mxu1 %v589_v9 }
  0x13   :  { %252 = vmatpush1.bf16.msra.mxu0 %v591_v10  ;;  %571 = vmatpush1.bf16.msra.mxu1 %v591_v10 }
  0x14   :  { %253 = vmatprep.subr.bf16.mxu0 %v592_v11  ;;  %564 = vmatprep.subr.bf16.mxu1 %v592_v11 }
  0x17   :  { %254 = vmatpush1.bf16.msra.mxu0 %v594_v12  ;;  %572 = vmatpush1.bf16.msra.mxu1 %v594_v12 }
  0x18   :  { %255 = vmatprep.subr.bf16.mxu0 %v595_v13  ;;  %565 = vmatprep.subr.bf16.mxu1 %v595_v13 }
  0x1b   :  { %256 = vmatpush1.bf16.msra.mxu0 %v597_v14  ;;  %573 = vmatpush1.bf16.msra.mxu1 %v597_v14 }
  0x1c   :  { %257 = vmatprep.subr.bf16.mxu0 %v598_v15  ;;  %566 = vmatprep.subr.bf16.mxu1 %v598_v15 }
  0x1f   :  { %258 = vmatpush1.bf16.msra.mxu0 %v600_v16  ;;  %574 = vmatpush1.bf16.msra.mxu1 %v600_v16 }
  0x22   :  { %276 = vmatmul.mubr.bf16.vlgmr.msra.gmra.mrb[0].mxu0 %v601_v17  ;;  %316 = vmatmul.mubr.bf16.vlgmr.msra.gmra.mrb[0].mxu1 %v602_v18 }
  0x23   :  { %285 = vmatprep.mubr.bf16.mxu0 %v609_v1  ;;  %325 = vmatprep.mubr.bf16.mxu1 %v609_v1 }
  0x2a   :  { %286 = vmatmul.mubr.bf16.gmra.mrb[4].mxu0 %v603_v19  ;;  %326 = vmatmul.mubr.bf16.gmra.mrb[4].mxu1 %v604_v20 }
  0x2b   :  { %295 = vmatprep.mubr.bf16.mxu0 %v609_v1  ;;  %335 = vmatprep.mubr.bf16.mxu1 %v609_v1 }
  0x32   :  { %296 = vmatmul.mubr.bf16.gmra.mrb[8].mxu0 %v605_v21  ;;  %336 = vmatmul.mubr.bf16.gmra.mrb[8].mxu1 %v606_v22 }
  0x33   :  { %305 = vmatprep.mubr.bf16.mxu0 %v609_v1  ;;  %345 = vmatprep.mubr.bf16.mxu1 %v609_v1 }
  0x3a   :  { %306 = vmatmul.mubr.bf16.gmra.mrb[12].mxu0 %v607_v23  ;;  %346 = vmatmul.mubr.bf16.gmra.mrb[12].mxu1 %v608_v24 }
  0xf5   :  { %v277_v31 = vpop.f32.mrb[0].mxu0  ;;  %v317_v32 = vpop.f32.mrb[0].mxu1 }
  0xf6   :  { %v279_v34 = vpop.f32.mrb[1].mxu0  ;;  %v319_v35 = vpop.f32.mrb[1].mxu1  ;;  %v467_v38 = vadd.f32 %v713_v30, %v277_v31  ;;  %v483_v39 = vadd.f32 %v713_v30, %v317_v32 }
  0xf7   :  { %v281_v36 = vpop.f32.mrb[2].mxu0  ;;  %v321_v37 = vpop.f32.mrb[2].mxu1  ;;  %v468_v42 = vadd.f32 %v715_v33, %v279_v34  ;;  %v484_v43 = vadd.f32 %v715_v33, %v319_v35 }
  0xf8   :  { %v283_v40 = vpop.f32.mrb[3].mxu0  ;;  %v323_v41 = vpop.f32.mrb[3].mxu1  ;;  %499 = vst [vmem:[%s848_s3] sm:$0xff] %v467_v38  ;;  %515 = vst [vmem:[%s848_s3 + $0x80] sm:$0xff] %v483_v39  ;;  %v469_v44 = vadd.f32 %v713_v30, %v281_v36  ;;  %v485_v45 = vadd.f32 %v713_v30, %v321_v37 }
  0xf9   :  { %500 = vst [vmem:[%s848_s3 + $0x8] sm:$0xff] %v468_v42  ;;  %516 = vst [vmem:[%s848_s3 + $0x88] sm:$0xff] %v484_v43  ;;  %v470_v46 = vadd.f32 %v715_v33, %v283_v40  ;;  %v486_v47 = vadd.f32 %v715_v33, %v323_v41 }
  0xfa   :  { %501 = vst [vmem:[%s848_s3 + $0x10] sm:$0xff] %v469_v44  ;;  %517 = vst [vmem:[%s848_s3 + $0x90] sm:$0xff] %v485_v45 }
  0xfb   :  { %502 = vst [vmem:[%s848_s3 + $0x18] sm:$0xff] %v470_v46  ;;  %518 = vst [vmem:[%s848_s3 + $0x98] sm:$0xff] %v486_v47 }
  0xfd   :  { %v287_v48 = vpop.f32.mrb[4].mxu0  ;;  %v327_v49 = vpop.f32.mrb[4].mxu1 }
  0xfe   :  { %v289_v50 = vpop.f32.mrb[5].mxu0  ;;  %v329_v51 = vpop.f32.mrb[5].mxu1  ;;  %v471_v54 = vadd.f32 %v713_v30, %v287_v48  ;;  %v487_v55 = vadd.f32 %v713_v30, %v327_v49 }
  0xff   :  { %v291_v52 = vpop.f32.mrb[6].mxu0  ;;  %v331_v53 = vpop.f32.mrb[6].mxu1  ;;  %v472_v58 = vadd.f32 %v715_v33, %v289_v50  ;;  %v488_v59 = vadd.f32 %v715_v33, %v329_v51 }
 0x100   :  { %v293_v56 = vpop.f32.mrb[7].mxu0  ;;  %v333_v57 = vpop.f32.mrb[7].mxu1  ;;  %503 = vst [vmem:[%s848_s3 + $0x20] sm:$0xff] %v471_v54  ;;  %519 = vst [vmem:[%s848_s3 + $0xa0] sm:$0xff] %v487_v55  ;;  %v473_v60 = vadd.f32 %v713_v30, %v291_v52  ;;  %v489_v61 = vadd.f32 %v713_v30, %v331_v53 }
 0x101   :  { %504 = vst [vmem:[%s848_s3 + $0x28] sm:$0xff] %v472_v58  ;;  %520 = vst [vmem:[%s848_s3 + $0xa8] sm:$0xff] %v488_v59  ;;  %v474_v62 = vadd.f32 %v715_v33, %v293_v56  ;;  %v490_v63 = vadd.f32 %v715_v33, %v333_v57 }
 0x102   :  { %505 = vst [vmem:[%s848_s3 + $0x30] sm:$0xff] %v473_v60  ;;  %521 = vst [vmem:[%s848_s3 + $0xb0] sm:$0xff] %v489_v61 }
 0x103   :  { %506 = vst [vmem:[%s848_s3 + $0x38] sm:$0xff] %v474_v62  ;;  %522 = vst [vmem:[%s848_s3 + $0xb8] sm:$0xff] %v490_v63 }
 0x105   :  { %v297_v0 = vpop.f32.mrb[8].mxu0  ;;  %v337_v1 = vpop.f32.mrb[8].mxu1 }
 0x106   :  { %v299_v2 = vpop.f32.mrb[9].mxu0  ;;  %v339_v3 = vpop.f32.mrb[9].mxu1  ;;  %v475_v6 = vadd.f32 %v713_v30, %v297_v0  ;;  %v491_v7 = vadd.f32 %v713_v30, %v337_v1 }
 0x107   :  { %v301_v4 = vpop.f32.mrb[10].mxu0  ;;  %v341_v5 = vpop.f32.mrb[10].mxu1  ;;  %v476_v10 = vadd.f32 %v715_v33, %v299_v2  ;;  %v492_v11 = vadd.f32 %v715_v33, %v339_v3 }
 0x108   :  { %v303_v8 = vpop.f32.mrb[11].mxu0  ;;  %v343_v9 = vpop.f32.mrb[11].mxu1  ;;  %507 = vst [vmem:[%s848_s3 + $0x40] sm:$0xff] %v475_v6  ;;  %523 = vst [vmem:[%s848_s3 + $0xc0] sm:$0xff] %v491_v7  ;;  %v477_v12 = vadd.f32 %v713_v30, %v301_v4  ;;  %v493_v13 = vadd.f32 %v713_v30, %v341_v5 }
 0x109   :  { %508 = vst [vmem:[%s848_s3 + $0x48] sm:$0xff] %v476_v10  ;;  %524 = vst [vmem:[%s848_s3 + $0xc8] sm:$0xff] %v492_v11  ;;  %v478_v14 = vadd.f32 %v715_v33, %v303_v8  ;;  %v494_v15 = vadd.f32 %v715_v33, %v343_v9 }
 0x10a   :  { %509 = vst [vmem:[%s848_s3 + $0x50] sm:$0xff] %v477_v12  ;;  %525 = vst [vmem:[%s848_s3 + $0xd0] sm:$0xff] %v493_v13 }
 0x10b   :  { %510 = vst [vmem:[%s848_s3 + $0x58] sm:$0xff] %v478_v14  ;;  %526 = vst [vmem:[%s848_s3 + $0xd8] sm:$0xff] %v494_v15 }
 0x10d   :  { %v307_v16 = vpop.f32.mrb[12].mxu0  ;;  %v347_v17 = vpop.f32.mrb[12].mxu1 }
 0x10e   :  { %v309_v18 = vpop.f32.mrb[13].mxu0  ;;  %v349_v19 = vpop.f32.mrb[13].mxu1  ;;  %v479_v22 = vadd.f32 %v713_v30, %v307_v16  ;;  %v495_v23 = vadd.f32 %v713_v30, %v347_v17 }
 0x10f   :  { %v311_v20 = vpop.f32.mrb[14].mxu0  ;;  %v351_v21 = vpop.f32.mrb[14].mxu1  ;;  %v480_v26 = vadd.f32 %v715_v33, %v309_v18  ;;  %v496_v27 = vadd.f32 %v715_v33, %v349_v19 }
 0x110   :  { %v313_v24 = vpop.f32.mrb[15].mxu0  ;;  %v353_v25 = vpop.f32.mrb[15].mxu1  ;;  %511 = vst [vmem:[%s848_s3 + $0x60] sm:$0xff] %v479_v22  ;;  %527 = vst [vmem:[%s848_s3 + $0xe0] sm:$0xff] %v495_v23  ;;  %v481_v28 = vadd.f32 %v713_v30, %v311_v20  ;;  %v497_v29 = vadd.f32 %v713_v30, %v351_v21 }
 0x111   :  { %512 = vst [vmem:[%s848_s3 + $0x68] sm:$0xff] %v480_v26  ;;  %528 = vst [vmem:[%s848_s3 + $0xe8] sm:$0xff] %v496_v27  ;;  %v482_v31 = vadd.f32 %v715_v33, %v313_v24  ;;  %v498_v32 = vadd.f32 %v715_v33, %v353_v25 }
 0x112   :  { %513 = vst [vmem:[%s848_s3 + $0x70] sm:$0xff] %v481_v28  ;;  %529 = vst [vmem:[%s848_s3 + $0xf0] sm:$0xff] %v497_v29 }
 0x113   :  { %514 = vst [vmem:[%s848_s3 + $0x78] sm:$0xff] %v482_v31  ;;  %530 = vst [vmem:[%s848_s3 + $0xf8] sm:$0xff] %v498_v32 }

// kernel: model_forward.21
= control target key start
LH: loop header
LB: loop body
LE: loop exit
PB: predicated region body
PF: predicated region fallthrough
CT: control target
= control target key end

     0   :  { %s1599_s15 = smov 0   ;;  %s1601_s16 = smov 0   ;;  %s2351_s0 = inlined_call_operand.vmem [shape: bf16[128,2304], index: 0, kind: input, shape index: {}]   ;;  %s2352_s1 = inlined_call_operand.vmem [shape: bf16[2304,256], index: 1, kind: input, shape index: {}]   ;;  %s2353_s2 = inlined_call_operand.vmem [shape: f32[1,256], index: 2, kind: input, shape index: {}]   ;;  %s2354_s3 = inlined_call_operand.vmem [shape: f32[128,256], index: 3, kind: input, shape index: {}]   ;;  %s2355_s4 = inlined_call_operand.vmem [shape: f32[128,256], index: 4, kind: output, shape index: {}]  }
   0x1   :  { %s1603_s17 = smov 0   ;;  %s1605_s18 = smov 0  }
   0x2   :  { %s1607_s19 = smov 0  }
   0x3 LB: > { %s26_s20 = sadd.s32 1, %s1567_s18  ;;  %p49_p1 = scmp.ne.s32.totalorder %s1559_s16, %s1555_s15  ;;  %s1571_s19 = sphi %s1607_s19, %s14_s19   ;;  %s1567_s18 = sphi %s1605_s18, %s2359_s18   ;;  %s1563_s17 = sphi %s1603_s17, %s2358_s17   ;;  %s1559_s16 = sphi %s1601_s16, %s2357_s16   ;;  %s1555_s15 = sphi %s1599_s15, %s2356_s15  }
   0x4   : > { %p27_p0 = scmp.ge.s32.totalorder %s26_s20, 9  ;;  %p50_p2 = scmp.eq.s32.totalorder %s1571_s19, 0 }
   0x5   : > { %s42_s22 = sadd.s32 1, %s1559_s16  ;;  %p1323_p5 = scmp.ge.s32.totalorder %s1571_s19, 9 }
   0x6   : > { %s2361_s20 = smov (%p27_p0, %s26_s20), 0  ;;  %p51_p3 = por %p50_p2, %p49_p1 }
   0x7   : > { %s38_s21 = ssub.s32 %s1567_s18, %s2361_s20  ;;  %208 = sbr.rel (%p1323_p5) target bundleno = 26 (0x1a), region = 24 }
   0x8   : > { %p40_p4 = scmp.eq.s32.totalorder %s38_s21, 0 }
   0xa   : > { %s1634_s23 = scalar_select %p40_p4, %s1559_s16, %s42_s22  }
   0xe   : > { %211 = sbr.rel (!%p51_p3) target bundleno = 26 (0x1a), region = 28  ;;  %s213_s24 = sand.u32 (%p51_p3), 1, %s1559_s16  }
   0xf   : > { %s1386_s25 = sshll.u32 (%p51_p3), %s1567_s18, 3  ;;  %s1324_s26 = sshll.u32 (%p51_p3), %s213_s24, 7 }
  0x10   : > { %s1642_s29 = scalar_lea.vmem (%p51_p3), %s2351_s0, %s1386_s25  ;;  %s215_s30 = scalar_lea.vmem (%p51_p3), [#allocation2], %s1324_s26 }
  0x11   : > { %v279_v0 = vld [vmem:[%s1642_s29] sm:$0xff] (%p51_p3)  ;;  %v281_v1 = vld [vmem:[%s1642_s29 + $0x48] sm:$0xff] (%p51_p3)  ;;  %v283_v2 = vld [vmem:[%s1642_s29 + $0x90] sm:$0xff] (%p51_p3) }
  0x12   : > { %280 = vst [vmem:[%s215_s30] sm:$0xff] (%p51_p3), %v279_v0  ;;  %282 = vst [vmem:[%s215_s30 + $0x8] sm:$0xff] (%p51_p3), %v281_v1  ;;  %v285_v3 = vld [vmem:[%s1642_s29 + $0xd8] sm:$0xff] (%p51_p3)  ;;  %v287_v4 = vld [vmem:[%s1642_s29 + $0x120] sm:$0xff] (%p51_p3) }
  0x13   : > { %284 = vst [vmem:[%s215_s30 + $0x10] sm:$0xff] (%p51_p3), %v283_v2  ;;  %v289_v5 = vld [vmem:[%s1642_s29 + $0x168] sm:$0xff] (%p51_p3)  ;;  %286 = vst [vmem:[%s215_s30 + $0x18] sm:$0xff] (%p51_p3), %v285_v3  ;;  %v291_v6 = vld [vmem:[%s1642_s29 + $0x1b0] sm:$0xff] (%p51_p3) }
  0x14   : > { %288 = vst [vmem:[%s215_s30 + $0x20] sm:$0xff] (%p51_p3), %v287_v4  ;;  %290 = vst [vmem:[%s215_s30 + $0x28] sm:$0xff] (%p51_p3), %v289_v5  ;;  %v293_v7 = vld [vmem:[%s1642_s29 + $0x1f8] sm:$0xff] (%p51_p3)  ;;  %v295_v8 = vld [vmem:[%s1642_s29 + $0x240] sm:$0xff] (%p51_p3) }
  0x15   : > { %292 = vst [vmem:[%s215_s30 + $0x30] sm:$0xff] %v291_v6  ;;  %294 = vst [vmem:[%s215_s30 + $0x38] sm:$0xff] %v293_v7  ;;  %v297_v9 = vld [vmem:[%s1642_s29 + $0x288] sm:$0xff]  ;;  %v299_v10 = vld [vmem:[%s1642_s29 + $0x2d0] sm:$0xff] }
  0x16   : > { %296 = vst [vmem:[%s215_s30 + $0x40] sm:$0xff] %v295_v8  ;;  %v301_v11 = vld [vmem:[%s1642_s29 + $0x318] sm:$0xff]  ;;  %298 = vst [vmem:[%s215_s30 + $0x48] sm:$0xff] %v297_v9  ;;  %v303_v12 = vld [vmem:[%s1642_s29 + $0x360] sm:$0xff] }
  0x17   : > { %300 = vst [vmem:[%s215_s30 + $0x50] sm:$0xff] %v299_v10  ;;  %302 = vst [vmem:[%s215_s30 + $0x58] sm:$0xff] %v301_v11  ;;  %v305_v13 = vld [vmem:[%s1642_s29 + $0x3a8] sm:$0xff]  ;;  %v307_v14 = vld [vmem:[%s1642_s29 + $0x3f0] sm:$0xff] }
  0x18   : > { %304 = vst [vmem:[%s215_s30 + $0x60] sm:$0xff] %v303_v12  ;;  %306 = vst [vmem:[%s215_s30 + $0x68] sm:$0xff] %v305_v13  ;;  %v309_v15 = vld [vmem:[%s1642_s29 + $0x438] sm:$0xff] }
  0x19   : > { %308 = vst [vmem:[%s215_s30 + $0x70] sm:$0xff] %v307_v14  ;;  %310 = vst [vmem:[%s215_s30 + $0x78] sm:$0xff] %v309_v15 }
  0x1a PF: > { %p1327_p6 = scmp.ge.s32.totalorder %s1571_s19, 1  ;;  %p330_p7 = scmp.lt.s32.totalorder %s1571_s19, 10 }
  0x1c   : > { %p331_p8 = pnand %p1327_p6, %p330_p7 }
  0x1d   : > { %s337_s5 = sand.u32 (!%p331_p8), 1, %s1555_s15   ;;  %s1329_s6 = sshll.u32 (!%p331_p8), %s1563_s17, 5 }
  0x1e   : > { %334 = sbr.rel (%p331_p8) target bundleno = 385 (0x181), region = 70  ;;  %s1328_s7 = sshll.u32 (!%p331_p8), %s337_s5, 7 }
  0x1f   : > { %p395_p9 = scmp.lt.s32.totalorder (!%p331_p8), %s1329_s6, 287  ;;  %s1669_s12 = scalar_lea.vmem (!%p331_p8), [#allocation2], %s1328_s7 }
  0x20   : > { %p1332_p10 = scmp.ne.s32.totalorder (!%p331_p8), %s1563_s17, 0 }
  0x25   : > { %s2363_s6 = smov (!%p395_p9, %s1329_s6), 287  ;;  %437 = sbr.rel (%p1332_p10) target bundleno = 55 (0x37), region = 78 }
  0x26   : > { %s1387_s8 = sshll.u32 %s2363_s6, 3  ;;  %v1573_v16 = vmov (!%p1332_p10), 0.0  }
  0x27   : > { %s1667_s11 = scalar_lea.vmem %s2352_s1, %s1387_s8  ;;  %438 = vst [vmem:[%s2355_s4] sm:$0xff] (!%p1332_p10), %v1573_v16  ;;  %439 = vst [vmem:[%s2355_s4 + $0x8] sm:$0xff] (!%p1332_p10), %v1573_v16 }
  0x28   : > { %440 = vst [vmem:[%s2355_s4 + $0x10] sm:$0xff] (!%p1332_p10), %v1573_v16  ;;  %441 = vst [vmem:[%s2355_s4 + $0x18] sm:$0xff] (!%p1332_p10), %v1573_v16 }
  0x29   : > { %442 = vst [vmem:[%s2355_s4 + $0x20] sm:$0xff] (!%p1332_p10), %v1573_v16  ;;  %443 = vst [vmem:[%s2355_s4 + $0x28] sm:$0xff] (!%p1332_p10), %v1573_v16 }
  0x2a   : > { %444 = vst [vmem:[%s2355_s4 + $0x30] sm:$0xff] (!%p1332_p10), %v1573_v16  ;;  %445 = vst [vmem:[%s2355_s4 + $0x38] sm:$0xff] (!%p1332_p10), %v1573_v16 }
  0x2b   : > { %446 = vst [vmem:[%s2355_s4 + $0x40] sm:$0xff] (!%p1332_p10), %v1573_v16  ;;  %447 = vst [vmem:[%s2355_s4 + $0x48] sm:$0xff] (!%p1332_p10), %v1573_v16 }
  0x2c   : > { %448 = vst [vmem:[%s2355_s4 + $0x50] sm:$0xff] %v1573_v16  ;;  %449 = vst [vmem:[%s2355_s4 + $0x58] sm:$0xff] %v1573_v16 }
  0x2d   : > { %450 = vst [vmem:[%s2355_s4 + $0x60] sm:$0xff] %v1573_v16  ;;  %451 = vst [vmem:[%s2355_s4 + $0x68] sm:$0xff] %v1573_v16 }
  0x2e   : > { %452 = vst [vmem:[%s2355_s4 + $0x70] sm:$0xff] %v1573_v16  ;;  %453 = vst [vmem:[%s2355_s4 + $0x78] sm:$0xff] %v1573_v16 }
  0x2f   : > { %454 = vst [vmem:[%s2355_s4 + $0x80] sm:$0xff] %v1573_v16  ;;  %455 = vst [vmem:[%s2355_s4 + $0x88] sm:$0xff] %v1573_v16 }
  0x30   : > { %456 = vst [vmem:[%s2355_s4 + $0x90] sm:$0xff] %v1573_v16  ;;  %457 = vst [vmem:[%s2355_s4 + $0x98] sm:$0xff] %v1573_v16 }
  0x31   : > { %458 = vst [vmem:[%s2355_s4 + $0xa0] sm:$0xff] %v1573_v16  ;;  %459 = vst [vmem:[%s2355_s4 + $0xa8] sm:$0xff] %v1573_v16 }
  0x32   : > { %460 = vst [vmem:[%s2355_s4 + $0xb0] sm:$0xff] %v1573_v16  ;;  %461 = vst [vmem:[%s2355_s4 + $0xb8] sm:$0xff] %v1573_v16 }
  0x33   : > { %462 = vst [vmem:[%s2355_s4 + $0xc0] sm:$0xff] %v1573_v16  ;;  %463 = vst [vmem:[%s2355_s4 + $0xc8] sm:$0xff] %v1573_v16 }
  0x34   : > { %464 = vst [vmem:[%s2355_s4 + $0xd0] sm:$0xff] %v1573_v16  ;;  %465 = vst [vmem:[%s2355_s4 + $0xd8] sm:$0xff] %v1573_v16 }
  0x35   : > { %466 = vst [vmem:[%s2355_s4 + $0xe0] sm:$0xff] %v1573_v16  ;;  %467 = vst [vmem:[%s2355_s4 + $0xe8] sm:$0xff] %v1573_v16 }
  0x36   : > { %468 = vst [vmem:[%s2355_s4 + $0xf0] sm:$0xff] %v1573_v16  ;;  %469 = vst [vmem:[%s2355_s4 + $0xf8] sm:$0xff] %v1573_v16 }
  0x37 PF: > { %v1461_v17 = vld [vmem:[%s1667_s11 + $0x4] ss:$8 sps:$4 sm:$0xff]   ;;  %v1463_v18 = vld [vmem:[%s1667_s11] ss:$8 sps:$4 sm:$0xff]   ;;  %v1464_v19 = vld [vmem:[%s1667_s11 + $0x14] ss:$8 sps:$4 sm:$0xff]  }
  0x38   : > { %790 = vmatprep.subr.bf16.mxu0 %v1461_v17  ;;  %1388 = vmatprep.subr.bf16.mxu1 %v1461_v17  ;;  %v1466_v20 = vld [vmem:[%s1667_s11 + $0x10] ss:$8 sps:$4 sm:$0xff]   ;;  %v1467_v21 = vld [vmem:[%s1667_s11 + $0x24] ss:$8 sps:$4 sm:$0xff]   ;;  %v1469_v22 = vld [vmem:[%s1667_s11 + $0x20] ss:$8 sps:$4 sm:$0xff]  }
  0x39   : > { %791 = vmatpush1.bf16.msra.mxu0 %v1463_v18  ;;  %1404 = vmatpush1.bf16.msra.mxu1 %v1463_v18  ;;  %v1470_v23 = vld [vmem:[%s1667_s11 + $0x34] ss:$8 sps:$4 sm:$0xff]   ;;  %v1472_v24 = vld [vmem:[%s1667_s11 + $0x30] ss:$8 sps:$4 sm:$0xff]   ;;  %v1473_v25 = vld [vmem:[%s1667_s11 + $0x44] ss:$8 sps:$4 sm:$0xff]  }
  0x3a   : > { %792 = vmatprep.subr.bf16.mxu0 %v1464_v19  ;;  %1389 = vmatprep.subr.bf16.mxu1 %v1464_v19  ;;  %v1475_v26 = vld [vmem:[%s1667_s11 + $0x40] ss:$8 sps:$4 sm:$0xff]   ;;  %v1476_v27 = vld [vmem:[%s1667_s11 + $0x54] ss:$8 sps:$4 sm:$0xff]   ;;  %v1478_v28 = vld [vmem:[%s1667_s11 + $0x50] ss:$8 sps:$4 sm:$0xff]  }
  0x3b   : > { %v1479_v29 = vld [vmem:[%s1667_s11 + $0x64] ss:$8 sps:$4 sm:$0xff]   ;;  %v1481_v31 = vld [vmem:[%s1667_s11 + $0x60] ss:$8 sps:$4 sm:$0xff]   ;;  %v1482_v33 = vld [vmem:[%s1667_s11 + $0x74] ss:$8 sps:$4 sm:$0xff]  }
  0x3c   : > { %v1511_v30 = vld [vmem:[%s1669_s12 + $0x4] ss:$8 sps:$4 sm:$0xff]   ;;  %v1484_v34 = vld [vmem:[%s1667_s11 + $0x70] ss:$8 sps:$4 sm:$0xff]   ;;  %v1487_v36 = vld [vmem:[%s1667_s11 + $0x80] ss:$8 sps:$4 sm:$0xff]  }
  0x3d   : > { %793 = vmatpush1.bf16.msra.mxu0 %v1466_v20  ;;  %1405 = vmatpush1.bf16.msra.mxu1 %v1466_v20  ;;  %v1514_v32 = vld [vmem:[%s1669_s12 + $0x44] ss:$8 sps:$4 sm:$0xff]   ;;  %v1488_v37 = vld [vmem:[%s1667_s11 + $0x94] ss:$8 sps:$4 sm:$0xff]   ;;  %v1490_v38 = vld [vmem:[%s1667_s11 + $0x90] ss:$8 sps:$4 sm:$0xff]  }
  0x3e   : > { %794 = vmatprep.subr.bf16.mxu0 %v1467_v21  ;;  %1390 = vmatprep.subr.bf16.mxu1 %v1467_v21  ;;  %v1485_v35 = vld [vmem:[%s1667_s11 + $0x84] ss:$8 sps:$4 sm:$0xff]   ;;  %v1493_v40 = vld [vmem:[%s1667_s11 + $0xa0] ss:$8 sps:$4 sm:$0xff]   ;;  %v1494_v41 = vld [vmem:[%s1667_s11 + $0xb4] ss:$8 sps:$4 sm:$0xff]  }
  0x3f   : > { %822 = vmatprep.mubr.bf16.mxu0 %v1511_v30  ;;  %862 = vmatprep.mubr.bf16.mxu1 %v1514_v32  ;;  %v1491_v39 = vld [vmem:[%s1667_s11 + $0xa4] ss:$8 sps:$4 sm:$0xff]   ;;  %v1496_v42 = vld [vmem:[%s1667_s11 + $0xb0] ss:$8 sps:$4 sm:$0xff]   ;;  %v1499_v44 = vld [vmem:[%s1667_s11 + $0xc0] ss:$8 sps:$4 sm:$0xff]  }
  0x40   : > { %v1497_v43 = vld [vmem:[%s1667_s11 + $0xc4] ss:$8 sps:$4 sm:$0xff]   ;;  %v1500_v45 = vld [vmem:[%s1667_s11 + $0xd4] ss:$8 sps:$4 sm:$0xff]   ;;  %v1502_v46 = vld [vmem:[%s1667_s11 + $0xd0] ss:$8 sps:$4 sm:$0xff]  }
  0x41   : > { %795 = vmatpush1.bf16.msra.mxu0 %v1469_v22  ;;  %1406 = vmatpush1.bf16.msra.mxu1 %v1469_v22  ;;  %v1503_v47 = vld [vmem:[%s1667_s11 + $0xe4] ss:$8 sps:$4 sm:$0xff]   ;;  %v1505_v48 = vld [vmem:[%s1667_s11 + $0xe0] ss:$8 sps:$4 sm:$0xff]   ;;  %v1506_v49 = vld [vmem:[%s1667_s11 + $0xf4] ss:$8 sps:$4 sm:$0xff]  }
  0x42   : > { %796 = vmatprep.subr.bf16.mxu0 %v1470_v23  ;;  %1391 = vmatprep.subr.bf16.mxu1 %v1470_v23  ;;  %v1508_v50 = vld [vmem:[%s1667_s11 + $0xf0] ss:$8 sps:$4 sm:$0xff]   ;;  %v1509_v51 = vld [vmem:[%s1669_s12] ss:$8 sps:$4 sm:$0xff]   ;;  %v1515_v53 = vld [vmem:[%s1669_s12 + $0x14] ss:$8 sps:$4 sm:$0xff]  }
  0x43   : > { %v1512_v52 = vld [vmem:[%s1669_s12 + $0x40] ss:$8 sps:$4 sm:$0xff]   ;;  %v1517_v54 = vld [vmem:[%s1669_s12 + $0x54] ss:$8 sps:$4 sm:$0xff]   ;;  %v1519_v55 = vld [vmem:[%s1669_s12 + $0x10] ss:$8 sps:$4 sm:$0xff]  }
  0x44   : > { %v1520_v56 = vld [vmem:[%s1669_s12 + $0x50] ss:$8 sps:$4 sm:$0xff]   ;;  %v1521_v57 = vld [vmem:[%s1669_s12 + $0x24] ss:$8 sps:$4 sm:$0xff]   ;;  %v1525_v59 = vld [vmem:[%s1669_s12 + $0x20] ss:$8 sps:$4 sm:$0xff]  }
  0x45   : > { %797 = vmatpush1.bf16.msra.mxu0 %v1472_v24  ;;  %1407 = vmatpush1.bf16.msra.mxu1 %v1472_v24  ;;  %v1523_v58 = vld [vmem:[%s1669_s12 + $0x64] ss:$8 sps:$4 sm:$0xff]   ;;  %v1526_v60 = vld [vmem:[%s1669_s12 + $0x60] ss:$8 sps:$4 sm:$0xff]   ;;  %v1527_v61 = vld [vmem:[%s1669_s12 + $0x34] ss:$8 sps:$4 sm:$0xff]  }
  0x46   : > { %798 = vmatprep.subr.bf16.mxu0 %v1473_v25  ;;  %1392 = vmatprep.subr.bf16.mxu1 %v1473_v25  ;;  %v1529_v62 = vld [vmem:[%s1669_s12 + $0x74] ss:$8 sps:$4 sm:$0xff]   ;;  %v1531_v63 = vld [vmem:[%s1669_s12 + $0x30] ss:$8 sps:$4 sm:$0xff]   ;;  %v470_v1 = vld [vmem:[%s2355_s4] sm:$0xff]  ;;  %p1381_p11 = scmp.ne.s32.totalorder %s1563_s17, 8 }
  0x47   : > { %v1532_v0 = vld [vmem:[%s1669_s12 + $0x70] ss:$8 sps:$4 sm:$0xff]   ;;  %v486_v2 = vld [vmem:[%s2355_s4 + $0x80] sm:$0xff]  ;;  %v471_v3 = vld [vmem:[%s2355_s4 + $0x8] sm:$0xff] }
  0x48   : > { %v487_v4 = vld [vmem:[%s2355_s4 + $0x88] sm:$0xff]  ;;  %v472_v7 = vld [vmem:[%s2355_s4 + $0x10] sm:$0xff]  ;;  %v473_v13 = vld [vmem:[%s2355_s4 + $0x18] sm:$0xff] }
  0x49   : > { %799 = vmatpush1.bf16.msra.mxu0 %v1475_v26  ;;  %1408 = vmatpush1.bf16.msra.mxu1 %v1475_v26  ;;  %v488_v8 = vld [vmem:[%s2355_s4 + $0x90] sm:$0xff]  ;;  %v489_v14 = vld [vmem:[%s2355_s4 + $0x98] sm:$0xff]  ;;  %v474_v25 = vld [vmem:[%s2355_s4 + $0x20] sm:$0xff] }
  0x4a   : > { %800 = vmatprep.subr.bf16.mxu0 %v1476_v27  ;;  %1393 = vmatprep.subr.bf16.mxu1 %v1476_v27  ;;  %v490_v26 = vld [vmem:[%s2355_s4 + $0xa0] sm:$0xff]  ;;  %v475_v27 = vld [vmem:[%s2355_s4 + $0x28] sm:$0xff]  ;;  %v492_v32 = vld [vmem:[%s2355_s4 + $0xb0] sm:$0xff] }
  0x4d   : > { %801 = vmatpush1.bf16.msra.mxu0 %v1478_v28  ;;  %1409 = vmatpush1.bf16.msra.mxu1 %v1478_v28  ;;  %v491_v28 = vld [vmem:[%s2355_s4 + $0xa8] sm:$0xff] }
  0x4e   : > { %802 = vmatprep.subr.bf16.mxu0 %v1479_v29  ;;  %1394 = vmatprep.subr.bf16.mxu1 %v1479_v29 }
  0x51   : > { %803 = vmatpush1.bf16.msra.mxu0 %v1481_v31  ;;  %1410 = vmatpush1.bf16.msra.mxu1 %v1481_v31  ;;  %v476_v31 = vld [vmem:[%s2355_s4 + $0x30] sm:$0xff] }
  0x52   : > { %804 = vmatprep.subr.bf16.mxu0 %v1482_v33  ;;  %1395 = vmatprep.subr.bf16.mxu1 %v1482_v33 }
  0x55   : > { %805 = vmatpush1.bf16.msra.mxu0 %v1484_v34  ;;  %1411 = vmatpush1.bf16.msra.mxu1 %v1484_v34 }
  0x56   : > { %806 = vmatprep.subr.bf16.mxu0 %v1485_v35  ;;  %1396 = vmatprep.subr.bf16.mxu1 %v1485_v35 }
  0x59   : > { %807 = vmatpush1.bf16.msra.mxu0 %v1487_v36  ;;  %1412 = vmatpush1.bf16.msra.mxu1 %v1487_v36 }
  0x5a   : > { %808 = vmatprep.subr.bf16.mxu0 %v1488_v37  ;;  %1397 = vmatprep.subr.bf16.mxu1 %v1488_v37  ;;  %v477_v37 = vld [vmem:[%s2355_s4 + $0x38] sm:$0xff] }
  0x5d   : > { %809 = vmatpush1.bf16.msra.mxu0 %v1490_v38  ;;  %1413 = vmatpush1.bf16.msra.mxu1 %v1490_v38  ;;  %v493_v38 = vld [vmem:[%s2355_s4 + $0xb8] sm:$0xff] }
  0x5e   : > { %810 = vmatprep.subr.bf16.mxu0 %v1491_v39  ;;  %1398 = vmatprep.subr.bf16.mxu1 %v1491_v39 }
  0x61   : > { %811 = vmatpush1.bf16.msra.mxu0 %v1493_v40  ;;  %1414 = vmatpush1.bf16.msra.mxu1 %v1493_v40 }
  0x62   : > { %812 = vmatprep.subr.bf16.mxu0 %v1494_v41  ;;  %1399 = vmatprep.subr.bf16.mxu1 %v1494_v41 }
  0x65   : > { %813 = vmatpush1.bf16.msra.mxu0 %v1496_v42  ;;  %1415 = vmatpush1.bf16.msra.mxu1 %v1496_v42 }
  0x66   : > { %814 = vmatprep.subr.bf16.mxu0 %v1497_v43  ;;  %1400 = vmatprep.subr.bf16.mxu1 %v1497_v43 }
  0x69   : > { %815 = vmatpush1.bf16.msra.mxu0 %v1499_v44  ;;  %1416 = vmatpush1.bf16.msra.mxu1 %v1499_v44 }
  0x6a   : > { %816 = vmatprep.subr.bf16.mxu0 %v1500_v45  ;;  %1401 = vmatprep.subr.bf16.mxu1 %v1500_v45 }
  0x6d   : > { %817 = vmatpush1.bf16.msra.mxu0 %v1502_v46  ;;  %1417 = vmatpush1.bf16.msra.mxu1 %v1502_v46 }
  0x6e   : > { %818 = vmatprep.subr.bf16.mxu0 %v1503_v47  ;;  %1402 = vmatprep.subr.bf16.mxu1 %v1503_v47 }
  0x71   : > { %819 = vmatpush1.bf16.msra.mxu0 %v1505_v48  ;;  %1418 = vmatpush1.bf16.msra.mxu1 %v1505_v48 }
  0x72   : > { %820 = vmatprep.subr.bf16.mxu0 %v1506_v49  ;;  %1403 = vmatprep.subr.bf16.mxu1 %v1506_v49  ;;  %v478_v49 = vld [vmem:[%s2355_s4 + $0x40] sm:$0xff] }
  0x75   : > { %821 = vmatpush1.bf16.msra.mxu0 %v1508_v50  ;;  %1419 = vmatpush1.bf16.msra.mxu1 %v1508_v50  ;;  %v494_v50 = vld [vmem:[%s2355_s4 + $0xc0] sm:$0xff] }
  0x78   : > { %823 = vmatmul.mubr.bf16.vlgmr.msra.gmra.mrb[0].mxu0 %v1509_v51  ;;  %863 = vmatmul.mubr.bf16.vlgmr.msra.gmra.mrb[0].mxu1 %v1512_v52  ;;  %v479_v51 = vld [vmem:[%s2355_s4 + $0x48] sm:$0xff] }
  0x79   : > { %832 = vmatprep.mubr.bf16.mxu0 %v1515_v53  ;;  %872 = vmatprep.mubr.bf16.mxu1 %v1517_v54  ;;  %v495_v52 = vld [vmem:[%s2355_s4 + $0xc8] sm:$0xff] }
  0x80   : > { %833 = vmatmul.mubr.bf16.gmra.mrb[4].mxu0 %v1519_v55  ;;  %873 = vmatmul.mubr.bf16.gmra.mrb[4].mxu1 %v1520_v56  ;;  %v480_v55 = vld [vmem:[%s2355_s4 + $0x50] sm:$0xff] }
  0x81   : > { %842 = vmatprep.mubr.bf16.mxu0 %v1521_v57  ;;  %882 = vmatprep.mubr.bf16.mxu1 %v1523_v58  ;;  %v496_v56 = vld [vmem:[%s2355_s4 + $0xd0] sm:$0xff] }
  0x88   : > { %843 = vmatmul.mubr.bf16.gmra.mrb[8].mxu0 %v1525_v59  ;;  %883 = vmatmul.mubr.bf16.gmra.mrb[8].mxu1 %v1526_v60 }
  0x89   : > { %852 = vmatprep.mubr.bf16.mxu0 %v1527_v61  ;;  %892 = vmatprep.mubr.bf16.mxu1 %v1529_v62  ;;  %v481_v61 = vld [vmem:[%s2355_s4 + $0x58] sm:$0xff] }
  0x8a   : > { %v497_v62 = vld [vmem:[%s2355_s4 + $0xd8] sm:$0xff] }
  0x90   : > { %853 = vmatmul.mubr.bf16.gmra.mrb[12].mxu0 %v1531_v63  ;;  %893 = vmatmul.mubr.bf16.gmra.mrb[12].mxu1 %v1532_v0 }
 0x14b   : > { %v824_v5 = vpop.f32.mrb[0].mxu0  ;;  %v864_v6 = vpop.f32.mrb[0].mxu1 }
 0x14c   : > { %v903_v9 = vadd.f32 %v824_v5, %v470_v1  ;;  %v919_v10 = vadd.f32 %v864_v6, %v486_v2  ;;  %v826_v11 = vpop.f32.mrb[1].mxu0  ;;  %v866_v12 = vpop.f32.mrb[1].mxu1 }
 0x14d   : > { %v904_v15 = vadd.f32 %v826_v11, %v471_v3  ;;  %v920_v16 = vadd.f32 %v866_v12, %v487_v4  ;;  %v828_v17 = vpop.f32.mrb[2].mxu0  ;;  %v868_v18 = vpop.f32.mrb[2].mxu1  ;;  %v483_v11 = vld [vmem:[%s2355_s4 + $0x68] sm:$0xff] }
 0x14e   : > { %935 = vst [vmem:[%s2355_s4] sm:$0xff] %v903_v9  ;;  %951 = vst [vmem:[%s2355_s4 + $0x80] sm:$0xff] %v919_v10  ;;  %v905_v19 = vadd.f32 %v828_v17, %v472_v7  ;;  %v921_v20 = vadd.f32 %v868_v18, %v488_v8  ;;  %v830_v21 = vpop.f32.mrb[3].mxu0  ;;  %v870_v22 = vpop.f32.mrb[3].mxu1  ;;  %v482_v9 = vld [vmem:[%s2355_s4 + $0x60] sm:$0xff]  ;;  %v499_v12 = vld [vmem:[%s2355_s4 + $0xe8] sm:$0xff] }
 0x14f   : > { %936 = vst [vmem:[%s2355_s4 + $0x8] sm:$0xff] %v904_v15  ;;  %952 = vst [vmem:[%s2355_s4 + $0x88] sm:$0xff] %v920_v16  ;;  %v906_v23 = vadd.f32 %v830_v21, %v473_v13  ;;  %v922_v24 = vadd.f32 %v870_v22, %v489_v14  ;;  %v498_v10 = vld [vmem:[%s2355_s4 + $0xe0] sm:$0xff]  ;;  %v484_v15 = vld [vmem:[%s2355_s4 + $0x70] sm:$0xff] }
 0x150   : > { %937 = vst [vmem:[%s2355_s4 + $0x10] sm:$0xff] %v905_v19  ;;  %953 = vst [vmem:[%s2355_s4 + $0x90] sm:$0xff] %v921_v20  ;;  %v500_v16 = vld [vmem:[%s2355_s4 + $0xf0] sm:$0xff]  ;;  %v485_v21 = vld [vmem:[%s2355_s4 + $0x78] sm:$0xff] }
 0x151   : > { %938 = vst [vmem:[%s2355_s4 + $0x18] sm:$0xff] %v906_v23  ;;  %954 = vst [vmem:[%s2355_s4 + $0x98] sm:$0xff] %v922_v24  ;;  %v501_v22 = vld [vmem:[%s2355_s4 + $0xf8] sm:$0xff] }
 0x153   : > { %v834_v29 = vpop.f32.mrb[4].mxu0  ;;  %v874_v30 = vpop.f32.mrb[4].mxu1 }
 0x154   : > { %v907_v33 = vadd.f32 %v834_v29, %v474_v25  ;;  %v923_v34 = vadd.f32 %v874_v30, %v490_v26  ;;  %v836_v35 = vpop.f32.mrb[5].mxu0  ;;  %v876_v36 = vpop.f32.mrb[5].mxu1 }
 0x155   : > { %v908_v39 = vadd.f32 %v836_v35, %v475_v27  ;;  %v924_v40 = vadd.f32 %v876_v36, %v491_v28  ;;  %v838_v41 = vpop.f32.mrb[6].mxu0  ;;  %v878_v42 = vpop.f32.mrb[6].mxu1  ;;  %v1003_v35 = vld [vmem:[%s2353_s2] sm:$0x3] (!%p1381_p11) }
 0x156   : > { %939 = vst [vmem:[%s2355_s4 + $0x20] sm:$0xff] %v907_v33  ;;  %955 = vst [vmem:[%s2355_s4 + $0xa0] sm:$0xff] %v923_v34  ;;  %v909_v43 = vadd.f32 %v838_v41, %v476_v31  ;;  %v925_v44 = vadd.f32 %v878_v42, %v492_v32  ;;  %v840_v45 = vpop.f32.mrb[7].mxu0  ;;  %v880_v46 = vpop.f32.mrb[7].mxu1  ;;  %v1005_v33 = vlaneseq (!%p1381_p11)  ;;  %v971_v36 = vld [vmem:[%s2355_s4] sm:$0xff] (!%p1381_p11)  ;;  %v1048_v41 = vld [vmem:[%s2354_s3 + $0x8] sm:$0xff] (!%p1381_p11) }
 0x157   : > { %940 = vst [vmem:[%s2355_s4 + $0x28] sm:$0xff] %v908_v39  ;;  %956 = vst [vmem:[%s2355_s4 + $0xa8] sm:$0xff] %v924_v40  ;;  %v910_v47 = vadd.f32 %v840_v45, %v477_v37  ;;  %v926_v48 = vadd.f32 %v880_v46, %v493_v38  ;;  %v972_v38 = vld [vmem:[%s2355_s4 + $0x8] sm:$0xff] (!%p1381_p11)  ;;  %v1047_v40 = vld [vmem:[%s2354_s3] sm:$0xff] (!%p1381_p11) }
 0x158   : > { %941 = vst [vmem:[%s2355_s4 + $0x30] sm:$0xff] %v909_v43  ;;  %957 = vst [vmem:[%s2355_s4 + $0xb0] sm:$0xff] %v925_v44  ;;  %v1006_v34 = vshrl.u32 (!%p1381_p11), %v1005_v33, 7  ;;  %v973_v42 = vld [vmem:[%s2355_s4 + $0x10] sm:$0xff] (!%p1381_p11)  ;;  %v974_v43 = vld [vmem:[%s2355_s4 + $0x18] sm:$0xff] (!%p1381_p11) }
 0x159   : > { %942 = vst [vmem:[%s2355_s4 + $0x38] sm:$0xff] %v910_v47  ;;  %958 = vst [vmem:[%s2355_s4 + $0xb8] sm:$0xff] %v926_v48  ;;  %v1060_v33 = vld [vmem:[%s2354_s3 + $0x68] sm:$0xff] (!%p1381_p11) }
 0x15a   : > { %v1007_v37 = vsub.s32 (!%p1381_p11), 0, %v1006_v34  ;;  %v1011_v39 = vsub.s32 (!%p1381_p11), 1, %v1006_v34  ;;  %v1061_v34 = vld [vmem:[%s2354_s3 + $0x70] sm:$0xff] (!%p1381_p11) }
 0x15b   : > { %v844_v53 = vpop.f32.mrb[8].mxu0  ;;  %v884_v54 = vpop.f32.mrb[8].mxu1 }
 0x15c   : > { %v911_v57 = vadd.f32 %v844_v53, %v478_v49  ;;  %v927_v58 = vadd.f32 %v884_v54, %v494_v50  ;;  %v846_v59 = vpop.f32.mrb[9].mxu0  ;;  %v886_v60 = vpop.f32.mrb[9].mxu1  ;;  %v2033_v45 = vrot.slane (!%p1381_p11), %v1003_v35, %v1007_v37  ;;  %v2035_v46 = vrot.slane (!%p1381_p11), %v1003_v35, %v1011_v39  ;;  %v1049_v50 = vld [vmem:[%s2354_s3 + $0x10] sm:$0xff] (!%p1381_p11)  ;;  %v1062_v35 = vld [vmem:[%s2354_s3 + $0x78] sm:$0xff] (!%p1381_p11) }
 0x15d   : > { %v912_v63 = vadd.f32 %v846_v59, %v479_v51  ;;  %v928_v0 = vadd.f32 %v886_v60, %v495_v52  ;;  %v848_v1 = vpop.f32.mrb[10].mxu0  ;;  %v888_v2 = vpop.f32.mrb[10].mxu1  ;;  %v975_v44 = vld [vmem:[%s2355_s4 + $0x20] sm:$0xff] (!%p1381_p11)  ;;  %v1050_v51 = vld [vmem:[%s2354_s3 + $0x18] sm:$0xff] (!%p1381_p11) }
 0x15e   : > { %943 = vst [vmem:[%s2355_s4 + $0x40] sm:$0xff] %v911_v57  ;;  %959 = vst [vmem:[%s2355_s4 + $0xc0] sm:$0xff] %v927_v58  ;;  %v913_v3 = vadd.f32 %v848_v1, %v480_v55  ;;  %v929_v4 = vadd.f32 %v888_v2, %v496_v56  ;;  %v850_v5 = vpop.f32.mrb[11].mxu0  ;;  %v890_v6 = vpop.f32.mrb[11].mxu1  ;;  %v976_v47 = vld [vmem:[%s2355_s4 + $0x28] sm:$0xff] (!%p1381_p11)  ;;  %v1051_v52 = vld [vmem:[%s2354_s3 + $0x20] sm:$0xff] (!%p1381_p11)  ;;  %v1015_v53 = vadd.f32 (!%p1381_p11), %v2033_v45, %v971_v36 }
 0x15f   : > { %944 = vst [vmem:[%s2355_s4 + $0x48] sm:$0xff] %v912_v63  ;;  %960 = vst [vmem:[%s2355_s4 + $0xc8] sm:$0xff] %v928_v0  ;;  %v914_v7 = vadd.f32 %v850_v5, %v481_v61  ;;  %v930_v8 = vadd.f32 %v890_v6, %v497_v62  ;;  %v977_v48 = vld [vmem:[%s2355_s4 + $0x30] sm:$0xff] (!%p1381_p11)  ;;  %v1016_v54 = vadd.f32 (!%p1381_p11), %v2035_v46, %v972_v38  ;;  %v1052_v57 = vld [vmem:[%s2354_s3 + $0x28] sm:$0xff] (!%p1381_p11) }
 0x160   : > { %945 = vst [vmem:[%s2355_s4 + $0x50] sm:$0xff] %v913_v3  ;;  %961 = vst [vmem:[%s2355_s4 + $0xd0] sm:$0xff] %v929_v4  ;;  %v978_v49 = vld [vmem:[%s2355_s4 + $0x38] sm:$0xff] (!%p1381_p11)  ;;  %v1017_v55 = vadd.f32 (!%p1381_p11), %v2033_v45, %v973_v42  ;;  %v1018_v56 = vadd.f32 (!%p1381_p11), %v2035_v46, %v974_v43  ;;  %v1053_v58 = vld [vmem:[%s2354_s3 + $0x30] sm:$0xff] (!%p1381_p11)  ;;  %v1019_v60 = vadd.f32 (!%p1381_p11), %v2033_v45, %v975_v44 }
 0x161   : > { %946 = vst [vmem:[%s2355_s4 + $0x58] sm:$0xff] %v914_v7  ;;  %962 = vst [vmem:[%s2355_s4 + $0xd8] sm:$0xff] %v930_v8  ;;  %v1054_v59 = vld [vmem:[%s2354_s3 + $0x38] sm:$0xff] (!%p1381_p11)  ;;  %v1020_v61 = vadd.f32 (!%p1381_p11), %v2035_v46, %v976_v47  ;;  %v1021_v62 = vadd.f32 (!%p1381_p11), %v2033_v45, %v977_v48  ;;  %v1022_v63 = vadd.f32 (!%p1381_p11), %v2035_v46, %v978_v49  ;;  %v987_v44 = vld [vmem:[%s2355_s4 + $0x80] sm:$0xff] (!%p1381_p11) }
 0x162   : > { %v1079_v0 = vadd.f32 (!%p1381_p11), %v1047_v40, %v1015_v53  ;;  %v1080_v1 = vadd.f32 (!%p1381_p11), %v1048_v41, %v1016_v54  ;;  %v1081_v2 = vadd.f32 (!%p1381_p11), %v1049_v50, %v1017_v55  ;;  %v1082_v3 = vadd.f32 (!%p1381_p11), %v1050_v51, %v1018_v56  ;;  %v988_v47 = vld [vmem:[%s2355_s4 + $0x88] sm:$0xff] (!%p1381_p11)  ;;  %v989_v48 = vld [vmem:[%s2355_s4 + $0x90] sm:$0xff] (!%p1381_p11)  ;;  %v1063_v53 = vld [vmem:[%s2354_s3 + $0x80] sm:$0xff] (!%p1381_p11) }
 0x163   : > { %v854_v13 = vpop.f32.mrb[12].mxu0  ;;  %v894_v14 = vpop.f32.mrb[12].mxu1  ;;  %970 = sbr.rel (%p1381_p11) target bundleno = 385 (0x181), region = 82  ;;  %v1083_v7 = vadd.f32 (!%p1381_p11), %v1051_v52, %v1019_v60  ;;  %v1084_v8 = vadd.f32 (!%p1381_p11), %v1052_v57, %v1020_v61  ;;  %v1064_v54 = vld [vmem:[%s2354_s3 + $0x88] sm:$0xff] (!%p1381_p11)  ;;  %v1065_v55 = vld [vmem:[%s2354_s3 + $0x90] sm:$0xff] (!%p1381_p11)  ;;  %v990_v56 = vld [vmem:[%s2355_s4 + $0x98] sm:$0xff] (!%p1381_p11) }
 0x164   : > { %v915_v17 = vadd.f32 %v854_v13, %v482_v9  ;;  %v931_v18 = vadd.f32 %v894_v14, %v498_v10  ;;  %v856_v19 = vpop.f32.mrb[13].mxu0  ;;  %v896_v20 = vpop.f32.mrb[13].mxu1  ;;  %v1085_v9 = vadd.f32 (!%p1381_p11), %v1053_v58, %v1021_v62  ;;  %v1086_v10 = vadd.f32 (!%p1381_p11), %v1054_v59, %v1022_v63  ;;  %v1057_v13 = vld [vmem:[%s2354_s3 + $0x50] sm:$0xff] (!%p1381_p11)  ;;  %v991_v57 = vld [vmem:[%s2355_s4 + $0xa0] sm:$0xff] (!%p1381_p11)  ;;  %v992_v58 = vld [vmem:[%s2355_s4 + $0xa8] sm:$0xff] (!%p1381_p11) }
 0x165   : > { %v916_v23 = vadd.f32 %v856_v19, %v483_v11  ;;  %v932_v24 = vadd.f32 %v896_v20, %v499_v12  ;;  %v858_v25 = vpop.f32.mrb[14].mxu0  ;;  %v898_v26 = vpop.f32.mrb[14].mxu1  ;;  %v979_v4 = vld [vmem:[%s2355_s4 + $0x40] sm:$0xff] (!%p1381_p11)  ;;  %v1056_v12 = vld [vmem:[%s2354_s3 + $0x48] sm:$0xff] (!%p1381_p11)  ;;  %v1113_v19 = vmax.f32 (!%p1381_p11), %v1081_v2, 0.0  ;;  %v1114_v20 = vmax.f32 (!%p1381_p11), %v1082_v3, 0.0 }
 0x166   : > { %947 = vst [vmem:[%s2355_s4 + $0x60] sm:$0xff] %v915_v17  ;;  %963 = vst [vmem:[%s2355_s4 + $0xe0] sm:$0xff] %v931_v18  ;;  %v917_v27 = vadd.f32 %v858_v25, %v484_v15  ;;  %v933_v28 = vadd.f32 %v898_v26, %v500_v16  ;;  %v860_v29 = vpop.f32.mrb[15].mxu0  ;;  %v900_v30 = vpop.f32.mrb[15].mxu1  ;;  %v980_v5 = vld [vmem:[%s2355_s4 + $0x48] sm:$0xff] (!%p1381_p11)  ;;  %v1055_v11 = vld [vmem:[%s2354_s3 + $0x40] sm:$0xff] (!%p1381_p11) }
 0x167   : > { %948 = vst [vmem:[%s2355_s4 + $0x68] sm:$0xff] %v916_v23  ;;  %964 = vst [vmem:[%s2355_s4 + $0xe8] sm:$0xff] %v932_v24  ;;  %v918_v31 = vadd.f32 %v860_v29, %v485_v21  ;;  %v934_v32 = vadd.f32 %v900_v30, %v501_v22  ;;  %v981_v6 = vld [vmem:[%s2355_s4 + $0x50] sm:$0xff] (!%p1381_p11)  ;;  %v1111_v17 = vmax.f32 (!%p1381_p11), %v1079_v0, 0.0  ;;  %v1112_v18 = vmax.f32 (!%p1381_p11), %v1080_v1, 0.0  ;;  %v994_v0 = vld [vmem:[%s2355_s4 + $0xb8] sm:$0xff] (!%p1381_p11) }
 0x168   : > { %949 = vst [vmem:[%s2355_s4 + $0x70] sm:$0xff] %v917_v27  ;;  %965 = vst [vmem:[%s2355_s4 + $0xf0] sm:$0xff] %v933_v28  ;;  %v982_v14 = vld [vmem:[%s2355_s4 + $0x58] sm:$0xff] (!%p1381_p11)  ;;  %v1115_v23 = vmax.f32 (!%p1381_p11), %v1083_v7, 0.0  ;;  %v1116_v24 = vmax.f32 (!%p1381_p11), %v1084_v8, 0.0  ;;  %v1117_v25 = vmax.f32 (!%p1381_p11), %v1085_v9, 0.0  ;;  %v1023_v29 = vadd.f32 (!%p1381_p11), %v2033_v45, %v979_v4 }
 0x169   : > { %950 = vst [vmem:[%s2355_s4 + $0x78] sm:$0xff] %v918_v31  ;;  %966 = vst [vmem:[%s2355_s4 + $0xf8] sm:$0xff] %v934_v32  ;;  %v1118_v26 = vmax.f32 (!%p1381_p11), %v1086_v10, 0.0  ;;  %v1058_v27 = vld [vmem:[%s2354_s3 + $0x58] sm:$0xff] (!%p1381_p11)  ;;  %v1059_v28 = vld [vmem:[%s2354_s3 + $0x60] sm:$0xff] (!%p1381_p11)  ;;  %v1024_v30 = vadd.f32 (!%p1381_p11), %v2035_v46, %v980_v5  ;;  %v1025_v31 = vadd.f32 (!%p1381_p11), %v2033_v45, %v981_v6  ;;  %v1026_v32 = vadd.f32 (!%p1381_p11), %v2035_v46, %v982_v14 }
 0x16a   : > { %1143 = vst [vmem:[%s2355_s4] sm:$0xff] %v1111_v17  ;;  %1144 = vst [vmem:[%s2355_s4 + $0x8] sm:$0xff] %v1112_v18  ;;  %v1087_v40 = vadd.f32 %v1055_v11, %v1023_v29  ;;  %v993_v63 = vld [vmem:[%s2355_s4 + $0xb0] sm:$0xff]  ;;  %v1066_v5 = vld [vmem:[%s2354_s3 + $0x98] sm:$0xff]  ;;  %v1031_v7 = vadd.f32 %v2033_v45, %v987_v44  ;;  %v1032_v8 = vadd.f32 %v2035_v46, %v988_v47 }
 0x16b   : > { %1145 = vst [vmem:[%s2355_s4 + $0x10] sm:$0xff] %v1113_v19  ;;  %1146 = vst [vmem:[%s2355_s4 + $0x18] sm:$0xff] %v1114_v20  ;;  %v1088_v41 = vadd.f32 %v1056_v12, %v1024_v30  ;;  %v1089_v42 = vadd.f32 %v1057_v13, %v1025_v31  ;;  %v1090_v43 = vadd.f32 %v1058_v27, %v1026_v32  ;;  %v1067_v6 = vld [vmem:[%s2354_s3 + $0xa0] sm:$0xff]  ;;  %v1068_v11 = vld [vmem:[%s2354_s3 + $0xa8] sm:$0xff] }
 0x16c   : > { %1147 = vst [vmem:[%s2355_s4 + $0x20] sm:$0xff] %v1115_v23  ;;  %1148 = vst [vmem:[%s2355_s4 + $0x28] sm:$0xff] %v1116_v24  ;;  %v1119_v59 = vmax.f32 %v1087_v40, 0.0  ;;  %v1033_v9 = vadd.f32 %v2033_v45, %v989_v48  ;;  %v1034_v10 = vadd.f32 %v2035_v46, %v990_v56  ;;  %v1069_v12 = vld [vmem:[%s2354_s3 + $0xb0] sm:$0xff]  ;;  %v1070_v13 = vld [vmem:[%s2354_s3 + $0xb8] sm:$0xff]  ;;  %v1035_v14 = vadd.f32 %v2033_v45, %v991_v57 }
 0x16d   : > { %v983_v15 = vld [vmem:[%s2355_s4 + $0x60] sm:$0xff]  ;;  %1149 = vst [vmem:[%s2355_s4 + $0x30] sm:$0xff] %v1117_v25  ;;  %1150 = vst [vmem:[%s2355_s4 + $0x38] sm:$0xff] %v1118_v26  ;;  %v1120_v60 = vmax.f32 %v1088_v41, 0.0  ;;  %v1121_v61 = vmax.f32 %v1089_v42, 0.0  ;;  %v1122_v62 = vmax.f32 %v1090_v43, 0.0  ;;  %v1038_v17 = vadd.f32 %v2035_v46, %v994_v0 }
 0x16e   : > { %v984_v16 = vld [vmem:[%s2355_s4 + $0x68] sm:$0xff]  ;;  %v1027_v36 = vadd.f32 %v2033_v45, %v983_v15  ;;  %1151 = vst [vmem:[%s2355_s4 + $0x40] sm:$0xff] %v1119_v59  ;;  %v1036_v15 = vadd.f32 %v2035_v46, %v992_v58  ;;  %v1095_v18 = vadd.f32 %v1063_v53, %v1031_v7  ;;  %v1096_v19 = vadd.f32 %v1064_v54, %v1032_v8  ;;  %v997_v24 = vld [vmem:[%s2355_s4 + $0xd0] sm:$0xff]  ;;  %v1071_v29 = vld [vmem:[%s2354_s3 + $0xc0] sm:$0xff] }
 0x16f   : > { %v985_v21 = vld [vmem:[%s2355_s4 + $0x70] sm:$0xff]  ;;  %v1028_v37 = vadd.f32 %v2035_v46, %v984_v16  ;;  %1152 = vst [vmem:[%s2355_s4 + $0x48] sm:$0xff] %v1120_v60  ;;  %1153 = vst [vmem:[%s2355_s4 + $0x50] sm:$0xff] %v1121_v61  ;;  %v1037_v16 = vadd.f32 %v2033_v45, %v993_v63  ;;  %v1097_v20 = vadd.f32 %v1065_v55, %v1033_v9  ;;  %v996_v23 = vld [vmem:[%s2355_s4 + $0xc8] sm:$0xff] }
 0x170   : > { %v986_v22 = vld [vmem:[%s2355_s4 + $0x78] sm:$0xff]  ;;  %v1029_v38 = vadd.f32 %v2033_v45, %v985_v21  ;;  %v1091_v49 = vadd.f32 %v1059_v28, %v1027_v36  ;;  %1154 = vst [vmem:[%s2355_s4 + $0x58] sm:$0xff] %v1122_v62  ;;  %v1098_v21 = vadd.f32 %v1066_v5, %v1034_v10  ;;  %v1099_v25 = vadd.f32 %v1067_v6, %v1035_v14  ;;  %v1072_v30 = vld [vmem:[%s2354_s3 + $0xc8] sm:$0xff]  ;;  %v1073_v31 = vld [vmem:[%s2354_s3 + $0xd0] sm:$0xff] }
 0x171   : > { %v1030_v39 = vadd.f32 %v2035_v46, %v986_v22  ;;  %v1092_v50 = vadd.f32 %v1060_v33, %v1028_v37  ;;  %v995_v22 = vld [vmem:[%s2355_s4 + $0xc0] sm:$0xff]  ;;  %v1100_v26 = vadd.f32 %v1068_v11, %v1036_v15  ;;  %v1101_v27 = vadd.f32 %v1069_v12, %v1037_v16  ;;  %v998_v32 = vld [vmem:[%s2355_s4 + $0xd8] sm:$0xff]  ;;  %v1076_v53 = vld [vmem:[%s2354_s3 + $0xe8] sm:$0xff] }
 0x172   : > { %v1093_v51 = vadd.f32 %v1061_v34, %v1029_v38  ;;  %v1123_v1 = vmax.f32 %v1091_v49, 0.0  ;;  %v1102_v28 = vadd.f32 %v1070_v13, %v1038_v17  ;;  %v999_v33 = vld [vmem:[%s2355_s4 + $0xe0] sm:$0xff]  ;;  %v1000_v34 = vld [vmem:[%s2355_s4 + $0xe8] sm:$0xff]  ;;  %v1128_v36 = vmax.f32 %v1096_v19, 0.0  ;;  %v1002_v40 = vld [vmem:[%s2355_s4 + $0xf8] sm:$0xff] }
 0x173   : > { %v1094_v52 = vadd.f32 %v1062_v35, %v1030_v39  ;;  %v1124_v2 = vmax.f32 %v1092_v50, 0.0  ;;  %v1127_v35 = vmax.f32 %v1095_v18, 0.0  ;;  %v1129_v37 = vmax.f32 %v1097_v20, 0.0  ;;  %v1001_v39 = vld [vmem:[%s2355_s4 + $0xf0] sm:$0xff]  ;;  %v1074_v47 = vld [vmem:[%s2354_s3 + $0xd8] sm:$0xff]  ;;  %v1075_v48 = vld [vmem:[%s2354_s3 + $0xe0] sm:$0xff] }
 0x174   : > { %v1125_v3 = vmax.f32 %v1093_v51, 0.0  ;;  %1155 = vst [vmem:[%s2355_s4 + $0x60] sm:$0xff] %v1123_v1  ;;  %v1130_v38 = vmax.f32 %v1098_v21, 0.0  ;;  %v1131_v41 = vmax.f32 %v1099_v25, 0.0  ;;  %v1132_v42 = vmax.f32 %v1100_v26, 0.0  ;;  %1160 = vst [vmem:[%s2355_s4 + $0x88] sm:$0xff] %v1128_v36 }
 0x175   : > { %v1126_v4 = vmax.f32 %v1094_v52, 0.0  ;;  %1156 = vst [vmem:[%s2355_s4 + $0x68] sm:$0xff] %v1124_v2  ;;  %v1133_v43 = vmax.f32 %v1101_v27, 0.0  ;;  %v1134_v44 = vmax.f32 %v1102_v28, 0.0  ;;  %1159 = vst [vmem:[%s2355_s4 + $0x80] sm:$0xff] %v1127_v35  ;;  %v1039_v49 = vadd.f32 %v2033_v45, %v995_v22  ;;  %v1077_v54 = vld [vmem:[%s2354_s3 + $0xf0] sm:$0xff] }
 0x176   : > { %1157 = vst [vmem:[%s2355_s4 + $0x70] sm:$0xff] %v1125_v3  ;;  %1161 = vst [vmem:[%s2355_s4 + $0x90] sm:$0xff] %v1129_v37  ;;  %v1040_v50 = vadd.f32 %v2035_v46, %v996_v23  ;;  %v1041_v51 = vadd.f32 %v2033_v45, %v997_v24  ;;  %v1042_v52 = vadd.f32 %v2035_v46, %v998_v32  ;;  %v1078_v55 = vld [vmem:[%s2354_s3 + $0xf8] sm:$0xff] }
 0x177   : > { %1158 = vst [vmem:[%s2355_s4 + $0x78] sm:$0xff] %v1126_v4  ;;  %1162 = vst [vmem:[%s2355_s4 + $0x98] sm:$0xff] %v1130_v38  ;;  %v1043_v56 = vadd.f32 %v2033_v45, %v999_v33  ;;  %v1044_v57 = vadd.f32 %v2035_v46, %v1000_v34  ;;  %v1045_v58 = vadd.f32 %v2033_v45, %v1001_v39 }
 0x178   : > { %1163 = vst [vmem:[%s2355_s4 + $0xa0] sm:$0xff] %v1131_v41  ;;  %1164 = vst [vmem:[%s2355_s4 + $0xa8] sm:$0xff] %v1132_v42  ;;  %v1046_v59 = vadd.f32 %v2035_v46, %v1002_v40  ;;  %v1103_v60 = vadd.f32 %v1071_v29, %v1039_v49  ;;  %v1104_v61 = vadd.f32 %v1072_v30, %v1040_v50 }
 0x179   : > { %1165 = vst [vmem:[%s2355_s4 + $0xb0] sm:$0xff] %v1133_v43  ;;  %1166 = vst [vmem:[%s2355_s4 + $0xb8] sm:$0xff] %v1134_v44  ;;  %v1105_v62 = vadd.f32 %v1073_v31, %v1041_v51  ;;  %v1106_v63 = vadd.f32 %v1074_v47, %v1042_v52  ;;  %v1107_v0 = vadd.f32 %v1075_v48, %v1043_v56 }
 0x17a   : > { %v1108_v1 = vadd.f32 %v1076_v53, %v1044_v57  ;;  %v1109_v2 = vadd.f32 %v1077_v54, %v1045_v58  ;;  %v1110_v3 = vadd.f32 %v1078_v55, %v1046_v59  ;;  %v1135_v4 = vmax.f32 %v1103_v60, 0.0 }
 0x17b   : > { %v1136_v5 = vmax.f32 %v1104_v61, 0.0  ;;  %v1137_v6 = vmax.f32 %v1105_v62, 0.0  ;;  %v1138_v7 = vmax.f32 %v1106_v63, 0.0  ;;  %v1139_v8 = vmax.f32 %v1107_v0, 0.0 }
 0x17c   : > { %v1140_v9 = vmax.f32 %v1108_v1, 0.0  ;;  %v1141_v10 = vmax.f32 %v1109_v2, 0.0  ;;  %v1142_v11 = vmax.f32 %v1110_v3, 0.0  ;;  %1167 = vst [vmem:[%s2355_s4 + $0xc0] sm:$0xff] %v1135_v4 }
 0x17d   : > { %1168 = vst [vmem:[%s2355_s4 + $0xc8] sm:$0xff] %v1136_v5  ;;  %1169 = vst [vmem:[%s2355_s4 + $0xd0] sm:$0xff] %v1137_v6 }
 0x17e   : > { %1170 = vst [vmem:[%s2355_s4 + $0xd8] sm:$0xff] %v1138_v7  ;;  %1171 = vst [vmem:[%s2355_s4 + $0xe0] sm:$0xff] %v1139_v8 }
 0x17f   : > { %1172 = vst [vmem:[%s2355_s4 + $0xe8] sm:$0xff] %v1140_v9  ;;  %1173 = vst [vmem:[%s2355_s4 + $0xf0] sm:$0xff] %v1141_v10 }
 0x180   : > { %1174 = vst [vmem:[%s2355_s4 + $0xf8] sm:$0xff] %v1142_v11 }
 0x181 PF: > { %s14_s19 = sadd.s32 1, %s1571_s19   ;;  %s2356_s15 = smov %s1559_s16 }
 0x182   : > { %p11_p12 = scmp.ge.s32.totalorder %s14_s19, 11   ;;  %s2357_s16 = smov %s1634_s23 }
 0x183   : > { %s2358_s17 = smov %s1567_s18  ;;  %s2359_s18 = smov %s2361_s20 }
 0x184   :  { %13 = sbr.rel (!%p11_p12) target bundleno = 3 (0x3), region = 126 }

// kernel: model_forward.23
= control target key start
LH: loop header
LB: loop body
LE: loop exit
PB: predicated region body
PF: predicated region fallthrough
CT: control target
= control target key end

     0   :  { %s2322_s0 = inlined_call_operand.vmem [shape: bf16[128,2304], index: 0, kind: input, shape index: {}]   ;;  %s2323_s1 = inlined_call_operand.vmem [shape: bf16[2304,512], index: 1, kind: input, shape index: {}]   ;;  %s2324_s2 = inlined_call_operand.vmem [shape: f32[1,512], index: 2, kind: input, shape index: {}]   ;;  %s2325_s3 = inlined_call_operand.vmem [shape: f32[128,512], index: 3, kind: output, shape index: {}]  }
   0x1   :  { %2327 = sst [smem:[#allocation6_spill]] %s2322_s0 }
   0x2   :  { %2328 = sst [smem:[#allocation7_spill]] %s2323_s1 }
   0x3   :  { %s1748_s12 = smov 0   ;;  %s1750_s13 = smov 0  }
   0x4   :  { %s1752_s14 = smov 0   ;;  %s1754_s15 = smov 0  }
   0x5   :  { %s1756_s16 = smov 0   ;;  %s1758_s17 = smov 0  }
   0x6   :  { %s1760_s18 = smov 0   ;;  %s1762_s19 = smov 0  }
   0x7   :  { %s1764_s20 = smov 0   ;;  %s1766_s21 = smov 0  }
   0x8   :  { %s1768_s22 = smov 0  }
   0x9 LB: > { %s1371_s23 = sadd.s32 4294967295, %s1725_s22   ;;  %s25_s24 = sadd.s32 1, %s1717_s20  ;;  %s1725_s22 = sphi %s1768_s22, %s13_s22   ;;  %s1721_s21 = sphi %s1766_s21, %s2345_s21   ;;  %s1717_s20 = sphi %s1764_s20, %s2344_s20   ;;  %s1713_s19 = sphi %s1762_s19, %s2343_s19   ;;  %s1709_s18 = sphi %s1760_s18, %s2342_s18   ;;  %s1705_s17 = sphi %s1758_s17, %s2341_s17   ;;  %s1701_s16 = sphi %s1756_s16, %s2340_s16   ;;  %s1697_s15 = sphi %s1754_s15, %s2339_s15   ;;  %s1693_s14 = sphi %s1752_s14, %s2338_s14   ;;  %s1689_s13 = sphi %s1750_s13, %s2337_s13   ;;  %s1685_s12 = sphi %s1748_s12, %s2336_s12  }
   0xa   : > { %p26_p0 = scmp.ge.s32.totalorder %s25_s24, 9  ;;  %s28_s25 = sadd.s32 1, %s1721_s21 }
   0xb   : > { %s41_s26 = sadd.s32 1, %s1705_s17  ;;  %p48_p1 = scmp.ne.s32.totalorder %s1705_s17, %s1701_s16 }
   0xc   : > { %s2347_s24 = smov (%p26_p0, %s25_s24), 0  ;;  %s2349_s25 = smov (!%p26_p0, %s28_s25), %s1721_s21 }
   0xd   : > { %s37_s27 = ssub.s32 %s1717_s20, %s2347_s24  ;;  %p49_p2 = scmp.eq.s32.totalorder %s1725_s22, 0 }
   0xe   : > { %p30_p3 = scmp.ge.s32.totalorder %s2349_s25, 2  ;;  %p39_p4 = scmp.eq.s32.totalorder %s37_s27, 0 }
   0xf   : > { %p1815_p5 = por %p49_p2, %p48_p1  ;;  %s69_s29 = sadd.s32 1, %s1697_s15 }
  0x10   : > { %s2351_s25 = smov (%p30_p3, %s2349_s25), 0  ;;  %p76_p6 = scmp.ne.s32.totalorder %s1697_s15, %s1693_s14 }
  0x11   : > { %2330 = sst [smem:[#allocation5_spill]] %s2351_s25  ;;  %s65_s4 = ssub.s32 %s1721_s21, %s2351_s25 }
  0x12   : > { %s1823_s30 = scalar_select %p39_p4, %s1705_s17, %s41_s26  }
  0x13   : > { %s66_s5 = sor.u32 %s65_s4, %s37_s27  ;;  %p121_p7 = scmp.eq.s32.totalorder %s65_s4, 0 }
  0x14   : > { %p67_p8 = scmp.eq.s32.totalorder %s66_s5, 0  ;;  %p1829_p9 = por %p76_p6, %p49_p2 }
  0x15   : > { %s123_s7 = sadd.s32 1, %s1689_s13  ;;  %p133_p10 = scmp.ne.s32.totalorder %s1689_s13, %s1685_s12 }
  0x16   : > { %s1837_s8 = scalar_select %p67_p8, %s1697_s15, %s69_s29  }
  0x17   : > { %s1840_s9 = scalar_select %p121_p7, %s1689_s13, %s123_s7  }
  0x18   : > { %p134_p11 = scmp.eq.s32.totalorder %s1371_s23, 17  ;;  %p1374_p13 = scmp.ge.s32.totalorder %s1725_s22, 18 }
  0x1a   : > { %p1842_p12 = por %p134_p11, %p133_p10  ;;  %156 = sbr.rel (%p1374_p13) target bundleno = 77 (0x4d), region = 16 }
  0x21   : > { %159 = sbr.rel (!%p1815_p5) target bundleno = 51 (0x33), region = 20  ;;  %s161_s11 = sand.u32 (%p1815_p5), 1, %s1705_s17  }
  0x22   : > { %s1443_s26 = sshll.u32 (%p1815_p5), %s1717_s20, 3  ;;  %s1375_s27 = sshll.u32 (%p1815_p5), %s161_s11, 7 }
  0x23   : > { %s2333_s0 = sld [smem:[#allocation6_spill]] (%p1815_p5)  ;;  %s163_s23 = scalar_lea.vmem (%p1815_p5), [#allocation2], %s1375_s27 }
  0x29   : > { %s1854_s5 = scalar_lea.vmem %s2333_s0, %s1443_s26 }
  0x2a   : > { %v227_v0 = vld [vmem:[%s1854_s5] sm:$0xff]  ;;  %v229_v1 = vld [vmem:[%s1854_s5 + $0x48] sm:$0xff]  ;;  %v231_v2 = vld [vmem:[%s1854_s5 + $0x90] sm:$0xff] }
  0x2b   : > { %228 = vst [vmem:[%s163_s23] sm:$0xff] %v227_v0  ;;  %230 = vst [vmem:[%s163_s23 + $0x8] sm:$0xff] %v229_v1  ;;  %v233_v3 = vld [vmem:[%s1854_s5 + $0xd8] sm:$0xff]  ;;  %v235_v4 = vld [vmem:[%s1854_s5 + $0x120] sm:$0xff] }
  0x2c   : > { %232 = vst [vmem:[%s163_s23 + $0x10] sm:$0xff] %v231_v2  ;;  %v237_v5 = vld [vmem:[%s1854_s5 + $0x168] sm:$0xff]  ;;  %234 = vst [vmem:[%s163_s23 + $0x18] sm:$0xff] %v233_v3  ;;  %v239_v6 = vld [vmem:[%s1854_s5 + $0x1b0] sm:$0xff] }
  0x2d   : > { %236 = vst [vmem:[%s163_s23 + $0x20] sm:$0xff] %v235_v4  ;;  %238 = vst [vmem:[%s163_s23 + $0x28] sm:$0xff] %v237_v5  ;;  %v241_v7 = vld [vmem:[%s1854_s5 + $0x1f8] sm:$0xff]  ;;  %v243_v8 = vld [vmem:[%s1854_s5 + $0x240] sm:$0xff] }
  0x2e   : > { %240 = vst [vmem:[%s163_s23 + $0x30] sm:$0xff] %v239_v6  ;;  %242 = vst [vmem:[%s163_s23 + $0x38] sm:$0xff] %v241_v7  ;;  %v245_v9 = vld [vmem:[%s1854_s5 + $0x288] sm:$0xff]  ;;  %v247_v10 = vld [vmem:[%s1854_s5 + $0x2d0] sm:$0xff] }
  0x2f   : > { %244 = vst [vmem:[%s163_s23 + $0x40] sm:$0xff] %v243_v8  ;;  %v249_v11 = vld [vmem:[%s1854_s5 + $0x318] sm:$0xff]  ;;  %246 = vst [vmem:[%s163_s23 + $0x48] sm:$0xff] %v245_v9  ;;  %v251_v12 = vld [vmem:[%s1854_s5 + $0x360] sm:$0xff] }
  0x30   : > { %248 = vst [vmem:[%s163_s23 + $0x50] sm:$0xff] %v247_v10  ;;  %250 = vst [vmem:[%s163_s23 + $0x58] sm:$0xff] %v249_v11  ;;  %v253_v13 = vld [vmem:[%s1854_s5 + $0x3a8] sm:$0xff]  ;;  %v255_v14 = vld [vmem:[%s1854_s5 + $0x3f0] sm:$0xff] }
  0x31   : > { %252 = vst [vmem:[%s163_s23 + $0x60] sm:$0xff] %v251_v12  ;;  %254 = vst [vmem:[%s163_s23 + $0x68] sm:$0xff] %v253_v13  ;;  %v257_v15 = vld [vmem:[%s1854_s5 + $0x438] sm:$0xff] }
  0x32   : > { %256 = vst [vmem:[%s163_s23 + $0x70] sm:$0xff] %v255_v14  ;;  %258 = vst [vmem:[%s163_s23 + $0x78] sm:$0xff] %v257_v15 }
  0x33 PF: > { %264 = sbr.rel (!%p1829_p9) target bundleno = 77 (0x4d), region = 58  ;;  %s266_s28 = sand.u32 (%p1829_p9), 1, %s1697_s15  }
  0x34   : > { %s1380_s7 = sshll.u32 (%p1829_p9), %s1721_s21, 1  ;;  %s1378_s11 = sshll.u32 (%p1829_p9), %s266_s28, 8 }
  0x35   : > { %s1444_s26 = sshll.u32 (%p1829_p9), %s1717_s20, 7  ;;  %s2334_s1 = sld [smem:[#allocation7_spill]] (%p1829_p9) }
  0x36   : > { %s272_s27 = sadd.s32 (%p1829_p9), %s1444_s26, %s1380_s7  ;;  %s1885_s6 = scalar_lea.vmem (%p1829_p9), [#allocation3], %s1378_s11 }
  0x37   : > { %s1382_s29 = sshll.u32 (%p1829_p9), %s272_s27, 2 }
  0x3b   : > { %s1880_s25 = scalar_lea.vmem %s2334_s1, %s1382_s29 }
  0x3c   : > { %v364_v16 = vld [vmem:[%s1880_s25] sm:$0xff]  ;;  %v366_v17 = vld [vmem:[%s1880_s25 + $0x10] sm:$0xff] }
  0x3d   : > { %v368_v18 = vld [vmem:[%s1880_s25 + $0x20] sm:$0xff]  ;;  %365 = vst [vmem:[%s1885_s6] sm:$0xff] %v364_v16  ;;  %367 = vst [vmem:[%s1885_s6 + $0x8] sm:$0xff] %v366_v17  ;;  %v370_v19 = vld [vmem:[%s1880_s25 + $0x30] sm:$0xff] }
  0x3e   : > { %369 = vst [vmem:[%s1885_s6 + $0x10] sm:$0xff] %v368_v18  ;;  %v372_v20 = vld [vmem:[%s1880_s25 + $0x40] sm:$0xff]  ;;  %v374_v21 = vld [vmem:[%s1880_s25 + $0x50] sm:$0xff]  ;;  %371 = vst [vmem:[%s1885_s6 + $0x18] sm:$0xff] %v370_v19 }
  0x3f   : > { %373 = vst [vmem:[%s1885_s6 + $0x20] sm:$0xff] %v372_v20  ;;  %375 = vst [vmem:[%s1885_s6 + $0x28] sm:$0xff] %v374_v21  ;;  %v376_v22 = vld [vmem:[%s1880_s25 + $0x60] sm:$0xff]  ;;  %v378_v23 = vld [vmem:[%s1880_s25 + $0x70] sm:$0xff] }
  0x40   : > { %v380_v24 = vld [vmem:[%s1880_s25 + $0x80] sm:$0xff]  ;;  %377 = vst [vmem:[%s1885_s6 + $0x30] sm:$0xff] %v376_v22  ;;  %379 = vst [vmem:[%s1885_s6 + $0x38] sm:$0xff] %v378_v23  ;;  %v382_v25 = vld [vmem:[%s1880_s25 + $0x90] sm:$0xff] }
  0x41   : > { %381 = vst [vmem:[%s1885_s6 + $0x40] sm:$0xff] %v380_v24  ;;  %v384_v26 = vld [vmem:[%s1880_s25 + $0xa0] sm:$0xff]  ;;  %v386_v27 = vld [vmem:[%s1880_s25 + $0xb0] sm:$0xff]  ;;  %383 = vst [vmem:[%s1885_s6 + $0x48] sm:$0xff] %v382_v25 }
  0x42   : > { %385 = vst [vmem:[%s1885_s6 + $0x50] sm:$0xff] %v384_v26  ;;  %387 = vst [vmem:[%s1885_s6 + $0x58] sm:$0xff] %v386_v27  ;;  %v388_v28 = vld [vmem:[%s1880_s25 + $0xc0] sm:$0xff]  ;;  %v390_v29 = vld [vmem:[%s1880_s25 + $0xd0] sm:$0xff] }
  0x43   : > { %v392_v30 = vld [vmem:[%s1880_s25 + $0xe0] sm:$0xff]  ;;  %389 = vst [vmem:[%s1885_s6 + $0x60] sm:$0xff] %v388_v28  ;;  %391 = vst [vmem:[%s1885_s6 + $0x68] sm:$0xff] %v390_v29  ;;  %v394_v31 = vld [vmem:[%s1880_s25 + $0xf0] sm:$0xff] }
  0x44   : > { %393 = vst [vmem:[%s1885_s6 + $0x70] sm:$0xff] %v392_v30  ;;  %v396_v32 = vld [vmem:[%s1880_s25 + $0x100] sm:$0xff]  ;;  %v398_v33 = vld [vmem:[%s1880_s25 + $0x110] sm:$0xff]  ;;  %395 = vst [vmem:[%s1885_s6 + $0x78] sm:$0xff] %v394_v31 }
  0x45   : > { %397 = vst [vmem:[%s1885_s6 + $0x80] sm:$0xff] %v396_v32  ;;  %399 = vst [vmem:[%s1885_s6 + $0x88] sm:$0xff] %v398_v33  ;;  %v400_v34 = vld [vmem:[%s1880_s25 + $0x120] sm:$0xff]  ;;  %v402_v35 = vld [vmem:[%s1880_s25 + $0x130] sm:$0xff] }
  0x46   : > { %v404_v36 = vld [vmem:[%s1880_s25 + $0x140] sm:$0xff]  ;;  %401 = vst [vmem:[%s1885_s6 + $0x90] sm:$0xff] %v400_v34  ;;  %403 = vst [vmem:[%s1885_s6 + $0x98] sm:$0xff] %v402_v35  ;;  %v406_v37 = vld [vmem:[%s1880_s25 + $0x150] sm:$0xff] }
  0x47   : > { %405 = vst [vmem:[%s1885_s6 + $0xa0] sm:$0xff] %v404_v36  ;;  %v408_v38 = vld [vmem:[%s1880_s25 + $0x160] sm:$0xff]  ;;  %v410_v39 = vld [vmem:[%s1880_s25 + $0x170] sm:$0xff]  ;;  %407 = vst [vmem:[%s1885_s6 + $0xa8] sm:$0xff] %v406_v37 }
  0x48   : > { %409 = vst [vmem:[%s1885_s6 + $0xb0] sm:$0xff] %v408_v38  ;;  %411 = vst [vmem:[%s1885_s6 + $0xb8] sm:$0xff] %v410_v39  ;;  %v412_v40 = vld [vmem:[%s1880_s25 + $0x180] sm:$0xff]  ;;  %v414_v41 = vld [vmem:[%s1880_s25 + $0x190] sm:$0xff] }
  0x49   : > { %v416_v42 = vld [vmem:[%s1880_s25 + $0x1a0] sm:$0xff]  ;;  %413 = vst [vmem:[%s1885_s6 + $0xc0] sm:$0xff] %v412_v40  ;;  %415 = vst [vmem:[%s1885_s6 + $0xc8] sm:$0xff] %v414_v41  ;;  %v418_v43 = vld [vmem:[%s1880_s25 + $0x1b0] sm:$0xff] }
  0x4a   : > { %417 = vst [vmem:[%s1885_s6 + $0xd0] sm:$0xff] %v416_v42  ;;  %v420_v44 = vld [vmem:[%s1880_s25 + $0x1c0] sm:$0xff]  ;;  %v422_v45 = vld [vmem:[%s1880_s25 + $0x1d0] sm:$0xff]  ;;  %419 = vst [vmem:[%s1885_s6 + $0xd8] sm:$0xff] %v418_v43 }
  0x4b   : > { %421 = vst [vmem:[%s1885_s6 + $0xe0] sm:$0xff] %v420_v44  ;;  %423 = vst [vmem:[%s1885_s6 + $0xe8] sm:$0xff] %v422_v45  ;;  %v424_v46 = vld [vmem:[%s1880_s25 + $0x1e0] sm:$0xff]  ;;  %v426_v47 = vld [vmem:[%s1880_s25 + $0x1f0] sm:$0xff] }
  0x4c   : > { %425 = vst [vmem:[%s1885_s6 + $0xf0] sm:$0xff] %v424_v46  ;;  %427 = vst [vmem:[%s1885_s6 + $0xf8] sm:$0xff] %v426_v47 }
  0x4d PF: > { %p1383_p0 = scmp.ge.s32.totalorder %s1725_s22, 1  ;;  %p440_p1 = scmp.lt.s32.totalorder %s1725_s22, 19 }
  0x4f   : > { %p441_p2 = pnand %p1383_p0, %p440_p1 }
  0x50   : > { %s447_s0 = sand.u32 (!%p441_p2), 1, %s1701_s16   ;;  %s454_s5 = sand.u32 (!%p441_p2), 1, %s1693_s14  }
  0x51   : > { %444 = sbr.rel (%p441_p2) target bundleno = 445 (0x1bd), region = 100  ;;  %s1384_s23 = sshll.u32 (!%p441_p2), %s447_s0, 7 }
  0x52   : > { %s1385_s28 = sshll.u32 (!%p441_p2), %s454_s5, 8  ;;  %s481_s7 = sand.u32 (!%p441_p2), 1, %s1685_s12  }
  0x53   : > { %s1387_s25 = sshll.u32 (!%p441_p2), %s1713_s19, 1  ;;  %s1386_s11 = sshll.u32 (!%p441_p2), %s481_s7, 8 }
  0x54   : > { %p489_p3 = scmp.lt.s32.totalorder (!%p441_p2), %s1387_s25, 3  ;;  %s1960_s4 = scalar_lea.vmem (!%p441_p2), [#allocation2], %s1384_s23 }
  0x55   : > { %s1962_s6 = scalar_lea.vmem (!%p441_p2), [#allocation3], %s1385_s28  ;;  %s1964_s1 = scalar_lea.vmem (!%p441_p2), [#allocation4], %s1386_s11 }
  0x56   : > { %p1388_p4 = scmp.ne.s32.totalorder (!%p441_p2), %s1709_s18, 0 }
  0x58   : > { %s2353_s25 = smov (!%p489_p3, %s1387_s25), 3  ;;  %498 = sbr.rel (%p1388_p4) target bundleno = 106 (0x6a), region = 112 }
  0x59   : > { %s491_s29 = scalar_lea.vmem %s2324_s2, %s2353_s25  ;;  %v1727_v48 = vmov (!%p1388_p4), 0.0  }
  0x5a   : > { %499 = vst [vmem:[%s1964_s1] sm:$0xff] (!%p1388_p4), %v1727_v48  ;;  %500 = vst [vmem:[%s1964_s1 + $0x8] sm:$0xff] (!%p1388_p4), %v1727_v48 }
  0x5b   : > { %501 = vst [vmem:[%s1964_s1 + $0x10] sm:$0xff] (!%p1388_p4), %v1727_v48  ;;  %502 = vst [vmem:[%s1964_s1 + $0x18] sm:$0xff] (!%p1388_p4), %v1727_v48 }
  0x5c   : > { %503 = vst [vmem:[%s1964_s1 + $0x20] sm:$0xff] (!%p1388_p4), %v1727_v48  ;;  %504 = vst [vmem:[%s1964_s1 + $0x28] sm:$0xff] (!%p1388_p4), %v1727_v48 }
  0x5d   : > { %505 = vst [vmem:[%s1964_s1 + $0x30] sm:$0xff] (!%p1388_p4), %v1727_v48  ;;  %506 = vst [vmem:[%s1964_s1 + $0x38] sm:$0xff] (!%p1388_p4), %v1727_v48 }
  0x5e   : > { %507 = vst [vmem:[%s1964_s1 + $0x40] sm:$0xff] (!%p1388_p4), %v1727_v48  ;;  %508 = vst [vmem:[%s1964_s1 + $0x48] sm:$0xff] (!%p1388_p4), %v1727_v48 }
  0x5f   : > { %509 = vst [vmem:[%s1964_s1 + $0x50] sm:$0xff] %v1727_v48  ;;  %510 = vst [vmem:[%s1964_s1 + $0x58] sm:$0xff] %v1727_v48 }
  0x60   : > { %511 = vst [vmem:[%s1964_s1 + $0x60] sm:$0xff] %v1727_v48  ;;  %512 = vst [vmem:[%s1964_s1 + $0x68] sm:$0xff] %v1727_v48 }
  0x61   : > { %513 = vst [vmem:[%s1964_s1 + $0x70] sm:$0xff] %v1727_v48  ;;  %514 = vst [vmem:[%s1964_s1 + $0x78] sm:$0xff] %v1727_v48 }
  0x62   : > { %515 = vst [vmem:[%s1964_s1 + $0x80] sm:$0xff] %v1727_v48  ;;  %516 = vst [vmem:[%s1964_s1 + $0x88] sm:$0xff] %v1727_v48 }
  0x63   : > { %517 = vst [vmem:[%s1964_s1 + $0x90] sm:$0xff] %v1727_v48  ;;  %518 = vst [vmem:[%s1964_s1 + $0x98] sm:$0xff] %v1727_v48 }
  0x64   : > { %519 = vst [vmem:[%s1964_s1 + $0xa0] sm:$0xff] %v1727_v48  ;;  %520 = vst [vmem:[%s1964_s1 + $0xa8] sm:$0xff] %v1727_v48 }
  0x65   : > { %521 = vst [vmem:[%s1964_s1 + $0xb0] sm:$0xff] %v1727_v48  ;;  %522 = vst [vmem:[%s1964_s1 + $0xb8] sm:$0xff] %v1727_v48 }
  0x66   : > { %523 = vst [vmem:[%s1964_s1 + $0xc0] sm:$0xff] %v1727_v48  ;;  %524 = vst [vmem:[%s1964_s1 + $0xc8] sm:$0xff] %v1727_v48 }
  0x67   : > { %525 = vst [vmem:[%s1964_s1 + $0xd0] sm:$0xff] %v1727_v48  ;;  %526 = vst [vmem:[%s1964_s1 + $0xd8] sm:$0xff] %v1727_v48 }
  0x68   : > { %527 = vst [vmem:[%s1964_s1 + $0xe0] sm:$0xff] %v1727_v48  ;;  %528 = vst [vmem:[%s1964_s1 + $0xe8] sm:$0xff] %v1727_v48 }
  0x69   : > { %529 = vst [vmem:[%s1964_s1 + $0xf0] sm:$0xff] %v1727_v48  ;;  %530 = vst [vmem:[%s1964_s1 + $0xf8] sm:$0xff] %v1727_v48 }
  0x6a PF: > { %v1567_v49 = vld [vmem:[%s1962_s6 + $0x4] ss:$8 sps:$4 sm:$0xff]   ;;  %v1569_v50 = vld [vmem:[%s1962_s6] ss:$8 sps:$4 sm:$0xff]   ;;  %v1570_v51 = vld [vmem:[%s1962_s6 + $0x14] ss:$8 sps:$4 sm:$0xff]  }
  0x6b   : > { %851 = vmatprep.subr.bf16.mxu0 %v1567_v49  ;;  %1446 = vmatprep.subr.bf16.mxu1 %v1567_v49  ;;  %v1572_v52 = vld [vmem:[%s1962_s6 + $0x10] ss:$8 sps:$4 sm:$0xff]   ;;  %v1573_v53 = vld [vmem:[%s1962_s6 + $0x24] ss:$8 sps:$4 sm:$0xff]   ;;  %v1575_v54 = vld [vmem:[%s1962_s6 + $0x20] ss:$8 sps:$4 sm:$0xff]  }
  0x6c   : > { %852 = vmatpush1.bf16.msra.mxu0 %v1569_v50  ;;  %1462 = vmatpush1.bf16.msra.mxu1 %v1569_v50  ;;  %v1576_v55 = vld [vmem:[%s1962_s6 + $0x34] ss:$8 sps:$4 sm:$0xff]   ;;  %v1578_v56 = vld [vmem:[%s1962_s6 + $0x30] ss:$8 sps:$4 sm:$0xff]   ;;  %v1579_v57 = vld [vmem:[%s1962_s6 + $0x44] ss:$8 sps:$4 sm:$0xff]  }
  0x6d   : > { %853 = vmatprep.subr.bf16.mxu0 %v1570_v51  ;;  %1447 = vmatprep.subr.bf16.mxu1 %v1570_v51  ;;  %v1581_v58 = vld [vmem:[%s1962_s6 + $0x40] ss:$8 sps:$4 sm:$0xff]   ;;  %v1582_v59 = vld [vmem:[%s1962_s6 + $0x54] ss:$8 sps:$4 sm:$0xff]   ;;  %v1584_v60 = vld [vmem:[%s1962_s6 + $0x50] ss:$8 sps:$4 sm:$0xff]  }
  0x6e   : > { %v1585_v61 = vld [vmem:[%s1962_s6 + $0x64] ss:$8 sps:$4 sm:$0xff]   ;;  %v1587_v63 = vld [vmem:[%s1962_s6 + $0x60] ss:$8 sps:$4 sm:$0xff]   ;;  %v1588_v1 = vld [vmem:[%s1962_s6 + $0x74] ss:$8 sps:$4 sm:$0xff]  }
  0x6f   : > { %v1617_v62 = vld [vmem:[%s1960_s4 + $0x4] ss:$8 sps:$4 sm:$0xff]   ;;  %v1590_v2 = vld [vmem:[%s1962_s6 + $0x70] ss:$8 sps:$4 sm:$0xff]   ;;  %v1593_v4 = vld [vmem:[%s1962_s6 + $0x80] ss:$8 sps:$4 sm:$0xff]  }
  0x70   : > { %854 = vmatpush1.bf16.msra.mxu0 %v1572_v52  ;;  %1463 = vmatpush1.bf16.msra.mxu1 %v1572_v52  ;;  %v1620_v0 = vld [vmem:[%s1960_s4 + $0x44] ss:$8 sps:$4 sm:$0xff]   ;;  %v1594_v5 = vld [vmem:[%s1962_s6 + $0x94] ss:$8 sps:$4 sm:$0xff]   ;;  %v1596_v6 = vld [vmem:[%s1962_s6 + $0x90] ss:$8 sps:$4 sm:$0xff]  }
  0x71   : > { %855 = vmatprep.subr.bf16.mxu0 %v1573_v53  ;;  %1448 = vmatprep.subr.bf16.mxu1 %v1573_v53  ;;  %v1591_v3 = vld [vmem:[%s1962_s6 + $0x84] ss:$8 sps:$4 sm:$0xff]   ;;  %v1599_v8 = vld [vmem:[%s1962_s6 + $0xa0] ss:$8 sps:$4 sm:$0xff]   ;;  %v1600_v9 = vld [vmem:[%s1962_s6 + $0xb4] ss:$8 sps:$4 sm:$0xff]  }
  0x72   : > { %883 = vmatprep.mubr.bf16.mxu0 %v1617_v62  ;;  %923 = vmatprep.mubr.bf16.mxu1 %v1620_v0  ;;  %v1597_v7 = vld [vmem:[%s1962_s6 + $0xa4] ss:$8 sps:$4 sm:$0xff]   ;;  %v1602_v10 = vld [vmem:[%s1962_s6 + $0xb0] ss:$8 sps:$4 sm:$0xff]   ;;  %v1605_v12 = vld [vmem:[%s1962_s6 + $0xc0] ss:$8 sps:$4 sm:$0xff]  }
  0x73   : > { %v1603_v11 = vld [vmem:[%s1962_s6 + $0xc4] ss:$8 sps:$4 sm:$0xff]   ;;  %v1606_v13 = vld [vmem:[%s1962_s6 + $0xd4] ss:$8 sps:$4 sm:$0xff]   ;;  %v1608_v14 = vld [vmem:[%s1962_s6 + $0xd0] ss:$8 sps:$4 sm:$0xff]  }
  0x74   : > { %856 = vmatpush1.bf16.msra.mxu0 %v1575_v54  ;;  %1464 = vmatpush1.bf16.msra.mxu1 %v1575_v54  ;;  %v1609_v15 = vld [vmem:[%s1962_s6 + $0xe4] ss:$8 sps:$4 sm:$0xff]   ;;  %v1611_v16 = vld [vmem:[%s1962_s6 + $0xe0] ss:$8 sps:$4 sm:$0xff]   ;;  %v1612_v17 = vld [vmem:[%s1962_s6 + $0xf4] ss:$8 sps:$4 sm:$0xff]  }
  0x75   : > { %857 = vmatprep.subr.bf16.mxu0 %v1576_v55  ;;  %1449 = vmatprep.subr.bf16.mxu1 %v1576_v55  ;;  %v1614_v18 = vld [vmem:[%s1962_s6 + $0xf0] ss:$8 sps:$4 sm:$0xff]   ;;  %v1615_v19 = vld [vmem:[%s1960_s4] ss:$8 sps:$4 sm:$0xff]   ;;  %v1621_v21 = vld [vmem:[%s1960_s4 + $0x14] ss:$8 sps:$4 sm:$0xff]  }
  0x76   : > { %v1618_v20 = vld [vmem:[%s1960_s4 + $0x40] ss:$8 sps:$4 sm:$0xff]   ;;  %v1623_v22 = vld [vmem:[%s1960_s4 + $0x54] ss:$8 sps:$4 sm:$0xff]   ;;  %v1625_v23 = vld [vmem:[%s1960_s4 + $0x10] ss:$8 sps:$4 sm:$0xff]  }
  0x77   : > { %v1626_v24 = vld [vmem:[%s1960_s4 + $0x50] ss:$8 sps:$4 sm:$0xff]   ;;  %v1627_v25 = vld [vmem:[%s1960_s4 + $0x24] ss:$8 sps:$4 sm:$0xff]   ;;  %v1631_v27 = vld [vmem:[%s1960_s4 + $0x20] ss:$8 sps:$4 sm:$0xff]  }
  0x78   : > { %858 = vmatpush1.bf16.msra.mxu0 %v1578_v56  ;;  %1465 = vmatpush1.bf16.msra.mxu1 %v1578_v56  ;;  %v1629_v26 = vld [vmem:[%s1960_s4 + $0x64] ss:$8 sps:$4 sm:$0xff]   ;;  %v1632_v28 = vld [vmem:[%s1960_s4 + $0x60] ss:$8 sps:$4 sm:$0xff]   ;;  %v1633_v29 = vld [vmem:[%s1960_s4 + $0x34] ss:$8 sps:$4 sm:$0xff]  }
  0x79   : > { %859 = vmatprep.subr.bf16.mxu0 %v1579_v57  ;;  %1450 = vmatprep.subr.bf16.mxu1 %v1579_v57  ;;  %v1635_v30 = vld [vmem:[%s1960_s4 + $0x74] ss:$8 sps:$4 sm:$0xff]   ;;  %v1637_v31 = vld [vmem:[%s1960_s4 + $0x30] ss:$8 sps:$4 sm:$0xff]   ;;  %v531_v33 = vld [vmem:[%s1964_s1] sm:$0xff]  ;;  %p1437_p5 = scmp.ne.s32.totalorder %s1709_s18, 8 }
  0x7a   : > { %v1638_v32 = vld [vmem:[%s1960_s4 + $0x70] ss:$8 sps:$4 sm:$0xff]   ;;  %v547_v34 = vld [vmem:[%s1964_s1 + $0x80] sm:$0xff]  ;;  %v532_v35 = vld [vmem:[%s1964_s1 + $0x8] sm:$0xff] }
  0x7b   : > { %v548_v36 = vld [vmem:[%s1964_s1 + $0x88] sm:$0xff]  ;;  %v533_v39 = vld [vmem:[%s1964_s1 + $0x10] sm:$0xff]  ;;  %v534_v45 = vld [vmem:[%s1964_s1 + $0x18] sm:$0xff] }
  0x7c   : > { %860 = vmatpush1.bf16.msra.mxu0 %v1581_v58  ;;  %1466 = vmatpush1.bf16.msra.mxu1 %v1581_v58  ;;  %v549_v40 = vld [vmem:[%s1964_s1 + $0x90] sm:$0xff]  ;;  %v550_v46 = vld [vmem:[%s1964_s1 + $0x98] sm:$0xff]  ;;  %v535_v57 = vld [vmem:[%s1964_s1 + $0x20] sm:$0xff] }
  0x7d   : > { %861 = vmatprep.subr.bf16.mxu0 %v1582_v59  ;;  %1451 = vmatprep.subr.bf16.mxu1 %v1582_v59  ;;  %v551_v58 = vld [vmem:[%s1964_s1 + $0xa0] sm:$0xff]  ;;  %v536_v59 = vld [vmem:[%s1964_s1 + $0x28] sm:$0xff]  ;;  %v553_v0 = vld [vmem:[%s1964_s1 + $0xb0] sm:$0xff] }
  0x80   : > { %862 = vmatpush1.bf16.msra.mxu0 %v1584_v60  ;;  %1467 = vmatpush1.bf16.msra.mxu1 %v1584_v60  ;;  %v552_v60 = vld [vmem:[%s1964_s1 + $0xa8] sm:$0xff] }
  0x81   : > { %863 = vmatprep.subr.bf16.mxu0 %v1585_v61  ;;  %1452 = vmatprep.subr.bf16.mxu1 %v1585_v61 }
  0x84   : > { %864 = vmatpush1.bf16.msra.mxu0 %v1587_v63  ;;  %1468 = vmatpush1.bf16.msra.mxu1 %v1587_v63  ;;  %v537_v63 = vld [vmem:[%s1964_s1 + $0x30] sm:$0xff] }
  0x85   : > { %865 = vmatprep.subr.bf16.mxu0 %v1588_v1  ;;  %1453 = vmatprep.subr.bf16.mxu1 %v1588_v1 }
  0x88   : > { %866 = vmatpush1.bf16.msra.mxu0 %v1590_v2  ;;  %1469 = vmatpush1.bf16.msra.mxu1 %v1590_v2 }
  0x89   : > { %867 = vmatprep.subr.bf16.mxu0 %v1591_v3  ;;  %1454 = vmatprep.subr.bf16.mxu1 %v1591_v3 }
  0x8c   : > { %868 = vmatpush1.bf16.msra.mxu0 %v1593_v4  ;;  %1470 = vmatpush1.bf16.msra.mxu1 %v1593_v4 }
  0x8d   : > { %869 = vmatprep.subr.bf16.mxu0 %v1594_v5  ;;  %1455 = vmatprep.subr.bf16.mxu1 %v1594_v5  ;;  %v538_v5 = vld [vmem:[%s1964_s1 + $0x38] sm:$0xff] }
  0x90   : > { %870 = vmatpush1.bf16.msra.mxu0 %v1596_v6  ;;  %1471 = vmatpush1.bf16.msra.mxu1 %v1596_v6  ;;  %v554_v6 = vld [vmem:[%s1964_s1 + $0xb8] sm:$0xff] }
  0x91   : > { %871 = vmatprep.subr.bf16.mxu0 %v1597_v7  ;;  %1456 = vmatprep.subr.bf16.mxu1 %v1597_v7 }
  0x94   : > { %872 = vmatpush1.bf16.msra.mxu0 %v1599_v8  ;;  %1472 = vmatpush1.bf16.msra.mxu1 %v1599_v8 }
  0x95   : > { %873 = vmatprep.subr.bf16.mxu0 %v1600_v9  ;;  %1457 = vmatprep.subr.bf16.mxu1 %v1600_v9 }
  0x98   : > { %874 = vmatpush1.bf16.msra.mxu0 %v1602_v10  ;;  %1473 = vmatpush1.bf16.msra.mxu1 %v1602_v10 }
  0x99   : > { %875 = vmatprep.subr.bf16.mxu0 %v1603_v11  ;;  %1458 = vmatprep.subr.bf16.mxu1 %v1603_v11 }
  0x9c   : > { %876 = vmatpush1.bf16.msra.mxu0 %v1605_v12  ;;  %1474 = vmatpush1.bf16.msra.mxu1 %v1605_v12 }
  0x9d   : > { %877 = vmatprep.subr.bf16.mxu0 %v1606_v13  ;;  %1459 = vmatprep.subr.bf16.mxu1 %v1606_v13 }
  0xa0   : > { %878 = vmatpush1.bf16.msra.mxu0 %v1608_v14  ;;  %1475 = vmatpush1.bf16.msra.mxu1 %v1608_v14 }
  0xa1   : > { %879 = vmatprep.subr.bf16.mxu0 %v1609_v15  ;;  %1460 = vmatprep.subr.bf16.mxu1 %v1609_v15 }
  0xa4   : > { %880 = vmatpush1.bf16.msra.mxu0 %v1611_v16  ;;  %1476 = vmatpush1.bf16.msra.mxu1 %v1611_v16 }
  0xa5   : > { %881 = vmatprep.subr.bf16.mxu0 %v1612_v17  ;;  %1461 = vmatprep.subr.bf16.mxu1 %v1612_v17  ;;  %v539_v17 = vld [vmem:[%s1964_s1 + $0x40] sm:$0xff] }
  0xa8   : > { %882 = vmatpush1.bf16.msra.mxu0 %v1614_v18  ;;  %1477 = vmatpush1.bf16.msra.mxu1 %v1614_v18  ;;  %v555_v18 = vld [vmem:[%s1964_s1 + $0xc0] sm:$0xff] }
  0xab   : > { %884 = vmatmul.mubr.bf16.vlgmr.msra.gmra.mrb[0].mxu0 %v1615_v19  ;;  %924 = vmatmul.mubr.bf16.vlgmr.msra.gmra.mrb[0].mxu1 %v1618_v20  ;;  %v540_v19 = vld [vmem:[%s1964_s1 + $0x48] sm:$0xff] }
  0xac   : > { %893 = vmatprep.mubr.bf16.mxu0 %v1621_v21  ;;  %933 = vmatprep.mubr.bf16.mxu1 %v1623_v22  ;;  %v556_v20 = vld [vmem:[%s1964_s1 + $0xc8] sm:$0xff] }
  0xb3   : > { %894 = vmatmul.mubr.bf16.gmra.mrb[4].mxu0 %v1625_v23  ;;  %934 = vmatmul.mubr.bf16.gmra.mrb[4].mxu1 %v1626_v24  ;;  %v541_v23 = vld [vmem:[%s1964_s1 + $0x50] sm:$0xff] }
  0xb4   : > { %903 = vmatprep.mubr.bf16.mxu0 %v1627_v25  ;;  %943 = vmatprep.mubr.bf16.mxu1 %v1629_v26  ;;  %v557_v24 = vld [vmem:[%s1964_s1 + $0xd0] sm:$0xff] }
  0xbb   : > { %904 = vmatmul.mubr.bf16.gmra.mrb[8].mxu0 %v1631_v27  ;;  %944 = vmatmul.mubr.bf16.gmra.mrb[8].mxu1 %v1632_v28 }
  0xbc   : > { %913 = vmatprep.mubr.bf16.mxu0 %v1633_v29  ;;  %953 = vmatprep.mubr.bf16.mxu1 %v1635_v30  ;;  %v542_v29 = vld [vmem:[%s1964_s1 + $0x58] sm:$0xff] }
  0xbd   : > { %v558_v30 = vld [vmem:[%s1964_s1 + $0xd8] sm:$0xff] }
  0xc3   : > { %914 = vmatmul.mubr.bf16.gmra.mrb[12].mxu0 %v1637_v31  ;;  %954 = vmatmul.mubr.bf16.gmra.mrb[12].mxu1 %v1638_v32 }
 0x17e   : > { %v885_v37 = vpop.f32.mrb[0].mxu0  ;;  %v925_v38 = vpop.f32.mrb[0].mxu1 }
 0x17f   : > { %v964_v41 = vadd.f32 %v885_v37, %v531_v33  ;;  %v980_v42 = vadd.f32 %v925_v38, %v547_v34  ;;  %v887_v43 = vpop.f32.mrb[1].mxu0  ;;  %v927_v44 = vpop.f32.mrb[1].mxu1 }
 0x180   : > { %v965_v47 = vadd.f32 %v887_v43, %v532_v35  ;;  %v981_v48 = vadd.f32 %v927_v44, %v548_v36  ;;  %v889_v49 = vpop.f32.mrb[2].mxu0  ;;  %v929_v50 = vpop.f32.mrb[2].mxu1  ;;  %v544_v43 = vld [vmem:[%s1964_s1 + $0x68] sm:$0xff] }
 0x181   : > { %996 = vst [vmem:[%s1964_s1] sm:$0xff] %v964_v41  ;;  %1012 = vst [vmem:[%s1964_s1 + $0x80] sm:$0xff] %v980_v42  ;;  %v966_v51 = vadd.f32 %v889_v49, %v533_v39  ;;  %v982_v52 = vadd.f32 %v929_v50, %v549_v40  ;;  %v891_v53 = vpop.f32.mrb[3].mxu0  ;;  %v931_v54 = vpop.f32.mrb[3].mxu1  ;;  %v543_v41 = vld [vmem:[%s1964_s1 + $0x60] sm:$0xff]  ;;  %v560_v44 = vld [vmem:[%s1964_s1 + $0xe8] sm:$0xff] }
 0x182   : > { %997 = vst [vmem:[%s1964_s1 + $0x8] sm:$0xff] %v965_v47  ;;  %1013 = vst [vmem:[%s1964_s1 + $0x88] sm:$0xff] %v981_v48  ;;  %v967_v55 = vadd.f32 %v891_v53, %v534_v45  ;;  %v983_v56 = vadd.f32 %v931_v54, %v550_v46  ;;  %v559_v42 = vld [vmem:[%s1964_s1 + $0xe0] sm:$0xff]  ;;  %v545_v47 = vld [vmem:[%s1964_s1 + $0x70] sm:$0xff] }
 0x183   : > { %998 = vst [vmem:[%s1964_s1 + $0x10] sm:$0xff] %v966_v51  ;;  %1014 = vst [vmem:[%s1964_s1 + $0x90] sm:$0xff] %v982_v52  ;;  %v561_v48 = vld [vmem:[%s1964_s1 + $0xf0] sm:$0xff]  ;;  %v546_v53 = vld [vmem:[%s1964_s1 + $0x78] sm:$0xff] }
 0x184   : > { %999 = vst [vmem:[%s1964_s1 + $0x18] sm:$0xff] %v967_v55  ;;  %1015 = vst [vmem:[%s1964_s1 + $0x98] sm:$0xff] %v983_v56  ;;  %v562_v54 = vld [vmem:[%s1964_s1 + $0xf8] sm:$0xff] }
 0x186   : > { %v895_v61 = vpop.f32.mrb[4].mxu0  ;;  %v935_v62 = vpop.f32.mrb[4].mxu1 }
 0x187   : > { %v968_v1 = vadd.f32 %v895_v61, %v535_v57  ;;  %v984_v2 = vadd.f32 %v935_v62, %v551_v58  ;;  %v897_v3 = vpop.f32.mrb[5].mxu0  ;;  %v937_v4 = vpop.f32.mrb[5].mxu1 }
 0x188   : > { %v969_v7 = vadd.f32 %v897_v3, %v536_v59  ;;  %v985_v8 = vadd.f32 %v937_v4, %v552_v60  ;;  %v899_v9 = vpop.f32.mrb[6].mxu0  ;;  %v939_v10 = vpop.f32.mrb[6].mxu1  ;;  %v1064_v3 = vld [vmem:[%s491_s29] sm:$0x3] (!%p1437_p5) }
 0x189   : > { %1000 = vst [vmem:[%s1964_s1 + $0x20] sm:$0xff] %v968_v1  ;;  %1016 = vst [vmem:[%s1964_s1 + $0xa0] sm:$0xff] %v984_v2  ;;  %v970_v11 = vadd.f32 %v899_v9, %v537_v63  ;;  %v986_v12 = vadd.f32 %v939_v10, %v553_v0  ;;  %v901_v13 = vpop.f32.mrb[7].mxu0  ;;  %v941_v14 = vpop.f32.mrb[7].mxu1  ;;  %v1066_v1 = vlaneseq (!%p1437_p5)  ;;  %v1032_v4 = vld [vmem:[%s1964_s1] sm:$0xff] (!%p1437_p5) }
 0x18a   : > { %1001 = vst [vmem:[%s1964_s1 + $0x28] sm:$0xff] %v969_v7  ;;  %1017 = vst [vmem:[%s1964_s1 + $0xa8] sm:$0xff] %v985_v8  ;;  %v971_v15 = vadd.f32 %v901_v13, %v538_v5  ;;  %v987_v16 = vadd.f32 %v941_v14, %v554_v6  ;;  %v1033_v6 = vld [vmem:[%s1964_s1 + $0x8] sm:$0xff] (!%p1437_p5)  ;;  %v1034_v8 = vld [vmem:[%s1964_s1 + $0x10] sm:$0xff] (!%p1437_p5) }
 0x18b   : > { %1002 = vst [vmem:[%s1964_s1 + $0x30] sm:$0xff] %v970_v11  ;;  %1018 = vst [vmem:[%s1964_s1 + $0xb0] sm:$0xff] %v986_v12  ;;  %v1067_v2 = vshrl.u32 (!%p1437_p5), %v1066_v1, 7  ;;  %v1035_v9 = vld [vmem:[%s1964_s1 + $0x18] sm:$0xff] (!%p1437_p5) }
 0x18c   : > { %1003 = vst [vmem:[%s1964_s1 + $0x38] sm:$0xff] %v971_v15  ;;  %1019 = vst [vmem:[%s1964_s1 + $0xb8] sm:$0xff] %v987_v16 }
 0x18d   : > { %v1068_v5 = vsub.s32 (!%p1437_p5), 0, %v1067_v2  ;;  %v1072_v7 = vsub.s32 (!%p1437_p5), 1, %v1067_v2 }
 0x18e   : > { %v905_v21 = vpop.f32.mrb[8].mxu0  ;;  %v945_v22 = vpop.f32.mrb[8].mxu1 }
 0x18f   : > { %v972_v25 = vadd.f32 %v905_v21, %v539_v17  ;;  %v988_v26 = vadd.f32 %v945_v22, %v555_v18  ;;  %v907_v27 = vpop.f32.mrb[9].mxu0  ;;  %v947_v28 = vpop.f32.mrb[9].mxu1  ;;  %v2122_v11 = vrot.slane (!%p1437_p5), %v1064_v3, %v1068_v5  ;;  %v2124_v12 = vrot.slane (!%p1437_p5), %v1064_v3, %v1072_v7 }
 0x190   : > { %v973_v31 = vadd.f32 %v907_v27, %v540_v19  ;;  %v989_v32 = vadd.f32 %v947_v28, %v556_v20  ;;  %v909_v33 = vpop.f32.mrb[10].mxu0  ;;  %v949_v34 = vpop.f32.mrb[10].mxu1  ;;  %v1036_v10 = vld [vmem:[%s1964_s1 + $0x20] sm:$0xff] (!%p1437_p5) }
 0x191   : > { %1004 = vst [vmem:[%s1964_s1 + $0x40] sm:$0xff] %v972_v25  ;;  %1020 = vst [vmem:[%s1964_s1 + $0xc0] sm:$0xff] %v988_v26  ;;  %v974_v35 = vadd.f32 %v909_v33, %v541_v23  ;;  %v990_v36 = vadd.f32 %v949_v34, %v557_v24  ;;  %v911_v37 = vpop.f32.mrb[11].mxu0  ;;  %v951_v38 = vpop.f32.mrb[11].mxu1  ;;  %v1037_v13 = vld [vmem:[%s1964_s1 + $0x28] sm:$0xff] (!%p1437_p5)  ;;  %v1076_v16 = vadd.f32 (!%p1437_p5), %v2122_v11, %v1032_v4 }
 0x192   : > { %1005 = vst [vmem:[%s1964_s1 + $0x48] sm:$0xff] %v973_v31  ;;  %1021 = vst [vmem:[%s1964_s1 + $0xc8] sm:$0xff] %v989_v32  ;;  %v975_v39 = vadd.f32 %v911_v37, %v542_v29  ;;  %v991_v40 = vadd.f32 %v951_v38, %v558_v30  ;;  %v1038_v14 = vld [vmem:[%s1964_s1 + $0x30] sm:$0xff] (!%p1437_p5)  ;;  %v1077_v17 = vadd.f32 (!%p1437_p5), %v2124_v12, %v1033_v6 }
 0x193   : > { %1006 = vst [vmem:[%s1964_s1 + $0x50] sm:$0xff] %v974_v35  ;;  %1022 = vst [vmem:[%s1964_s1 + $0xd0] sm:$0xff] %v990_v36  ;;  %v1039_v15 = vld [vmem:[%s1964_s1 + $0x38] sm:$0xff] (!%p1437_p5)  ;;  %v1078_v18 = vadd.f32 (!%p1437_p5), %v2122_v11, %v1034_v8  ;;  %v1079_v19 = vadd.f32 (!%p1437_p5), %v2124_v12, %v1035_v9  ;;  %v1080_v23 = vadd.f32 (!%p1437_p5), %v2122_v11, %v1036_v10  ;;  %v1108_v30 = vmax.f32 (!%p1437_p5), %v1076_v16, 0.0 }
 0x194   : > { %1007 = vst [vmem:[%s1964_s1 + $0x58] sm:$0xff] %v975_v39  ;;  %1023 = vst [vmem:[%s1964_s1 + $0xd8] sm:$0xff] %v991_v40  ;;  %v1081_v24 = vadd.f32 (!%p1437_p5), %v2124_v12, %v1037_v13  ;;  %v1082_v25 = vadd.f32 (!%p1437_p5), %v2122_v11, %v1038_v14  ;;  %v1083_v26 = vadd.f32 (!%p1437_p5), %v2124_v12, %v1039_v15  ;;  %v1109_v31 = vmax.f32 (!%p1437_p5), %v1077_v17, 0.0 }
 0x195   : > { %v1110_v32 = vmax.f32 (!%p1437_p5), %v1078_v18, 0.0  ;;  %v1111_v33 = vmax.f32 (!%p1437_p5), %v1079_v19, 0.0  ;;  %v1112_v36 = vmax.f32 (!%p1437_p5), %v1080_v23, 0.0  ;;  %1140 = vst [vmem:[%s1964_s1] sm:$0xff] (!%p1437_p5), %v1108_v30 }
 0x196   : > { %v915_v45 = vpop.f32.mrb[12].mxu0  ;;  %v955_v46 = vpop.f32.mrb[12].mxu1  ;;  %1031 = sbr.rel (%p1437_p5) target bundleno = 427 (0x1ab), region = 116  ;;  %v1113_v37 = vmax.f32 (!%p1437_p5), %v1081_v24, 0.0  ;;  %v1114_v38 = vmax.f32 (!%p1437_p5), %v1082_v25, 0.0  ;;  %v1115_v39 = vmax.f32 (!%p1437_p5), %v1083_v26, 0.0 }
 0x197   : > { %v976_v49 = vadd.f32 %v915_v45, %v543_v41  ;;  %v992_v50 = vadd.f32 %v955_v46, %v559_v42  ;;  %v917_v51 = vpop.f32.mrb[13].mxu0  ;;  %v957_v52 = vpop.f32.mrb[13].mxu1  ;;  %1141 = vst [vmem:[%s1964_s1 + $0x8] sm:$0xff] (!%p1437_p5), %v1109_v31  ;;  %1142 = vst [vmem:[%s1964_s1 + $0x10] sm:$0xff] (!%p1437_p5), %v1110_v32  ;;  %v1049_v45 = vld [vmem:[%s1964_s1 + $0x88] sm:$0xff] (!%p1437_p5)  ;;  %v1050_v46 = vld [vmem:[%s1964_s1 + $0x90] sm:$0xff] (!%p1437_p5) }
 0x198   : > { %v977_v55 = vadd.f32 %v917_v51, %v544_v43  ;;  %v993_v56 = vadd.f32 %v957_v52, %v560_v44  ;;  %v919_v57 = vpop.f32.mrb[14].mxu0  ;;  %v959_v58 = vpop.f32.mrb[14].mxu1  ;;  %v1040_v20 = vld [vmem:[%s1964_s1 + $0x40] sm:$0xff] (!%p1437_p5)  ;;  %1143 = vst [vmem:[%s1964_s1 + $0x18] sm:$0xff] (!%p1437_p5), %v1111_v33  ;;  %1144 = vst [vmem:[%s1964_s1 + $0x20] sm:$0xff] (!%p1437_p5), %v1112_v36  ;;  %v1051_v51 = vld [vmem:[%s1964_s1 + $0x98] sm:$0xff] (!%p1437_p5)  ;;  %v1093_v1 = vadd.f32 (!%p1437_p5), %v2124_v12, %v1049_v45 }
 0x199   : > { %1008 = vst [vmem:[%s1964_s1 + $0x60] sm:$0xff] %v976_v49  ;;  %1024 = vst [vmem:[%s1964_s1 + $0xe0] sm:$0xff] %v992_v50  ;;  %v978_v59 = vadd.f32 %v919_v57, %v545_v47  ;;  %v994_v60 = vadd.f32 %v959_v58, %v561_v48  ;;  %v921_v61 = vpop.f32.mrb[15].mxu0  ;;  %v961_v62 = vpop.f32.mrb[15].mxu1  ;;  %v1041_v21 = vld [vmem:[%s1964_s1 + $0x48] sm:$0xff] (!%p1437_p5)  ;;  %v1084_v40 = vadd.f32 (!%p1437_p5), %v2122_v11, %v1040_v20  ;;  %v1048_v44 = vld [vmem:[%s1964_s1 + $0x80] sm:$0xff] (!%p1437_p5) }
 0x19a   : > { %1009 = vst [vmem:[%s1964_s1 + $0x68] sm:$0xff] %v977_v55  ;;  %1025 = vst [vmem:[%s1964_s1 + $0xe8] sm:$0xff] %v993_v56  ;;  %v979_v63 = vadd.f32 %v921_v61, %v546_v53  ;;  %v995_v0 = vadd.f32 %v961_v62, %v562_v54  ;;  %v1042_v22 = vld [vmem:[%s1964_s1 + $0x50] sm:$0xff] (!%p1437_p5)  ;;  %v1085_v41 = vadd.f32 (!%p1437_p5), %v2124_v12, %v1041_v21  ;;  %v1052_v52 = vld [vmem:[%s1964_s1 + $0xa0] sm:$0xff] (!%p1437_p5)  ;;  %v1125_v17 = vmax.f32 (!%p1437_p5), %v1093_v1, 0.0 }
 0x19b   : > { %1010 = vst [vmem:[%s1964_s1 + $0x70] sm:$0xff] %v978_v59  ;;  %1026 = vst [vmem:[%s1964_s1 + $0xf0] sm:$0xff] %v994_v60  ;;  %v1043_v27 = vld [vmem:[%s1964_s1 + $0x58] sm:$0xff] (!%p1437_p5)  ;;  %v1086_v42 = vadd.f32 (!%p1437_p5), %v2122_v11, %v1042_v22  ;;  %v1053_v53 = vld [vmem:[%s1964_s1 + $0xa8] sm:$0xff] (!%p1437_p5)  ;;  %v1116_v54 = vmax.f32 (!%p1437_p5), %v1084_v40, 0.0  ;;  %v1094_v2 = vadd.f32 (!%p1437_p5), %v2122_v11, %v1050_v46  ;;  %v1095_v3 = vadd.f32 (!%p1437_p5), %v2124_v12, %v1051_v51 }
 0x19c   : > { %1011 = vst [vmem:[%s1964_s1 + $0x78] sm:$0xff] %v979_v63  ;;  %1027 = vst [vmem:[%s1964_s1 + $0xf8] sm:$0xff] %v995_v0  ;;  %v1087_v43 = vadd.f32 (!%p1437_p5), %v2124_v12, %v1043_v27  ;;  %v1117_v55 = vmax.f32 (!%p1437_p5), %v1085_v41, 0.0  ;;  %v1054_v58 = vld [vmem:[%s1964_s1 + $0xb0] sm:$0xff] (!%p1437_p5)  ;;  %v1055_v59 = vld [vmem:[%s1964_s1 + $0xb8] sm:$0xff] (!%p1437_p5)  ;;  %v1092_v0 = vadd.f32 (!%p1437_p5), %v2122_v11, %v1048_v44  ;;  %v1096_v7 = vadd.f32 (!%p1437_p5), %v2122_v11, %v1052_v52 }
 0x19d   : > { %1145 = vst [vmem:[%s1964_s1 + $0x28] sm:$0xff] %v1113_v37  ;;  %1146 = vst [vmem:[%s1964_s1 + $0x30] sm:$0xff] %v1114_v38  ;;  %v1118_v56 = vmax.f32 %v1086_v42, 0.0  ;;  %v1056_v4 = vld [vmem:[%s1964_s1 + $0xc0] sm:$0xff]  ;;  %v1057_v5 = vld [vmem:[%s1964_s1 + $0xc8] sm:$0xff]  ;;  %v1097_v8 = vadd.f32 %v2124_v12, %v1053_v53  ;;  %v1098_v9 = vadd.f32 %v2122_v11, %v1054_v58  ;;  %v1099_v10 = vadd.f32 %v2124_v12, %v1055_v59 }
 0x19e   : > { %1147 = vst [vmem:[%s1964_s1 + $0x38] sm:$0xff] %v1115_v39  ;;  %v1119_v57 = vmax.f32 %v1087_v43, 0.0  ;;  %1148 = vst [vmem:[%s1964_s1 + $0x40] sm:$0xff] %v1116_v54  ;;  %v1058_v6 = vld [vmem:[%s1964_s1 + $0xd0] sm:$0xff]  ;;  %v1059_v13 = vld [vmem:[%s1964_s1 + $0xd8] sm:$0xff]  ;;  %v1124_v16 = vmax.f32 %v1092_v0, 0.0  ;;  %v1100_v26 = vadd.f32 %v2122_v11, %v1056_v4  ;;  %v1101_v27 = vadd.f32 %v2124_v12, %v1057_v5 }
 0x19f   : > { %1149 = vst [vmem:[%s1964_s1 + $0x48] sm:$0xff] %v1117_v55  ;;  %1150 = vst [vmem:[%s1964_s1 + $0x50] sm:$0xff] %v1118_v56  ;;  %v1126_v18 = vmax.f32 %v1094_v2, 0.0  ;;  %v1127_v19 = vmax.f32 %v1095_v3, 0.0  ;;  %v1128_v22 = vmax.f32 %v1096_v7, 0.0  ;;  %v1129_v23 = vmax.f32 %v1097_v8, 0.0 }
 0x1a0   : > { %v1044_v28 = vld [vmem:[%s1964_s1 + $0x60] sm:$0xff]  ;;  %1151 = vst [vmem:[%s1964_s1 + $0x58] sm:$0xff] %v1119_v57  ;;  %v1130_v24 = vmax.f32 %v1098_v9, 0.0  ;;  %v1131_v25 = vmax.f32 %v1099_v10, 0.0  ;;  %1156 = vst [vmem:[%s1964_s1 + $0x80] sm:$0xff] %v1124_v16 }
 0x1a1   : > { %v1045_v29 = vld [vmem:[%s1964_s1 + $0x68] sm:$0xff]  ;;  %v1088_v47 = vadd.f32 %v2122_v11, %v1044_v28  ;;  %v1060_v14 = vld [vmem:[%s1964_s1 + $0xe0] sm:$0xff]  ;;  %1157 = vst [vmem:[%s1964_s1 + $0x88] sm:$0xff] %v1125_v17  ;;  %1158 = vst [vmem:[%s1964_s1 + $0x90] sm:$0xff] %v1126_v18  ;;  %v1102_v28 = vadd.f32 %v2122_v11, %v1058_v6 }
 0x1a2   : > { %v1046_v34 = vld [vmem:[%s1964_s1 + $0x70] sm:$0xff]  ;;  %v1089_v48 = vadd.f32 %v2124_v12, %v1045_v29  ;;  %v1061_v15 = vld [vmem:[%s1964_s1 + $0xe8] sm:$0xff]  ;;  %1159 = vst [vmem:[%s1964_s1 + $0x98] sm:$0xff] %v1127_v19  ;;  %v1103_v29 = vadd.f32 %v2124_v12, %v1059_v13  ;;  %1160 = vst [vmem:[%s1964_s1 + $0xa0] sm:$0xff] %v1128_v22  ;;  %v1104_v30 = vadd.f32 %v2122_v11, %v1060_v14 }
 0x1a3   : > { %v1047_v35 = vld [vmem:[%s1964_s1 + $0x78] sm:$0xff]  ;;  %v1090_v49 = vadd.f32 %v2122_v11, %v1046_v34  ;;  %v1120_v60 = vmax.f32 %v1088_v47, 0.0  ;;  %v1062_v20 = vld [vmem:[%s1964_s1 + $0xf0] sm:$0xff]  ;;  %1161 = vst [vmem:[%s1964_s1 + $0xa8] sm:$0xff] %v1129_v23  ;;  %1162 = vst [vmem:[%s1964_s1 + $0xb0] sm:$0xff] %v1130_v24  ;;  %v1105_v31 = vadd.f32 %v2124_v12, %v1061_v15  ;;  %v1132_v34 = vmax.f32 %v1100_v26, 0.0 }
 0x1a4   : > { %v1091_v50 = vadd.f32 %v2124_v12, %v1047_v35  ;;  %v1121_v61 = vmax.f32 %v1089_v48, 0.0  ;;  %v1063_v21 = vld [vmem:[%s1964_s1 + $0xf8] sm:$0xff]  ;;  %1163 = vst [vmem:[%s1964_s1 + $0xb8] sm:$0xff] %v1131_v25  ;;  %v1106_v32 = vadd.f32 %v2122_v11, %v1062_v20  ;;  %v1133_v35 = vmax.f32 %v1101_v27, 0.0 }
 0x1a5   : > { %v1122_v62 = vmax.f32 %v1090_v49, 0.0  ;;  %1152 = vst [vmem:[%s1964_s1 + $0x60] sm:$0xff] %v1120_v60  ;;  %v1107_v33 = vadd.f32 %v2124_v12, %v1063_v21  ;;  %v1134_v36 = vmax.f32 %v1102_v28, 0.0  ;;  %v1135_v37 = vmax.f32 %v1103_v29, 0.0  ;;  %1164 = vst [vmem:[%s1964_s1 + $0xc0] sm:$0xff] %v1132_v34 }
 0x1a6   : > { %v1123_v63 = vmax.f32 %v1091_v50, 0.0  ;;  %1153 = vst [vmem:[%s1964_s1 + $0x68] sm:$0xff] %v1121_v61  ;;  %v1136_v38 = vmax.f32 %v1104_v30, 0.0  ;;  %v1137_v39 = vmax.f32 %v1105_v31, 0.0  ;;  %v1138_v40 = vmax.f32 %v1106_v32, 0.0  ;;  %1165 = vst [vmem:[%s1964_s1 + $0xc8] sm:$0xff] %v1133_v35 }
 0x1a7   : > { %1154 = vst [vmem:[%s1964_s1 + $0x70] sm:$0xff] %v1122_v62  ;;  %v1139_v41 = vmax.f32 %v1107_v33, 0.0  ;;  %1166 = vst [vmem:[%s1964_s1 + $0xd0] sm:$0xff] %v1134_v36 }
 0x1a8   : > { %1155 = vst [vmem:[%s1964_s1 + $0x78] sm:$0xff] %v1123_v63  ;;  %1167 = vst [vmem:[%s1964_s1 + $0xd8] sm:$0xff] %v1135_v37 }
 0x1a9   : > { %1168 = vst [vmem:[%s1964_s1 + $0xe0] sm:$0xff] %v1136_v38  ;;  %1169 = vst [vmem:[%s1964_s1 + $0xe8] sm:$0xff] %v1137_v39 }
 0x1aa   : > { %1170 = vst [vmem:[%s1964_s1 + $0xf0] sm:$0xff] %v1138_v40  ;;  %1171 = vst [vmem:[%s1964_s1 + $0xf8] sm:$0xff] %v1139_v41 }
 0x1ab PF: > { %1178 = sbr.rel (!%p1842_p12) target bundleno = 445 (0x1bd), region = 120  ;;  %s1445_s16 = sshll.u32 (%p1842_p12), %s1713_s19, 4  ;;  %v1197_v11 = vld [vmem:[%s1964_s1] sm:$0xff] (%p1842_p12)  ;;  %v1211_v47 = vld [vmem:[%s1964_s1 + $0x38] sm:$0xff] (%p1842_p12)  ;;  %v1215_v49 = vld [vmem:[%s1964_s1 + $0x48] sm:$0xff] (%p1842_p12) }
 0x1ac   : > { %v1199_v12 = vld [vmem:[%s1964_s1 + $0x8] sm:$0xff] (%p1842_p12)  ;;  %v1201_v42 = vld [vmem:[%s1964_s1 + $0x10] sm:$0xff] (%p1842_p12)  ;;  %s2226_s5 = scalar_lea.vmem (%p1842_p12), %s2325_s3, %s1445_s16  ;;  %v1213_v48 = vld [vmem:[%s1964_s1 + $0x40] sm:$0xff] (%p1842_p12) }
 0x1ad   : > { %v1203_v43 = vld [vmem:[%s1964_s1 + $0x18] sm:$0xff] (%p1842_p12)  ;;  %v1205_v44 = vld [vmem:[%s1964_s1 + $0x20] sm:$0xff] (%p1842_p12)  ;;  %1198 = vst [vmem:[%s2226_s5] sm:$0xff] (%p1842_p12), %v1197_v11  ;;  %1200 = vst [vmem:[%s2226_s5 + $0x8] sm:$0xff] (%p1842_p12), %v1199_v12 }
 0x1ae   : > { %1202 = vst [vmem:[%s2226_s5 + $0x20] sm:$0xff] (%p1842_p12), %v1201_v42  ;;  %1204 = vst [vmem:[%s2226_s5 + $0x28] sm:$0xff] (%p1842_p12), %v1203_v43  ;;  %v1217_v50 = vld [vmem:[%s1964_s1 + $0x50] sm:$0xff] (%p1842_p12)  ;;  %v1219_v51 = vld [vmem:[%s1964_s1 + $0x58] sm:$0xff] (%p1842_p12) }
 0x1af   : > { %1206 = vst [vmem:[%s2226_s5 + $0x40] sm:$0xff] (%p1842_p12), %v1205_v44  ;;  %1212 = vst [vmem:[%s2226_s5 + $0x68] sm:$0xff] (%p1842_p12), %v1211_v47  ;;  %v1221_v52 = vld [vmem:[%s1964_s1 + $0x60] sm:$0xff] (%p1842_p12)  ;;  %v1223_v53 = vld [vmem:[%s1964_s1 + $0x68] sm:$0xff] (%p1842_p12) }
 0x1b0   : > { %1214 = vst [vmem:[%s2226_s5 + $0x80] sm:$0xff] (%p1842_p12), %v1213_v48  ;;  %1216 = vst [vmem:[%s2226_s5 + $0x88] sm:$0xff] (%p1842_p12), %v1215_v49  ;;  %v1225_v54 = vld [vmem:[%s1964_s1 + $0x70] sm:$0xff] (%p1842_p12)  ;;  %v1229_v56 = vld [vmem:[%s1964_s1 + $0x80] sm:$0xff] (%p1842_p12) }
 0x1b1   : > { %1218 = vst [vmem:[%s2226_s5 + $0xa0] sm:$0xff] (%p1842_p12), %v1217_v50  ;;  %1220 = vst [vmem:[%s2226_s5 + $0xa8] sm:$0xff] (%p1842_p12), %v1219_v51  ;;  %v1227_v55 = vld [vmem:[%s1964_s1 + $0x78] sm:$0xff] (%p1842_p12)  ;;  %v1231_v57 = vld [vmem:[%s1964_s1 + $0x88] sm:$0xff] (%p1842_p12) }
 0x1b2   : > { %v1207_v45 = vld [vmem:[%s1964_s1 + $0x28] sm:$0xff]  ;;  %v1209_v46 = vld [vmem:[%s1964_s1 + $0x30] sm:$0xff]  ;;  %1222 = vst [vmem:[%s2226_s5 + $0xc0] sm:$0xff] %v1221_v52  ;;  %1224 = vst [vmem:[%s2226_s5 + $0xc8] sm:$0xff] %v1223_v53 }
 0x1b3   : > { %1208 = vst [vmem:[%s2226_s5 + $0x48] sm:$0xff] %v1207_v45  ;;  %1210 = vst [vmem:[%s2226_s5 + $0x60] sm:$0xff] %v1209_v46  ;;  %v1233_v58 = vld [vmem:[%s1964_s1 + $0x90] sm:$0xff]  ;;  %v1235_v59 = vld [vmem:[%s1964_s1 + $0x98] sm:$0xff] }
 0x1b4   : > { %1226 = vst [vmem:[%s2226_s5 + $0xe0] sm:$0xff] %v1225_v54  ;;  %1228 = vst [vmem:[%s2226_s5 + $0xe8] sm:$0xff] %v1227_v55  ;;  %v1237_v60 = vld [vmem:[%s1964_s1 + $0xa0] sm:$0xff]  ;;  %v1239_v61 = vld [vmem:[%s1964_s1 + $0xa8] sm:$0xff] }
 0x1b5   : > { %1230 = vst [vmem:[%s2226_s5 + $0x100] sm:$0xff] %v1229_v56  ;;  %1232 = vst [vmem:[%s2226_s5 + $0x108] sm:$0xff] %v1231_v57  ;;  %v1241_v62 = vld [vmem:[%s1964_s1 + $0xb0] sm:$0xff]  ;;  %v1243_v63 = vld [vmem:[%s1964_s1 + $0xb8] sm:$0xff] }
 0x1b6   : > { %1234 = vst [vmem:[%s2226_s5 + $0x120] sm:$0xff] %v1233_v58  ;;  %1236 = vst [vmem:[%s2226_s5 + $0x128] sm:$0xff] %v1235_v59  ;;  %v1245_v0 = vld [vmem:[%s1964_s1 + $0xc0] sm:$0xff]  ;;  %v1247_v1 = vld [vmem:[%s1964_s1 + $0xc8] sm:$0xff] }
 0x1b7   : > { %1238 = vst [vmem:[%s2226_s5 + $0x140] sm:$0xff] %v1237_v60  ;;  %1240 = vst [vmem:[%s2226_s5 + $0x148] sm:$0xff] %v1239_v61  ;;  %v1249_v2 = vld [vmem:[%s1964_s1 + $0xd0] sm:$0xff]  ;;  %v1251_v3 = vld [vmem:[%s1964_s1 + $0xd8] sm:$0xff] }
 0x1b8   : > { %1242 = vst [vmem:[%s2226_s5 + $0x160] sm:$0xff] %v1241_v62  ;;  %1244 = vst [vmem:[%s2226_s5 + $0x168] sm:$0xff] %v1243_v63  ;;  %v1253_v4 = vld [vmem:[%s1964_s1 + $0xe0] sm:$0xff]  ;;  %v1255_v5 = vld [vmem:[%s1964_s1 + $0xe8] sm:$0xff] }
 0x1b9   : > { %1246 = vst [vmem:[%s2226_s5 + $0x180] sm:$0xff] %v1245_v0  ;;  %1248 = vst [vmem:[%s2226_s5 + $0x188] sm:$0xff] %v1247_v1  ;;  %v1257_v6 = vld [vmem:[%s1964_s1 + $0xf0] sm:$0xff]  ;;  %v1259_v7 = vld [vmem:[%s1964_s1 + $0xf8] sm:$0xff] }
 0x1ba   : > { %1250 = vst [vmem:[%s2226_s5 + $0x1a0] sm:$0xff] %v1249_v2  ;;  %1252 = vst [vmem:[%s2226_s5 + $0x1a8] sm:$0xff] %v1251_v3 }
 0x1bb   : > { %1254 = vst [vmem:[%s2226_s5 + $0x1c0] sm:$0xff] %v1253_v4  ;;  %1256 = vst [vmem:[%s2226_s5 + $0x1c8] sm:$0xff] %v1255_v5 }
 0x1bc   : > { %1258 = vst [vmem:[%s2226_s5 + $0x1e0] sm:$0xff] %v1257_v6  ;;  %1260 = vst [vmem:[%s2226_s5 + $0x1e8] sm:$0xff] %v1259_v7 }
 0x1bd PF: > { %s13_s22 = sadd.s32 1, %s1725_s22   ;;  %s2335_s10 = sld [smem:[#allocation5_spill]] }
 0x1be   : > { %p10_p6 = scmp.ge.s32.totalorder %s13_s22, 20   ;;  %s2336_s12 = smov %s1689_s13 }
 0x1bf   : > { %s2337_s13 = smov %s1840_s9  ;;  %s2338_s14 = smov %s1697_s15 }
 0x1c0   : > { %s2339_s15 = smov %s1837_s8  ;;  %s2340_s16 = smov %s1705_s17 }
 0x1c1   : > { %s2341_s17 = smov %s1823_s30  ;;  %s2342_s18 = smov %s1717_s20 }
 0x1c2   : > { %s2343_s19 = smov %s1721_s21  ;;  %s2344_s20 = smov %s2347_s24 }
 0x1c3   : > { %s2345_s21 = smov %s2335_s10  ;;  %12 = sbr.rel (!%p10_p6) target bundleno = 9 (0x9), region = 185 }

// kernel: model_forward.22
= control target key start
LH: loop header
LB: loop body
LE: loop exit
PB: predicated region body
PF: predicated region fallthrough
CT: control target
= control target key end

     0   :  { %s1526_s12 = smov 0   ;;  %s1528_s13 = smov 0   ;;  %s1892_s0 = inlined_call_operand.vmem [shape: bf16[128,256], index: 0, kind: input, shape index: {}]   ;;  %s1893_s1 = inlined_call_operand.vmem [shape: bf16[256,512], index: 1, kind: input, shape index: {}]   ;;  %s1894_s2 = inlined_call_operand.vmem [shape: f32[1,512], index: 2, kind: input, shape index: {}]   ;;  %s1895_s3 = inlined_call_operand.vmem [shape: f32[128,512], index: 3, kind: output, shape index: {}]  }
   0x1   :  { %s1530_s14 = smov 0   ;;  %s1532_s15 = smov 0  }
   0x2   :  { %s1534_s16 = smov 0  }
   0x3 LB: > { %s28_s17 = sadd.s32 1, %s1500_s15  ;;  %s1254_s18 = sadd.s32 4294967295, %s1504_s16   ;;  %s1504_s16 = sphi %s1534_s16, %s13_s16   ;;  %s1500_s15 = sphi %s1532_s15, %s1900_s15   ;;  %s1496_s14 = sphi %s1530_s14, %s1899_s14   ;;  %s1492_s13 = sphi %s1528_s13, %s1898_s13   ;;  %s1488_s12 = sphi %s1526_s12, %s1897_s12  }
   0x4   : > { %p30_p0 = scmp.ge.s32.totalorder %s28_s17, 2  ;;  %p76_p1 = scmp.ne.s32.totalorder %s1492_s13, %s1488_s12 }
   0x5   : > { %p77_p2 = scmp.eq.s32.totalorder %s1504_s16, 0  ;;  %p134_p4 = scmp.eq.s32.totalorder %s1254_s18, 1 }
   0x6   : > { %s1902_s17 = smov (%p30_p0, %s28_s17), 0  ;;  %s69_s20 = sadd.s32 1, %s1492_s13 }
   0x7   : > { %p78_p3 = por %p77_p2, %p76_p1  ;;  %s65_s19 = ssub.s32 %s1500_s15, %s1902_s17 }
   0x8   : > { %p67_p5 = scmp.eq.s32.totalorder %s65_s19, 0  ;;  %p1561_p6 = por %p134_p4, %p76_p1 }
   0x9   : > { %p1258_p7 = scmp.ge.s32.totalorder %s1504_s16, 2 }
   0xa   : > { %s1566_s22 = scalar_select %p67_p5, %s1492_s13, %s69_s20  }
   0xb   : > { %171 = sbr.rel (%p1258_p7) target bundleno = 38 (0x26), region = 20 }
  0x12   : > { %174 = sbr.rel (!%p78_p3) target bundleno = 38 (0x26), region = 24  ;;  %s176_s23 = sand.u32 (%p78_p3), 1, %s1492_s13  }
  0x13   : > { %s1319_s24 = sshll.u32 (%p78_p3), %s1500_s15, 3  ;;  %s1259_s25 = sshll.u32 (%p78_p3), %s176_s23, 8 }
  0x14   : > { %s1574_s28 = scalar_lea.vmem (%p78_p3), %s1893_s1, %s1319_s24  ;;  %s1579_s29 = scalar_lea.vmem (%p78_p3), [#allocation2], %s1259_s25 }
  0x15   : > { %v274_v0 = vld [vmem:[%s1574_s28] sm:$0xff] (%p78_p3)  ;;  %v276_v1 = vld [vmem:[%s1574_s28 + $0x10] sm:$0xff] (%p78_p3) }
  0x16   : > { %v278_v2 = vld [vmem:[%s1574_s28 + $0x20] sm:$0xff] (%p78_p3)  ;;  %275 = vst [vmem:[%s1579_s29] sm:$0xff] (%p78_p3), %v274_v0  ;;  %277 = vst [vmem:[%s1579_s29 + $0x8] sm:$0xff] (%p78_p3), %v276_v1  ;;  %v280_v3 = vld [vmem:[%s1574_s28 + $0x30] sm:$0xff] (%p78_p3) }
  0x17   : > { %279 = vst [vmem:[%s1579_s29 + $0x10] sm:$0xff] (%p78_p3), %v278_v2  ;;  %v282_v4 = vld [vmem:[%s1574_s28 + $0x40] sm:$0xff] (%p78_p3)  ;;  %v284_v5 = vld [vmem:[%s1574_s28 + $0x50] sm:$0xff] (%p78_p3)  ;;  %281 = vst [vmem:[%s1579_s29 + $0x18] sm:$0xff] (%p78_p3), %v280_v3 }
  0x18   : > { %283 = vst [vmem:[%s1579_s29 + $0x20] sm:$0xff] (%p78_p3), %v282_v4  ;;  %285 = vst [vmem:[%s1579_s29 + $0x28] sm:$0xff] (%p78_p3), %v284_v5  ;;  %v286_v6 = vld [vmem:[%s1574_s28 + $0x60] sm:$0xff] (%p78_p3)  ;;  %v288_v7 = vld [vmem:[%s1574_s28 + $0x70] sm:$0xff] (%p78_p3) }
  0x19   : > { %v290_v8 = vld [vmem:[%s1574_s28 + $0x80] sm:$0xff]  ;;  %287 = vst [vmem:[%s1579_s29 + $0x30] sm:$0xff] %v286_v6  ;;  %289 = vst [vmem:[%s1579_s29 + $0x38] sm:$0xff] %v288_v7  ;;  %v292_v9 = vld [vmem:[%s1574_s28 + $0x90] sm:$0xff] }
  0x1a   : > { %291 = vst [vmem:[%s1579_s29 + $0x40] sm:$0xff] %v290_v8  ;;  %v294_v10 = vld [vmem:[%s1574_s28 + $0xa0] sm:$0xff]  ;;  %v296_v11 = vld [vmem:[%s1574_s28 + $0xb0] sm:$0xff]  ;;  %293 = vst [vmem:[%s1579_s29 + $0x48] sm:$0xff] %v292_v9 }
  0x1b   : > { %295 = vst [vmem:[%s1579_s29 + $0x50] sm:$0xff] %v294_v10  ;;  %297 = vst [vmem:[%s1579_s29 + $0x58] sm:$0xff] %v296_v11  ;;  %v298_v12 = vld [vmem:[%s1574_s28 + $0xc0] sm:$0xff]  ;;  %v300_v13 = vld [vmem:[%s1574_s28 + $0xd0] sm:$0xff] }
  0x1c   : > { %v302_v14 = vld [vmem:[%s1574_s28 + $0xe0] sm:$0xff]  ;;  %299 = vst [vmem:[%s1579_s29 + $0x60] sm:$0xff] %v298_v12  ;;  %301 = vst [vmem:[%s1579_s29 + $0x68] sm:$0xff] %v300_v13  ;;  %v304_v15 = vld [vmem:[%s1574_s28 + $0xf0] sm:$0xff] }
  0x1d   : > { %303 = vst [vmem:[%s1579_s29 + $0x70] sm:$0xff] %v302_v14  ;;  %v306_v16 = vld [vmem:[%s1574_s28 + $0x100] sm:$0xff]  ;;  %v308_v17 = vld [vmem:[%s1574_s28 + $0x110] sm:$0xff]  ;;  %305 = vst [vmem:[%s1579_s29 + $0x78] sm:$0xff] %v304_v15 }
  0x1e   : > { %307 = vst [vmem:[%s1579_s29 + $0x80] sm:$0xff] %v306_v16  ;;  %309 = vst [vmem:[%s1579_s29 + $0x88] sm:$0xff] %v308_v17  ;;  %v310_v18 = vld [vmem:[%s1574_s28 + $0x120] sm:$0xff]  ;;  %v312_v19 = vld [vmem:[%s1574_s28 + $0x130] sm:$0xff] }
  0x1f   : > { %v314_v20 = vld [vmem:[%s1574_s28 + $0x140] sm:$0xff]  ;;  %311 = vst [vmem:[%s1579_s29 + $0x90] sm:$0xff] %v310_v18  ;;  %313 = vst [vmem:[%s1579_s29 + $0x98] sm:$0xff] %v312_v19  ;;  %v316_v21 = vld [vmem:[%s1574_s28 + $0x150] sm:$0xff] }
  0x20   : > { %315 = vst [vmem:[%s1579_s29 + $0xa0] sm:$0xff] %v314_v20  ;;  %v318_v22 = vld [vmem:[%s1574_s28 + $0x160] sm:$0xff]  ;;  %v320_v23 = vld [vmem:[%s1574_s28 + $0x170] sm:$0xff]  ;;  %317 = vst [vmem:[%s1579_s29 + $0xa8] sm:$0xff] %v316_v21 }
  0x21   : > { %319 = vst [vmem:[%s1579_s29 + $0xb0] sm:$0xff] %v318_v22  ;;  %321 = vst [vmem:[%s1579_s29 + $0xb8] sm:$0xff] %v320_v23  ;;  %v322_v24 = vld [vmem:[%s1574_s28 + $0x180] sm:$0xff]  ;;  %v324_v25 = vld [vmem:[%s1574_s28 + $0x190] sm:$0xff] }
  0x22   : > { %v326_v26 = vld [vmem:[%s1574_s28 + $0x1a0] sm:$0xff]  ;;  %323 = vst [vmem:[%s1579_s29 + $0xc0] sm:$0xff] %v322_v24  ;;  %325 = vst [vmem:[%s1579_s29 + $0xc8] sm:$0xff] %v324_v25  ;;  %v328_v27 = vld [vmem:[%s1574_s28 + $0x1b0] sm:$0xff] }
  0x23   : > { %327 = vst [vmem:[%s1579_s29 + $0xd0] sm:$0xff] %v326_v26  ;;  %v330_v28 = vld [vmem:[%s1574_s28 + $0x1c0] sm:$0xff]  ;;  %v332_v29 = vld [vmem:[%s1574_s28 + $0x1d0] sm:$0xff]  ;;  %329 = vst [vmem:[%s1579_s29 + $0xd8] sm:$0xff] %v328_v27 }
  0x24   : > { %331 = vst [vmem:[%s1579_s29 + $0xe0] sm:$0xff] %v330_v28  ;;  %333 = vst [vmem:[%s1579_s29 + $0xe8] sm:$0xff] %v332_v29  ;;  %v334_v30 = vld [vmem:[%s1574_s28 + $0x1e0] sm:$0xff]  ;;  %v336_v31 = vld [vmem:[%s1574_s28 + $0x1f0] sm:$0xff] }
  0x25   : > { %335 = vst [vmem:[%s1579_s29 + $0xf0] sm:$0xff] %v334_v30  ;;  %337 = vst [vmem:[%s1579_s29 + $0xf8] sm:$0xff] %v336_v31 }
  0x26 PF: > { %p1262_p8 = scmp.ge.s32.totalorder %s1504_s16, 1  ;;  %p350_p9 = scmp.lt.s32.totalorder %s1504_s16, 3 }
  0x28   : > { %p351_p10 = pnand %p1262_p8, %p350_p9 }
  0x29   : > { %s357_s30 = sand.u32 (!%p351_p10), 1, %s1488_s12   ;;  %v1444_v32 = vld [vmem:[%s1892_s0 + $0x4] ss:$8 sps:$4 sm:$0xff] (!%p351_p10)   ;;  %v1442_v2 = vld [vmem:[%s1892_s0] ss:$8 sps:$4 sm:$0xff] (!%p351_p10)   ;;  %s1265_s26 = sshll.u32 (!%p351_p10), %s1496_s14, 1  ;;  %v984_v16 = vlaneseq (!%p351_p10) }
  0x2a   : > { %354 = sbr.rel (%p351_p10) target bundleno = 360 (0x168), region = 66  ;;  %s1645_s4 = sshll.u32 (!%p351_p10), %s357_s30, 8  ;;  %v1447_v33 = vld [vmem:[%s1892_s0 + $0x44] ss:$8 sps:$4 sm:$0xff] (!%p351_p10)   ;;  %802 = vmatprep.mubr.bf16.mxu0 (!%p351_p10), %v1444_v32  ;;  %v1445_v3 = vld [vmem:[%s1892_s0 + $0x40] ss:$8 sps:$4 sm:$0xff] (!%p351_p10)  }
  0x2b   : > { %s1654_s9 = scalar_lea.vmem (!%p351_p10), [#allocation2], %s1645_s4  ;;  %842 = vmatprep.mubr.bf16.mxu1 (!%p351_p10), %v1447_v33  ;;  %v1448_v4 = vld [vmem:[%s1892_s0 + $0x14] ss:$8 sps:$4 sm:$0xff] (!%p351_p10)   ;;  %v1452_v6 = vld [vmem:[%s1892_s0 + $0x10] ss:$8 sps:$4 sm:$0xff] (!%p351_p10)   ;;  %p408_p11 = scmp.lt.s32.totalorder (!%p351_p10), %s1265_s26, 3 }
  0x2c   : > { %v1394_v34 = vld [vmem:[%s1654_s9 + $0x4] ss:$8 sps:$4 sm:$0xff] (!%p351_p10)   ;;  %v1396_v35 = vld [vmem:[%s1654_s9] ss:$8 sps:$4 sm:$0xff] (!%p351_p10)   ;;  %v1397_v36 = vld [vmem:[%s1654_s9 + $0x14] ss:$8 sps:$4 sm:$0xff] (!%p351_p10)  }
  0x2d   : > { %770 = vmatprep.subr.bf16.mxu0 (!%p351_p10), %v1394_v34  ;;  %1321 = vmatprep.subr.bf16.mxu1 (!%p351_p10), %v1394_v34  ;;  %v1399_v37 = vld [vmem:[%s1654_s9 + $0x10] ss:$8 sps:$4 sm:$0xff] (!%p351_p10)   ;;  %v1400_v38 = vld [vmem:[%s1654_s9 + $0x24] ss:$8 sps:$4 sm:$0xff] (!%p351_p10)   ;;  %v1402_v39 = vld [vmem:[%s1654_s9 + $0x20] ss:$8 sps:$4 sm:$0xff] (!%p351_p10)  }
  0x2e   : > { %771 = vmatpush1.bf16.msra.mxu0 (!%p351_p10), %v1396_v35  ;;  %1337 = vmatpush1.bf16.msra.mxu1 (!%p351_p10), %v1396_v35  ;;  %v1403_v40 = vld [vmem:[%s1654_s9 + $0x34] ss:$8 sps:$4 sm:$0xff] (!%p351_p10)   ;;  %v1405_v41 = vld [vmem:[%s1654_s9 + $0x30] ss:$8 sps:$4 sm:$0xff] (!%p351_p10)   ;;  %v1406_v42 = vld [vmem:[%s1654_s9 + $0x44] ss:$8 sps:$4 sm:$0xff] (!%p351_p10)  }
  0x2f   : > { %772 = vmatprep.subr.bf16.mxu0 (!%p351_p10), %v1397_v36  ;;  %1322 = vmatprep.subr.bf16.mxu1 (!%p351_p10), %v1397_v36  ;;  %v1408_v43 = vld [vmem:[%s1654_s9 + $0x40] ss:$8 sps:$4 sm:$0xff] (!%p351_p10)   ;;  %v1409_v44 = vld [vmem:[%s1654_s9 + $0x54] ss:$8 sps:$4 sm:$0xff] (!%p351_p10)   ;;  %v1411_v45 = vld [vmem:[%s1654_s9 + $0x50] ss:$8 sps:$4 sm:$0xff] (!%p351_p10)  }
  0x30   : > { %v1412_v46 = vld [vmem:[%s1654_s9 + $0x64] ss:$8 sps:$4 sm:$0xff] (!%p351_p10)   ;;  %v1414_v47 = vld [vmem:[%s1654_s9 + $0x60] ss:$8 sps:$4 sm:$0xff] (!%p351_p10)   ;;  %v1415_v48 = vld [vmem:[%s1654_s9 + $0x74] ss:$8 sps:$4 sm:$0xff] (!%p351_p10)  }
  0x31   : > { %v1417_v49 = vld [vmem:[%s1654_s9 + $0x70] ss:$8 sps:$4 sm:$0xff]   ;;  %v1418_v50 = vld [vmem:[%s1654_s9 + $0x84] ss:$8 sps:$4 sm:$0xff]   ;;  %v1420_v51 = vld [vmem:[%s1654_s9 + $0x80] ss:$8 sps:$4 sm:$0xff]  }
  0x32   : > { %773 = vmatpush1.bf16.msra.mxu0 %v1399_v37  ;;  %1338 = vmatpush1.bf16.msra.mxu1 %v1399_v37  ;;  %v1421_v52 = vld [vmem:[%s1654_s9 + $0x94] ss:$8 sps:$4 sm:$0xff]   ;;  %v1423_v53 = vld [vmem:[%s1654_s9 + $0x90] ss:$8 sps:$4 sm:$0xff]   ;;  %v1424_v54 = vld [vmem:[%s1654_s9 + $0xa4] ss:$8 sps:$4 sm:$0xff]  }
  0x33   : > { %774 = vmatprep.subr.bf16.mxu0 %v1400_v38  ;;  %1323 = vmatprep.subr.bf16.mxu1 %v1400_v38  ;;  %v1426_v55 = vld [vmem:[%s1654_s9 + $0xa0] ss:$8 sps:$4 sm:$0xff]   ;;  %v1427_v56 = vld [vmem:[%s1654_s9 + $0xb4] ss:$8 sps:$4 sm:$0xff]   ;;  %v1429_v57 = vld [vmem:[%s1654_s9 + $0xb0] ss:$8 sps:$4 sm:$0xff]  }
  0x34   : > { %v1430_v58 = vld [vmem:[%s1654_s9 + $0xc4] ss:$8 sps:$4 sm:$0xff]   ;;  %v1432_v59 = vld [vmem:[%s1654_s9 + $0xc0] ss:$8 sps:$4 sm:$0xff]   ;;  %v1433_v60 = vld [vmem:[%s1654_s9 + $0xd4] ss:$8 sps:$4 sm:$0xff]  }
  0x35   : > { %v1435_v61 = vld [vmem:[%s1654_s9 + $0xd0] ss:$8 sps:$4 sm:$0xff]   ;;  %v1436_v62 = vld [vmem:[%s1654_s9 + $0xe4] ss:$8 sps:$4 sm:$0xff]   ;;  %v1438_v63 = vld [vmem:[%s1654_s9 + $0xe0] ss:$8 sps:$4 sm:$0xff]  }
  0x36   : > { %775 = vmatpush1.bf16.msra.mxu0 %v1402_v39  ;;  %1339 = vmatpush1.bf16.msra.mxu1 %v1402_v39  ;;  %v1439_v0 = vld [vmem:[%s1654_s9 + $0xf4] ss:$8 sps:$4 sm:$0xff]   ;;  %v1441_v1 = vld [vmem:[%s1654_s9 + $0xf0] ss:$8 sps:$4 sm:$0xff]   ;;  %v1454_v8 = vld [vmem:[%s1892_s0 + $0x24] ss:$8 sps:$4 sm:$0xff]  }
  0x37   : > { %776 = vmatprep.subr.bf16.mxu0 %v1403_v40  ;;  %1324 = vmatprep.subr.bf16.mxu1 %v1403_v40  ;;  %v1450_v5 = vld [vmem:[%s1892_s0 + $0x54] ss:$8 sps:$4 sm:$0xff]   ;;  %v1453_v7 = vld [vmem:[%s1892_s0 + $0x50] ss:$8 sps:$4 sm:$0xff]   ;;  %v1456_v9 = vld [vmem:[%s1892_s0 + $0x64] ss:$8 sps:$4 sm:$0xff]  }
  0x38   : > { %v1458_v10 = vld [vmem:[%s1892_s0 + $0x20] ss:$8 sps:$4 sm:$0xff]   ;;  %v1460_v12 = vld [vmem:[%s1892_s0 + $0x34] ss:$8 sps:$4 sm:$0xff]   ;;  %v1464_v14 = vld [vmem:[%s1892_s0 + $0x30] ss:$8 sps:$4 sm:$0xff]  }
  0x39   : > { %v1459_v11 = vld [vmem:[%s1892_s0 + $0x60] ss:$8 sps:$4 sm:$0xff]   ;;  %v1462_v13 = vld [vmem:[%s1892_s0 + $0x74] ss:$8 sps:$4 sm:$0xff]   ;;  %v1465_v15 = vld [vmem:[%s1892_s0 + $0x70] ss:$8 sps:$4 sm:$0xff]  }
  0x3a   : > { %777 = vmatpush1.bf16.msra.mxu0 %v1405_v41  ;;  %1340 = vmatpush1.bf16.msra.mxu1 %v1405_v41  ;;  %s1904_s26 = smov (!%p408_p11, %s1265_s26), 3  ;;  %v985_v17 = vshrl.u32 %v984_v16, 7  ;;  %s1743_s30 = scalar_lea.vmem [#allocation3], %s1645_s4 }
  0x3b   : > { %778 = vmatprep.subr.bf16.mxu0 %v1406_v42  ;;  %1325 = vmatprep.subr.bf16.mxu1 %v1406_v42  ;;  %s410_s29 = scalar_lea.vmem %s1894_s2, %s1904_s26  ;;  %s1320_s4 = sshll.u32 (%p1561_p6), %s1496_s14, 4 }
  0x3c   : > { %v986_v18 = vsub.s32 0, %v985_v17  ;;  %v982_v19 = vld [vmem:[%s410_s29] sm:$0x3]  ;;  %v990_v20 = vsub.s32 1, %v985_v17  ;;  %s1814_s7 = scalar_lea.vmem (%p1561_p6), %s1895_s3, %s1320_s4 }
  0x3e   : > { %779 = vmatpush1.bf16.msra.mxu0 %v1408_v43  ;;  %1341 = vmatpush1.bf16.msra.mxu1 %v1408_v43  ;;  %v1734_v21 = vrot.slane %v982_v19, %v986_v18  ;;  %v1736_v24 = vrot.slane %v982_v19, %v990_v20 }
  0x3f   : > { %780 = vmatprep.subr.bf16.mxu0 %v1409_v44  ;;  %1326 = vmatprep.subr.bf16.mxu1 %v1409_v44 }
  0x42   : > { %781 = vmatpush1.bf16.msra.mxu0 %v1411_v45  ;;  %1342 = vmatpush1.bf16.msra.mxu1 %v1411_v45 }
  0x43   : > { %782 = vmatprep.subr.bf16.mxu0 %v1412_v46  ;;  %1327 = vmatprep.subr.bf16.mxu1 %v1412_v46 }
  0x46   : > { %783 = vmatpush1.bf16.msra.mxu0 %v1414_v47  ;;  %1343 = vmatpush1.bf16.msra.mxu1 %v1414_v47 }
  0x47   : > { %784 = vmatprep.subr.bf16.mxu0 %v1415_v48  ;;  %1328 = vmatprep.subr.bf16.mxu1 %v1415_v48 }
  0x4a   : > { %785 = vmatpush1.bf16.msra.mxu0 %v1417_v49  ;;  %1344 = vmatpush1.bf16.msra.mxu1 %v1417_v49 }
  0x4b   : > { %786 = vmatprep.subr.bf16.mxu0 %v1418_v50  ;;  %1329 = vmatprep.subr.bf16.mxu1 %v1418_v50 }
  0x4e   : > { %787 = vmatpush1.bf16.msra.mxu0 %v1420_v51  ;;  %1345 = vmatpush1.bf16.msra.mxu1 %v1420_v51 }
  0x4f   : > { %788 = vmatprep.subr.bf16.mxu0 %v1421_v52  ;;  %1330 = vmatprep.subr.bf16.mxu1 %v1421_v52 }
  0x52   : > { %789 = vmatpush1.bf16.msra.mxu0 %v1423_v53  ;;  %1346 = vmatpush1.bf16.msra.mxu1 %v1423_v53 }
  0x53   : > { %790 = vmatprep.subr.bf16.mxu0 %v1424_v54  ;;  %1331 = vmatprep.subr.bf16.mxu1 %v1424_v54 }
  0x56   : > { %791 = vmatpush1.bf16.msra.mxu0 %v1426_v55  ;;  %1347 = vmatpush1.bf16.msra.mxu1 %v1426_v55 }
  0x57   : > { %792 = vmatprep.subr.bf16.mxu0 %v1427_v56  ;;  %1332 = vmatprep.subr.bf16.mxu1 %v1427_v56 }
  0x5a   : > { %793 = vmatpush1.bf16.msra.mxu0 %v1429_v57  ;;  %1348 = vmatpush1.bf16.msra.mxu1 %v1429_v57 }
  0x5b   : > { %794 = vmatprep.subr.bf16.mxu0 %v1430_v58  ;;  %1333 = vmatprep.subr.bf16.mxu1 %v1430_v58 }
  0x5e   : > { %795 = vmatpush1.bf16.msra.mxu0 %v1432_v59  ;;  %1349 = vmatpush1.bf16.msra.mxu1 %v1432_v59 }
  0x5f   : > { %796 = vmatprep.subr.bf16.mxu0 %v1433_v60  ;;  %1334 = vmatprep.subr.bf16.mxu1 %v1433_v60 }
  0x62   : > { %797 = vmatpush1.bf16.msra.mxu0 %v1435_v61  ;;  %1350 = vmatpush1.bf16.msra.mxu1 %v1435_v61 }
  0x63   : > { %798 = vmatprep.subr.bf16.mxu0 %v1436_v62  ;;  %1335 = vmatprep.subr.bf16.mxu1 %v1436_v62 }
  0x66   : > { %799 = vmatpush1.bf16.msra.mxu0 %v1438_v63  ;;  %1351 = vmatpush1.bf16.msra.mxu1 %v1438_v63 }
  0x67   : > { %800 = vmatprep.subr.bf16.mxu0 %v1439_v0  ;;  %1336 = vmatprep.subr.bf16.mxu1 %v1439_v0 }
  0x6a   : > { %801 = vmatpush1.bf16.msra.mxu0 %v1441_v1  ;;  %1352 = vmatpush1.bf16.msra.mxu1 %v1441_v1 }
  0x6d   : > { %803 = vmatmul.mubr.bf16.vlgmr.msra.gmra.mrb[0].mxu0 %v1442_v2  ;;  %843 = vmatmul.mubr.bf16.vlgmr.msra.gmra.mrb[0].mxu1 %v1445_v3 }
  0x6e   : > { %812 = vmatprep.mubr.bf16.mxu0 %v1448_v4  ;;  %852 = vmatprep.mubr.bf16.mxu1 %v1450_v5 }
  0x75   : > { %813 = vmatmul.mubr.bf16.gmra.mrb[4].mxu0 %v1452_v6  ;;  %853 = vmatmul.mubr.bf16.gmra.mrb[4].mxu1 %v1453_v7 }
  0x76   : > { %822 = vmatprep.mubr.bf16.mxu0 %v1454_v8  ;;  %862 = vmatprep.mubr.bf16.mxu1 %v1456_v9 }
  0x7d   : > { %823 = vmatmul.mubr.bf16.gmra.mrb[8].mxu0 %v1458_v10  ;;  %863 = vmatmul.mubr.bf16.gmra.mrb[8].mxu1 %v1459_v11 }
  0x7e   : > { %832 = vmatprep.mubr.bf16.mxu0 %v1460_v12  ;;  %872 = vmatprep.mubr.bf16.mxu1 %v1462_v13 }
  0x85   : > { %833 = vmatmul.mubr.bf16.gmra.mrb[12].mxu0 %v1464_v14  ;;  %873 = vmatmul.mubr.bf16.gmra.mrb[12].mxu1 %v1465_v15 }
 0x140   : > { %v804_v22 = vpop.f32.mrb[0].mxu0  ;;  %v844_v23 = vpop.f32.mrb[0].mxu1 }
 0x141   : > { %v806_v25 = vpop.f32.mrb[1].mxu0  ;;  %v846_v26 = vpop.f32.mrb[1].mxu1  ;;  %v994_v29 = vadd.f32 %v1734_v21, %v804_v22  ;;  %v1010_v30 = vadd.f32 %v1734_v21, %v844_v23 }
 0x142   : > { %v808_v27 = vpop.f32.mrb[2].mxu0  ;;  %v848_v28 = vpop.f32.mrb[2].mxu1  ;;  %v995_v33 = vadd.f32 %v1736_v24, %v806_v25  ;;  %v1011_v34 = vadd.f32 %v1736_v24, %v846_v26 }
 0x143   : > { %v810_v31 = vpop.f32.mrb[3].mxu0  ;;  %v850_v32 = vpop.f32.mrb[3].mxu1  ;;  %1026 = vst [vmem:[%s1743_s30] sm:$0xff] %v994_v29  ;;  %1042 = vst [vmem:[%s1743_s30 + $0x80] sm:$0xff] %v1010_v30  ;;  %v996_v35 = vadd.f32 %v1734_v21, %v808_v27  ;;  %v1012_v36 = vadd.f32 %v1734_v21, %v848_v28 }
 0x144   : > { %1027 = vst [vmem:[%s1743_s30 + $0x8] sm:$0xff] %v995_v33  ;;  %1043 = vst [vmem:[%s1743_s30 + $0x88] sm:$0xff] %v1011_v34  ;;  %v997_v37 = vadd.f32 %v1736_v24, %v810_v31  ;;  %v1013_v38 = vadd.f32 %v1736_v24, %v850_v32 }
 0x145   : > { %1028 = vst [vmem:[%s1743_s30 + $0x10] sm:$0xff] %v996_v35  ;;  %1044 = vst [vmem:[%s1743_s30 + $0x90] sm:$0xff] %v1012_v36 }
 0x146   : > { %1029 = vst [vmem:[%s1743_s30 + $0x18] sm:$0xff] %v997_v37  ;;  %1045 = vst [vmem:[%s1743_s30 + $0x98] sm:$0xff] %v1013_v38 }
 0x148   : > { %v814_v39 = vpop.f32.mrb[4].mxu0  ;;  %v854_v40 = vpop.f32.mrb[4].mxu1 }
 0x149   : > { %v816_v41 = vpop.f32.mrb[5].mxu0  ;;  %v856_v42 = vpop.f32.mrb[5].mxu1  ;;  %v998_v45 = vadd.f32 %v1734_v21, %v814_v39  ;;  %v1014_v46 = vadd.f32 %v1734_v21, %v854_v40 }
 0x14a   : > { %v818_v43 = vpop.f32.mrb[6].mxu0  ;;  %v858_v44 = vpop.f32.mrb[6].mxu1  ;;  %v999_v49 = vadd.f32 %v1736_v24, %v816_v41  ;;  %v1015_v50 = vadd.f32 %v1736_v24, %v856_v42  ;;  %v1115_v39 = vld [vmem:[%s1743_s30 + $0x80] sm:$0xff] (%p1561_p6) }
 0x14b   : > { %v820_v47 = vpop.f32.mrb[7].mxu0  ;;  %v860_v48 = vpop.f32.mrb[7].mxu1  ;;  %1030 = vst [vmem:[%s1743_s30 + $0x20] sm:$0xff] %v998_v45  ;;  %1046 = vst [vmem:[%s1743_s30 + $0xa0] sm:$0xff] %v1014_v46  ;;  %v1000_v51 = vadd.f32 %v1734_v21, %v818_v43  ;;  %v1016_v52 = vadd.f32 %v1734_v21, %v858_v44  ;;  %v1117_v40 = vld [vmem:[%s1743_s30 + $0x88] sm:$0xff] (%p1561_p6) }
 0x14c   : > { %1031 = vst [vmem:[%s1743_s30 + $0x28] sm:$0xff] %v999_v49  ;;  %1047 = vst [vmem:[%s1743_s30 + $0xa8] sm:$0xff] %v1015_v50  ;;  %v1001_v53 = vadd.f32 %v1736_v24, %v820_v47  ;;  %v1017_v54 = vadd.f32 %v1736_v24, %v860_v48  ;;  %v1087_v25 = vld [vmem:[%s1743_s30 + $0x10] sm:$0xff] (%p1561_p6) }
 0x14d   : > { %1032 = vst [vmem:[%s1743_s30 + $0x30] sm:$0xff] %v1000_v51  ;;  %1048 = vst [vmem:[%s1743_s30 + $0xb0] sm:$0xff] %v1016_v52  ;;  %v1089_v26 = vld [vmem:[%s1743_s30 + $0x18] sm:$0xff] (%p1561_p6)  ;;  %v1119_v41 = vld [vmem:[%s1743_s30 + $0x90] sm:$0xff] (%p1561_p6) }
 0x14e   : > { %1033 = vst [vmem:[%s1743_s30 + $0x38] sm:$0xff] %v1001_v53  ;;  %1049 = vst [vmem:[%s1743_s30 + $0xb8] sm:$0xff] %v1017_v54  ;;  %v1121_v42 = vld [vmem:[%s1743_s30 + $0x98] sm:$0xff] (%p1561_p6) }
 0x14f   : > { %1088 = vst [vmem:[%s1814_s7 + $0x20] sm:$0xff] (%p1561_p6), %v1087_v25  ;;  %1090 = vst [vmem:[%s1814_s7 + $0x28] sm:$0xff] (%p1561_p6), %v1089_v26 }
 0x150   : > { %v824_v55 = vpop.f32.mrb[8].mxu0  ;;  %v864_v56 = vpop.f32.mrb[8].mxu1  ;;  %1116 = vst [vmem:[%s1814_s7 + $0x100] sm:$0xff] (%p1561_p6), %v1115_v39  ;;  %1118 = vst [vmem:[%s1814_s7 + $0x108] sm:$0xff] (%p1561_p6), %v1117_v40 }
 0x151   : > { %v826_v57 = vpop.f32.mrb[9].mxu0  ;;  %v866_v58 = vpop.f32.mrb[9].mxu1  ;;  %v1002_v61 = vadd.f32 %v1734_v21, %v824_v55  ;;  %v1018_v62 = vadd.f32 %v1734_v21, %v864_v56  ;;  %1120 = vst [vmem:[%s1814_s7 + $0x120] sm:$0xff] (%p1561_p6), %v1119_v41  ;;  %1122 = vst [vmem:[%s1814_s7 + $0x128] sm:$0xff] (%p1561_p6), %v1121_v42 }
 0x152   : > { %v828_v59 = vpop.f32.mrb[10].mxu0  ;;  %v868_v60 = vpop.f32.mrb[10].mxu1  ;;  %v1003_v1 = vadd.f32 %v1736_v24, %v826_v57  ;;  %v1019_v2 = vadd.f32 %v1736_v24, %v866_v58  ;;  %v1091_v27 = vld [vmem:[%s1743_s30 + $0x20] sm:$0xff] (%p1561_p6) }
 0x153   : > { %v830_v63 = vpop.f32.mrb[11].mxu0  ;;  %v870_v0 = vpop.f32.mrb[11].mxu1  ;;  %1034 = vst [vmem:[%s1743_s30 + $0x40] sm:$0xff] %v1002_v61  ;;  %1050 = vst [vmem:[%s1743_s30 + $0xc0] sm:$0xff] %v1018_v62  ;;  %v1004_v3 = vadd.f32 %v1734_v21, %v828_v59  ;;  %v1020_v4 = vadd.f32 %v1734_v21, %v868_v60  ;;  %v1093_v28 = vld [vmem:[%s1743_s30 + $0x28] sm:$0xff] (%p1561_p6)  ;;  %v1123_v43 = vld [vmem:[%s1743_s30 + $0xa0] sm:$0xff] (%p1561_p6) }
 0x154   : > { %1035 = vst [vmem:[%s1743_s30 + $0x48] sm:$0xff] %v1003_v1  ;;  %1051 = vst [vmem:[%s1743_s30 + $0xc8] sm:$0xff] %v1019_v2  ;;  %v1005_v5 = vadd.f32 %v1736_v24, %v830_v63  ;;  %v1021_v6 = vadd.f32 %v1736_v24, %v870_v0  ;;  %v1095_v29 = vld [vmem:[%s1743_s30 + $0x30] sm:$0xff] (%p1561_p6)  ;;  %v1125_v44 = vld [vmem:[%s1743_s30 + $0xa8] sm:$0xff] (%p1561_p6) }
 0x155   : > { %1036 = vst [vmem:[%s1743_s30 + $0x50] sm:$0xff] %v1004_v3  ;;  %1052 = vst [vmem:[%s1743_s30 + $0xd0] sm:$0xff] %v1020_v4  ;;  %v1097_v30 = vld [vmem:[%s1743_s30 + $0x38] sm:$0xff] (%p1561_p6)  ;;  %v1127_v45 = vld [vmem:[%s1743_s30 + $0xb0] sm:$0xff] (%p1561_p6) }
 0x156   : > { %1037 = vst [vmem:[%s1743_s30 + $0x58] sm:$0xff] %v1005_v5  ;;  %1053 = vst [vmem:[%s1743_s30 + $0xd8] sm:$0xff] %v1021_v6  ;;  %v1129_v46 = vld [vmem:[%s1743_s30 + $0xb8] sm:$0xff] (%p1561_p6) }
 0x157   : > { %1092 = vst [vmem:[%s1814_s7 + $0x40] sm:$0xff] (%p1561_p6), %v1091_v27  ;;  %1094 = vst [vmem:[%s1814_s7 + $0x48] sm:$0xff] (%p1561_p6), %v1093_v28 }
 0x158   : > { %v834_v7 = vpop.f32.mrb[12].mxu0  ;;  %v874_v8 = vpop.f32.mrb[12].mxu1  ;;  %1064 = sbr.rel (!%p1561_p6) target bundleno = 360 (0x168), region = 82  ;;  %1096 = vst [vmem:[%s1814_s7 + $0x60] sm:$0xff] (%p1561_p6), %v1095_v29  ;;  %1098 = vst [vmem:[%s1814_s7 + $0x68] sm:$0xff] (%p1561_p6), %v1097_v30 }
 0x159   : > { %v836_v9 = vpop.f32.mrb[13].mxu0  ;;  %v876_v10 = vpop.f32.mrb[13].mxu1  ;;  %v1006_v13 = vadd.f32 %v1734_v21, %v834_v7  ;;  %v1022_v14 = vadd.f32 %v1734_v21, %v874_v8  ;;  %1124 = vst [vmem:[%s1814_s7 + $0x140] sm:$0xff] (%p1561_p6), %v1123_v43  ;;  %1126 = vst [vmem:[%s1814_s7 + $0x148] sm:$0xff] (%p1561_p6), %v1125_v44 }
 0x15a   : > { %v838_v11 = vpop.f32.mrb[14].mxu0  ;;  %v878_v12 = vpop.f32.mrb[14].mxu1  ;;  %v1007_v17 = vadd.f32 %v1736_v24, %v836_v9  ;;  %v1023_v18 = vadd.f32 %v1736_v24, %v876_v10  ;;  %v1099_v31 = vld [vmem:[%s1743_s30 + $0x40] sm:$0xff] (%p1561_p6)  ;;  %1128 = vst [vmem:[%s1814_s7 + $0x160] sm:$0xff] (%p1561_p6), %v1127_v45  ;;  %1130 = vst [vmem:[%s1814_s7 + $0x168] sm:$0xff] (%p1561_p6), %v1129_v46 }
 0x15b   : > { %v840_v15 = vpop.f32.mrb[15].mxu0  ;;  %v880_v16 = vpop.f32.mrb[15].mxu1  ;;  %1038 = vst [vmem:[%s1743_s30 + $0x60] sm:$0xff] %v1006_v13  ;;  %1054 = vst [vmem:[%s1743_s30 + $0xe0] sm:$0xff] %v1022_v14  ;;  %v1008_v19 = vadd.f32 %v1734_v21, %v838_v11  ;;  %v1024_v20 = vadd.f32 %v1734_v21, %v878_v12  ;;  %v1083_v21 = vld [vmem:[%s1743_s30] sm:$0xff] (%p1561_p6)  ;;  %v1101_v32 = vld [vmem:[%s1743_s30 + $0x48] sm:$0xff] (%p1561_p6) }
 0x15c   : > { %1039 = vst [vmem:[%s1743_s30 + $0x68] sm:$0xff] %v1007_v17  ;;  %1055 = vst [vmem:[%s1743_s30 + $0xe8] sm:$0xff] %v1023_v18  ;;  %v1009_v22 = vadd.f32 %v1736_v24, %v840_v15  ;;  %v1025_v23 = vadd.f32 %v1736_v24, %v880_v16  ;;  %v1085_v24 = vld [vmem:[%s1743_s30 + $0x8] sm:$0xff] (%p1561_p6)  ;;  %v1103_v33 = vld [vmem:[%s1743_s30 + $0x50] sm:$0xff] (%p1561_p6) }
 0x15d   : > { %1040 = vst [vmem:[%s1743_s30 + $0x70] sm:$0xff] %v1008_v19  ;;  %1056 = vst [vmem:[%s1743_s30 + $0xf0] sm:$0xff] %v1024_v20  ;;  %v1105_v34 = vld [vmem:[%s1743_s30 + $0x58] sm:$0xff] (%p1561_p6)  ;;  %v1131_v47 = vld [vmem:[%s1743_s30 + $0xc0] sm:$0xff] (%p1561_p6) }
 0x15e   : > { %1041 = vst [vmem:[%s1743_s30 + $0x78] sm:$0xff] %v1009_v22  ;;  %1057 = vst [vmem:[%s1743_s30 + $0xf8] sm:$0xff] %v1025_v23  ;;  %v1133_v48 = vld [vmem:[%s1743_s30 + $0xc8] sm:$0xff] (%p1561_p6)  ;;  %v1135_v49 = vld [vmem:[%s1743_s30 + $0xd0] sm:$0xff] (%p1561_p6) }
 0x15f   : > { %1084 = vst [vmem:[%s1814_s7] sm:$0xff] %v1083_v21  ;;  %1086 = vst [vmem:[%s1814_s7 + $0x8] sm:$0xff] %v1085_v24  ;;  %v1137_v50 = vld [vmem:[%s1743_s30 + $0xd8] sm:$0xff] }
 0x160   : > { %1100 = vst [vmem:[%s1814_s7 + $0x80] sm:$0xff] %v1099_v31  ;;  %1102 = vst [vmem:[%s1814_s7 + $0x88] sm:$0xff] %v1101_v32 }
 0x161   : > { %1104 = vst [vmem:[%s1814_s7 + $0xa0] sm:$0xff] %v1103_v33  ;;  %1106 = vst [vmem:[%s1814_s7 + $0xa8] sm:$0xff] %v1105_v34 }
 0x162   : > { %v1107_v35 = vld [vmem:[%s1743_s30 + $0x60] sm:$0xff]  ;;  %1132 = vst [vmem:[%s1814_s7 + $0x180] sm:$0xff] %v1131_v47  ;;  %1134 = vst [vmem:[%s1814_s7 + $0x188] sm:$0xff] %v1133_v48 }
 0x163   : > { %v1109_v36 = vld [vmem:[%s1743_s30 + $0x68] sm:$0xff]  ;;  %1108 = vst [vmem:[%s1814_s7 + $0xc0] sm:$0xff] %v1107_v35  ;;  %1136 = vst [vmem:[%s1814_s7 + $0x1a0] sm:$0xff] %v1135_v49  ;;  %v1139_v51 = vld [vmem:[%s1743_s30 + $0xe0] sm:$0xff] }
 0x164   : > { %v1111_v37 = vld [vmem:[%s1743_s30 + $0x70] sm:$0xff]  ;;  %1110 = vst [vmem:[%s1814_s7 + $0xc8] sm:$0xff] %v1109_v36  ;;  %v1141_v52 = vld [vmem:[%s1743_s30 + $0xe8] sm:$0xff]  ;;  %1138 = vst [vmem:[%s1814_s7 + $0x1a8] sm:$0xff] %v1137_v50 }
 0x165   : > { %1112 = vst [vmem:[%s1814_s7 + $0xe0] sm:$0xff] %v1111_v37  ;;  %v1113_v38 = vld [vmem:[%s1743_s30 + $0x78] sm:$0xff]  ;;  %1140 = vst [vmem:[%s1814_s7 + $0x1c0] sm:$0xff] %v1139_v51  ;;  %v1143_v53 = vld [vmem:[%s1743_s30 + $0xf0] sm:$0xff] }
 0x166   : > { %1114 = vst [vmem:[%s1814_s7 + $0xe8] sm:$0xff] %v1113_v38  ;;  %1142 = vst [vmem:[%s1814_s7 + $0x1c8] sm:$0xff] %v1141_v52  ;;  %v1145_v54 = vld [vmem:[%s1743_s30 + $0xf8] sm:$0xff] }
 0x167   : > { %1144 = vst [vmem:[%s1814_s7 + $0x1e0] sm:$0xff] %v1143_v53  ;;  %1146 = vst [vmem:[%s1814_s7 + $0x1e8] sm:$0xff] %v1145_v54 }
 0x168 PF: > { %s13_s16 = sadd.s32 1, %s1504_s16   ;;  %s1897_s12 = smov %s1492_s13 }
 0x169   : > { %p10_p12 = scmp.ge.s32.totalorder %s13_s16, 4   ;;  %s1898_s13 = smov %s1566_s22 }
 0x16a   : > { %s1899_s14 = smov %s1500_s15  ;;  %s1900_s15 = smov %s1902_s17 }
 0x16b   :  { %12 = sbr.rel (!%p10_p12) target bundleno = 3 (0x3), region = 142 }

// kernel: model_forward.25
= control target key start
LH: loop header
LB: loop body
LE: loop exit
PB: predicated region body
PF: predicated region fallthrough
CT: control target
= control target key end

     0   :  { %vm270_vm0 = vcmask 1041409   ;;  %s973_s1 = inlined_call_operand.vmem [shape: f32[512,128], index: 1, kind: input, shape index: {}]   ;;  %s974_s0 = inlined_call_operand.vmem [shape: f32[2,64,512], index: 0, kind: input, shape index: {}]   ;;  %s975_s2 = inlined_call_operand.vmem [shape: f32[1,128], index: 2, kind: input, shape index: {}]   ;;  %s976_s3 = inlined_call_operand.vmem [shape: f32[2,128], index: 3, kind: output, shape index: {}]  }
   0x1   :  { %v207_v0 = vld [vmem:[%s973_s1 + $0x80] sm:$0xff]  ;;  %v208_v1 = vld [vmem:[%s973_s1 + $0x88] sm:$0xff]  ;;  %v209_v11 = vld [vmem:[%s973_s1 + $0x90] sm:$0xff] }
   0x2   :  { %v191_v2 = vld [vmem:[%s973_s1] sm:$0xff]  ;;  %v495_v3 = vpack.c.bf16 %v208_v1, %v207_v0  ;;  %v192_v4 = vld [vmem:[%s973_s1 + $0x8] sm:$0xff]  ;;  %v210_v13 = vld [vmem:[%s973_s1 + $0x98] sm:$0xff] }
   0x3   :  { %v239_v5 = vld [vmem:[%s973_s1 + $0x180] sm:$0xff]  ;;  %v240_v6 = vld [vmem:[%s973_s1 + $0x188] sm:$0xff]  ;;  %v497_v7 = vpack.c.bf16 %v192_v4, %v191_v2  ;;  %v193_v14 = vld [vmem:[%s973_s1 + $0x10] sm:$0xff]  ;;  %v499_v16 = vpack.c.bf16 %v210_v13, %v209_v11 }
   0x4   :  { %v527_v8 = vpack.c.bf16 %v240_v6, %v239_v5  ;;  %v223_v9 = vld [vmem:[%s973_s1 + $0x100] sm:$0xff]  ;;  %v224_v10 = vld [vmem:[%s973_s1 + $0x108] sm:$0xff]  ;;  %496 = vmatprep.subr.bf16.mxu0 %v495_v3  ;;  %v194_v15 = vld [vmem:[%s973_s1 + $0x18] sm:$0xff] }
   0x5   :  { %v529_v12 = vpack.c.bf16 %v224_v10, %v223_v9  ;;  %498 = vmatpush3.bf16.msra.mxu0 %v497_v7  ;;  %v501_v17 = vpack.c.bf16 %v194_v15, %v193_v14  ;;  %v241_v18 = vld [vmem:[%s973_s1 + $0x190] sm:$0xff]  ;;  %v242_v19 = vld [vmem:[%s973_s1 + $0x198] sm:$0xff]  ;;  %v211_v23 = vld [vmem:[%s973_s1 + $0xa0] sm:$0xff] }
   0x6   :  { %528 = vmatprep.subr.bf16.mxu1 %v527_v8  ;;  %v225_v20 = vld [vmem:[%s973_s1 + $0x110] sm:$0xff]  ;;  %v531_v21 = vpack.c.bf16 %v242_v19, %v241_v18  ;;  %v226_v22 = vld [vmem:[%s973_s1 + $0x118] sm:$0xff]  ;;  %v212_v24 = vld [vmem:[%s973_s1 + $0xa8] sm:$0xff]  ;;  %500 = vmatprep.subr.bf16.mxu0 %v499_v16 }
   0x7   :  { %530 = vmatpush3.bf16.msra.mxu1 %v529_v12  ;;  %v533_v25 = vpack.c.bf16 %v226_v22, %v225_v20  ;;  %v503_v26 = vpack.c.bf16 %v212_v24, %v211_v23  ;;  %v195_v27 = vld [vmem:[%s973_s1 + $0x20] sm:$0xff]  ;;  %v196_v28 = vld [vmem:[%s973_s1 + $0x28] sm:$0xff]  ;;  %v213_v35 = vld [vmem:[%s973_s1 + $0xb0] sm:$0xff] }
   0x8   :  { %v243_v29 = vld [vmem:[%s973_s1 + $0x1a0] sm:$0xff]  ;;  %532 = vmatprep.subr.bf16.mxu1 %v531_v21  ;;  %v244_v30 = vld [vmem:[%s973_s1 + $0x1a8] sm:$0xff]  ;;  %v505_v33 = vpack.c.bf16 %v196_v28, %v195_v27  ;;  %v214_v36 = vld [vmem:[%s973_s1 + $0xb8] sm:$0xff] }
   0x9   :  { %v227_v31 = vld [vmem:[%s973_s1 + $0x120] sm:$0xff]  ;;  %v228_v32 = vld [vmem:[%s973_s1 + $0x128] sm:$0xff]  ;;  %502 = vmatpush3.bf16.msra.mxu0 %v501_v17  ;;  %v535_v34 = vpack.c.bf16 %v244_v30, %v243_v29  ;;  %v197_v37 = vld [vmem:[%s973_s1 + $0x30] sm:$0xff]  ;;  %v507_v39 = vpack.c.bf16 %v214_v36, %v213_v35 }
   0xa   :  { %504 = vmatprep.subr.bf16.mxu0 %v503_v26  ;;  %v537_v38 = vpack.c.bf16 %v228_v32, %v227_v31  ;;  %v198_v40 = vld [vmem:[%s973_s1 + $0x38] sm:$0xff]  ;;  %v245_v41 = vld [vmem:[%s973_s1 + $0x1b0] sm:$0xff]  ;;  %v215_v46 = vld [vmem:[%s973_s1 + $0xc0] sm:$0xff] }
   0xb   :  { %534 = vmatpush3.bf16.msra.mxu1 %v533_v25  ;;  %v246_v42 = vld [vmem:[%s973_s1 + $0x1b8] sm:$0xff]  ;;  %v229_v44 = vld [vmem:[%s973_s1 + $0x130] sm:$0xff]  ;;  %v216_v47 = vld [vmem:[%s973_s1 + $0xc8] sm:$0xff]  ;;  %v509_v48 = vpack.c.bf16 %v198_v40, %v197_v37 }
   0xc   :  { %536 = vmatprep.subr.bf16.mxu1 %v535_v34  ;;  %v539_v43 = vpack.c.bf16 %v246_v42, %v245_v41  ;;  %v230_v45 = vld [vmem:[%s973_s1 + $0x138] sm:$0xff]  ;;  %v247_v49 = vld [vmem:[%s973_s1 + $0x1c0] sm:$0xff]  ;;  %v248_v50 = vld [vmem:[%s973_s1 + $0x1c8] sm:$0xff]  ;;  %v511_v52 = vpack.c.bf16 %v216_v47, %v215_v46 }
   0xd   :  { %506 = vmatpush3.bf16.msra.mxu0 %v505_v33  ;;  %v541_v51 = vpack.c.bf16 %v230_v45, %v229_v44  ;;  %v199_v53 = vld [vmem:[%s973_s1 + $0x40] sm:$0xff]  ;;  %v200_v54 = vld [vmem:[%s973_s1 + $0x48] sm:$0xff]  ;;  %v543_v56 = vpack.c.bf16 %v248_v50, %v247_v49  ;;  %v217_v58 = vld [vmem:[%s973_s1 + $0xd0] sm:$0xff] }
   0xe   :  { %508 = vmatprep.subr.bf16.mxu0 %v507_v39  ;;  %v231_v55 = vld [vmem:[%s973_s1 + $0x140] sm:$0xff]  ;;  %v232_v57 = vld [vmem:[%s973_s1 + $0x148] sm:$0xff]  ;;  %v218_v59 = vld [vmem:[%s973_s1 + $0xd8] sm:$0xff]  ;;  %v513_v62 = vpack.c.bf16 %v200_v54, %v199_v53 }
   0xf   :  { %538 = vmatpush3.bf16.msra.mxu1 %v537_v38  ;;  %v249_v60 = vld [vmem:[%s973_s1 + $0x1d0] sm:$0xff]  ;;  %v250_v61 = vld [vmem:[%s973_s1 + $0x1d8] sm:$0xff]  ;;  %v545_v63 = vpack.c.bf16 %v232_v57, %v231_v55  ;;  %v515_v0 = vpack.c.bf16 %v218_v59, %v217_v58  ;;  %v219_v6 = vld [vmem:[%s973_s1 + $0xe0] sm:$0xff] }
  0x10   :  { %540 = vmatprep.subr.bf16.mxu1 %v539_v43  ;;  %v201_v1 = vld [vmem:[%s973_s1 + $0x50] sm:$0xff]  ;;  %v202_v2 = vld [vmem:[%s973_s1 + $0x58] sm:$0xff]  ;;  %v547_v4 = vpack.c.bf16 %v250_v61, %v249_v60  ;;  %v220_v7 = vld [vmem:[%s973_s1 + $0xe8] sm:$0xff] }
  0x11   :  { %510 = vmatpush3.bf16.msra.mxu0 %v509_v48  ;;  %v233_v3 = vld [vmem:[%s973_s1 + $0x150] sm:$0xff]  ;;  %v234_v5 = vld [vmem:[%s973_s1 + $0x158] sm:$0xff]  ;;  %v251_v8 = vld [vmem:[%s973_s1 + $0x1e0] sm:$0xff]  ;;  %v517_v10 = vpack.c.bf16 %v202_v2, %v201_v1  ;;  %v519_v15 = vpack.c.bf16 %v220_v7, %v219_v6 }
  0x12   :  { %512 = vmatprep.subr.bf16.mxu0 %v511_v52  ;;  %v252_v9 = vld [vmem:[%s973_s1 + $0x1e8] sm:$0xff]  ;;  %v203_v11 = vld [vmem:[%s973_s1 + $0x60] sm:$0xff]  ;;  %v549_v14 = vpack.c.bf16 %v234_v5, %v233_v3  ;;  %v221_v20 = vld [vmem:[%s973_s1 + $0xf0] sm:$0xff] }
  0x13   :  { %542 = vmatpush3.bf16.msra.mxu1 %v541_v51  ;;  %v204_v12 = vld [vmem:[%s973_s1 + $0x68] sm:$0xff]  ;;  %v235_v13 = vld [vmem:[%s973_s1 + $0x160] sm:$0xff]  ;;  %v551_v19 = vpack.c.bf16 %v252_v9, %v251_v8  ;;  %v222_v21 = vld [vmem:[%s973_s1 + $0xf8] sm:$0xff] }
  0x14   :  { %544 = vmatprep.subr.bf16.mxu1 %v543_v56  ;;  %v236_v16 = vld [vmem:[%s973_s1 + $0x168] sm:$0xff]  ;;  %v205_v24 = vld [vmem:[%s973_s1 + $0x70] sm:$0xff]  ;;  %v254_v26 = vld [vmem:[%s973_s1 + $0x1f8] sm:$0xff]  ;;  %v521_v28 = vpack.c.bf16 %v204_v12, %v203_v11  ;;  %v523_v34 = vpack.c.bf16 %v222_v21, %v221_v20 }
  0x15   :  { %514 = vmatpush3.bf16.msra.mxu0 %v513_v62  ;;  %v15_v17 = vld [vmem:[%s974_s0 + $0x8] sm:$0xff]  ;;  %v253_v25 = vld [vmem:[%s973_s1 + $0x1f0] sm:$0xff]  ;;  %v553_v33 = vpack.c.bf16 %v236_v16, %v235_v13  ;;  %v206_v35 = vld [vmem:[%s973_s1 + $0x78] sm:$0xff] }
  0x16   :  { %516 = vmatprep.subr.bf16.mxu0 %v515_v0  ;;  %v19_v18 = vld [vmem:[%s974_s0 + $0x28] sm:$0xff]  ;;  %v237_v36 = vld [vmem:[%s973_s1 + $0x170] sm:$0xff]  ;;  %v555_v39 = vpack.c.bf16 %v254_v26, %v253_v25  ;;  %v238_v40 = vld [vmem:[%s973_s1 + $0x178] sm:$0xff]  ;;  %v525_v48 = vpack.c.bf16 %v206_v35, %v205_v24 }
  0x17   :  { %546 = vmatpush3.bf16.msra.mxu1 %v545_v63  ;;  %v23_v22 = vld [vmem:[%s974_s0 + $0x48] sm:$0xff]  ;;  %v91_v23 = vadd.f32 %v19_v18, %v15_v17  ;;  %v14_v43 = vld [vmem:[%s974_s0] sm:$0xff]  ;;  %v557_v53 = vpack.c.bf16 %v238_v40, %v237_v36  ;;  %v17_v7 = vld [vmem:[%s974_s0 + $0x18] sm:$0xff] }
  0x18   :  { %548 = vmatprep.subr.bf16.mxu1 %v547_v4  ;;  %v27_v27 = vld [vmem:[%s974_s0 + $0x68] sm:$0xff]  ;;  %v18_v46 = vld [vmem:[%s974_s0 + $0x20] sm:$0xff]  ;;  %v21_v8 = vld [vmem:[%s974_s0 + $0x38] sm:$0xff] }
  0x19   :  { %518 = vmatpush3.bf16.msra.mxu0 %v517_v10  ;;  %v47_v29 = vld [vmem:[%s974_s0 + $0x108] sm:$0xff]  ;;  %v92_v32 = vadd.f32 %v91_v23, %v23_v22  ;;  %v22_v47 = vld [vmem:[%s974_s0 + $0x40] sm:$0xff]  ;;  %v78_v52 = vadd.f32 %v18_v46, %v14_v43  ;;  %v25_v9 = vld [vmem:[%s974_s0 + $0x58] sm:$0xff] }
  0x1a   :  { %v51_v30 = vld [vmem:[%s974_s0 + $0x128] sm:$0xff]  ;;  %520 = vmatprep.subr.bf16.mxu0 %v519_v15  ;;  %v26_v55 = vld [vmem:[%s974_s0 + $0x60] sm:$0xff]  ;;  %v49_v20 = vld [vmem:[%s974_s0 + $0x118] sm:$0xff] }
  0x1b   :  { %v55_v31 = vld [vmem:[%s974_s0 + $0x148] sm:$0xff]  ;;  %550 = vmatpush3.bf16.msra.mxu1 %v549_v14  ;;  %v143_v38 = vadd.f32 %v51_v30, %v47_v29  ;;  %v93_v42 = vadd.f32 %v92_v32, %v27_v27  ;;  %v46_v56 = vld [vmem:[%s974_s0 + $0x100] sm:$0xff]  ;;  %v79_v62 = vadd.f32 %v78_v52, %v22_v47  ;;  %v117_v14 = vadd.f32 %v21_v8, %v17_v7  ;;  %v53_v23 = vld [vmem:[%s974_s0 + $0x138] sm:$0xff] }
  0x1c   :  { %v31_v37 = vld [vmem:[%s974_s0 + $0x88] sm:$0xff]  ;;  %552 = vmatprep.subr.bf16.mxu1 %v551_v19  ;;  %v50_v57 = vld [vmem:[%s974_s0 + $0x120] sm:$0xff]  ;;  %v29_v19 = vld [vmem:[%s974_s0 + $0x78] sm:$0xff]  ;;  %v169_v32 = vadd.f32 %v53_v23, %v49_v20 }
  0x1d   :  { %v59_v41 = vld [vmem:[%s974_s0 + $0x168] sm:$0xff]  ;;  %v144_v45 = vadd.f32 %v143_v38, %v55_v31  ;;  %522 = vmatpush3.bf16.msra.mxu0 %v521_v28  ;;  %v94_v51 = vadd.f32 %v93_v42, %v31_v37  ;;  %v54_v61 = vld [vmem:[%s974_s0 + $0x140] sm:$0xff]  ;;  %v130_v63 = vadd.f32 %v50_v57, %v46_v56  ;;  %v80_v5 = vadd.f32 %v79_v62, %v26_v55  ;;  %v57_v24 = vld [vmem:[%s974_s0 + $0x158] sm:$0xff] }
  0x1e   :  { %v35_v44 = vld [vmem:[%s974_s0 + $0xa8] sm:$0xff]  ;;  %524 = vmatprep.subr.bf16.mxu0 %v523_v34  ;;  %v30_v2 = vld [vmem:[%s974_s0 + $0x80] sm:$0xff]  ;;  %v118_v25 = vadd.f32 %v117_v14, %v25_v9  ;;  %v33_v31 = vld [vmem:[%s974_s0 + $0x98] sm:$0xff]  ;;  %v170_v43 = vadd.f32 %v169_v32, %v57_v24 }
  0x1f   :  { %v39_v49 = vld [vmem:[%s974_s0 + $0xc8] sm:$0xff]  ;;  %554 = vmatpush3.bf16.msra.mxu1 %v553_v33  ;;  %v145_v54 = vadd.f32 %v144_v45, %v59_v41  ;;  %v95_v60 = vadd.f32 %v94_v51, %v35_v44  ;;  %v58_v3 = vld [vmem:[%s974_s0 + $0x160] sm:$0xff]  ;;  %v131_v6 = vadd.f32 %v130_v63, %v54_v61  ;;  %v81_v17 = vadd.f32 %v80_v5, %v30_v2  ;;  %v61_v34 = vld [vmem:[%s974_s0 + $0x178] sm:$0xff] }
  0x20   :  { %v63_v50 = vld [vmem:[%s974_s0 + $0x188] sm:$0xff]  ;;  %556 = vmatprep.subr.bf16.mxu1 %v555_v39  ;;  %v34_v12 = vld [vmem:[%s974_s0 + $0xa0] sm:$0xff]  ;;  %v119_v35 = vadd.f32 %v118_v25, %v29_v19  ;;  %v16_v36 = vld [vmem:[%s974_s0 + $0x10] sm:$0xff] }
  0x21   :  { %v43_v58 = vld [vmem:[%s974_s0 + $0xe8] sm:$0xff]  ;;  %v146_v1 = vadd.f32 %v145_v54, %v63_v50  ;;  %526 = vmatpush3.bf16.msra.mxu0 %v525_v48  ;;  %v96_v4 = vadd.f32 %v95_v60, %v39_v49  ;;  %v62_v13 = vld [vmem:[%s974_s0 + $0x180] sm:$0xff]  ;;  %v132_v18 = vadd.f32 %v131_v6, %v58_v3  ;;  %v82_v29 = vadd.f32 %v81_v17, %v34_v12  ;;  %v20_v37 = vld [vmem:[%s974_s0 + $0x30] sm:$0xff] }
  0x22   :  { %v67_v59 = vld [vmem:[%s974_s0 + $0x1a8] sm:$0xff]  ;;  %v38_v16 = vld [vmem:[%s974_s0 + $0xc0] sm:$0xff]  ;;  %v37_v42 = vld [vmem:[%s974_s0 + $0xb8] sm:$0xff]  ;;  %v120_v48 = vadd.f32 %v119_v35, %v33_v31  ;;  %v104_v50 = vadd.f32 %v20_v37, %v16_v36  ;;  %v171_v54 = vadd.f32 %v170_v43, %v61_v34 }
  0x23   :  { %v71_v0 = vld [vmem:[%s974_s0 + $0x1c8] sm:$0xff]  ;;  %558 = vmatpush3.bf16.msra.mxu1 %v557_v53  ;;  %v147_v11 = vadd.f32 %v146_v1, %v67_v59  ;;  %v97_v15 = vadd.f32 %v96_v4, %v43_v58  ;;  %v66_v22 = vld [vmem:[%s974_s0 + $0x1a0] sm:$0xff]  ;;  %v133_v30 = vadd.f32 %v132_v18, %v62_v13  ;;  %v83_v40 = vadd.f32 %v82_v29, %v38_v16  ;;  %v24_v44 = vld [vmem:[%s974_s0 + $0x50] sm:$0xff] }
  0x24   :  { %v75_v10 = vld [vmem:[%s974_s0 + $0x1e8] sm:$0xff]  ;;  %v42_v27 = vld [vmem:[%s974_s0 + $0xe0] sm:$0xff]  ;;  %v41_v46 = vld [vmem:[%s974_s0 + $0xd8] sm:$0xff]  ;;  %v121_v60 = vadd.f32 %v120_v48, %v37_v42  ;;  %v105_v61 = vadd.f32 %v104_v50, %v24_v44 }
  0x25   :  { %v148_v21 = vadd.f32 %v147_v11, %v71_v0  ;;  %v98_v26 = vrot.slane %v97_v15, 4  ;;  %v70_v28 = vld [vmem:[%s974_s0 + $0x1c0] sm:$0xff]  ;;  %v134_v41 = vadd.f32 %v133_v30, %v66_v22  ;;  %v65_v47 = vld [vmem:[%s974_s0 + $0x198] sm:$0xff]  ;;  %v28_v49 = vld [vmem:[%s974_s0 + $0x70] sm:$0xff]  ;;  %v84_v52 = vadd.f32 %v83_v40, %v42_v27 }
  0x26   :  { %v74_v39 = vld [vmem:[%s974_s0 + $0x1e0] sm:$0xff]  ;;  %v48_v55 = vld [vmem:[%s974_s0 + $0x110] sm:$0xff]  ;;  %v69_v59 = vld [vmem:[%s974_s0 + $0x1b8] sm:$0xff]  ;;  %v172_v3 = vadd.f32 %v171_v54, %v65_v47  ;;  %v122_v8 = vadd.f32 %v121_v60, %v41_v46  ;;  %v106_v9 = vadd.f32 %v105_v61, %v28_v49 }
  0x27   :  { %v149_v33 = vadd.f32 %v148_v21, %v75_v10  ;;  %v99_v38 = vadd.f32 %v98_v26, %v97_v15  ;;  %v135_v53 = vadd.f32 %v134_v41, %v70_v28  ;;  %v52_v56 = vld [vmem:[%s974_s0 + $0x130] sm:$0xff]  ;;  %v85_v0 = vrot.slane %v84_v52, 4  ;;  %v45_v2 = vld [vmem:[%s974_s0 + $0xf8] sm:$0xff] }
  0x28   :  { %v56_v57 = vld [vmem:[%s974_s0 + $0x150] sm:$0xff]  ;;  %v156_v62 = vadd.f32 %v52_v56, %v48_v55  ;;  %v73_v7 = vld [vmem:[%s974_s0 + $0x1d8] sm:$0xff]  ;;  %v173_v14 = vadd.f32 %v172_v3, %v69_v59  ;;  %v123_v19 = vadd.f32 %v122_v8, %v45_v2 }
  0x29   :  { %v150_v45 = vrot.slane %v149_v33, 4  ;;  %v100_v51 = vrot.slane %v99_v38, 2  ;;  %v136_v1 = vadd.f32 %v135_v53, %v74_v39  ;;  %v32_v4 = vld [vmem:[%s974_s0 + $0x90] sm:$0xff]  ;;  %v86_v12 = vadd.f32 %v85_v0, %v84_v52  ;;  %v77_v18 = vld [vmem:[%s974_s0 + $0x1f8] sm:$0xff] }
  0x2a   :  { %v60_v5 = vld [vmem:[%s974_s0 + $0x170] sm:$0xff]  ;;  %v157_v10 = vadd.f32 %v156_v62, %v56_v57  ;;  %v107_v20 = vadd.f32 %v106_v9, %v32_v4  ;;  %v174_v25 = vadd.f32 %v173_v14, %v73_v7  ;;  %v124_v29 = vrot.slane %v123_v19, 4 }
  0x2b   :  { %v151_v58 = vadd.f32 %v150_v45, %v149_v33  ;;  %v101_v63 = vadd.f32 %v100_v51, %v99_v38  ;;  %v137_v13 = vrot.slane %v136_v1, 4  ;;  %v36_v15 = vld [vmem:[%s974_s0 + $0xb0] sm:$0xff]  ;;  %v87_v23 = vrot.slane %v86_v12, 2 }
  0x2c   :  { %v64_v16 = vld [vmem:[%s974_s0 + $0x190] sm:$0xff]  ;;  %v158_v21 = vadd.f32 %v157_v10, %v60_v5  ;;  %v108_v30 = vadd.f32 %v107_v20, %v36_v15  ;;  %v175_v35 = vadd.f32 %v174_v25, %v77_v18  ;;  %v125_v39 = vadd.f32 %v124_v29, %v123_v19 }
  0x2d   :  { %v152_v6 = vrot.slane %v151_v58, 2  ;;  %v102_v11 = vrot.slane %v101_v63, 1  ;;  %v138_v24 = vadd.f32 %v137_v13, %v136_v1  ;;  %v40_v26 = vld [vmem:[%s974_s0 + $0xd0] sm:$0xff]  ;;  %v88_v33 = vadd.f32 %v87_v23, %v86_v12  ;;  %v424_v23 = vld [vmem:[%s975_s2] ss:$0 sm:$0xff] }
  0x2e   :  { %v68_v27 = vld [vmem:[%s974_s0 + $0x1b0] sm:$0xff]  ;;  %v159_v31 = vadd.f32 %v158_v21, %v64_v16  ;;  %v109_v40 = vadd.f32 %v108_v30, %v40_v26  ;;  %v176_v44 = vrot.slane %v175_v35, 4  ;;  %v126_v47 = vrot.slane %v125_v39, 2 }
  0x2f   :  { %v153_v17 = vadd.f32 %v152_v6, %v151_v58  ;;  %v103_v22 = vadd.f32 %v102_v11, %v101_v63  ;;  %v139_v34 = vrot.slane %v138_v24, 2  ;;  %v44_v36 = vld [vmem:[%s974_s0 + $0xf0] sm:$0xff]  ;;  %v89_v42 = vrot.slane %v88_v33, 1 }
  0x30   :  { %v72_v37 = vld [vmem:[%s974_s0 + $0x1d0] sm:$0xff]  ;;  %v160_v41 = vadd.f32 %v159_v31, %v68_v27  ;;  %v110_v48 = vadd.f32 %v109_v40, %v44_v36  ;;  %v177_v52 = vadd.f32 %v176_v44, %v175_v35  ;;  %v127_v54 = vadd.f32 %v126_v47, %v125_v39 }
  0x31   :  { %v154_v28 = vrot.slane %v153_v17, 1  ;;  %v184_v32 = vmul.f32 0.015625, %v103_v22  ;;  %v140_v43 = vadd.f32 %v139_v34, %v138_v24  ;;  %v76_v45 = vld [vmem:[%s974_s0 + $0x1f0] sm:$0xff]  ;;  %v90_v50 = vadd.f32 %v89_v42, %v88_v33 }
  0x32   :  { %v161_v49 = vadd.f32 %v160_v41, %v72_v37  ;;  %v111_v55 = vrot.slane %v110_v48, 4  ;;  %v178_v59 = vrot.slane %v177_v52, 2  ;;  %v128_v60 = vrot.slane %v127_v54, 1 }
  0x33   :  { %v155_v38 = vadd.f32 %v154_v28, %v153_v17  ;;  %v141_v51 = vrot.slane %v140_v43, 1  ;;  %v183_v58 = vmul.f32 0.015625, %v90_v50 }
  0x34   :  { %v162_v56 = vadd.f32 %v161_v49, %v76_v45  ;;  %v112_v61 = vadd.f32 %v111_v55, %v110_v48  ;;  %v179_v0 = vadd.f32 %v178_v59, %v177_v52  ;;  %v129_v1 = vadd.f32 %v128_v60, %v127_v54 }
  0x35   :  { %v188_v46 = vmul.f32 0.015625, %v155_v38  ;;  %v142_v57 = vadd.f32 %v141_v51, %v140_v43 }
  0x36   :  { %v163_v62 = vrot.slane %v162_v56, 4  ;;  %v113_v2 = vrot.slane %v112_v61, 2  ;;  %v180_v5 = vrot.slane %v179_v0, 1  ;;  %v186_v9 = vmul.f32 0.015625, %v129_v1 }
  0x37   :  { %v272_v53 = vsel %vm270_vm0, %v188_v46, %v184_v32  ;;  %v187_v63 = vmul.f32 0.015625, %v142_v57 }
  0x38   :  { %343 = vmatprep.mubr.f32.mxu0 %v272_v53  ;;  %v164_v3 = vadd.f32 %v163_v62, %v162_v56  ;;  %v114_v6 = vadd.f32 %v113_v2, %v112_v61  ;;  %v181_v8 = vadd.f32 %v180_v5, %v179_v0 }
  0x39   :  { %v271_v4 = vsel %vm270_vm0, %v187_v63, %v183_v58 }
  0x3a   :  { %344 = vmatmul.mubr.f32.vlgmr.msra.gmra.mrb[0].mxu0 %v271_v4  ;;  %v165_v7 = vrot.slane %v164_v3, 2  ;;  %v115_v10 = vrot.slane %v114_v6, 1  ;;  %v190_v12 = vmul.f32 0.015625, %v181_v8 }
  0x3c   :  { %v166_v11 = vadd.f32 %v165_v7, %v164_v3  ;;  %v116_v13 = vadd.f32 %v115_v10, %v114_v6  ;;  %v274_v15 = vsel %vm270_vm0, %v190_v12, %v186_v9 }
  0x3d   :  { %413 = vmatprep.mubr.f32.mxu1 %v274_v15 }
  0x3e   :  { %v167_v14 = vrot.slane %v166_v11, 1  ;;  %v185_v17 = vmul.f32 0.015625, %v116_v13 }
  0x40   :  { %v168_v16 = vadd.f32 %v167_v14, %v166_v11 }
  0x42   :  { %v189_v18 = vmul.f32 0.015625, %v168_v16 }
  0x44   :  { %v273_v19 = vsel %vm270_vm0, %v189_v18, %v185_v17 }
  0x45   :  { %414 = vmatmul.mubr.f32.vlgmr.msra.gmra.mrb[0].mxu1 %v273_v19 }
 0x10d   :  { %v457_v20 = vpop.f32.mrb[0].mxu0 }
 0x10e   :  { %v458_v21 = vpop.f32.mrb[1].mxu0 }
 0x10f   :  { %v459_v22 = vadd.f32 %v458_v21, %v457_v20 }
 0x111   :  { %v346_v24 = vadd.f32 %v459_v22, %v424_v23 }
 0x118   :  { %v492_v25 = vpop.f32.mrb[0].mxu1 }
 0x119   :  { %v493_v26 = vpop.f32.mrb[1].mxu1 }
 0x11a   :  { %v494_v27 = vadd.f32 %v493_v26, %v492_v25 }
 0x11c   :  { %v416_v28 = vadd.f32 %v494_v27, %v346_v24 }
 0x11e   :  { %419 = vst [vmem:[%s976_s3] sm:$0x3] %v416_v28 }

// kernel: model_forward.24
= control target key start
LH: loop header
LB: loop body
LE: loop exit
PB: predicated region body
PF: predicated region fallthrough
CT: control target
= control target key end

     0   :  { %s2672_s0 = inlined_call_operand.vmem [shape: bf16[128,4608], index: 0, kind: input, shape index: {}]   ;;  %s2673_s1 = inlined_call_operand.vmem [shape: bf16[4608,512], index: 1, kind: input, shape index: {}]   ;;  %s2674_s2 = inlined_call_operand.vmem [shape: f32[1,512], index: 2, kind: input, shape index: {}]   ;;  %s2675_s3 = inlined_call_operand.vmem [shape: f32[128,512], index: 3, kind: input, shape index: {}]   ;;  %s2676_s4 = inlined_call_operand.vmem [shape: f32[128,512], index: 4, kind: output, shape index: {}]  }
   0x1   :  { %2679 = sst [smem:[#allocation9_spill]] %s2672_s0 }
   0x2   :  { %s1979_s15 = smov 0   ;;  %s1981_s16 = smov 0  }
   0x3   :  { %s1983_s17 = smov 0   ;;  %s1985_s18 = smov 0  }
   0x4   :  { %s1987_s19 = smov 0   ;;  %s1989_s20 = smov 0  }
   0x5   :  { %s1991_s21 = smov 0   ;;  %s1993_s22 = smov 0  }
   0x6   :  { %s1995_s23 = smov 0   ;;  %s1997_s24 = smov 0  }
   0x7   :  { %s1999_s25 = smov 0  }
   0x8 LB: > { %s1592_s26 = sadd.s32 4294967295, %s1951_s25   ;;  %s26_s27 = sadd.s32 1, %s1943_s23  ;;  %s1951_s25 = sphi %s1999_s25, %s14_s25   ;;  %s1947_s24 = sphi %s1997_s24, %s2700_s24   ;;  %s1943_s23 = sphi %s1995_s23, %s2699_s23   ;;  %s1939_s22 = sphi %s1993_s22, %s2698_s22   ;;  %s1935_s21 = sphi %s1991_s21, %s2697_s21   ;;  %s1931_s20 = sphi %s1989_s20, %s2696_s20   ;;  %s1927_s19 = sphi %s1987_s19, %s2695_s19   ;;  %s1923_s18 = sphi %s1985_s18, %s2694_s18   ;;  %s1919_s17 = sphi %s1983_s17, %s2693_s17   ;;  %s1915_s16 = sphi %s1981_s16, %s2692_s16   ;;  %s1911_s15 = sphi %s1979_s15, %s2691_s15  }
   0x9   : > { %p27_p0 = scmp.ge.s32.totalorder %s26_s27, 18  ;;  %s29_s28 = sadd.s32 1, %s1947_s24 }
   0xa   : > { %s42_s29 = sadd.s32 1, %s1931_s20  ;;  %p49_p1 = scmp.ne.s32.totalorder %s1931_s20, %s1927_s19 }
   0xb   : > { %s2702_s27 = smov (%p27_p0, %s26_s27), 0  ;;  %s2704_s28 = smov (!%p27_p0, %s29_s28), %s1947_s24 }
   0xc   : > { %2680 = sst [smem:[#allocation6_spill]] %s2702_s27  ;;  %s38_s30 = ssub.s32 %s1943_s23, %s2702_s27 }
   0xd   : > { %p50_p2 = scmp.eq.s32.totalorder %s1951_s25, 0  ;;  %p31_p3 = scmp.ge.s32.totalorder %s2704_s28, 2 }
   0xe   : > { %p40_p4 = scmp.eq.s32.totalorder %s38_s30, 0  ;;  %s70_s6 = sadd.s32 1, %s1923_s18 }
   0xf   : > { %p2048_p5 = por %p50_p2, %p49_p1  ;;  %s2706_s28 = smov (%p31_p3, %s2704_s28), 0 }
  0x10   : > { %2682 = sst [smem:[#allocation7_spill]] %s2706_s28  ;;  %s66_s8 = ssub.s32 %s1947_s24, %s2706_s28 }
  0x11   : > { %s2056_s7 = scalar_select %p40_p4, %s1931_s20, %s42_s29  }
  0x12   : > { %p77_p6 = scmp.ne.s32.totalorder %s1923_s18, %s1919_s17  ;;  %s67_s9 = sor.u32 %s66_s8, %s38_s30 }
  0x13   : > { %2683 = sst [smem:[#allocation8_spill]] %s2056_s7  ;;  %p122_p7 = scmp.eq.s32.totalorder %s66_s8, 0 }
  0x14   : > { %p68_p8 = scmp.eq.s32.totalorder %s67_s9, 0  ;;  %p2064_p9 = por %p77_p6, %p50_p2 }
  0x15   : > { %s124_s11 = sadd.s32 1, %s1915_s16  ;;  %p131_p10 = scmp.ne.s32.totalorder %s1915_s16, %s1911_s15 }
  0x16   : > { %s2072_s12 = scalar_select %p68_p8, %s1923_s18, %s70_s6  }
  0x17   : > { %s2075_s13 = scalar_select %p122_p7, %s1915_s16, %s124_s11  }
  0x18   : > { %p2079_p11 = por %p131_p10, %p50_p2  ;;  %p163_p12 = scmp.eq.s32.totalorder %s1592_s26, 35 }
  0x19   : > { %p1595_p0 = scmp.ge.s32.totalorder %s1951_s25, 36 }
  0x1a   : > { %p2083_p13 = por %p163_p12, %p131_p10 }
  0x1b   : > { %185 = sbr.rel (%p1595_p0) target bundleno = 95 (0x5f), region = 16 }
  0x22   : > { %188 = sbr.rel (!%p2048_p5) target bundleno = 52 (0x34), region = 20  ;;  %s190_s30 = sand.u32 (%p2048_p5), 1, %s1931_s20  }
  0x23   : > { %s1668_s6 = sshll.u32 (%p2048_p5), %s1943_s23, 3  ;;  %s1596_s8 = sshll.u32 (%p2048_p5), %s190_s30, 7 }
  0x24   : > { %s2687_s0 = sld [smem:[#allocation9_spill]] (%p2048_p5)  ;;  %s192_s26 = scalar_lea.vmem (%p2048_p5), [#allocation2], %s1596_s8 }
  0x2a   : > { %s2095_s28 = scalar_lea.vmem %s2687_s0, %s1668_s6 }
  0x2b   : > { %v256_v0 = vld [vmem:[%s2095_s28] sm:$0xff]  ;;  %v258_v1 = vld [vmem:[%s2095_s28 + $0x90] sm:$0xff] }
  0x2c   : > { %v260_v2 = vld [vmem:[%s2095_s28 + $0x120] sm:$0xff]  ;;  %257 = vst [vmem:[%s192_s26] sm:$0xff] %v256_v0  ;;  %259 = vst [vmem:[%s192_s26 + $0x8] sm:$0xff] %v258_v1  ;;  %v262_v3 = vld [vmem:[%s2095_s28 + $0x1b0] sm:$0xff] }
  0x2d   : > { %261 = vst [vmem:[%s192_s26 + $0x10] sm:$0xff] %v260_v2  ;;  %v264_v4 = vld [vmem:[%s2095_s28 + $0x240] sm:$0xff]  ;;  %v266_v5 = vld [vmem:[%s2095_s28 + $0x2d0] sm:$0xff]  ;;  %263 = vst [vmem:[%s192_s26 + $0x18] sm:$0xff] %v262_v3 }
  0x2e   : > { %265 = vst [vmem:[%s192_s26 + $0x20] sm:$0xff] %v264_v4  ;;  %267 = vst [vmem:[%s192_s26 + $0x28] sm:$0xff] %v266_v5  ;;  %v268_v6 = vld [vmem:[%s2095_s28 + $0x360] sm:$0xff]  ;;  %v270_v7 = vld [vmem:[%s2095_s28 + $0x3f0] sm:$0xff] }
  0x2f   : > { %v272_v8 = vld [vmem:[%s2095_s28 + $0x480] sm:$0xff]  ;;  %269 = vst [vmem:[%s192_s26 + $0x30] sm:$0xff] %v268_v6  ;;  %271 = vst [vmem:[%s192_s26 + $0x38] sm:$0xff] %v270_v7  ;;  %v274_v9 = vld [vmem:[%s2095_s28 + $0x510] sm:$0xff] }
  0x30   : > { %273 = vst [vmem:[%s192_s26 + $0x40] sm:$0xff] %v272_v8  ;;  %v276_v10 = vld [vmem:[%s2095_s28 + $0x5a0] sm:$0xff]  ;;  %v278_v11 = vld [vmem:[%s2095_s28 + $0x630] sm:$0xff]  ;;  %275 = vst [vmem:[%s192_s26 + $0x48] sm:$0xff] %v274_v9 }
  0x31   : > { %277 = vst [vmem:[%s192_s26 + $0x50] sm:$0xff] %v276_v10  ;;  %279 = vst [vmem:[%s192_s26 + $0x58] sm:$0xff] %v278_v11  ;;  %v280_v12 = vld [vmem:[%s2095_s28 + $0x6c0] sm:$0xff]  ;;  %v282_v13 = vld [vmem:[%s2095_s28 + $0x750] sm:$0xff] }
  0x32   : > { %v284_v14 = vld [vmem:[%s2095_s28 + $0x7e0] sm:$0xff]  ;;  %281 = vst [vmem:[%s192_s26 + $0x60] sm:$0xff] %v280_v12  ;;  %283 = vst [vmem:[%s192_s26 + $0x68] sm:$0xff] %v282_v13  ;;  %v286_v15 = vld [vmem:[%s2095_s28 + $0x870] sm:$0xff] }
  0x33   : > { %285 = vst [vmem:[%s192_s26 + $0x70] sm:$0xff] %v284_v14  ;;  %287 = vst [vmem:[%s192_s26 + $0x78] sm:$0xff] %v286_v15 }
  0x34 PF: > { %293 = sbr.rel (!%p2064_p9) target bundleno = 75 (0x4b), region = 58  ;;  %s295_s5 = sand.u32 (%p2064_p9), 1, %s1923_s18  }
  0x35   : > { %s1601_s30 = sshll.u32 (%p2064_p9), %s1947_s24, 1  ;;  %s1599_s6 = sshll.u32 (%p2064_p9), %s295_s5, 8 }
  0x36   : > { %s1669_s8 = sshll.u32 (%p2064_p9), %s1943_s23, 7  ;;  %s2126_s28 = scalar_lea.vmem (%p2064_p9), [#allocation3], %s1599_s6 }
  0x37   : > { %s301_s9 = sadd.s32 (%p2064_p9), %s1669_s8, %s1601_s30 }
  0x38   : > { %s1603_s11 = sshll.u32 (%p2064_p9), %s301_s9, 2 }
  0x39   : > { %s2121_s7 = scalar_lea.vmem (%p2064_p9), %s2673_s1, %s1603_s11 }
  0x3a   : > { %v393_v16 = vld [vmem:[%s2121_s7] sm:$0xff] (%p2064_p9)  ;;  %v395_v17 = vld [vmem:[%s2121_s7 + $0x10] sm:$0xff] (%p2064_p9) }
  0x3b   : > { %v397_v18 = vld [vmem:[%s2121_s7 + $0x20] sm:$0xff]  ;;  %394 = vst [vmem:[%s2126_s28] sm:$0xff] %v393_v16  ;;  %396 = vst [vmem:[%s2126_s28 + $0x8] sm:$0xff] %v395_v17  ;;  %v399_v19 = vld [vmem:[%s2121_s7 + $0x30] sm:$0xff] }
  0x3c   : > { %398 = vst [vmem:[%s2126_s28 + $0x10] sm:$0xff] %v397_v18  ;;  %v401_v20 = vld [vmem:[%s2121_s7 + $0x40] sm:$0xff]  ;;  %v403_v21 = vld [vmem:[%s2121_s7 + $0x50] sm:$0xff]  ;;  %400 = vst [vmem:[%s2126_s28 + $0x18] sm:$0xff] %v399_v19 }
  0x3d   : > { %402 = vst [vmem:[%s2126_s28 + $0x20] sm:$0xff] %v401_v20  ;;  %404 = vst [vmem:[%s2126_s28 + $0x28] sm:$0xff] %v403_v21  ;;  %v405_v22 = vld [vmem:[%s2121_s7 + $0x60] sm:$0xff]  ;;  %v407_v23 = vld [vmem:[%s2121_s7 + $0x70] sm:$0xff] }
  0x3e   : > { %v409_v24 = vld [vmem:[%s2121_s7 + $0x80] sm:$0xff]  ;;  %406 = vst [vmem:[%s2126_s28 + $0x30] sm:$0xff] %v405_v22  ;;  %408 = vst [vmem:[%s2126_s28 + $0x38] sm:$0xff] %v407_v23  ;;  %v411_v25 = vld [vmem:[%s2121_s7 + $0x90] sm:$0xff] }
  0x3f   : > { %410 = vst [vmem:[%s2126_s28 + $0x40] sm:$0xff] %v409_v24  ;;  %v413_v26 = vld [vmem:[%s2121_s7 + $0xa0] sm:$0xff]  ;;  %v415_v27 = vld [vmem:[%s2121_s7 + $0xb0] sm:$0xff]  ;;  %412 = vst [vmem:[%s2126_s28 + $0x48] sm:$0xff] %v411_v25 }
  0x40   : > { %414 = vst [vmem:[%s2126_s28 + $0x50] sm:$0xff] %v413_v26  ;;  %416 = vst [vmem:[%s2126_s28 + $0x58] sm:$0xff] %v415_v27  ;;  %v417_v28 = vld [vmem:[%s2121_s7 + $0xc0] sm:$0xff]  ;;  %v419_v29 = vld [vmem:[%s2121_s7 + $0xd0] sm:$0xff] }
  0x41   : > { %v421_v30 = vld [vmem:[%s2121_s7 + $0xe0] sm:$0xff]  ;;  %418 = vst [vmem:[%s2126_s28 + $0x60] sm:$0xff] %v417_v28  ;;  %420 = vst [vmem:[%s2126_s28 + $0x68] sm:$0xff] %v419_v29  ;;  %v423_v31 = vld [vmem:[%s2121_s7 + $0xf0] sm:$0xff] }
  0x42   : > { %422 = vst [vmem:[%s2126_s28 + $0x70] sm:$0xff] %v421_v30  ;;  %v425_v32 = vld [vmem:[%s2121_s7 + $0x100] sm:$0xff]  ;;  %v427_v33 = vld [vmem:[%s2121_s7 + $0x110] sm:$0xff]  ;;  %424 = vst [vmem:[%s2126_s28 + $0x78] sm:$0xff] %v423_v31 }
  0x43   : > { %426 = vst [vmem:[%s2126_s28 + $0x80] sm:$0xff] %v425_v32  ;;  %428 = vst [vmem:[%s2126_s28 + $0x88] sm:$0xff] %v427_v33  ;;  %v429_v34 = vld [vmem:[%s2121_s7 + $0x120] sm:$0xff]  ;;  %v431_v35 = vld [vmem:[%s2121_s7 + $0x130] sm:$0xff] }
  0x44   : > { %v433_v36 = vld [vmem:[%s2121_s7 + $0x140] sm:$0xff]  ;;  %430 = vst [vmem:[%s2126_s28 + $0x90] sm:$0xff] %v429_v34  ;;  %432 = vst [vmem:[%s2126_s28 + $0x98] sm:$0xff] %v431_v35  ;;  %v435_v37 = vld [vmem:[%s2121_s7 + $0x150] sm:$0xff] }
  0x45   : > { %434 = vst [vmem:[%s2126_s28 + $0xa0] sm:$0xff] %v433_v36  ;;  %v437_v38 = vld [vmem:[%s2121_s7 + $0x160] sm:$0xff]  ;;  %v439_v39 = vld [vmem:[%s2121_s7 + $0x170] sm:$0xff]  ;;  %436 = vst [vmem:[%s2126_s28 + $0xa8] sm:$0xff] %v435_v37 }
  0x46   : > { %438 = vst [vmem:[%s2126_s28 + $0xb0] sm:$0xff] %v437_v38  ;;  %440 = vst [vmem:[%s2126_s28 + $0xb8] sm:$0xff] %v439_v39  ;;  %v441_v40 = vld [vmem:[%s2121_s7 + $0x180] sm:$0xff]  ;;  %v443_v41 = vld [vmem:[%s2121_s7 + $0x190] sm:$0xff] }
  0x47   : > { %v445_v42 = vld [vmem:[%s2121_s7 + $0x1a0] sm:$0xff]  ;;  %442 = vst [vmem:[%s2126_s28 + $0xc0] sm:$0xff] %v441_v40  ;;  %444 = vst [vmem:[%s2126_s28 + $0xc8] sm:$0xff] %v443_v41  ;;  %v447_v43 = vld [vmem:[%s2121_s7 + $0x1b0] sm:$0xff] }
  0x48   : > { %446 = vst [vmem:[%s2126_s28 + $0xd0] sm:$0xff] %v445_v42  ;;  %v449_v44 = vld [vmem:[%s2121_s7 + $0x1c0] sm:$0xff]  ;;  %v451_v45 = vld [vmem:[%s2121_s7 + $0x1d0] sm:$0xff]  ;;  %448 = vst [vmem:[%s2126_s28 + $0xd8] sm:$0xff] %v447_v43 }
  0x49   : > { %450 = vst [vmem:[%s2126_s28 + $0xe0] sm:$0xff] %v449_v44  ;;  %452 = vst [vmem:[%s2126_s28 + $0xe8] sm:$0xff] %v451_v45  ;;  %v453_v46 = vld [vmem:[%s2121_s7 + $0x1e0] sm:$0xff]  ;;  %v455_v47 = vld [vmem:[%s2121_s7 + $0x1f0] sm:$0xff] }
  0x4a   : > { %454 = vst [vmem:[%s2126_s28 + $0xf0] sm:$0xff] %v453_v46  ;;  %456 = vst [vmem:[%s2126_s28 + $0xf8] sm:$0xff] %v455_v47 }
  0x4b PF: > { %470 = sbr.rel (!%p2079_p11) target bundleno = 95 (0x5f), region = 100  ;;  %s472_s0 = sand.u32 (%p2079_p11), 1, %s1915_s16  }
  0x4c   : > { %s1670_s27 = sshll.u32 (%p2079_p11), %s1947_s24, 4  ;;  %s1604_s10 = sshll.u32 (%p2079_p11), %s472_s0, 8 }
  0x4d   : > { %s2196_s30 = scalar_lea.vmem (%p2079_p11), %s2675_s3, %s1670_s27  ;;  %s2201_s7 = scalar_lea.vmem (%p2079_p11), [#allocation4], %s1604_s10 }
  0x4e   : > { %v493_v48 = vld [vmem:[%s2196_s30] sm:$0xff] (%p2079_p11)  ;;  %v495_v49 = vld [vmem:[%s2196_s30 + $0x8] sm:$0xff] (%p2079_p11) }
  0x4f   : > { %v497_v50 = vld [vmem:[%s2196_s30 + $0x20] sm:$0xff] (%p2079_p11)  ;;  %494 = vst [vmem:[%s2201_s7] sm:$0xff] (%p2079_p11), %v493_v48  ;;  %496 = vst [vmem:[%s2201_s7 + $0x8] sm:$0xff] (%p2079_p11), %v495_v49  ;;  %v499_v51 = vld [vmem:[%s2196_s30 + $0x28] sm:$0xff] (%p2079_p11) }
  0x50   : > { %498 = vst [vmem:[%s2201_s7 + $0x10] sm:$0xff] (%p2079_p11), %v497_v50  ;;  %v501_v52 = vld [vmem:[%s2196_s30 + $0x40] sm:$0xff] (%p2079_p11)  ;;  %v503_v53 = vld [vmem:[%s2196_s30 + $0x48] sm:$0xff] (%p2079_p11)  ;;  %500 = vst [vmem:[%s2201_s7 + $0x18] sm:$0xff] (%p2079_p11), %v499_v51 }
  0x51   : > { %502 = vst [vmem:[%s2201_s7 + $0x20] sm:$0xff] (%p2079_p11), %v501_v52  ;;  %504 = vst [vmem:[%s2201_s7 + $0x28] sm:$0xff] (%p2079_p11), %v503_v53  ;;  %v505_v54 = vld [vmem:[%s2196_s30 + $0x60] sm:$0xff] (%p2079_p11)  ;;  %v507_v55 = vld [vmem:[%s2196_s30 + $0x68] sm:$0xff] (%p2079_p11) }
  0x52   : > { %v509_v56 = vld [vmem:[%s2196_s30 + $0x80] sm:$0xff]  ;;  %506 = vst [vmem:[%s2201_s7 + $0x30] sm:$0xff] %v505_v54  ;;  %508 = vst [vmem:[%s2201_s7 + $0x38] sm:$0xff] %v507_v55  ;;  %v511_v57 = vld [vmem:[%s2196_s30 + $0x88] sm:$0xff] }
  0x53   : > { %510 = vst [vmem:[%s2201_s7 + $0x40] sm:$0xff] %v509_v56  ;;  %v513_v58 = vld [vmem:[%s2196_s30 + $0xa0] sm:$0xff]  ;;  %v515_v59 = vld [vmem:[%s2196_s30 + $0xa8] sm:$0xff]  ;;  %512 = vst [vmem:[%s2201_s7 + $0x48] sm:$0xff] %v511_v57 }
  0x54   : > { %514 = vst [vmem:[%s2201_s7 + $0x50] sm:$0xff] %v513_v58  ;;  %516 = vst [vmem:[%s2201_s7 + $0x58] sm:$0xff] %v515_v59  ;;  %v517_v60 = vld [vmem:[%s2196_s30 + $0xc0] sm:$0xff]  ;;  %v519_v61 = vld [vmem:[%s2196_s30 + $0xc8] sm:$0xff] }
  0x55   : > { %v521_v62 = vld [vmem:[%s2196_s30 + $0xe0] sm:$0xff]  ;;  %518 = vst [vmem:[%s2201_s7 + $0x60] sm:$0xff] %v517_v60  ;;  %520 = vst [vmem:[%s2201_s7 + $0x68] sm:$0xff] %v519_v61  ;;  %v523_v63 = vld [vmem:[%s2196_s30 + $0xe8] sm:$0xff] }
  0x56   : > { %522 = vst [vmem:[%s2201_s7 + $0x70] sm:$0xff] %v521_v62  ;;  %v525_v0 = vld [vmem:[%s2196_s30 + $0x100] sm:$0xff]  ;;  %v527_v1 = vld [vmem:[%s2196_s30 + $0x108] sm:$0xff]  ;;  %524 = vst [vmem:[%s2201_s7 + $0x78] sm:$0xff] %v523_v63 }
  0x57   : > { %526 = vst [vmem:[%s2201_s7 + $0x80] sm:$0xff] %v525_v0  ;;  %528 = vst [vmem:[%s2201_s7 + $0x88] sm:$0xff] %v527_v1  ;;  %v529_v2 = vld [vmem:[%s2196_s30 + $0x120] sm:$0xff]  ;;  %v531_v3 = vld [vmem:[%s2196_s30 + $0x128] sm:$0xff] }
  0x58   : > { %v533_v4 = vld [vmem:[%s2196_s30 + $0x140] sm:$0xff]  ;;  %530 = vst [vmem:[%s2201_s7 + $0x90] sm:$0xff] %v529_v2  ;;  %532 = vst [vmem:[%s2201_s7 + $0x98] sm:$0xff] %v531_v3  ;;  %v535_v5 = vld [vmem:[%s2196_s30 + $0x148] sm:$0xff] }
  0x59   : > { %534 = vst [vmem:[%s2201_s7 + $0xa0] sm:$0xff] %v533_v4  ;;  %v537_v6 = vld [vmem:[%s2196_s30 + $0x160] sm:$0xff]  ;;  %v539_v7 = vld [vmem:[%s2196_s30 + $0x168] sm:$0xff]  ;;  %536 = vst [vmem:[%s2201_s7 + $0xa8] sm:$0xff] %v535_v5 }
  0x5a   : > { %538 = vst [vmem:[%s2201_s7 + $0xb0] sm:$0xff] %v537_v6  ;;  %540 = vst [vmem:[%s2201_s7 + $0xb8] sm:$0xff] %v539_v7  ;;  %v541_v8 = vld [vmem:[%s2196_s30 + $0x180] sm:$0xff]  ;;  %v543_v9 = vld [vmem:[%s2196_s30 + $0x188] sm:$0xff] }
  0x5b   : > { %v545_v10 = vld [vmem:[%s2196_s30 + $0x1a0] sm:$0xff]  ;;  %542 = vst [vmem:[%s2201_s7 + $0xc0] sm:$0xff] %v541_v8  ;;  %544 = vst [vmem:[%s2201_s7 + $0xc8] sm:$0xff] %v543_v9  ;;  %v547_v11 = vld [vmem:[%s2196_s30 + $0x1a8] sm:$0xff] }
  0x5c   : > { %546 = vst [vmem:[%s2201_s7 + $0xd0] sm:$0xff] %v545_v10  ;;  %v549_v12 = vld [vmem:[%s2196_s30 + $0x1c0] sm:$0xff]  ;;  %v551_v13 = vld [vmem:[%s2196_s30 + $0x1c8] sm:$0xff]  ;;  %548 = vst [vmem:[%s2201_s7 + $0xd8] sm:$0xff] %v547_v11 }
  0x5d   : > { %550 = vst [vmem:[%s2201_s7 + $0xe0] sm:$0xff] %v549_v12  ;;  %552 = vst [vmem:[%s2201_s7 + $0xe8] sm:$0xff] %v551_v13  ;;  %v553_v14 = vld [vmem:[%s2196_s30 + $0x1e0] sm:$0xff]  ;;  %v555_v15 = vld [vmem:[%s2196_s30 + $0x1e8] sm:$0xff] }
  0x5e   : > { %554 = vst [vmem:[%s2201_s7 + $0xf0] sm:$0xff] %v553_v14  ;;  %556 = vst [vmem:[%s2201_s7 + $0xf8] sm:$0xff] %v555_v15 }
  0x5f PF: > { %p1607_p1 = scmp.ge.s32.totalorder %s1951_s25, 1  ;;  %p561_p2 = scmp.lt.s32.totalorder %s1951_s25, 37 }
  0x61   : > { %p562_p3 = pnand %p1607_p1, %p561_p2 }
  0x62   : > { %s568_s14 = sand.u32 (!%p562_p3), 1, %s1927_s19   ;;  %s575_s6 = sand.u32 (!%p562_p3), 1, %s1919_s17  }
  0x63   : > { %565 = sbr.rel (%p562_p3) target bundleno = 472 (0x1d8), region = 123  ;;  %s1608_s8 = sshll.u32 (!%p562_p3), %s568_s14, 7 }
  0x64   : > { %s1609_s9 = sshll.u32 (!%p562_p3), %s575_s6, 8  ;;  %s582_s11 = sand.u32 (!%p562_p3), 1, %s1911_s15  }
  0x65   : > { %s1612_s28 = sshll.u32 (!%p562_p3), %s1939_s22, 1  ;;  %s1610_s0 = sshll.u32 (!%p562_p3), %s582_s11, 8 }
  0x66   : > { %p623_p4 = scmp.lt.s32.totalorder (!%p562_p3), %s1612_s28, 3  ;;  %s2276_s5 = scalar_lea.vmem (!%p562_p3), [#allocation2], %s1608_s8 }
  0x67   : > { %s2278_s30 = scalar_lea.vmem (!%p562_p3), [#allocation3], %s1609_s9  ;;  %s2280_s7 = scalar_lea.vmem (!%p562_p3), [#allocation4], %s1610_s0 }
  0x68   : > { %s2282_s17 = scalar_lea.vmem (!%p562_p3), [#allocation5], %s1610_s0  ;;  %p1613_p5 = scmp.ne.s32.totalorder (!%p562_p3), %s1935_s21, 0 }
  0x6a   : > { %s2708_s28 = smov (!%p623_p4, %s1612_s28), 3  ;;  %634 = sbr.rel (%p1613_p5) target bundleno = 124 (0x7c), region = 139 }
  0x6b   : > { %s625_s26 = scalar_lea.vmem %s2674_s2, %s2708_s28  ;;  %v1953_v16 = vmov (!%p1613_p5), 0.0  }
  0x6c   : > { %635 = vst [vmem:[%s2282_s17] sm:$0xff] (!%p1613_p5), %v1953_v16  ;;  %636 = vst [vmem:[%s2282_s17 + $0x8] sm:$0xff] (!%p1613_p5), %v1953_v16 }
  0x6d   : > { %637 = vst [vmem:[%s2282_s17 + $0x10] sm:$0xff] (!%p1613_p5), %v1953_v16  ;;  %638 = vst [vmem:[%s2282_s17 + $0x18] sm:$0xff] (!%p1613_p5), %v1953_v16 }
  0x6e   : > { %639 = vst [vmem:[%s2282_s17 + $0x20] sm:$0xff] (!%p1613_p5), %v1953_v16  ;;  %640 = vst [vmem:[%s2282_s17 + $0x28] sm:$0xff] (!%p1613_p5), %v1953_v16 }
  0x6f   : > { %641 = vst [vmem:[%s2282_s17 + $0x30] sm:$0xff] (!%p1613_p5), %v1953_v16  ;;  %642 = vst [vmem:[%s2282_s17 + $0x38] sm:$0xff] (!%p1613_p5), %v1953_v16 }
  0x70   : > { %643 = vst [vmem:[%s2282_s17 + $0x40] sm:$0xff] (!%p1613_p5), %v1953_v16  ;;  %644 = vst [vmem:[%s2282_s17 + $0x48] sm:$0xff] (!%p1613_p5), %v1953_v16 }
  0x71   : > { %645 = vst [vmem:[%s2282_s17 + $0x50] sm:$0xff] %v1953_v16  ;;  %646 = vst [vmem:[%s2282_s17 + $0x58] sm:$0xff] %v1953_v16 }
  0x72   : > { %647 = vst [vmem:[%s2282_s17 + $0x60] sm:$0xff] %v1953_v16  ;;  %648 = vst [vmem:[%s2282_s17 + $0x68] sm:$0xff] %v1953_v16 }
  0x73   : > { %649 = vst [vmem:[%s2282_s17 + $0x70] sm:$0xff] %v1953_v16  ;;  %650 = vst [vmem:[%s2282_s17 + $0x78] sm:$0xff] %v1953_v16 }
  0x74   : > { %651 = vst [vmem:[%s2282_s17 + $0x80] sm:$0xff] %v1953_v16  ;;  %652 = vst [vmem:[%s2282_s17 + $0x88] sm:$0xff] %v1953_v16 }
  0x75   : > { %653 = vst [vmem:[%s2282_s17 + $0x90] sm:$0xff] %v1953_v16  ;;  %654 = vst [vmem:[%s2282_s17 + $0x98] sm:$0xff] %v1953_v16 }
  0x76   : > { %655 = vst [vmem:[%s2282_s17 + $0xa0] sm:$0xff] %v1953_v16  ;;  %656 = vst [vmem:[%s2282_s17 + $0xa8] sm:$0xff] %v1953_v16 }
  0x77   : > { %657 = vst [vmem:[%s2282_s17 + $0xb0] sm:$0xff] %v1953_v16  ;;  %658 = vst [vmem:[%s2282_s17 + $0xb8] sm:$0xff] %v1953_v16 }
  0x78   : > { %659 = vst [vmem:[%s2282_s17 + $0xc0] sm:$0xff] %v1953_v16  ;;  %660 = vst [vmem:[%s2282_s17 + $0xc8] sm:$0xff] %v1953_v16 }
  0x79   : > { %661 = vst [vmem:[%s2282_s17 + $0xd0] sm:$0xff] %v1953_v16  ;;  %662 = vst [vmem:[%s2282_s17 + $0xd8] sm:$0xff] %v1953_v16 }
  0x7a   : > { %663 = vst [vmem:[%s2282_s17 + $0xe0] sm:$0xff] %v1953_v16  ;;  %664 = vst [vmem:[%s2282_s17 + $0xe8] sm:$0xff] %v1953_v16 }
  0x7b   : > { %665 = vst [vmem:[%s2282_s17 + $0xf0] sm:$0xff] %v1953_v16  ;;  %666 = vst [vmem:[%s2282_s17 + $0xf8] sm:$0xff] %v1953_v16 }
  0x7c PF: > { %v1793_v17 = vld [vmem:[%s2278_s30 + $0x4] ss:$8 sps:$4 sm:$0xff]   ;;  %v1795_v18 = vld [vmem:[%s2278_s30] ss:$8 sps:$4 sm:$0xff]   ;;  %v1796_v19 = vld [vmem:[%s2278_s30 + $0x14] ss:$8 sps:$4 sm:$0xff]  }
  0x7d   : > { %987 = vmatprep.subr.bf16.mxu0 %v1793_v17  ;;  %1672 = vmatprep.subr.bf16.mxu1 %v1793_v17  ;;  %v1798_v20 = vld [vmem:[%s2278_s30 + $0x10] ss:$8 sps:$4 sm:$0xff]   ;;  %v1799_v21 = vld [vmem:[%s2278_s30 + $0x24] ss:$8 sps:$4 sm:$0xff]   ;;  %v1801_v22 = vld [vmem:[%s2278_s30 + $0x20] ss:$8 sps:$4 sm:$0xff]  }
  0x7e   : > { %988 = vmatpush1.bf16.msra.mxu0 %v1795_v18  ;;  %1688 = vmatpush1.bf16.msra.mxu1 %v1795_v18  ;;  %v1802_v23 = vld [vmem:[%s2278_s30 + $0x34] ss:$8 sps:$4 sm:$0xff]   ;;  %v1804_v24 = vld [vmem:[%s2278_s30 + $0x30] ss:$8 sps:$4 sm:$0xff]   ;;  %v1805_v25 = vld [vmem:[%s2278_s30 + $0x44] ss:$8 sps:$4 sm:$0xff]  }
  0x7f   : > { %989 = vmatprep.subr.bf16.mxu0 %v1796_v19  ;;  %1673 = vmatprep.subr.bf16.mxu1 %v1796_v19  ;;  %v1807_v26 = vld [vmem:[%s2278_s30 + $0x40] ss:$8 sps:$4 sm:$0xff]   ;;  %v1808_v27 = vld [vmem:[%s2278_s30 + $0x54] ss:$8 sps:$4 sm:$0xff]   ;;  %v1810_v28 = vld [vmem:[%s2278_s30 + $0x50] ss:$8 sps:$4 sm:$0xff]  }
  0x80   : > { %v1811_v29 = vld [vmem:[%s2278_s30 + $0x64] ss:$8 sps:$4 sm:$0xff]   ;;  %v1813_v31 = vld [vmem:[%s2278_s30 + $0x60] ss:$8 sps:$4 sm:$0xff]   ;;  %v1814_v33 = vld [vmem:[%s2278_s30 + $0x74] ss:$8 sps:$4 sm:$0xff]  }
  0x81   : > { %v1843_v30 = vld [vmem:[%s2276_s5 + $0x4] ss:$8 sps:$4 sm:$0xff]   ;;  %v1816_v34 = vld [vmem:[%s2278_s30 + $0x70] ss:$8 sps:$4 sm:$0xff]   ;;  %v1819_v36 = vld [vmem:[%s2278_s30 + $0x80] ss:$8 sps:$4 sm:$0xff]  }
  0x82   : > { %990 = vmatpush1.bf16.msra.mxu0 %v1798_v20  ;;  %1689 = vmatpush1.bf16.msra.mxu1 %v1798_v20  ;;  %v1846_v32 = vld [vmem:[%s2276_s5 + $0x44] ss:$8 sps:$4 sm:$0xff]   ;;  %v1820_v37 = vld [vmem:[%s2278_s30 + $0x94] ss:$8 sps:$4 sm:$0xff]   ;;  %v1822_v38 = vld [vmem:[%s2278_s30 + $0x90] ss:$8 sps:$4 sm:$0xff]  }
  0x83   : > { %991 = vmatprep.subr.bf16.mxu0 %v1799_v21  ;;  %1674 = vmatprep.subr.bf16.mxu1 %v1799_v21  ;;  %v1817_v35 = vld [vmem:[%s2278_s30 + $0x84] ss:$8 sps:$4 sm:$0xff]   ;;  %v1825_v40 = vld [vmem:[%s2278_s30 + $0xa0] ss:$8 sps:$4 sm:$0xff]   ;;  %v1826_v41 = vld [vmem:[%s2278_s30 + $0xb4] ss:$8 sps:$4 sm:$0xff]  }
  0x84   : > { %1019 = vmatprep.mubr.bf16.mxu0 %v1843_v30  ;;  %1059 = vmatprep.mubr.bf16.mxu1 %v1846_v32  ;;  %v1823_v39 = vld [vmem:[%s2278_s30 + $0xa4] ss:$8 sps:$4 sm:$0xff]   ;;  %v1828_v42 = vld [vmem:[%s2278_s30 + $0xb0] ss:$8 sps:$4 sm:$0xff]   ;;  %v1831_v44 = vld [vmem:[%s2278_s30 + $0xc0] ss:$8 sps:$4 sm:$0xff]  }
  0x85   : > { %v1829_v43 = vld [vmem:[%s2278_s30 + $0xc4] ss:$8 sps:$4 sm:$0xff]   ;;  %v1832_v45 = vld [vmem:[%s2278_s30 + $0xd4] ss:$8 sps:$4 sm:$0xff]   ;;  %v1834_v46 = vld [vmem:[%s2278_s30 + $0xd0] ss:$8 sps:$4 sm:$0xff]  }
  0x86   : > { %992 = vmatpush1.bf16.msra.mxu0 %v1801_v22  ;;  %1690 = vmatpush1.bf16.msra.mxu1 %v1801_v22  ;;  %v1835_v47 = vld [vmem:[%s2278_s30 + $0xe4] ss:$8 sps:$4 sm:$0xff]   ;;  %v1837_v48 = vld [vmem:[%s2278_s30 + $0xe0] ss:$8 sps:$4 sm:$0xff]   ;;  %v1838_v49 = vld [vmem:[%s2278_s30 + $0xf4] ss:$8 sps:$4 sm:$0xff]  }
  0x87   : > { %993 = vmatprep.subr.bf16.mxu0 %v1802_v23  ;;  %1675 = vmatprep.subr.bf16.mxu1 %v1802_v23  ;;  %v1840_v50 = vld [vmem:[%s2278_s30 + $0xf0] ss:$8 sps:$4 sm:$0xff]   ;;  %v1841_v51 = vld [vmem:[%s2276_s5] ss:$8 sps:$4 sm:$0xff]   ;;  %v1847_v53 = vld [vmem:[%s2276_s5 + $0x14] ss:$8 sps:$4 sm:$0xff]  }
  0x88   : > { %v1844_v52 = vld [vmem:[%s2276_s5 + $0x40] ss:$8 sps:$4 sm:$0xff]   ;;  %v1849_v54 = vld [vmem:[%s2276_s5 + $0x54] ss:$8 sps:$4 sm:$0xff]   ;;  %v1851_v55 = vld [vmem:[%s2276_s5 + $0x10] ss:$8 sps:$4 sm:$0xff]  }
  0x89   : > { %v1852_v56 = vld [vmem:[%s2276_s5 + $0x50] ss:$8 sps:$4 sm:$0xff]   ;;  %v1853_v57 = vld [vmem:[%s2276_s5 + $0x24] ss:$8 sps:$4 sm:$0xff]   ;;  %v1857_v59 = vld [vmem:[%s2276_s5 + $0x20] ss:$8 sps:$4 sm:$0xff]  }
  0x8a   : > { %994 = vmatpush1.bf16.msra.mxu0 %v1804_v24  ;;  %1691 = vmatpush1.bf16.msra.mxu1 %v1804_v24  ;;  %v1855_v58 = vld [vmem:[%s2276_s5 + $0x64] ss:$8 sps:$4 sm:$0xff]   ;;  %v1858_v60 = vld [vmem:[%s2276_s5 + $0x60] ss:$8 sps:$4 sm:$0xff]   ;;  %v1859_v61 = vld [vmem:[%s2276_s5 + $0x34] ss:$8 sps:$4 sm:$0xff]  }
  0x8b   : > { %995 = vmatprep.subr.bf16.mxu0 %v1805_v25  ;;  %1676 = vmatprep.subr.bf16.mxu1 %v1805_v25  ;;  %v1861_v62 = vld [vmem:[%s2276_s5 + $0x74] ss:$8 sps:$4 sm:$0xff]   ;;  %v1863_v63 = vld [vmem:[%s2276_s5 + $0x30] ss:$8 sps:$4 sm:$0xff]   ;;  %v667_v1 = vld [vmem:[%s2282_s17] sm:$0xff]  ;;  %p1662_p6 = scmp.ne.s32.totalorder %s1935_s21, 17 }
  0x8c   : > { %v1864_v0 = vld [vmem:[%s2276_s5 + $0x70] ss:$8 sps:$4 sm:$0xff]   ;;  %v683_v2 = vld [vmem:[%s2282_s17 + $0x80] sm:$0xff]  ;;  %v668_v3 = vld [vmem:[%s2282_s17 + $0x8] sm:$0xff] }
  0x8d   : > { %v684_v4 = vld [vmem:[%s2282_s17 + $0x88] sm:$0xff]  ;;  %v669_v7 = vld [vmem:[%s2282_s17 + $0x10] sm:$0xff]  ;;  %v670_v13 = vld [vmem:[%s2282_s17 + $0x18] sm:$0xff] }
  0x8e   : > { %996 = vmatpush1.bf16.msra.mxu0 %v1807_v26  ;;  %1692 = vmatpush1.bf16.msra.mxu1 %v1807_v26  ;;  %v685_v8 = vld [vmem:[%s2282_s17 + $0x90] sm:$0xff]  ;;  %v686_v14 = vld [vmem:[%s2282_s17 + $0x98] sm:$0xff]  ;;  %v671_v25 = vld [vmem:[%s2282_s17 + $0x20] sm:$0xff] }
  0x8f   : > { %997 = vmatprep.subr.bf16.mxu0 %v1808_v27  ;;  %1677 = vmatprep.subr.bf16.mxu1 %v1808_v27  ;;  %v687_v26 = vld [vmem:[%s2282_s17 + $0xa0] sm:$0xff]  ;;  %v672_v27 = vld [vmem:[%s2282_s17 + $0x28] sm:$0xff]  ;;  %v689_v32 = vld [vmem:[%s2282_s17 + $0xb0] sm:$0xff] }
  0x92   : > { %998 = vmatpush1.bf16.msra.mxu0 %v1810_v28  ;;  %1693 = vmatpush1.bf16.msra.mxu1 %v1810_v28  ;;  %v688_v28 = vld [vmem:[%s2282_s17 + $0xa8] sm:$0xff] }
  0x93   : > { %999 = vmatprep.subr.bf16.mxu0 %v1811_v29  ;;  %1678 = vmatprep.subr.bf16.mxu1 %v1811_v29 }
  0x96   : > { %1000 = vmatpush1.bf16.msra.mxu0 %v1813_v31  ;;  %1694 = vmatpush1.bf16.msra.mxu1 %v1813_v31  ;;  %v673_v31 = vld [vmem:[%s2282_s17 + $0x30] sm:$0xff] }
  0x97   : > { %1001 = vmatprep.subr.bf16.mxu0 %v1814_v33  ;;  %1679 = vmatprep.subr.bf16.mxu1 %v1814_v33 }
  0x9a   : > { %1002 = vmatpush1.bf16.msra.mxu0 %v1816_v34  ;;  %1695 = vmatpush1.bf16.msra.mxu1 %v1816_v34 }
  0x9b   : > { %1003 = vmatprep.subr.bf16.mxu0 %v1817_v35  ;;  %1680 = vmatprep.subr.bf16.mxu1 %v1817_v35 }
  0x9e   : > { %1004 = vmatpush1.bf16.msra.mxu0 %v1819_v36  ;;  %1696 = vmatpush1.bf16.msra.mxu1 %v1819_v36 }
  0x9f   : > { %1005 = vmatprep.subr.bf16.mxu0 %v1820_v37  ;;  %1681 = vmatprep.subr.bf16.mxu1 %v1820_v37  ;;  %v674_v37 = vld [vmem:[%s2282_s17 + $0x38] sm:$0xff] }
  0xa2   : > { %1006 = vmatpush1.bf16.msra.mxu0 %v1822_v38  ;;  %1697 = vmatpush1.bf16.msra.mxu1 %v1822_v38  ;;  %v690_v38 = vld [vmem:[%s2282_s17 + $0xb8] sm:$0xff] }
  0xa3   : > { %1007 = vmatprep.subr.bf16.mxu0 %v1823_v39  ;;  %1682 = vmatprep.subr.bf16.mxu1 %v1823_v39 }
  0xa6   : > { %1008 = vmatpush1.bf16.msra.mxu0 %v1825_v40  ;;  %1698 = vmatpush1.bf16.msra.mxu1 %v1825_v40 }
  0xa7   : > { %1009 = vmatprep.subr.bf16.mxu0 %v1826_v41  ;;  %1683 = vmatprep.subr.bf16.mxu1 %v1826_v41 }
  0xaa   : > { %1010 = vmatpush1.bf16.msra.mxu0 %v1828_v42  ;;  %1699 = vmatpush1.bf16.msra.mxu1 %v1828_v42 }
  0xab   : > { %1011 = vmatprep.subr.bf16.mxu0 %v1829_v43  ;;  %1684 = vmatprep.subr.bf16.mxu1 %v1829_v43 }
  0xae   : > { %1012 = vmatpush1.bf16.msra.mxu0 %v1831_v44  ;;  %1700 = vmatpush1.bf16.msra.mxu1 %v1831_v44 }
  0xaf   : > { %1013 = vmatprep.subr.bf16.mxu0 %v1832_v45  ;;  %1685 = vmatprep.subr.bf16.mxu1 %v1832_v45 }
  0xb2   : > { %1014 = vmatpush1.bf16.msra.mxu0 %v1834_v46  ;;  %1701 = vmatpush1.bf16.msra.mxu1 %v1834_v46 }
  0xb3   : > { %1015 = vmatprep.subr.bf16.mxu0 %v1835_v47  ;;  %1686 = vmatprep.subr.bf16.mxu1 %v1835_v47 }
  0xb6   : > { %1016 = vmatpush1.bf16.msra.mxu0 %v1837_v48  ;;  %1702 = vmatpush1.bf16.msra.mxu1 %v1837_v48 }
  0xb7   : > { %1017 = vmatprep.subr.bf16.mxu0 %v1838_v49  ;;  %1687 = vmatprep.subr.bf16.mxu1 %v1838_v49  ;;  %v675_v49 = vld [vmem:[%s2282_s17 + $0x40] sm:$0xff] }
  0xba   : > { %1018 = vmatpush1.bf16.msra.mxu0 %v1840_v50  ;;  %1703 = vmatpush1.bf16.msra.mxu1 %v1840_v50  ;;  %v691_v50 = vld [vmem:[%s2282_s17 + $0xc0] sm:$0xff] }
  0xbd   : > { %1020 = vmatmul.mubr.bf16.vlgmr.msra.gmra.mrb[0].mxu0 %v1841_v51  ;;  %1060 = vmatmul.mubr.bf16.vlgmr.msra.gmra.mrb[0].mxu1 %v1844_v52  ;;  %v676_v51 = vld [vmem:[%s2282_s17 + $0x48] sm:$0xff] }
  0xbe   : > { %1029 = vmatprep.mubr.bf16.mxu0 %v1847_v53  ;;  %1069 = vmatprep.mubr.bf16.mxu1 %v1849_v54  ;;  %v692_v52 = vld [vmem:[%s2282_s17 + $0xc8] sm:$0xff] }
  0xc5   : > { %1030 = vmatmul.mubr.bf16.gmra.mrb[4].mxu0 %v1851_v55  ;;  %1070 = vmatmul.mubr.bf16.gmra.mrb[4].mxu1 %v1852_v56  ;;  %v677_v55 = vld [vmem:[%s2282_s17 + $0x50] sm:$0xff] }
  0xc6   : > { %1039 = vmatprep.mubr.bf16.mxu0 %v1853_v57  ;;  %1079 = vmatprep.mubr.bf16.mxu1 %v1855_v58  ;;  %v693_v56 = vld [vmem:[%s2282_s17 + $0xd0] sm:$0xff] }
  0xcd   : > { %1040 = vmatmul.mubr.bf16.gmra.mrb[8].mxu0 %v1857_v59  ;;  %1080 = vmatmul.mubr.bf16.gmra.mrb[8].mxu1 %v1858_v60 }
  0xce   : > { %1049 = vmatprep.mubr.bf16.mxu0 %v1859_v61  ;;  %1089 = vmatprep.mubr.bf16.mxu1 %v1861_v62  ;;  %v678_v61 = vld [vmem:[%s2282_s17 + $0x58] sm:$0xff] }
  0xcf   : > { %v694_v62 = vld [vmem:[%s2282_s17 + $0xd8] sm:$0xff] }
  0xd5   : > { %1050 = vmatmul.mubr.bf16.gmra.mrb[12].mxu0 %v1863_v63  ;;  %1090 = vmatmul.mubr.bf16.gmra.mrb[12].mxu1 %v1864_v0 }
 0x190   : > { %v1021_v5 = vpop.f32.mrb[0].mxu0  ;;  %v1061_v6 = vpop.f32.mrb[0].mxu1 }
 0x191   : > { %v1100_v9 = vadd.f32 %v1021_v5, %v667_v1  ;;  %v1116_v10 = vadd.f32 %v1061_v6, %v683_v2  ;;  %v1023_v11 = vpop.f32.mrb[1].mxu0  ;;  %v1063_v12 = vpop.f32.mrb[1].mxu1 }
 0x192   : > { %v1101_v15 = vadd.f32 %v1023_v11, %v668_v3  ;;  %v1117_v16 = vadd.f32 %v1063_v12, %v684_v4  ;;  %v1025_v17 = vpop.f32.mrb[2].mxu0  ;;  %v1065_v18 = vpop.f32.mrb[2].mxu1  ;;  %v680_v11 = vld [vmem:[%s2282_s17 + $0x68] sm:$0xff] }
 0x193   : > { %1132 = vst [vmem:[%s2282_s17] sm:$0xff] %v1100_v9  ;;  %1148 = vst [vmem:[%s2282_s17 + $0x80] sm:$0xff] %v1116_v10  ;;  %v1102_v19 = vadd.f32 %v1025_v17, %v669_v7  ;;  %v1118_v20 = vadd.f32 %v1065_v18, %v685_v8  ;;  %v1027_v21 = vpop.f32.mrb[3].mxu0  ;;  %v1067_v22 = vpop.f32.mrb[3].mxu1  ;;  %v679_v9 = vld [vmem:[%s2282_s17 + $0x60] sm:$0xff]  ;;  %v696_v12 = vld [vmem:[%s2282_s17 + $0xe8] sm:$0xff] }
 0x194   : > { %1133 = vst [vmem:[%s2282_s17 + $0x8] sm:$0xff] %v1101_v15  ;;  %1149 = vst [vmem:[%s2282_s17 + $0x88] sm:$0xff] %v1117_v16  ;;  %v1103_v23 = vadd.f32 %v1027_v21, %v670_v13  ;;  %v1119_v24 = vadd.f32 %v1067_v22, %v686_v14  ;;  %v695_v10 = vld [vmem:[%s2282_s17 + $0xe0] sm:$0xff]  ;;  %v681_v15 = vld [vmem:[%s2282_s17 + $0x70] sm:$0xff] }
 0x195   : > { %1134 = vst [vmem:[%s2282_s17 + $0x10] sm:$0xff] %v1102_v19  ;;  %1150 = vst [vmem:[%s2282_s17 + $0x90] sm:$0xff] %v1118_v20  ;;  %v697_v16 = vld [vmem:[%s2282_s17 + $0xf0] sm:$0xff]  ;;  %v682_v21 = vld [vmem:[%s2282_s17 + $0x78] sm:$0xff] }
 0x196   : > { %1135 = vst [vmem:[%s2282_s17 + $0x18] sm:$0xff] %v1103_v23  ;;  %1151 = vst [vmem:[%s2282_s17 + $0x98] sm:$0xff] %v1119_v24  ;;  %v698_v22 = vld [vmem:[%s2282_s17 + $0xf8] sm:$0xff] }
 0x198   : > { %v1031_v29 = vpop.f32.mrb[4].mxu0  ;;  %v1071_v30 = vpop.f32.mrb[4].mxu1 }
 0x199   : > { %v1104_v33 = vadd.f32 %v1031_v29, %v671_v25  ;;  %v1120_v34 = vadd.f32 %v1071_v30, %v687_v26  ;;  %v1033_v35 = vpop.f32.mrb[5].mxu0  ;;  %v1073_v36 = vpop.f32.mrb[5].mxu1 }
 0x19a   : > { %v1105_v39 = vadd.f32 %v1033_v35, %v672_v27  ;;  %v1121_v40 = vadd.f32 %v1073_v36, %v688_v28  ;;  %v1035_v41 = vpop.f32.mrb[6].mxu0  ;;  %v1075_v42 = vpop.f32.mrb[6].mxu1  ;;  %v1200_v35 = vld [vmem:[%s625_s26] sm:$0x3] (!%p1662_p6) }
 0x19b   : > { %1136 = vst [vmem:[%s2282_s17 + $0x20] sm:$0xff] %v1104_v33  ;;  %1152 = vst [vmem:[%s2282_s17 + $0xa0] sm:$0xff] %v1120_v34  ;;  %v1106_v43 = vadd.f32 %v1035_v41, %v673_v31  ;;  %v1122_v44 = vadd.f32 %v1075_v42, %v689_v32  ;;  %v1037_v45 = vpop.f32.mrb[7].mxu0  ;;  %v1077_v46 = vpop.f32.mrb[7].mxu1  ;;  %v1202_v33 = vlaneseq (!%p1662_p6)  ;;  %v1168_v36 = vld [vmem:[%s2282_s17] sm:$0xff] (!%p1662_p6)  ;;  %v1245_v41 = vld [vmem:[%s2280_s7 + $0x8] sm:$0xff] (!%p1662_p6) }
 0x19c   : > { %1137 = vst [vmem:[%s2282_s17 + $0x28] sm:$0xff] %v1105_v39  ;;  %1153 = vst [vmem:[%s2282_s17 + $0xa8] sm:$0xff] %v1121_v40  ;;  %v1107_v47 = vadd.f32 %v1037_v45, %v674_v37  ;;  %v1123_v48 = vadd.f32 %v1077_v46, %v690_v38  ;;  %v1169_v38 = vld [vmem:[%s2282_s17 + $0x8] sm:$0xff] (!%p1662_p6)  ;;  %v1244_v40 = vld [vmem:[%s2280_s7] sm:$0xff] (!%p1662_p6) }
 0x19d   : > { %1138 = vst [vmem:[%s2282_s17 + $0x30] sm:$0xff] %v1106_v43  ;;  %1154 = vst [vmem:[%s2282_s17 + $0xb0] sm:$0xff] %v1122_v44  ;;  %v1203_v34 = vshrl.u32 (!%p1662_p6), %v1202_v33, 7  ;;  %v1170_v42 = vld [vmem:[%s2282_s17 + $0x10] sm:$0xff] (!%p1662_p6)  ;;  %v1171_v43 = vld [vmem:[%s2282_s17 + $0x18] sm:$0xff] (!%p1662_p6) }
 0x19e   : > { %1139 = vst [vmem:[%s2282_s17 + $0x38] sm:$0xff] %v1107_v47  ;;  %1155 = vst [vmem:[%s2282_s17 + $0xb8] sm:$0xff] %v1123_v48  ;;  %v1257_v33 = vld [vmem:[%s2280_s7 + $0x68] sm:$0xff] (!%p1662_p6) }
 0x19f   : > { %v1204_v37 = vsub.s32 (!%p1662_p6), 0, %v1203_v34  ;;  %v1208_v39 = vsub.s32 (!%p1662_p6), 1, %v1203_v34  ;;  %v1258_v34 = vld [vmem:[%s2280_s7 + $0x70] sm:$0xff] (!%p1662_p6) }
 0x1a0   : > { %v1041_v53 = vpop.f32.mrb[8].mxu0  ;;  %v1081_v54 = vpop.f32.mrb[8].mxu1 }
 0x1a1   : > { %v1108_v57 = vadd.f32 %v1041_v53, %v675_v49  ;;  %v1124_v58 = vadd.f32 %v1081_v54, %v691_v50  ;;  %v1043_v59 = vpop.f32.mrb[9].mxu0  ;;  %v1083_v60 = vpop.f32.mrb[9].mxu1  ;;  %v2442_v45 = vrot.slane (!%p1662_p6), %v1200_v35, %v1204_v37  ;;  %v2444_v46 = vrot.slane (!%p1662_p6), %v1200_v35, %v1208_v39  ;;  %v1246_v50 = vld [vmem:[%s2280_s7 + $0x10] sm:$0xff] (!%p1662_p6)  ;;  %v1259_v35 = vld [vmem:[%s2280_s7 + $0x78] sm:$0xff] (!%p1662_p6) }
 0x1a2   : > { %v1109_v63 = vadd.f32 %v1043_v59, %v676_v51  ;;  %v1125_v0 = vadd.f32 %v1083_v60, %v692_v52  ;;  %v1045_v1 = vpop.f32.mrb[10].mxu0  ;;  %v1085_v2 = vpop.f32.mrb[10].mxu1  ;;  %v1172_v44 = vld [vmem:[%s2282_s17 + $0x20] sm:$0xff] (!%p1662_p6)  ;;  %v1247_v51 = vld [vmem:[%s2280_s7 + $0x18] sm:$0xff] (!%p1662_p6) }
 0x1a3   : > { %1140 = vst [vmem:[%s2282_s17 + $0x40] sm:$0xff] %v1108_v57  ;;  %1156 = vst [vmem:[%s2282_s17 + $0xc0] sm:$0xff] %v1124_v58  ;;  %v1110_v3 = vadd.f32 %v1045_v1, %v677_v55  ;;  %v1126_v4 = vadd.f32 %v1085_v2, %v693_v56  ;;  %v1047_v5 = vpop.f32.mrb[11].mxu0  ;;  %v1087_v6 = vpop.f32.mrb[11].mxu1  ;;  %v1173_v47 = vld [vmem:[%s2282_s17 + $0x28] sm:$0xff] (!%p1662_p6)  ;;  %v1248_v52 = vld [vmem:[%s2280_s7 + $0x20] sm:$0xff] (!%p1662_p6)  ;;  %v1212_v53 = vadd.f32 (!%p1662_p6), %v2442_v45, %v1168_v36 }
 0x1a4   : > { %1141 = vst [vmem:[%s2282_s17 + $0x48] sm:$0xff] %v1109_v63  ;;  %1157 = vst [vmem:[%s2282_s17 + $0xc8] sm:$0xff] %v1125_v0  ;;  %v1111_v7 = vadd.f32 %v1047_v5, %v678_v61  ;;  %v1127_v8 = vadd.f32 %v1087_v6, %v694_v62  ;;  %v1174_v48 = vld [vmem:[%s2282_s17 + $0x30] sm:$0xff] (!%p1662_p6)  ;;  %v1213_v54 = vadd.f32 (!%p1662_p6), %v2444_v46, %v1169_v38  ;;  %v1249_v57 = vld [vmem:[%s2280_s7 + $0x28] sm:$0xff] (!%p1662_p6) }
 0x1a5   : > { %1142 = vst [vmem:[%s2282_s17 + $0x50] sm:$0xff] %v1110_v3  ;;  %1158 = vst [vmem:[%s2282_s17 + $0xd0] sm:$0xff] %v1126_v4  ;;  %v1175_v49 = vld [vmem:[%s2282_s17 + $0x38] sm:$0xff] (!%p1662_p6)  ;;  %v1214_v55 = vadd.f32 (!%p1662_p6), %v2442_v45, %v1170_v42  ;;  %v1215_v56 = vadd.f32 (!%p1662_p6), %v2444_v46, %v1171_v43  ;;  %v1250_v58 = vld [vmem:[%s2280_s7 + $0x30] sm:$0xff] (!%p1662_p6)  ;;  %v1216_v60 = vadd.f32 (!%p1662_p6), %v2442_v45, %v1172_v44 }
 0x1a6   : > { %1143 = vst [vmem:[%s2282_s17 + $0x58] sm:$0xff] %v1111_v7  ;;  %1159 = vst [vmem:[%s2282_s17 + $0xd8] sm:$0xff] %v1127_v8  ;;  %v1251_v59 = vld [vmem:[%s2280_s7 + $0x38] sm:$0xff] (!%p1662_p6)  ;;  %v1217_v61 = vadd.f32 (!%p1662_p6), %v2444_v46, %v1173_v47  ;;  %v1218_v62 = vadd.f32 (!%p1662_p6), %v2442_v45, %v1174_v48  ;;  %v1219_v63 = vadd.f32 (!%p1662_p6), %v2444_v46, %v1175_v49  ;;  %v1184_v44 = vld [vmem:[%s2282_s17 + $0x80] sm:$0xff] (!%p1662_p6) }
 0x1a7   : > { %v1276_v0 = vadd.f32 (!%p1662_p6), %v1244_v40, %v1212_v53  ;;  %v1277_v1 = vadd.f32 (!%p1662_p6), %v1245_v41, %v1213_v54  ;;  %v1278_v2 = vadd.f32 (!%p1662_p6), %v1246_v50, %v1214_v55  ;;  %v1279_v3 = vadd.f32 (!%p1662_p6), %v1247_v51, %v1215_v56  ;;  %v1185_v47 = vld [vmem:[%s2282_s17 + $0x88] sm:$0xff] (!%p1662_p6)  ;;  %v1186_v48 = vld [vmem:[%s2282_s17 + $0x90] sm:$0xff] (!%p1662_p6)  ;;  %v1260_v53 = vld [vmem:[%s2280_s7 + $0x80] sm:$0xff] (!%p1662_p6) }
 0x1a8   : > { %v1051_v13 = vpop.f32.mrb[12].mxu0  ;;  %v1091_v14 = vpop.f32.mrb[12].mxu1  ;;  %1167 = sbr.rel (%p1662_p6) target bundleno = 454 (0x1c6), region = 143  ;;  %v1280_v7 = vadd.f32 (!%p1662_p6), %v1248_v52, %v1216_v60  ;;  %v1281_v8 = vadd.f32 (!%p1662_p6), %v1249_v57, %v1217_v61  ;;  %v1261_v54 = vld [vmem:[%s2280_s7 + $0x88] sm:$0xff] (!%p1662_p6)  ;;  %v1262_v55 = vld [vmem:[%s2280_s7 + $0x90] sm:$0xff] (!%p1662_p6)  ;;  %v1187_v56 = vld [vmem:[%s2282_s17 + $0x98] sm:$0xff] (!%p1662_p6) }
 0x1a9   : > { %v1112_v17 = vadd.f32 %v1051_v13, %v679_v9  ;;  %v1128_v18 = vadd.f32 %v1091_v14, %v695_v10  ;;  %v1053_v19 = vpop.f32.mrb[13].mxu0  ;;  %v1093_v20 = vpop.f32.mrb[13].mxu1  ;;  %v1282_v9 = vadd.f32 (!%p1662_p6), %v1250_v58, %v1218_v62  ;;  %v1283_v10 = vadd.f32 (!%p1662_p6), %v1251_v59, %v1219_v63  ;;  %v1254_v13 = vld [vmem:[%s2280_s7 + $0x50] sm:$0xff] (!%p1662_p6)  ;;  %v1188_v57 = vld [vmem:[%s2282_s17 + $0xa0] sm:$0xff] (!%p1662_p6)  ;;  %v1189_v58 = vld [vmem:[%s2282_s17 + $0xa8] sm:$0xff] (!%p1662_p6) }
 0x1aa   : > { %v1113_v23 = vadd.f32 %v1053_v19, %v680_v11  ;;  %v1129_v24 = vadd.f32 %v1093_v20, %v696_v12  ;;  %v1055_v25 = vpop.f32.mrb[14].mxu0  ;;  %v1095_v26 = vpop.f32.mrb[14].mxu1  ;;  %v1176_v4 = vld [vmem:[%s2282_s17 + $0x40] sm:$0xff] (!%p1662_p6)  ;;  %v1253_v12 = vld [vmem:[%s2280_s7 + $0x48] sm:$0xff] (!%p1662_p6)  ;;  %v1310_v19 = vmax.f32 (!%p1662_p6), %v1278_v2, 0.0  ;;  %v1311_v20 = vmax.f32 (!%p1662_p6), %v1279_v3, 0.0 }
 0x1ab   : > { %1144 = vst [vmem:[%s2282_s17 + $0x60] sm:$0xff] %v1112_v17  ;;  %1160 = vst [vmem:[%s2282_s17 + $0xe0] sm:$0xff] %v1128_v18  ;;  %v1114_v27 = vadd.f32 %v1055_v25, %v681_v15  ;;  %v1130_v28 = vadd.f32 %v1095_v26, %v697_v16  ;;  %v1057_v29 = vpop.f32.mrb[15].mxu0  ;;  %v1097_v30 = vpop.f32.mrb[15].mxu1  ;;  %v1177_v5 = vld [vmem:[%s2282_s17 + $0x48] sm:$0xff] (!%p1662_p6)  ;;  %v1252_v11 = vld [vmem:[%s2280_s7 + $0x40] sm:$0xff] (!%p1662_p6) }
 0x1ac   : > { %1145 = vst [vmem:[%s2282_s17 + $0x68] sm:$0xff] %v1113_v23  ;;  %1161 = vst [vmem:[%s2282_s17 + $0xe8] sm:$0xff] %v1129_v24  ;;  %v1115_v31 = vadd.f32 %v1057_v29, %v682_v21  ;;  %v1131_v32 = vadd.f32 %v1097_v30, %v698_v22  ;;  %v1178_v6 = vld [vmem:[%s2282_s17 + $0x50] sm:$0xff] (!%p1662_p6)  ;;  %v1308_v17 = vmax.f32 (!%p1662_p6), %v1276_v0, 0.0  ;;  %v1309_v18 = vmax.f32 (!%p1662_p6), %v1277_v1, 0.0  ;;  %v1191_v0 = vld [vmem:[%s2282_s17 + $0xb8] sm:$0xff] (!%p1662_p6) }
 0x1ad   : > { %1146 = vst [vmem:[%s2282_s17 + $0x70] sm:$0xff] %v1114_v27  ;;  %1162 = vst [vmem:[%s2282_s17 + $0xf0] sm:$0xff] %v1130_v28  ;;  %v1179_v14 = vld [vmem:[%s2282_s17 + $0x58] sm:$0xff] (!%p1662_p6)  ;;  %v1312_v23 = vmax.f32 (!%p1662_p6), %v1280_v7, 0.0  ;;  %v1313_v24 = vmax.f32 (!%p1662_p6), %v1281_v8, 0.0  ;;  %v1314_v25 = vmax.f32 (!%p1662_p6), %v1282_v9, 0.0  ;;  %v1220_v29 = vadd.f32 (!%p1662_p6), %v2442_v45, %v1176_v4 }
 0x1ae   : > { %1147 = vst [vmem:[%s2282_s17 + $0x78] sm:$0xff] %v1115_v31  ;;  %1163 = vst [vmem:[%s2282_s17 + $0xf8] sm:$0xff] %v1131_v32  ;;  %v1315_v26 = vmax.f32 (!%p1662_p6), %v1283_v10, 0.0  ;;  %v1255_v27 = vld [vmem:[%s2280_s7 + $0x58] sm:$0xff] (!%p1662_p6)  ;;  %v1256_v28 = vld [vmem:[%s2280_s7 + $0x60] sm:$0xff] (!%p1662_p6)  ;;  %v1221_v30 = vadd.f32 (!%p1662_p6), %v2444_v46, %v1177_v5  ;;  %v1222_v31 = vadd.f32 (!%p1662_p6), %v2442_v45, %v1178_v6  ;;  %v1223_v32 = vadd.f32 (!%p1662_p6), %v2444_v46, %v1179_v14 }
 0x1af   : > { %1340 = vst [vmem:[%s2282_s17] sm:$0xff] %v1308_v17  ;;  %1341 = vst [vmem:[%s2282_s17 + $0x8] sm:$0xff] %v1309_v18  ;;  %v1284_v40 = vadd.f32 %v1252_v11, %v1220_v29  ;;  %v1190_v63 = vld [vmem:[%s2282_s17 + $0xb0] sm:$0xff]  ;;  %v1263_v5 = vld [vmem:[%s2280_s7 + $0x98] sm:$0xff]  ;;  %v1228_v7 = vadd.f32 %v2442_v45, %v1184_v44  ;;  %v1229_v8 = vadd.f32 %v2444_v46, %v1185_v47 }
 0x1b0   : > { %1342 = vst [vmem:[%s2282_s17 + $0x10] sm:$0xff] %v1310_v19  ;;  %1343 = vst [vmem:[%s2282_s17 + $0x18] sm:$0xff] %v1311_v20  ;;  %v1285_v41 = vadd.f32 %v1253_v12, %v1221_v30  ;;  %v1286_v42 = vadd.f32 %v1254_v13, %v1222_v31  ;;  %v1287_v43 = vadd.f32 %v1255_v27, %v1223_v32  ;;  %v1264_v6 = vld [vmem:[%s2280_s7 + $0xa0] sm:$0xff]  ;;  %v1265_v11 = vld [vmem:[%s2280_s7 + $0xa8] sm:$0xff] }
 0x1b1   : > { %1344 = vst [vmem:[%s2282_s17 + $0x20] sm:$0xff] %v1312_v23  ;;  %1345 = vst [vmem:[%s2282_s17 + $0x28] sm:$0xff] %v1313_v24  ;;  %v1316_v59 = vmax.f32 %v1284_v40, 0.0  ;;  %v1230_v9 = vadd.f32 %v2442_v45, %v1186_v48  ;;  %v1231_v10 = vadd.f32 %v2444_v46, %v1187_v56  ;;  %v1266_v12 = vld [vmem:[%s2280_s7 + $0xb0] sm:$0xff]  ;;  %v1267_v13 = vld [vmem:[%s2280_s7 + $0xb8] sm:$0xff]  ;;  %v1232_v14 = vadd.f32 %v2442_v45, %v1188_v57 }
 0x1b2   : > { %v1180_v15 = vld [vmem:[%s2282_s17 + $0x60] sm:$0xff]  ;;  %1346 = vst [vmem:[%s2282_s17 + $0x30] sm:$0xff] %v1314_v25  ;;  %1347 = vst [vmem:[%s2282_s17 + $0x38] sm:$0xff] %v1315_v26  ;;  %v1317_v60 = vmax.f32 %v1285_v41, 0.0  ;;  %v1318_v61 = vmax.f32 %v1286_v42, 0.0  ;;  %v1319_v62 = vmax.f32 %v1287_v43, 0.0  ;;  %v1235_v17 = vadd.f32 %v2444_v46, %v1191_v0 }
 0x1b3   : > { %v1181_v16 = vld [vmem:[%s2282_s17 + $0x68] sm:$0xff]  ;;  %v1224_v36 = vadd.f32 %v2442_v45, %v1180_v15  ;;  %1348 = vst [vmem:[%s2282_s17 + $0x40] sm:$0xff] %v1316_v59  ;;  %v1233_v15 = vadd.f32 %v2444_v46, %v1189_v58  ;;  %v1292_v18 = vadd.f32 %v1260_v53, %v1228_v7  ;;  %v1293_v19 = vadd.f32 %v1261_v54, %v1229_v8  ;;  %v1194_v24 = vld [vmem:[%s2282_s17 + $0xd0] sm:$0xff]  ;;  %v1268_v29 = vld [vmem:[%s2280_s7 + $0xc0] sm:$0xff] }
 0x1b4   : > { %v1182_v21 = vld [vmem:[%s2282_s17 + $0x70] sm:$0xff]  ;;  %v1225_v37 = vadd.f32 %v2444_v46, %v1181_v16  ;;  %1349 = vst [vmem:[%s2282_s17 + $0x48] sm:$0xff] %v1317_v60  ;;  %1350 = vst [vmem:[%s2282_s17 + $0x50] sm:$0xff] %v1318_v61  ;;  %v1234_v16 = vadd.f32 %v2442_v45, %v1190_v63  ;;  %v1294_v20 = vadd.f32 %v1262_v55, %v1230_v9  ;;  %v1193_v23 = vld [vmem:[%s2282_s17 + $0xc8] sm:$0xff] }
 0x1b5   : > { %v1183_v22 = vld [vmem:[%s2282_s17 + $0x78] sm:$0xff]  ;;  %v1226_v38 = vadd.f32 %v2442_v45, %v1182_v21  ;;  %v1288_v49 = vadd.f32 %v1256_v28, %v1224_v36  ;;  %1351 = vst [vmem:[%s2282_s17 + $0x58] sm:$0xff] %v1319_v62  ;;  %v1295_v21 = vadd.f32 %v1263_v5, %v1231_v10  ;;  %v1296_v25 = vadd.f32 %v1264_v6, %v1232_v14  ;;  %v1269_v30 = vld [vmem:[%s2280_s7 + $0xc8] sm:$0xff]  ;;  %v1270_v31 = vld [vmem:[%s2280_s7 + $0xd0] sm:$0xff] }
 0x1b6   : > { %v1227_v39 = vadd.f32 %v2444_v46, %v1183_v22  ;;  %v1289_v50 = vadd.f32 %v1257_v33, %v1225_v37  ;;  %v1192_v22 = vld [vmem:[%s2282_s17 + $0xc0] sm:$0xff]  ;;  %v1297_v26 = vadd.f32 %v1265_v11, %v1233_v15  ;;  %v1298_v27 = vadd.f32 %v1266_v12, %v1234_v16  ;;  %v1195_v32 = vld [vmem:[%s2282_s17 + $0xd8] sm:$0xff]  ;;  %v1273_v53 = vld [vmem:[%s2280_s7 + $0xe8] sm:$0xff] }
 0x1b7   : > { %v1290_v51 = vadd.f32 %v1258_v34, %v1226_v38  ;;  %v1320_v1 = vmax.f32 %v1288_v49, 0.0  ;;  %v1299_v28 = vadd.f32 %v1267_v13, %v1235_v17  ;;  %v1196_v33 = vld [vmem:[%s2282_s17 + $0xe0] sm:$0xff]  ;;  %v1197_v34 = vld [vmem:[%s2282_s17 + $0xe8] sm:$0xff]  ;;  %v1325_v36 = vmax.f32 %v1293_v19, 0.0  ;;  %v1199_v40 = vld [vmem:[%s2282_s17 + $0xf8] sm:$0xff] }
 0x1b8   : > { %v1291_v52 = vadd.f32 %v1259_v35, %v1227_v39  ;;  %v1321_v2 = vmax.f32 %v1289_v50, 0.0  ;;  %v1324_v35 = vmax.f32 %v1292_v18, 0.0  ;;  %v1326_v37 = vmax.f32 %v1294_v20, 0.0  ;;  %v1198_v39 = vld [vmem:[%s2282_s17 + $0xf0] sm:$0xff]  ;;  %v1271_v47 = vld [vmem:[%s2280_s7 + $0xd8] sm:$0xff]  ;;  %v1272_v48 = vld [vmem:[%s2280_s7 + $0xe0] sm:$0xff] }
 0x1b9   : > { %v1322_v3 = vmax.f32 %v1290_v51, 0.0  ;;  %1352 = vst [vmem:[%s2282_s17 + $0x60] sm:$0xff] %v1320_v1  ;;  %v1327_v38 = vmax.f32 %v1295_v21, 0.0  ;;  %v1328_v41 = vmax.f32 %v1296_v25, 0.0  ;;  %v1329_v42 = vmax.f32 %v1297_v26, 0.0  ;;  %1357 = vst [vmem:[%s2282_s17 + $0x88] sm:$0xff] %v1325_v36 }
 0x1ba   : > { %v1323_v4 = vmax.f32 %v1291_v52, 0.0  ;;  %1353 = vst [vmem:[%s2282_s17 + $0x68] sm:$0xff] %v1321_v2  ;;  %v1330_v43 = vmax.f32 %v1298_v27, 0.0  ;;  %v1331_v44 = vmax.f32 %v1299_v28, 0.0  ;;  %1356 = vst [vmem:[%s2282_s17 + $0x80] sm:$0xff] %v1324_v35  ;;  %v1236_v49 = vadd.f32 %v2442_v45, %v1192_v22  ;;  %v1274_v54 = vld [vmem:[%s2280_s7 + $0xf0] sm:$0xff] }
 0x1bb   : > { %1354 = vst [vmem:[%s2282_s17 + $0x70] sm:$0xff] %v1322_v3  ;;  %1358 = vst [vmem:[%s2282_s17 + $0x90] sm:$0xff] %v1326_v37  ;;  %v1237_v50 = vadd.f32 %v2444_v46, %v1193_v23  ;;  %v1238_v51 = vadd.f32 %v2442_v45, %v1194_v24  ;;  %v1239_v52 = vadd.f32 %v2444_v46, %v1195_v32  ;;  %v1275_v55 = vld [vmem:[%s2280_s7 + $0xf8] sm:$0xff] }
 0x1bc   : > { %1355 = vst [vmem:[%s2282_s17 + $0x78] sm:$0xff] %v1323_v4  ;;  %1359 = vst [vmem:[%s2282_s17 + $0x98] sm:$0xff] %v1327_v38  ;;  %v1240_v56 = vadd.f32 %v2442_v45, %v1196_v33  ;;  %v1241_v57 = vadd.f32 %v2444_v46, %v1197_v34  ;;  %v1242_v58 = vadd.f32 %v2442_v45, %v1198_v39 }
 0x1bd   : > { %1360 = vst [vmem:[%s2282_s17 + $0xa0] sm:$0xff] %v1328_v41  ;;  %1361 = vst [vmem:[%s2282_s17 + $0xa8] sm:$0xff] %v1329_v42  ;;  %v1243_v59 = vadd.f32 %v2444_v46, %v1199_v40  ;;  %v1300_v60 = vadd.f32 %v1268_v29, %v1236_v49  ;;  %v1301_v61 = vadd.f32 %v1269_v30, %v1237_v50 }
 0x1be   : > { %1362 = vst [vmem:[%s2282_s17 + $0xb0] sm:$0xff] %v1330_v43  ;;  %1363 = vst [vmem:[%s2282_s17 + $0xb8] sm:$0xff] %v1331_v44  ;;  %v1302_v62 = vadd.f32 %v1270_v31, %v1238_v51  ;;  %v1303_v63 = vadd.f32 %v1271_v47, %v1239_v52  ;;  %v1304_v0 = vadd.f32 %v1272_v48, %v1240_v56 }
 0x1bf   : > { %v1305_v1 = vadd.f32 %v1273_v53, %v1241_v57  ;;  %v1306_v2 = vadd.f32 %v1274_v54, %v1242_v58  ;;  %v1307_v3 = vadd.f32 %v1275_v55, %v1243_v59  ;;  %v1332_v4 = vmax.f32 %v1300_v60, 0.0 }
 0x1c0   : > { %v1333_v45 = vmax.f32 %v1301_v61, 0.0  ;;  %v1334_v5 = vmax.f32 %v1302_v62, 0.0  ;;  %v1335_v46 = vmax.f32 %v1303_v63, 0.0  ;;  %v1336_v6 = vmax.f32 %v1304_v0, 0.0 }
 0x1c1   : > { %v1337_v7 = vmax.f32 %v1305_v1, 0.0  ;;  %v1338_v8 = vmax.f32 %v1306_v2, 0.0  ;;  %v1339_v9 = vmax.f32 %v1307_v3, 0.0  ;;  %1364 = vst [vmem:[%s2282_s17 + $0xc0] sm:$0xff] %v1332_v4 }
 0x1c2   : > { %1365 = vst [vmem:[%s2282_s17 + $0xc8] sm:$0xff] %v1333_v45  ;;  %1366 = vst [vmem:[%s2282_s17 + $0xd0] sm:$0xff] %v1334_v5 }
 0x1c3   : > { %1367 = vst [vmem:[%s2282_s17 + $0xd8] sm:$0xff] %v1335_v46  ;;  %1368 = vst [vmem:[%s2282_s17 + $0xe0] sm:$0xff] %v1336_v6 }
 0x1c4   : > { %1369 = vst [vmem:[%s2282_s17 + $0xe8] sm:$0xff] %v1337_v7  ;;  %1370 = vst [vmem:[%s2282_s17 + $0xf0] sm:$0xff] %v1338_v8 }
 0x1c5   : > { %1371 = vst [vmem:[%s2282_s17 + $0xf8] sm:$0xff] %v1339_v9 }
 0x1c6 PF: > { %1378 = sbr.rel (!%p2083_p13) target bundleno = 472 (0x1d8), region = 147  ;;  %s1671_s21 = sshll.u32 (%p2083_p13), %s1939_s22, 4  ;;  %v1401_v12 = vld [vmem:[%s2282_s17 + $0x10] sm:$0xff] (%p2083_p13)  ;;  %v1403_v13 = vld [vmem:[%s2282_s17 + $0x18] sm:$0xff] (%p2083_p13)  ;;  %v1405_v14 = vld [vmem:[%s2282_s17 + $0x20] sm:$0xff] (%p2083_p13) }
 0x1c7   : > { %s2576_s8 = scalar_lea.vmem (%p2083_p13), %s2676_s4, %s1671_s21  ;;  %v1407_v15 = vld [vmem:[%s2282_s17 + $0x28] sm:$0xff] (%p2083_p13)  ;;  %v1409_v16 = vld [vmem:[%s2282_s17 + $0x30] sm:$0xff] (%p2083_p13)  ;;  %v1411_v17 = vld [vmem:[%s2282_s17 + $0x38] sm:$0xff] (%p2083_p13) }
 0x1c8   : > { %1402 = vst [vmem:[%s2576_s8 + $0x20] sm:$0xff] (%p2083_p13), %v1401_v12  ;;  %1404 = vst [vmem:[%s2576_s8 + $0x28] sm:$0xff] (%p2083_p13), %v1403_v13  ;;  %v1413_v18 = vld [vmem:[%s2282_s17 + $0x40] sm:$0xff] (%p2083_p13)  ;;  %v1415_v19 = vld [vmem:[%s2282_s17 + $0x48] sm:$0xff] (%p2083_p13) }
 0x1c9   : > { %1406 = vst [vmem:[%s2576_s8 + $0x40] sm:$0xff] (%p2083_p13), %v1405_v14  ;;  %1408 = vst [vmem:[%s2576_s8 + $0x48] sm:$0xff] (%p2083_p13), %v1407_v15  ;;  %v1417_v20 = vld [vmem:[%s2282_s17 + $0x50] sm:$0xff] (%p2083_p13)  ;;  %v1419_v21 = vld [vmem:[%s2282_s17 + $0x58] sm:$0xff] (%p2083_p13) }
 0x1ca   : > { %1410 = vst [vmem:[%s2576_s8 + $0x60] sm:$0xff] (%p2083_p13), %v1409_v16  ;;  %1412 = vst [vmem:[%s2576_s8 + $0x68] sm:$0xff] (%p2083_p13), %v1411_v17  ;;  %v1421_v22 = vld [vmem:[%s2282_s17 + $0x60] sm:$0xff] (%p2083_p13)  ;;  %v1423_v23 = vld [vmem:[%s2282_s17 + $0x68] sm:$0xff] (%p2083_p13) }
 0x1cb   : > { %1414 = vst [vmem:[%s2576_s8 + $0x80] sm:$0xff] (%p2083_p13), %v1413_v18  ;;  %1416 = vst [vmem:[%s2576_s8 + $0x88] sm:$0xff] (%p2083_p13), %v1415_v19  ;;  %v1425_v24 = vld [vmem:[%s2282_s17 + $0x70] sm:$0xff] (%p2083_p13)  ;;  %v1429_v26 = vld [vmem:[%s2282_s17 + $0x80] sm:$0xff] (%p2083_p13) }
 0x1cc   : > { %1418 = vst [vmem:[%s2576_s8 + $0xa0] sm:$0xff] (%p2083_p13), %v1417_v20  ;;  %1420 = vst [vmem:[%s2576_s8 + $0xa8] sm:$0xff] (%p2083_p13), %v1419_v21  ;;  %v1427_v25 = vld [vmem:[%s2282_s17 + $0x78] sm:$0xff] (%p2083_p13)  ;;  %v1431_v27 = vld [vmem:[%s2282_s17 + $0x88] sm:$0xff] (%p2083_p13) }
 0x1cd   : > { %v1397_v10 = vld [vmem:[%s2282_s17] sm:$0xff]  ;;  %v1399_v11 = vld [vmem:[%s2282_s17 + $0x8] sm:$0xff]  ;;  %1422 = vst [vmem:[%s2576_s8 + $0xc0] sm:$0xff] %v1421_v22  ;;  %1424 = vst [vmem:[%s2576_s8 + $0xc8] sm:$0xff] %v1423_v23 }
 0x1ce   : > { %1398 = vst [vmem:[%s2576_s8] sm:$0xff] %v1397_v10  ;;  %1400 = vst [vmem:[%s2576_s8 + $0x8] sm:$0xff] %v1399_v11  ;;  %v1433_v28 = vld [vmem:[%s2282_s17 + $0x90] sm:$0xff]  ;;  %v1435_v29 = vld [vmem:[%s2282_s17 + $0x98] sm:$0xff] }
 0x1cf   : > { %1426 = vst [vmem:[%s2576_s8 + $0xe0] sm:$0xff] %v1425_v24  ;;  %1428 = vst [vmem:[%s2576_s8 + $0xe8] sm:$0xff] %v1427_v25  ;;  %v1437_v30 = vld [vmem:[%s2282_s17 + $0xa0] sm:$0xff]  ;;  %v1439_v31 = vld [vmem:[%s2282_s17 + $0xa8] sm:$0xff] }
 0x1d0   : > { %1430 = vst [vmem:[%s2576_s8 + $0x100] sm:$0xff] %v1429_v26  ;;  %1432 = vst [vmem:[%s2576_s8 + $0x108] sm:$0xff] %v1431_v27  ;;  %v1441_v32 = vld [vmem:[%s2282_s17 + $0xb0] sm:$0xff]  ;;  %v1443_v33 = vld [vmem:[%s2282_s17 + $0xb8] sm:$0xff] }
 0x1d1   : > { %1434 = vst [vmem:[%s2576_s8 + $0x120] sm:$0xff] %v1433_v28  ;;  %1436 = vst [vmem:[%s2576_s8 + $0x128] sm:$0xff] %v1435_v29  ;;  %v1445_v34 = vld [vmem:[%s2282_s17 + $0xc0] sm:$0xff]  ;;  %v1447_v35 = vld [vmem:[%s2282_s17 + $0xc8] sm:$0xff] }
 0x1d2   : > { %1438 = vst [vmem:[%s2576_s8 + $0x140] sm:$0xff] %v1437_v30  ;;  %1440 = vst [vmem:[%s2576_s8 + $0x148] sm:$0xff] %v1439_v31  ;;  %v1449_v36 = vld [vmem:[%s2282_s17 + $0xd0] sm:$0xff]  ;;  %v1451_v37 = vld [vmem:[%s2282_s17 + $0xd8] sm:$0xff] }
 0x1d3   : > { %1442 = vst [vmem:[%s2576_s8 + $0x160] sm:$0xff] %v1441_v32  ;;  %1444 = vst [vmem:[%s2576_s8 + $0x168] sm:$0xff] %v1443_v33  ;;  %v1453_v38 = vld [vmem:[%s2282_s17 + $0xe0] sm:$0xff]  ;;  %v1455_v39 = vld [vmem:[%s2282_s17 + $0xe8] sm:$0xff] }
 0x1d4   : > { %1446 = vst [vmem:[%s2576_s8 + $0x180] sm:$0xff] %v1445_v34  ;;  %1448 = vst [vmem:[%s2576_s8 + $0x188] sm:$0xff] %v1447_v35  ;;  %v1457_v40 = vld [vmem:[%s2282_s17 + $0xf0] sm:$0xff]  ;;  %v1459_v41 = vld [vmem:[%s2282_s17 + $0xf8] sm:$0xff] }
 0x1d5   : > { %1450 = vst [vmem:[%s2576_s8 + $0x1a0] sm:$0xff] %v1449_v36  ;;  %1452 = vst [vmem:[%s2576_s8 + $0x1a8] sm:$0xff] %v1451_v37 }
 0x1d6   : > { %1454 = vst [vmem:[%s2576_s8 + $0x1c0] sm:$0xff] %v1453_v38  ;;  %1456 = vst [vmem:[%s2576_s8 + $0x1c8] sm:$0xff] %v1455_v39 }
 0x1d7   : > { %1458 = vst [vmem:[%s2576_s8 + $0x1e0] sm:$0xff] %v1457_v40  ;;  %1460 = vst [vmem:[%s2576_s8 + $0x1e8] sm:$0xff] %v1459_v41 }
 0x1d8 PF: > { %s14_s25 = sadd.s32 1, %s1951_s25   ;;  %s2688_s22 = sld [smem:[#allocation8_spill]] }
 0x1d9   : > { %p11_p7 = scmp.ge.s32.totalorder %s14_s25, 38   ;;  %s2689_s29 = sld [smem:[#allocation6_spill]] }
 0x1da   : > { %s2690_s9 = sld [smem:[#allocation7_spill]]  ;;  %s2691_s15 = smov %s1915_s16 }
 0x1db   : > { %s2692_s16 = smov %s2075_s13  ;;  %s2693_s17 = smov %s1923_s18 }
 0x1dc   : > { %s2694_s18 = smov %s2072_s12  ;;  %s2695_s19 = smov %s1931_s20 }
 0x1dd   : > { %s2697_s21 = smov %s1943_s23  ;;  %13 = sbr.rel (!%p11_p7) target bundleno = 8 (0x8), region = 220 }
 0x1de   : > { %s2696_s20 = smov %s2688_s22  ;;  %s2698_s22 = smov %s1947_s24 }
 0x1df   : > { %s2699_s23 = smov %s2689_s29 }
 0x1e0   : > { %s2700_s24 = smov %s2690_s9 }

</bundles_post_ra>
